<compile_context>
chip_gen: v7x
topology: tpu7x:2x2x1
jax: 0.10.0
libtpu: 0.0.40
codegen_flags: <defaults>
</compile_context>

<pallas_src>
import numpy as np
import jax
import jax.numpy as jnp
from jax.experimental import pallas as pl
from jax.experimental.pallas import tpu as pltpu


# ----------------------------------------------------------------------------
# Bilinear (align_corners=True) interpolation helpers (static, trace-time).
# ----------------------------------------------------------------------------
def _bilinear_matrix(n_in, n_out):
    """1-D bilinear interpolation matrix, align_corners=True."""
    A = np.zeros((n_out, n_in), np.float32)
    if n_out == 1 or n_in == 1:
        A[:, 0] = 1.0
        return A
    for i in range(n_out):
        s = i * (n_in - 1) / (n_out - 1)
        p0 = min(int(np.floor(s)), n_in - 1)
        f = s - p0
        p1 = min(p0 + 1, n_in - 1)
        A[i, p0] += 1.0 - f
        A[i, p1] += f
    return A


def _bilinear_taps(n_in, n_out):
    """Per-output-row (p0, p1, frac) taps, align_corners=True (static)."""
    taps = []
    for i in range(n_out):
        if n_out == 1 or n_in == 1:
            taps.append((0, 0, 0.0))
            continue
        s = i * (n_in - 1) / (n_out - 1)
        p0 = min(int(np.floor(s)), n_in - 1)
        f = float(s - p0)
        p1 = min(p0 + 1, n_in - 1)
        taps.append((p0, p1, f))
    return taps


# ----------------------------------------------------------------------------
# Fused conv1 -> conv2 -> bilinear x2 kernel (one batch element per grid step).
# ----------------------------------------------------------------------------
def _make_fused_kernel(H, W, C0, C1, C2, taps_h):
    HO, WO = 2 * H, 2 * W

    def kernel(x_ref, w1_ref, b1_ref, w2_ref, b2_ref, aw_ref, o_ref,
               xpad_ref, ypad_ref):
        # x_ref : (1, H, W, C0) bf16          w1_ref: (3, 3*C0, C1) bf16
        # b1_ref: (1, C1) f32                 w2_ref: (3, 3*C1, C2) bf16
        # b2_ref: (1, C2) f32                 aw_ref: (WO, W) f32
        # o_ref : (1, HO, WO, C2) f32
        # xpad_ref: (H+2, W+2, C0) bf16 scratch; ypad_ref: (H+2, W+2, C1) bf16

        # ---------------- conv1: (H,W,C0) -> (H,W,C1) ----------------------
        xpad_ref[...] = jnp.zeros_like(xpad_ref)           # zero halo border
        xpad_ref[1:H + 1, 1:W + 1, :] = x_ref[0]
        acc1 = jnp.broadcast_to(b1_ref[...], (H * W, C1))  # bias-init acc (f32)
        for dx in range(3):
            xs = xpad_ref[:, dx:dx + W, :]                 # (H+2, W, C0)
            # 3 dy taps concatenated channel-wise -> K = 3*C0 contraction
            patch = jnp.concatenate([xs[dy:dy + H] for dy in range(3)],
                                    axis=-1)               # (H, W, 3*C0) bf16
            acc1 = acc1 + jnp.dot(patch.reshape(H * W, 3 * C0), w1_ref[dx],
                                  preferred_element_type=jnp.float32)

        # ---------------- conv2: (H,W,C1) -> (H,W,C2) ----------------------
        ypad_ref[...] = jnp.zeros_like(ypad_ref)
        ypad_ref[1:H + 1, 1:W + 1, :] = (
            acc1.reshape(H, W, C1).astype(jnp.bfloat16))
        acc2 = jnp.broadcast_to(b2_ref[...], (H * W, C2))
        for dx in range(3):
            ys = ypad_ref[:, dx:dx + W, :]                 # (H+2, W, C1)
            patch = jnp.concatenate([ys[dy:dy + H] for dy in range(3)],
                                    axis=-1)               # (H, W, 3*C1) bf16
            acc2 = acc2 + jnp.dot(patch.reshape(H * W, 3 * C1), w2_ref[dx],
                                  preferred_element_type=jnp.float32)
        y2 = acc2.reshape(H, W, C2)                        # (H, W, C2) f32

        # -------- x2 bilinear upsample (align_corners=True), separable -----
        # W direction: batched matmul (batch=h, contract=w), channels on lanes.
        aw = jnp.broadcast_to(aw_ref[...][None], (H, WO, W))
        z = jnp.einsum('hjw,hwc->hjc', aw, y2,
                       preferred_element_type=jnp.float32)  # (H, WO, C2) f32
        # H direction: static 2-tap blends; first-axis row picks are free.
        for i, (p0, p1, f) in enumerate(taps_h):
            if f == 0.0:
                row = z[p0]
            else:
                row = (1.0 - f) * z[p0] + f * z[p1]
            o_ref[0, i] = row.astype(o_ref.dtype)

    return kernel


# ----------------------------------------------------------------------------
# Parameters (HWIO weights; PyTorch Conv2d is OIHW — layout chosen for TPU).
# ----------------------------------------------------------------------------
def init_params(key):
    k1, k2, k3, k4 = jax.random.split(key, 4)
    w1 = jax.random.normal(k1, (3, 3, 64, 128), jnp.float32) * 0.05
    b1 = jax.random.normal(k2, (128,), jnp.float32) * 0.05
    w2 = jax.random.normal(k3, (3, 3, 128, 256), jnp.float32) * 0.05
    b2 = jax.random.normal(k4, (256,), jnp.float32) * 0.05
    return {"w1": w1, "b1": b1, "w2": w2, "b2": b2}


# ----------------------------------------------------------------------------
# FeatureMapNet forward (NCHW in / NCHW out, like the PyTorch module).
# ----------------------------------------------------------------------------
@jax.jit
def feature_map_net(x_nchw, params):
    N, C0, H, W = x_nchw.shape
    C1 = params["w1"].shape[-1]
    C2 = params["w2"].shape[-1]
    HO, WO = 2 * H, 2 * W

    # NCHW -> NHWC (channels on lanes) and bf16 for the MXU operands.
    x = jnp.transpose(x_nchw, (0, 2, 3, 1)).astype(jnp.bfloat16)

    # Per-dx weight slabs: slab[dx, dy*Cin + cin, cout] = w[dy, dx, cin, cout].
    w1s = jnp.transpose(params["w1"], (1, 0, 2, 3)).reshape(3, 3 * C0, C1)
    w1s = w1s.astype(jnp.bfloat16)
    w2s = jnp.transpose(params["w2"], (1, 0, 2, 3)).reshape(3, 3 * C1, C2)
    w2s = w2s.astype(jnp.bfloat16)
    b1 = params["b1"].reshape(1, C1).astype(jnp.float32)
    b2 = params["b2"].reshape(1, C2).astype(jnp.float32)
    a_w = jnp.asarray(_bilinear_matrix(W, WO))              # (WO, W) f32
    taps_h = _bilinear_taps(H, HO)                          # static taps

    kernel = _make_fused_kernel(H, W, C0, C1, C2, taps_h)
    out_nhwc = pl.pallas_call(
        kernel,
        out_shape=jax.ShapeDtypeStruct((N, HO, WO, C2), jnp.float32),
        grid=(N,),
        in_specs=[
            pl.BlockSpec((1, H, W, C0), lambda n: (n, 0, 0, 0)),
            pl.BlockSpec((3, 3 * C0, C1), lambda n: (0, 0, 0)),
            pl.BlockSpec((1, C1), lambda n: (0, 0)),
            pl.BlockSpec((3, 3 * C1, C2), lambda n: (0, 0, 0)),
            pl.BlockSpec((1, C2), lambda n: (0, 0)),
            pl.BlockSpec((WO, W), lambda n: (0, 0)),
        ],
        out_specs=pl.BlockSpec((1, HO, WO, C2), lambda n: (n, 0, 0, 0)),
        scratch_shapes=[
            pltpu.VMEM((H + 2, W + 2, C0), jnp.bfloat16),   # padded conv1 input
            pltpu.VMEM((H + 2, W + 2, C1), jnp.bfloat16),   # padded conv2 input
        ],
        compiler_params=pltpu.CompilerParams(
            dimension_semantics=("parallel",)),
    )(x, w1s, b1, w2s, b2, a_w)

    return jnp.transpose(out_nhwc, (0, 3, 1, 2))            # NHWC -> NCHW


# ----------------------------------------------------------------------------
# Pure-JAX f32 reference (module semantics check).
# ----------------------------------------------------------------------------
def reference(x_nchw, params):
    x = jnp.transpose(x_nchw, (0, 2, 3, 1))
    for w, b in ((params["w1"], params["b1"]), (params["w2"], params["b2"])):
        dn = jax.lax.conv_dimension_numbers(x.shape, w.shape,
                                            ("NHWC", "HWIO", "NHWC"))
        x = jax.lax.conv_general_dilated(
            x, w, (1, 1), ((1, 1), (1, 1)), dimension_numbers=dn,
            precision=jax.lax.Precision.HIGHEST) + b
    N, H, W, C = x.shape
    A_h = jnp.asarray(_bilinear_matrix(H, 2 * H))
    A_w = jnp.asarray(_bilinear_matrix(W, 2 * W))
    x = jnp.einsum("ip,jq,npqc->nijc", A_h, A_w, x,
                   precision=jax.lax.Precision.HIGHEST)
    return jnp.transpose(x, (0, 3, 1, 2))


if __name__ == "__main__":
    key = jax.random.PRNGKey(0)
    kx, kp = jax.random.split(key)
    # conv1 requires 64 input channels; small spatial size.
    x = jax.random.normal(kx, (2, 64, 16, 16), jnp.float32)   # NCHW
    params = init_params(kp)

    out = jax.block_until_ready(feature_map_net(x, params))
    assert out.shape == (2, 256, 32, 32), out.shape

    ref = jax.block_until_ready(reference(x, params))
    # bf16 MXU operands (f32 accumulation) vs. f32 HIGHEST reference.
    np.testing.assert_allclose(np.asarray(out), np.asarray(ref),
                               rtol=2e-2, atol=5e-2)
    print("KERNEL_OK")
</pallas_src>

<mosaic_0001>
module attributes {stable_mosaic.version = 11 : i64} {
  func.func @kernel(%arg0: i32, %arg1: memref<1x16x16x64xbf16, #tpu.memory_space<vmem>>, %arg2: memref<3x192x128xbf16, #tpu.memory_space<vmem>>, %arg3: memref<1x128xf32, #tpu.memory_space<vmem>>, %arg4: memref<3x384x256xbf16, #tpu.memory_space<vmem>>, %arg5: memref<1x256xf32, #tpu.memory_space<vmem>>, %arg6: memref<32x16xf32, #tpu.memory_space<vmem>>, %arg7: memref<1x32x32x256xf32, #tpu.memory_space<vmem>>, %arg8: memref<18x18x64xbf16, #tpu.memory_space<vmem>>, %arg9: memref<18x18x128xbf16, #tpu.memory_space<vmem>>) attributes {dimension_semantics = [#tpu.dimension_semantics<parallel>], iteration_bounds = array<i64: 2>, scalar_prefetch = 0 : i64, scratch_operands = 2 : i64, tpu.core_type = #tpu.core_type<tc>, window_params = [{transform_indices = @transform_0, window_bounds = array<i64: 1, 16, 16, 64>}, {pipeline_mode = #tpu.pipeline_mode<synchronous>, transform_indices = @transform_1, window_bounds = array<i64: 3, 192, 128>}, {pipeline_mode = #tpu.pipeline_mode<synchronous>, transform_indices = @transform_2, window_bounds = array<i64: 1, 128>}, {pipeline_mode = #tpu.pipeline_mode<synchronous>, transform_indices = @transform_3, window_bounds = array<i64: 3, 384, 256>}, {pipeline_mode = #tpu.pipeline_mode<synchronous>, transform_indices = @transform_4, window_bounds = array<i64: 1, 256>}, {pipeline_mode = #tpu.pipeline_mode<synchronous>, transform_indices = @transform_5, window_bounds = array<i64: 32, 16>}, {transform_indices = @transform_6, window_bounds = array<i64: 1, 32, 32, 256>}]} {
    %cst = arith.constant 0.000000e+00 : bf16
    %0 = vector.broadcast %cst : bf16 to vector<18x18x64xbf16>
    %c0 = arith.constant 0 : index
    %c0_0 = arith.constant 0 : index
    %c0_1 = arith.constant 0 : index
    %1 = vector.load %arg8[%c0, %c0_0, %c0_1] : memref<18x18x64xbf16, #tpu.memory_space<vmem>>, vector<18x18x64xbf16>
    tpu.vector_store %arg8[%c0, %c0_0, %c0_1], %0 {strides = array<i32>} : memref<18x18x64xbf16, #tpu.memory_space<vmem>>, vector<18x18x64xbf16>,
    %c0_2 = arith.constant 0 : index
    %c0_3 = arith.constant 0 : index
    %c0_4 = arith.constant 0 : index
    %c0_5 = arith.constant 0 : index
    %2 = vector.load %arg1[%c0_2, %c0_3, %c0_4, %c0_5] : memref<1x16x16x64xbf16, #tpu.memory_space<vmem>>, vector<1x16x16x64xbf16>
    %3 = vector.shape_cast %2 : vector<1x16x16x64xbf16> to vector<16x16x64xbf16>
    %c1 = arith.constant 1 : index
    %c1_6 = arith.constant 1 : index
    %c0_7 = arith.constant 0 : index
    %4 = vector.load %arg8[%c1, %c1_6, %c0_7] : memref<18x18x64xbf16, #tpu.memory_space<vmem>>, vector<16x16x64xbf16>
    tpu.vector_store %arg8[%c1, %c1_6, %c0_7], %3 {strides = array<i32>} : memref<18x18x64xbf16, #tpu.memory_space<vmem>>, vector<16x16x64xbf16>,
    %c0_8 = arith.constant 0 : index
    %c0_9 = arith.constant 0 : index
    %5 = vector.load %arg3[%c0_8, %c0_9] : memref<1x128xf32, #tpu.memory_space<vmem>>, vector<1x128xf32>
    %6 = vector.shape_cast %5 : vector<1x128xf32> to vector<1x128xf32>
    %7 = vector.broadcast %6 : vector<1x128xf32> to vector<256x128xf32>
    %c0_10 = arith.constant 0 : index
    %c0_11 = arith.constant 0 : index
    %c0_12 = arith.constant 0 : index
    %8 = vector.load %arg8[%c0_10, %c0_11, %c0_12] : memref<18x18x64xbf16, #tpu.memory_space<vmem>>, vector<18x16x64xbf16>
    %9 = vector.extract_strided_slice %8 {offsets = [0, 0, 0], sizes = [16, 16, 64], strides = [1, 1, 1]} : vector<18x16x64xbf16> to vector<16x16x64xbf16>
    %10 = vector.extract_strided_slice %8 {offsets = [1, 0, 0], sizes = [16, 16, 64], strides = [1, 1, 1]} : vector<18x16x64xbf16> to vector<16x16x64xbf16>
    %11 = vector.extract_strided_slice %8 {offsets = [2, 0, 0], sizes = [16, 16, 64], strides = [1, 1, 1]} : vector<18x16x64xbf16> to vector<16x16x64xbf16>
    %12 = tpu.concatenate %9, %10, %11 in 2 : vector<16x16x64xbf16>, vector<16x16x64xbf16>, vector<16x16x64xbf16> -> vector<16x16x192xbf16>
    %13 = vector.shape_cast %12 : vector<16x16x192xbf16> to vector<256x192xbf16>
    %c0_13 = arith.constant 0 : index
    %c0_14 = arith.constant 0 : index
    %c0_15 = arith.constant 0 : index
    %14 = vector.load %arg2[%c0_13, %c0_14, %c0_15] : memref<3x192x128xbf16, #tpu.memory_space<vmem>>, vector<1x192x128xbf16>
    %15 = vector.shape_cast %14 : vector<1x192x128xbf16> to vector<192x128xbf16>
    %cst_16 = arith.constant dense<0.000000e+00> : vector<256x128xf32>
    %16 = tpu.matmul %13, %15, %cst_16 {dimension_numbers = #tpu.dot_dimension_numbers<[1], [0], [0], [1], [0, 0, 1, 1], [], []>} : vector<256x192xbf16>, vector<192x128xbf16>, vector<256x128xf32> -> vector<256x128xf32>
    %17 = arith.addf %7, %16 : vector<256x128xf32>
    %c0_17 = arith.constant 0 : index
    %c1_18 = arith.constant 1 : index
    %c0_19 = arith.constant 0 : index
    %18 = vector.load %arg8[%c0_17, %c1_18, %c0_19] : memref<18x18x64xbf16, #tpu.memory_space<vmem>>, vector<18x16x64xbf16>
    %19 = vector.extract_strided_slice %18 {offsets = [0, 0, 0], sizes = [16, 16, 64], strides = [1, 1, 1]} : vector<18x16x64xbf16> to vector<16x16x64xbf16>
    %20 = vector.extract_strided_slice %18 {offsets = [1, 0, 0], sizes = [16, 16, 64], strides = [1, 1, 1]} : vector<18x16x64xbf16> to vector<16x16x64xbf16>
    %21 = vector.extract_strided_slice %18 {offsets = [2, 0, 0], sizes = [16, 16, 64], strides = [1, 1, 1]} : vector<18x16x64xbf16> to vector<16x16x64xbf16>
    %22 = tpu.concatenate %19, %20, %21 in 2 : vector<16x16x64xbf16>, vector<16x16x64xbf16>, vector<16x16x64xbf16> -> vector<16x16x192xbf16>
    %23 = vector.shape_cast %22 : vector<16x16x192xbf16> to vector<256x192xbf16>
    %c1_20 = arith.constant 1 : index
    %c0_21 = arith.constant 0 : index
    %c0_22 = arith.constant 0 : index
    %24 = vector.load %arg2[%c1_20, %c0_21, %c0_22] : memref<3x192x128xbf16, #tpu.memory_space<vmem>>, vector<1x192x128xbf16>
    %25 = vector.shape_cast %24 : vector<1x192x128xbf16> to vector<192x128xbf16>
    %cst_23 = arith.constant dense<0.000000e+00> : vector<256x128xf32>
    %26 = tpu.matmul %23, %25, %cst_23 {dimension_numbers = #tpu.dot_dimension_numbers<[1], [0], [0], [1], [0, 0, 1, 1], [], []>} : vector<256x192xbf16>, vector<192x128xbf16>, vector<256x128xf32> -> vector<256x128xf32>
    %27 = arith.addf %17, %26 : vector<256x128xf32>
    %c0_24 = arith.constant 0 : index
    %c2 = arith.constant 2 : index
    %c0_25 = arith.constant 0 : index
    %28 = vector.load %arg8[%c0_24, %c2, %c0_25] : memref<18x18x64xbf16, #tpu.memory_space<vmem>>, vector<18x16x64xbf16>
    %29 = vector.extract_strided_slice %28 {offsets = [0, 0, 0], sizes = [16, 16, 64], strides = [1, 1, 1]} : vector<18x16x64xbf16> to vector<16x16x64xbf16>
    %30 = vector.extract_strided_slice %28 {offsets = [1, 0, 0], sizes = [16, 16, 64], strides = [1, 1, 1]} : vector<18x16x64xbf16> to vector<16x16x64xbf16>
    %31 = vector.extract_strided_slice %28 {offsets = [2, 0, 0], sizes = [16, 16, 64], strides = [1, 1, 1]} : vector<18x16x64xbf16> to vector<16x16x64xbf16>
    %32 = tpu.concatenate %29, %30, %31 in 2 : vector<16x16x64xbf16>, vector<16x16x64xbf16>, vector<16x16x64xbf16> -> vector<16x16x192xbf16>
    %33 = vector.shape_cast %32 : vector<16x16x192xbf16> to vector<256x192xbf16>
    %c2_26 = arith.constant 2 : index
    %c0_27 = arith.constant 0 : index
    %c0_28 = arith.constant 0 : index
    %34 = vector.load %arg2[%c2_26, %c0_27, %c0_28] : memref<3x192x128xbf16, #tpu.memory_space<vmem>>, vector<1x192x128xbf16>
    %35 = vector.shape_cast %34 : vector<1x192x128xbf16> to vector<192x128xbf16>
    %cst_29 = arith.constant dense<0.000000e+00> : vector<256x128xf32>
    %36 = tpu.matmul %33, %35, %cst_29 {dimension_numbers = #tpu.dot_dimension_numbers<[1], [0], [0], [1], [0, 0, 1, 1], [], []>} : vector<256x192xbf16>, vector<192x128xbf16>, vector<256x128xf32> -> vector<256x128xf32>
    %37 = arith.addf %27, %36 : vector<256x128xf32>
    %cst_30 = arith.constant 0.000000e+00 : bf16
    %38 = vector.broadcast %cst_30 : bf16 to vector<18x18x128xbf16>
    %c0_31 = arith.constant 0 : index
    %c0_32 = arith.constant 0 : index
    %c0_33 = arith.constant 0 : index
    %39 = vector.load %arg9[%c0_31, %c0_32, %c0_33] : memref<18x18x128xbf16, #tpu.memory_space<vmem>>, vector<18x18x128xbf16>
    tpu.vector_store %arg9[%c0_31, %c0_32, %c0_33], %38 {strides = array<i32>} : memref<18x18x128xbf16, #tpu.memory_space<vmem>>, vector<18x18x128xbf16>,
    %40 = vector.shape_cast %37 : vector<256x128xf32> to vector<16x16x128xf32>
    %41 = arith.truncf %40 : vector<16x16x128xf32> to vector<16x16x128xbf16>
    %c1_34 = arith.constant 1 : index
    %c1_35 = arith.constant 1 : index
    %c0_36 = arith.constant 0 : index
    %42 = vector.load %arg9[%c1_34, %c1_35, %c0_36] : memref<18x18x128xbf16, #tpu.memory_space<vmem>>, vector<16x16x128xbf16>
    tpu.vector_store %arg9[%c1_34, %c1_35, %c0_36], %41 {strides = array<i32>} : memref<18x18x128xbf16, #tpu.memory_space<vmem>>, vector<16x16x128xbf16>,
    %c0_37 = arith.constant 0 : index
    %c0_38 = arith.constant 0 : index
    %43 = vector.load %arg5[%c0_37, %c0_38] : memref<1x256xf32, #tpu.memory_space<vmem>>, vector<1x256xf32>
    %44 = vector.shape_cast %43 : vector<1x256xf32> to vector<1x256xf32>
    %45 = vector.broadcast %44 : vector<1x256xf32> to vector<256x256xf32>
    %c0_39 = arith.constant 0 : index
    %c0_40 = arith.constant 0 : index
    %c0_41 = arith.constant 0 : index
    %46 = vector.load %arg9[%c0_39, %c0_40, %c0_41] : memref<18x18x128xbf16, #tpu.memory_space<vmem>>, vector<18x16x128xbf16>
    %47 = vector.extract_strided_slice %46 {offsets = [0, 0, 0], sizes = [16, 16, 128], strides = [1, 1, 1]} : vector<18x16x128xbf16> to vector<16x16x128xbf16>
    %48 = vector.extract_strided_slice %46 {offsets = [1, 0, 0], sizes = [16, 16, 128], strides = [1, 1, 1]} : vector<18x16x128xbf16> to vector<16x16x128xbf16>
    %49 = vector.extract_strided_slice %46 {offsets = [2, 0, 0], sizes = [16, 16, 128], strides = [1, 1, 1]} : vector<18x16x128xbf16> to vector<16x16x128xbf16>
    %50 = tpu.concatenate %47, %48, %49 in 2 : vector<16x16x128xbf16>, vector<16x16x128xbf16>, vector<16x16x128xbf16> -> vector<16x16x384xbf16>
    %51 = vector.shape_cast %50 : vector<16x16x384xbf16> to vector<256x384xbf16>
    %c0_42 = arith.constant 0 : index
    %c0_43 = arith.constant 0 : index
    %c0_44 = arith.constant 0 : index
    %52 = vector.load %arg4[%c0_42, %c0_43, %c0_44] : memref<3x384x256xbf16, #tpu.memory_space<vmem>>, vector<1x384x256xbf16>
    %53 = vector.shape_cast %52 : vector<1x384x256xbf16> to vector<384x256xbf16>
    %cst_45 = arith.constant dense<0.000000e+00> : vector<256x256xf32>
    %54 = tpu.matmul %51, %53, %cst_45 {dimension_numbers = #tpu.dot_dimension_numbers<[1], [0], [0], [1], [0, 0, 1, 1], [], []>} : vector<256x384xbf16>, vector<384x256xbf16>, vector<256x256xf32> -> vector<256x256xf32>
    %55 = arith.addf %45, %54 : vector<256x256xf32>
    %c0_46 = arith.constant 0 : index
    %c1_47 = arith.constant 1 : index
    %c0_48 = arith.constant 0 : index
    %56 = vector.load %arg9[%c0_46, %c1_47, %c0_48] : memref<18x18x128xbf16, #tpu.memory_space<vmem>>, vector<18x16x128xbf16>
    %57 = vector.extract_strided_slice %56 {offsets = [0, 0, 0], sizes = [16, 16, 128], strides = [1, 1, 1]} : vector<18x16x128xbf16> to vector<16x16x128xbf16>
    %58 = vector.extract_strided_slice %56 {offsets = [1, 0, 0], sizes = [16, 16, 128], strides = [1, 1, 1]} : vector<18x16x128xbf16> to vector<16x16x128xbf16>
    %59 = vector.extract_strided_slice %56 {offsets = [2, 0, 0], sizes = [16, 16, 128], strides = [1, 1, 1]} : vector<18x16x128xbf16> to vector<16x16x128xbf16>
    %60 = tpu.concatenate %57, %58, %59 in 2 : vector<16x16x128xbf16>, vector<16x16x128xbf16>, vector<16x16x128xbf16> -> vector<16x16x384xbf16>
    %61 = vector.shape_cast %60 : vector<16x16x384xbf16> to vector<256x384xbf16>
    %c1_49 = arith.constant 1 : index
    %c0_50 = arith.constant 0 : index
    %c0_51 = arith.constant 0 : index
    %62 = vector.load %arg4[%c1_49, %c0_50, %c0_51] : memref<3x384x256xbf16, #tpu.memory_space<vmem>>, vector<1x384x256xbf16>
    %63 = vector.shape_cast %62 : vector<1x384x256xbf16> to vector<384x256xbf16>
    %cst_52 = arith.constant dense<0.000000e+00> : vector<256x256xf32>
    %64 = tpu.matmul %61, %63, %cst_52 {dimension_numbers = #tpu.dot_dimension_numbers<[1], [0], [0], [1], [0, 0, 1, 1], [], []>} : vector<256x384xbf16>, vector<384x256xbf16>, vector<256x256xf32> -> vector<256x256xf32>
    %65 = arith.addf %55, %64 : vector<256x256xf32>
    %c0_53 = arith.constant 0 : index
    %c2_54 = arith.constant 2 : index
    %c0_55 = arith.constant 0 : index
    %66 = vector.load %arg9[%c0_53, %c2_54, %c0_55] : memref<18x18x128xbf16, #tpu.memory_space<vmem>>, vector<18x16x128xbf16>
    %67 = vector.extract_strided_slice %66 {offsets = [0, 0, 0], sizes = [16, 16, 128], strides = [1, 1, 1]} : vector<18x16x128xbf16> to vector<16x16x128xbf16>
    %68 = vector.extract_strided_slice %66 {offsets = [1, 0, 0], sizes = [16, 16, 128], strides = [1, 1, 1]} : vector<18x16x128xbf16> to vector<16x16x128xbf16>
    %69 = vector.extract_strided_slice %66 {offsets = [2, 0, 0], sizes = [16, 16, 128], strides = [1, 1, 1]} : vector<18x16x128xbf16> to vector<16x16x128xbf16>
    %70 = tpu.concatenate %67, %68, %69 in 2 : vector<16x16x128xbf16>, vector<16x16x128xbf16>, vector<16x16x128xbf16> -> vector<16x16x384xbf16>
    %71 = vector.shape_cast %70 : vector<16x16x384xbf16> to vector<256x384xbf16>
    %c2_56 = arith.constant 2 : index
    %c0_57 = arith.constant 0 : index
    %c0_58 = arith.constant 0 : index
    %72 = vector.load %arg4[%c2_56, %c0_57, %c0_58] : memref<3x384x256xbf16, #tpu.memory_space<vmem>>, vector<1x384x256xbf16>
    %73 = vector.shape_cast %72 : vector<1x384x256xbf16> to vector<384x256xbf16>
    %cst_59 = arith.constant dense<0.000000e+00> : vector<256x256xf32>
    %74 = tpu.matmul %71, %73, %cst_59 {dimension_numbers = #tpu.dot_dimension_numbers<[1], [0], [0], [1], [0, 0, 1, 1], [], []>} : vector<256x384xbf16>, vector<384x256xbf16>, vector<256x256xf32> -> vector<256x256xf32>
    %75 = arith.addf %65, %74 : vector<256x256xf32>
    %76 = vector.shape_cast %75 : vector<256x256xf32> to vector<16x16x256xf32>
    %c0_60 = arith.constant 0 : index
    %c0_61 = arith.constant 0 : index
    %77 = vector.load %arg6[%c0_60, %c0_61] : memref<32x16xf32, #tpu.memory_space<vmem>>, vector<32x16xf32>
    %78 = vector.shape_cast %77 : vector<32x16xf32> to vector<1x32x16xf32>
    %79 = vector.shape_cast %78 : vector<1x32x16xf32> to vector<1x32x16xf32>
    %80 = vector.broadcast %79 : vector<1x32x16xf32> to vector<16x32x16xf32>
    "tpu.trace_start"() <{level = 10 : i32, message = "hjw,hwc->hjc"}> : () -> ()
    %cst_62 = arith.constant dense<0.000000e+00> : vector<16x32x256xf32>
    %81 = tpu.matmul %80, %76, %cst_62 {dimension_numbers = #tpu.dot_dimension_numbers<[2], [1], [1], [2], [0, 0, 0, 1, 1, 2], [0], [0]>} : vector<16x32x16xf32>, vector<16x16x256xf32>, vector<16x32x256xf32> -> vector<16x32x256xf32>
    "tpu.trace_stop"() : () -> ()
    %82 = vector.extract_strided_slice %81 {offsets = [0, 0, 0], sizes = [1, 32, 256], strides = [1, 1, 1]} : vector<16x32x256xf32> to vector<1x32x256xf32>
    %83 = vector.shape_cast %82 : vector<1x32x256xf32> to vector<32x256xf32>
    %c0_63 = arith.constant 0 : index
    %c0_64 = arith.constant 0 : index
    %c0_65 = arith.constant 0 : index
    %c0_66 = arith.constant 0 : index
    %84 = vector.load %arg7[%c0_63, %c0_64, %c0_65, %c0_66] : memref<1x32x32x256xf32, #tpu.memory_space<vmem>>, vector<1x1x32x256xf32>
    %85 = vector.shape_cast %84 : vector<1x1x32x256xf32> to vector<32x256xf32>
    %86 = vector.shape_cast %83 : vector<32x256xf32> to vector<1x1x32x256xf32>
    tpu.vector_store %arg7[%c0_63, %c0_64, %c0_65, %c0_66], %86 {strides = array<i32>} : memref<1x32x32x256xf32, #tpu.memory_space<vmem>>, vector<1x1x32x256xf32>,
    %87 = vector.extract_strided_slice %81 {offsets = [0, 0, 0], sizes = [1, 32, 256], strides = [1, 1, 1]} : vector<16x32x256xf32> to vector<1x32x256xf32>
    %88 = vector.shape_cast %87 : vector<1x32x256xf32> to vector<32x256xf32>
    %cst_67 = arith.constant 5.161290e-01 : f32
    %89 = vector.broadcast %cst_67 : f32 to vector<32x256xf32>
    %90 = arith.mulf %89, %88 : vector<32x256xf32>
    %91 = vector.extract_strided_slice %81 {offsets = [1, 0, 0], sizes = [1, 32, 256], strides = [1, 1, 1]} : vector<16x32x256xf32> to vector<1x32x256xf32>
    %92 = vector.shape_cast %91 : vector<1x32x256xf32> to vector<32x256xf32>
    %cst_68 = arith.constant 0.483870953 : f32
    %93 = vector.broadcast %cst_68 : f32 to vector<32x256xf32>
    %94 = arith.mulf %93, %92 : vector<32x256xf32>
    %95 = arith.addf %90, %94 : vector<32x256xf32>
    %c0_69 = arith.constant 0 : index
    %c1_70 = arith.constant 1 : index
    %c0_71 = arith.constant 0 : index
    %c0_72 = arith.constant 0 : index
    %96 = vector.load %arg7[%c0_69, %c1_70, %c0_71, %c0_72] : memref<1x32x32x256xf32, #tpu.memory_space<vmem>>, vector<1x1x32x256xf32>
    %97 = vector.shape_cast %96 : vector<1x1x32x256xf32> to vector<32x256xf32>
    %98 = vector.shape_cast %95 : vector<32x256xf32> to vector<1x1x32x256xf32>
    tpu.vector_store %arg7[%c0_69, %c1_70, %c0_71, %c0_72], %98 {strides = array<i32>} : memref<1x32x32x256xf32, #tpu.memory_space<vmem>>, vector<1x1x32x256xf32>,
    %99 = vector.extract_strided_slice %81 {offsets = [0, 0, 0], sizes = [1, 32, 256], strides = [1, 1, 1]} : vector<16x32x256xf32> to vector<1x32x256xf32>
    %100 = vector.shape_cast %99 : vector<1x32x256xf32> to vector<32x256xf32>
    %cst_73 = arith.constant 0.0322580636 : f32
    %101 = vector.broadcast %cst_73 : f32 to vector<32x256xf32>
    %102 = arith.mulf %101, %100 : vector<32x256xf32>
    %103 = vector.extract_strided_slice %81 {offsets = [1, 0, 0], sizes = [1, 32, 256], strides = [1, 1, 1]} : vector<16x32x256xf32> to vector<1x32x256xf32>
    %104 = vector.shape_cast %103 : vector<1x32x256xf32> to vector<32x256xf32>
    %cst_74 = arith.constant 0.967741906 : f32
    %105 = vector.broadcast %cst_74 : f32 to vector<32x256xf32>
    %106 = arith.mulf %105, %104 : vector<32x256xf32>
    %107 = arith.addf %102, %106 : vector<32x256xf32>
    %c0_75 = arith.constant 0 : index
    %c2_76 = arith.constant 2 : index
    %c0_77 = arith.constant 0 : index
    %c0_78 = arith.constant 0 : index
    %108 = vector.load %arg7[%c0_75, %c2_76, %c0_77, %c0_78] : memref<1x32x32x256xf32, #tpu.memory_space<vmem>>, vector<1x1x32x256xf32>
    %109 = vector.shape_cast %108 : vector<1x1x32x256xf32> to vector<32x256xf32>
    %110 = vector.shape_cast %107 : vector<32x256xf32> to vector<1x1x32x256xf32>
    tpu.vector_store %arg7[%c0_75, %c2_76, %c0_77, %c0_78], %110 {strides = array<i32>} : memref<1x32x32x256xf32, #tpu.memory_space<vmem>>, vector<1x1x32x256xf32>,
    %111 = vector.extract_strided_slice %81 {offsets = [1, 0, 0], sizes = [1, 32, 256], strides = [1, 1, 1]} : vector<16x32x256xf32> to vector<1x32x256xf32>
    %112 = vector.shape_cast %111 : vector<1x32x256xf32> to vector<32x256xf32>
    %cst_79 = arith.constant 0.54838711 : f32
    %113 = vector.broadcast %cst_79 : f32 to vector<32x256xf32>
    %114 = arith.mulf %113, %112 : vector<32x256xf32>
    %115 = vector.extract_strided_slice %81 {offsets = [2, 0, 0], sizes = [1, 32, 256], strides = [1, 1, 1]} : vector<16x32x256xf32> to vector<1x32x256xf32>
    %116 = vector.shape_cast %115 : vector<1x32x256xf32> to vector<32x256xf32>
    %cst_80 = arith.constant 0.45161289 : f32
    %117 = vector.broadcast %cst_80 : f32 to vector<32x256xf32>
    %118 = arith.mulf %117, %116 : vector<32x256xf32>
    %119 = arith.addf %114, %118 : vector<32x256xf32>
    %c0_81 = arith.constant 0 : index
    %c3 = arith.constant 3 : index
    %c0_82 = arith.constant 0 : index
    %c0_83 = arith.constant 0 : index
    %120 = vector.load %arg7[%c0_81, %c3, %c0_82, %c0_83] : memref<1x32x32x256xf32, #tpu.memory_space<vmem>>, vector<1x1x32x256xf32>
    %121 = vector.shape_cast %120 : vector<1x1x32x256xf32> to vector<32x256xf32>
    %122 = vector.shape_cast %119 : vector<32x256xf32> to vector<1x1x32x256xf32>
    tpu.vector_store %arg7[%c0_81, %c3, %c0_82, %c0_83], %122 {strides = array<i32>} : memref<1x32x32x256xf32, #tpu.memory_space<vmem>>, vector<1x1x32x256xf32>,
    %123 = vector.extract_strided_slice %81 {offsets = [1, 0, 0], sizes = [1, 32, 256], strides = [1, 1, 1]} : vector<16x32x256xf32> to vector<1x32x256xf32>
    %124 = vector.shape_cast %123 : vector<1x32x256xf32> to vector<32x256xf32>
    %cst_84 = arith.constant 0.0645161271 : f32
    %125 = vector.broadcast %cst_84 : f32 to vector<32x256xf32>
    %126 = arith.mulf %125, %124 : vector<32x256xf32>
    %127 = vector.extract_strided_slice %81 {offsets = [2, 0, 0], sizes = [1, 32, 256], strides = [1, 1, 1]} : vector<16x32x256xf32> to vector<1x32x256xf32>
    %128 = vector.shape_cast %127 : vector<1x32x256xf32> to vector<32x256xf32>
    %cst_85 = arith.constant 0.935483872 : f32
    %129 = vector.broadcast %cst_85 : f32 to vector<32x256xf32>
    %130 = arith.mulf %129, %128 : vector<32x256xf32>
    %131 = arith.addf %126, %130 : vector<32x256xf32>
    %c0_86 = arith.constant 0 : index
    %c4 = arith.constant 4 : index
    %c0_87 = arith.constant 0 : index
    %c0_88 = arith.constant 0 : index
    %132 = vector.load %arg7[%c0_86, %c4, %c0_87, %c0_88] : memref<1x32x32x256xf32, #tpu.memory_space<vmem>>, vector<1x1x32x256xf32>
    %133 = vector.shape_cast %132 : vector<1x1x32x256xf32> to vector<32x256xf32>
    %134 = vector.shape_cast %131 : vector<32x256xf32> to vector<1x1x32x256xf32>
    tpu.vector_store %arg7[%c0_86, %c4, %c0_87, %c0_88], %134 {strides = array<i32>} : memref<1x32x32x256xf32, #tpu.memory_space<vmem>>, vector<1x1x32x256xf32>,
    %135 = vector.extract_strided_slice %81 {offsets = [2, 0, 0], sizes = [1, 32, 256], strides = [1, 1, 1]} : vector<16x32x256xf32> to vector<1x32x256xf32>
    %136 = vector.shape_cast %135 : vector<1x32x256xf32> to vector<32x256xf32>
    %cst_89 = arith.constant 0.580645144 : f32
    %137 = vector.broadcast %cst_89 : f32 to vector<32x256xf32>
    %138 = arith.mulf %137, %136 : vector<32x256xf32>
    %139 = vector.extract_strided_slice %81 {offsets = [3, 0, 0], sizes = [1, 32, 256], strides = [1, 1, 1]} : vector<16x32x256xf32> to vector<1x32x256xf32>
    %140 = vector.shape_cast %139 : vector<1x32x256xf32> to vector<32x256xf32>
    %cst_90 = arith.constant 0.419354826 : f32
    %141 = vector.broadcast %cst_90 : f32 to vector<32x256xf32>
    %142 = arith.mulf %141, %140 : vector<32x256xf32>
    %143 = arith.addf %138, %142 : vector<32x256xf32>
    %c0_91 = arith.constant 0 : index
    %c5 = arith.constant 5 : index
    %c0_92 = arith.constant 0 : index
    %c0_93 = arith.constant 0 : index
    %144 = vector.load %arg7[%c0_91, %c5, %c0_92, %c0_93] : memref<1x32x32x256xf32, #tpu.memory_space<vmem>>, vector<1x1x32x256xf32>
    %145 = vector.shape_cast %144 : vector<1x1x32x256xf32> to vector<32x256xf32>
    %146 = vector.shape_cast %143 : vector<32x256xf32> to vector<1x1x32x256xf32>
    tpu.vector_store %arg7[%c0_91, %c5, %c0_92, %c0_93], %146 {strides = array<i32>} : memref<1x32x32x256xf32, #tpu.memory_space<vmem>>, vector<1x1x32x256xf32>,
    %147 = vector.extract_strided_slice %81 {offsets = [2, 0, 0], sizes = [1, 32, 256], strides = [1, 1, 1]} : vector<16x32x256xf32> to vector<1x32x256xf32>
    %148 = vector.shape_cast %147 : vector<1x32x256xf32> to vector<32x256xf32>
    %cst_94 = arith.constant 0.0967741906 : f32
    %149 = vector.broadcast %cst_94 : f32 to vector<32x256xf32>
    %150 = arith.mulf %149, %148 : vector<32x256xf32>
    %151 = vector.extract_strided_slice %81 {offsets = [3, 0, 0], sizes = [1, 32, 256], strides = [1, 1, 1]} : vector<16x32x256xf32> to vector<1x32x256xf32>
    %152 = vector.shape_cast %151 : vector<1x32x256xf32> to vector<32x256xf32>
    %cst_95 = arith.constant 0.903225779 : f32
    %153 = vector.broadcast %cst_95 : f32 to vector<32x256xf32>
    %154 = arith.mulf %153, %152 : vector<32x256xf32>
    %155 = arith.addf %150, %154 : vector<32x256xf32>
    %c0_96 = arith.constant 0 : index
    %c6 = arith.constant 6 : index
    %c0_97 = arith.constant 0 : index
    %c0_98 = arith.constant 0 : index
    %156 = vector.load %arg7[%c0_96, %c6, %c0_97, %c0_98] : memref<1x32x32x256xf32, #tpu.memory_space<vmem>>, vector<1x1x32x256xf32>
    %157 = vector.shape_cast %156 : vector<1x1x32x256xf32> to vector<32x256xf32>
    %158 = vector.shape_cast %155 : vector<32x256xf32> to vector<1x1x32x256xf32>
    tpu.vector_store %arg7[%c0_96, %c6, %c0_97, %c0_98], %158 {strides = array<i32>} : memref<1x32x32x256xf32, #tpu.memory_space<vmem>>, vector<1x1x32x256xf32>,
    %159 = vector.extract_strided_slice %81 {offsets = [3, 0, 0], sizes = [1, 32, 256], strides = [1, 1, 1]} : vector<16x32x256xf32> to vector<1x32x256xf32>
    %160 = vector.shape_cast %159 : vector<1x32x256xf32> to vector<32x256xf32>
    %cst_99 = arith.constant 0.612903237 : f32
    %161 = vector.broadcast %cst_99 : f32 to vector<32x256xf32>
    %162 = arith.mulf %161, %160 : vector<32x256xf32>
    %163 = vector.extract_strided_slice %81 {offsets = [4, 0, 0], sizes = [1, 32, 256], strides = [1, 1, 1]} : vector<16x32x256xf32> to vector<1x32x256xf32>
    %164 = vector.shape_cast %163 : vector<1x32x256xf32> to vector<32x256xf32>
    %cst_100 = arith.constant 0.387096763 : f32
    %165 = vector.broadcast %cst_100 : f32 to vector<32x256xf32>
    %166 = arith.mulf %165, %164 : vector<32x256xf32>
    %167 = arith.addf %162, %166 : vector<32x256xf32>
    %c0_101 = arith.constant 0 : index
    %c7 = arith.constant 7 : index
    %c0_102 = arith.constant 0 : index
    %c0_103 = arith.constant 0 : index
    %168 = vector.load %arg7[%c0_101, %c7, %c0_102, %c0_103] : memref<1x32x32x256xf32, #tpu.memory_space<vmem>>, vector<1x1x32x256xf32>
    %169 = vector.shape_cast %168 : vector<1x1x32x256xf32> to vector<32x256xf32>
    %170 = vector.shape_cast %167 : vector<32x256xf32> to vector<1x1x32x256xf32>
    tpu.vector_store %arg7[%c0_101, %c7, %c0_102, %c0_103], %170 {strides = array<i32>} : memref<1x32x32x256xf32, #tpu.memory_space<vmem>>, vector<1x1x32x256xf32>,
    %171 = vector.extract_strided_slice %81 {offsets = [3, 0, 0], sizes = [1, 32, 256], strides = [1, 1, 1]} : vector<16x32x256xf32> to vector<1x32x256xf32>
    %172 = vector.shape_cast %171 : vector<1x32x256xf32> to vector<32x256xf32>
    %cst_104 = arith.constant 0.129032254 : f32
    %173 = vector.broadcast %cst_104 : f32 to vector<32x256xf32>
    %174 = arith.mulf %173, %172 : vector<32x256xf32>
    %175 = vector.extract_strided_slice %81 {offsets = [4, 0, 0], sizes = [1, 32, 256], strides = [1, 1, 1]} : vector<16x32x256xf32> to vector<1x32x256xf32>
    %176 = vector.shape_cast %175 : vector<1x32x256xf32> to vector<32x256xf32>
    %cst_105 = arith.constant 0.870967745 : f32
    %177 = vector.broadcast %cst_105 : f32 to vector<32x256xf32>
    %178 = arith.mulf %177, %176 : vector<32x256xf32>
    %179 = arith.addf %174, %178 : vector<32x256xf32>
    %c0_106 = arith.constant 0 : index
    %c8 = arith.constant 8 : index
    %c0_107 = arith.constant 0 : index
    %c0_108 = arith.constant 0 : index
    %180 = vector.load %arg7[%c0_106, %c8, %c0_107, %c0_108] : memref<1x32x32x256xf32, #tpu.memory_space<vmem>>, vector<1x1x32x256xf32>
    %181 = vector.shape_cast %180 : vector<1x1x32x256xf32> to vector<32x256xf32>
    %182 = vector.shape_cast %179 : vector<32x256xf32> to vector<1x1x32x256xf32>
    tpu.vector_store %arg7[%c0_106, %c8, %c0_107, %c0_108], %182 {strides = array<i32>} : memref<1x32x32x256xf32, #tpu.memory_space<vmem>>, vector<1x1x32x256xf32>,
    %183 = vector.extract_strided_slice %81 {offsets = [4, 0, 0], sizes = [1, 32, 256], strides = [1, 1, 1]} : vector<16x32x256xf32> to vector<1x32x256xf32>
    %184 = vector.shape_cast %183 : vector<1x32x256xf32> to vector<32x256xf32>
    %cst_109 = arith.constant 0.645161271 : f32
    %185 = vector.broadcast %cst_109 : f32 to vector<32x256xf32>
    %186 = arith.mulf %185, %184 : vector<32x256xf32>
    %187 = vector.extract_strided_slice %81 {offsets = [5, 0, 0], sizes = [1, 32, 256], strides = [1, 1, 1]} : vector<16x32x256xf32> to vector<1x32x256xf32>
    %188 = vector.shape_cast %187 : vector<1x32x256xf32> to vector<32x256xf32>
    %cst_110 = arith.constant 0.354838699 : f32
    %189 = vector.broadcast %cst_110 : f32 to vector<32x256xf32>
    %190 = arith.mulf %189, %188 : vector<32x256xf32>
    %191 = arith.addf %186, %190 : vector<32x256xf32>
    %c0_111 = arith.constant 0 : index
    %c9 = arith.constant 9 : index
    %c0_112 = arith.constant 0 : index
    %c0_113 = arith.constant 0 : index
    %192 = vector.load %arg7[%c0_111, %c9, %c0_112, %c0_113] : memref<1x32x32x256xf32, #tpu.memory_space<vmem>>, vector<1x1x32x256xf32>
    %193 = vector.shape_cast %192 : vector<1x1x32x256xf32> to vector<32x256xf32>
    %194 = vector.shape_cast %191 : vector<32x256xf32> to vector<1x1x32x256xf32>
    tpu.vector_store %arg7[%c0_111, %c9, %c0_112, %c0_113], %194 {strides = array<i32>} : memref<1x32x32x256xf32, #tpu.memory_space<vmem>>, vector<1x1x32x256xf32>,
    %195 = vector.extract_strided_slice %81 {offsets = [4, 0, 0], sizes = [1, 32, 256], strides = [1, 1, 1]} : vector<16x32x256xf32> to vector<1x32x256xf32>
    %196 = vector.shape_cast %195 : vector<1x32x256xf32> to vector<32x256xf32>
    %cst_114 = arith.constant 0.161290318 : f32
    %197 = vector.broadcast %cst_114 : f32 to vector<32x256xf32>
    %198 = arith.mulf %197, %196 : vector<32x256xf32>
    %199 = vector.extract_strided_slice %81 {offsets = [5, 0, 0], sizes = [1, 32, 256], strides = [1, 1, 1]} : vector<16x32x256xf32> to vector<1x32x256xf32>
    %200 = vector.shape_cast %199 : vector<1x32x256xf32> to vector<32x256xf32>
    %cst_115 = arith.constant 0.838709652 : f32
    %201 = vector.broadcast %cst_115 : f32 to vector<32x256xf32>
    %202 = arith.mulf %201, %200 : vector<32x256xf32>
    %203 = arith.addf %198, %202 : vector<32x256xf32>
    %c0_116 = arith.constant 0 : index
    %c10 = arith.constant 10 : index
    %c0_117 = arith.constant 0 : index
    %c0_118 = arith.constant 0 : index
    %204 = vector.load %arg7[%c0_116, %c10, %c0_117, %c0_118] : memref<1x32x32x256xf32, #tpu.memory_space<vmem>>, vector<1x1x32x256xf32>
    %205 = vector.shape_cast %204 : vector<1x1x32x256xf32> to vector<32x256xf32>
    %206 = vector.shape_cast %203 : vector<32x256xf32> to vector<1x1x32x256xf32>
    tpu.vector_store %arg7[%c0_116, %c10, %c0_117, %c0_118], %206 {strides = array<i32>} : memref<1x32x32x256xf32, #tpu.memory_space<vmem>>, vector<1x1x32x256xf32>,
    %207 = vector.extract_strided_slice %81 {offsets = [5, 0, 0], sizes = [1, 32, 256], strides = [1, 1, 1]} : vector<16x32x256xf32> to vector<1x32x256xf32>
    %208 = vector.shape_cast %207 : vector<1x32x256xf32> to vector<32x256xf32>
    %cst_119 = arith.constant 0.677419364 : f32
    %209 = vector.broadcast %cst_119 : f32 to vector<32x256xf32>
    %210 = arith.mulf %209, %208 : vector<32x256xf32>
    %211 = vector.extract_strided_slice %81 {offsets = [6, 0, 0], sizes = [1, 32, 256], strides = [1, 1, 1]} : vector<16x32x256xf32> to vector<1x32x256xf32>
    %212 = vector.shape_cast %211 : vector<1x32x256xf32> to vector<32x256xf32>
    %cst_120 = arith.constant 0.322580636 : f32
    %213 = vector.broadcast %cst_120 : f32 to vector<32x256xf32>
    %214 = arith.mulf %213, %212 : vector<32x256xf32>
    %215 = arith.addf %210, %214 : vector<32x256xf32>
    %c0_121 = arith.constant 0 : index
    %c11 = arith.constant 11 : index
    %c0_122 = arith.constant 0 : index
    %c0_123 = arith.constant 0 : index
    %216 = vector.load %arg7[%c0_121, %c11, %c0_122, %c0_123] : memref<1x32x32x256xf32, #tpu.memory_space<vmem>>, vector<1x1x32x256xf32>
    %217 = vector.shape_cast %216 : vector<1x1x32x256xf32> to vector<32x256xf32>
    %218 = vector.shape_cast %215 : vector<32x256xf32> to vector<1x1x32x256xf32>
    tpu.vector_store %arg7[%c0_121, %c11, %c0_122, %c0_123], %218 {strides = array<i32>} : memref<1x32x32x256xf32, #tpu.memory_space<vmem>>, vector<1x1x32x256xf32>,
    %219 = vector.extract_strided_slice %81 {offsets = [5, 0, 0], sizes = [1, 32, 256], strides = [1, 1, 1]} : vector<16x32x256xf32> to vector<1x32x256xf32>
    %220 = vector.shape_cast %219 : vector<1x32x256xf32> to vector<32x256xf32>
    %cst_124 = arith.constant 0.193548381 : f32
    %221 = vector.broadcast %cst_124 : f32 to vector<32x256xf32>
    %222 = arith.mulf %221, %220 : vector<32x256xf32>
    %223 = vector.extract_strided_slice %81 {offsets = [6, 0, 0], sizes = [1, 32, 256], strides = [1, 1, 1]} : vector<16x32x256xf32> to vector<1x32x256xf32>
    %224 = vector.shape_cast %223 : vector<1x32x256xf32> to vector<32x256xf32>
    %cst_125 = arith.constant 0.806451618 : f32
    %225 = vector.broadcast %cst_125 : f32 to vector<32x256xf32>
    %226 = arith.mulf %225, %224 : vector<32x256xf32>
    %227 = arith.addf %222, %226 : vector<32x256xf32>
    %c0_126 = arith.constant 0 : index
    %c12 = arith.constant 12 : index
    %c0_127 = arith.constant 0 : index
    %c0_128 = arith.constant 0 : index
    %228 = vector.load %arg7[%c0_126, %c12, %c0_127, %c0_128] : memref<1x32x32x256xf32, #tpu.memory_space<vmem>>, vector<1x1x32x256xf32>
    %229 = vector.shape_cast %228 : vector<1x1x32x256xf32> to vector<32x256xf32>
    %230 = vector.shape_cast %227 : vector<32x256xf32> to vector<1x1x32x256xf32>
    tpu.vector_store %arg7[%c0_126, %c12, %c0_127, %c0_128], %230 {strides = array<i32>} : memref<1x32x32x256xf32, #tpu.memory_space<vmem>>, vector<1x1x32x256xf32>,
    %231 = vector.extract_strided_slice %81 {offsets = [6, 0, 0], sizes = [1, 32, 256], strides = [1, 1, 1]} : vector<16x32x256xf32> to vector<1x32x256xf32>
    %232 = vector.shape_cast %231 : vector<1x32x256xf32> to vector<32x256xf32>
    %cst_129 = arith.constant 0.709677398 : f32
    %233 = vector.broadcast %cst_129 : f32 to vector<32x256xf32>
    %234 = arith.mulf %233, %232 : vector<32x256xf32>
    %235 = vector.extract_strided_slice %81 {offsets = [7, 0, 0], sizes = [1, 32, 256], strides = [1, 1, 1]} : vector<16x32x256xf32> to vector<1x32x256xf32>
    %236 = vector.shape_cast %235 : vector<1x32x256xf32> to vector<32x256xf32>
    %cst_130 = arith.constant 0.290322572 : f32
    %237 = vector.broadcast %cst_130 : f32 to vector<32x256xf32>
    %238 = arith.mulf %237, %236 : vector<32x256xf32>
    %239 = arith.addf %234, %238 : vector<32x256xf32>
    %c0_131 = arith.constant 0 : index
    %c13 = arith.constant 13 : index
    %c0_132 = arith.constant 0 : index
    %c0_133 = arith.constant 0 : index
    %240 = vector.load %arg7[%c0_131, %c13, %c0_132, %c0_133] : memref<1x32x32x256xf32, #tpu.memory_space<vmem>>, vector<1x1x32x256xf32>
    %241 = vector.shape_cast %240 : vector<1x1x32x256xf32> to vector<32x256xf32>
    %242 = vector.shape_cast %239 : vector<32x256xf32> to vector<1x1x32x256xf32>
    tpu.vector_store %arg7[%c0_131, %c13, %c0_132, %c0_133], %242 {strides = array<i32>} : memref<1x32x32x256xf32, #tpu.memory_space<vmem>>, vector<1x1x32x256xf32>,
    %243 = vector.extract_strided_slice %81 {offsets = [6, 0, 0], sizes = [1, 32, 256], strides = [1, 1, 1]} : vector<16x32x256xf32> to vector<1x32x256xf32>
    %244 = vector.shape_cast %243 : vector<1x32x256xf32> to vector<32x256xf32>
    %cst_134 = arith.constant 0.225806445 : f32
    %245 = vector.broadcast %cst_134 : f32 to vector<32x256xf32>
    %246 = arith.mulf %245, %244 : vector<32x256xf32>
    %247 = vector.extract_strided_slice %81 {offsets = [7, 0, 0], sizes = [1, 32, 256], strides = [1, 1, 1]} : vector<16x32x256xf32> to vector<1x32x256xf32>
    %248 = vector.shape_cast %247 : vector<1x32x256xf32> to vector<32x256xf32>
    %cst_135 = arith.constant 0.774193525 : f32
    %249 = vector.broadcast %cst_135 : f32 to vector<32x256xf32>
    %250 = arith.mulf %249, %248 : vector<32x256xf32>
    %251 = arith.addf %246, %250 : vector<32x256xf32>
    %c0_136 = arith.constant 0 : index
    %c14 = arith.constant 14 : index
    %c0_137 = arith.constant 0 : index
    %c0_138 = arith.constant 0 : index
    %252 = vector.load %arg7[%c0_136, %c14, %c0_137, %c0_138] : memref<1x32x32x256xf32, #tpu.memory_space<vmem>>, vector<1x1x32x256xf32>
    %253 = vector.shape_cast %252 : vector<1x1x32x256xf32> to vector<32x256xf32>
    %254 = vector.shape_cast %251 : vector<32x256xf32> to vector<1x1x32x256xf32>
    tpu.vector_store %arg7[%c0_136, %c14, %c0_137, %c0_138], %254 {strides = array<i32>} : memref<1x32x32x256xf32, #tpu.memory_space<vmem>>, vector<1x1x32x256xf32>,
    %255 = vector.extract_strided_slice %81 {offsets = [7, 0, 0], sizes = [1, 32, 256], strides = [1, 1, 1]} : vector<16x32x256xf32> to vector<1x32x256xf32>
    %256 = vector.shape_cast %255 : vector<1x32x256xf32> to vector<32x256xf32>
    %cst_139 = arith.constant 0.741935492 : f32
    %257 = vector.broadcast %cst_139 : f32 to vector<32x256xf32>
    %258 = arith.mulf %257, %256 : vector<32x256xf32>
    %259 = vector.extract_strided_slice %81 {offsets = [8, 0, 0], sizes = [1, 32, 256], strides = [1, 1, 1]} : vector<16x32x256xf32> to vector<1x32x256xf32>
    %260 = vector.shape_cast %259 : vector<1x32x256xf32> to vector<32x256xf32>
    %cst_140 = arith.constant 0.258064508 : f32
    %261 = vector.broadcast %cst_140 : f32 to vector<32x256xf32>
    %262 = arith.mulf %261, %260 : vector<32x256xf32>
    %263 = arith.addf %258, %262 : vector<32x256xf32>
    %c0_141 = arith.constant 0 : index
    %c15 = arith.constant 15 : index
    %c0_142 = arith.constant 0 : index
    %c0_143 = arith.constant 0 : index
    %264 = vector.load %arg7[%c0_141, %c15, %c0_142, %c0_143] : memref<1x32x32x256xf32, #tpu.memory_space<vmem>>, vector<1x1x32x256xf32>
    %265 = vector.shape_cast %264 : vector<1x1x32x256xf32> to vector<32x256xf32>
    %266 = vector.shape_cast %263 : vector<32x256xf32> to vector<1x1x32x256xf32>
    tpu.vector_store %arg7[%c0_141, %c15, %c0_142, %c0_143], %266 {strides = array<i32>} : memref<1x32x32x256xf32, #tpu.memory_space<vmem>>, vector<1x1x32x256xf32>,
    %267 = vector.extract_strided_slice %81 {offsets = [7, 0, 0], sizes = [1, 32, 256], strides = [1, 1, 1]} : vector<16x32x256xf32> to vector<1x32x256xf32>
    %268 = vector.shape_cast %267 : vector<1x32x256xf32> to vector<32x256xf32>
    %cst_144 = arith.constant 0.258064508 : f32
    %269 = vector.broadcast %cst_144 : f32 to vector<32x256xf32>
    %270 = arith.mulf %269, %268 : vector<32x256xf32>
    %271 = vector.extract_strided_slice %81 {offsets = [8, 0, 0], sizes = [1, 32, 256], strides = [1, 1, 1]} : vector<16x32x256xf32> to vector<1x32x256xf32>
    %272 = vector.shape_cast %271 : vector<1x32x256xf32> to vector<32x256xf32>
    %cst_145 = arith.constant 0.741935492 : f32
    %273 = vector.broadcast %cst_145 : f32 to vector<32x256xf32>
    %274 = arith.mulf %273, %272 : vector<32x256xf32>
    %275 = arith.addf %270, %274 : vector<32x256xf32>
    %c0_146 = arith.constant 0 : index
    %c16 = arith.constant 16 : index
    %c0_147 = arith.constant 0 : index
    %c0_148 = arith.constant 0 : index
    %276 = vector.load %arg7[%c0_146, %c16, %c0_147, %c0_148] : memref<1x32x32x256xf32, #tpu.memory_space<vmem>>, vector<1x1x32x256xf32>
    %277 = vector.shape_cast %276 : vector<1x1x32x256xf32> to vector<32x256xf32>
    %278 = vector.shape_cast %275 : vector<32x256xf32> to vector<1x1x32x256xf32>
    tpu.vector_store %arg7[%c0_146, %c16, %c0_147, %c0_148], %278 {strides = array<i32>} : memref<1x32x32x256xf32, #tpu.memory_space<vmem>>, vector<1x1x32x256xf32>,
    %279 = vector.extract_strided_slice %81 {offsets = [8, 0, 0], sizes = [1, 32, 256], strides = [1, 1, 1]} : vector<16x32x256xf32> to vector<1x32x256xf32>
    %280 = vector.shape_cast %279 : vector<1x32x256xf32> to vector<32x256xf32>
    %cst_149 = arith.constant 0.774193525 : f32
    %281 = vector.broadcast %cst_149 : f32 to vector<32x256xf32>
    %282 = arith.mulf %281, %280 : vector<32x256xf32>
    %283 = vector.extract_strided_slice %81 {offsets = [9, 0, 0], sizes = [1, 32, 256], strides = [1, 1, 1]} : vector<16x32x256xf32> to vector<1x32x256xf32>
    %284 = vector.shape_cast %283 : vector<1x32x256xf32> to vector<32x256xf32>
    %cst_150 = arith.constant 0.225806445 : f32
    %285 = vector.broadcast %cst_150 : f32 to vector<32x256xf32>
    %286 = arith.mulf %285, %284 : vector<32x256xf32>
    %287 = arith.addf %282, %286 : vector<32x256xf32>
    %c0_151 = arith.constant 0 : index
    %c17 = arith.constant 17 : index
    %c0_152 = arith.constant 0 : index
    %c0_153 = arith.constant 0 : index
    %288 = vector.load %arg7[%c0_151, %c17, %c0_152, %c0_153] : memref<1x32x32x256xf32, #tpu.memory_space<vmem>>, vector<1x1x32x256xf32>
    %289 = vector.shape_cast %288 : vector<1x1x32x256xf32> to vector<32x256xf32>
    %290 = vector.shape_cast %287 : vector<32x256xf32> to vector<1x1x32x256xf32>
    tpu.vector_store %arg7[%c0_151, %c17, %c0_152, %c0_153], %290 {strides = array<i32>} : memref<1x32x32x256xf32, #tpu.memory_space<vmem>>, vector<1x1x32x256xf32>,
    %291 = vector.extract_strided_slice %81 {offsets = [8, 0, 0], sizes = [1, 32, 256], strides = [1, 1, 1]} : vector<16x32x256xf32> to vector<1x32x256xf32>
    %292 = vector.shape_cast %291 : vector<1x32x256xf32> to vector<32x256xf32>
    %cst_154 = arith.constant 0.290322572 : f32
    %293 = vector.broadcast %cst_154 : f32 to vector<32x256xf32>
    %294 = arith.mulf %293, %292 : vector<32x256xf32>
    %295 = vector.extract_strided_slice %81 {offsets = [9, 0, 0], sizes = [1, 32, 256], strides = [1, 1, 1]} : vector<16x32x256xf32> to vector<1x32x256xf32>
    %296 = vector.shape_cast %295 : vector<1x32x256xf32> to vector<32x256xf32>
    %cst_155 = arith.constant 0.709677398 : f32
    %297 = vector.broadcast %cst_155 : f32 to vector<32x256xf32>
    %298 = arith.mulf %297, %296 : vector<32x256xf32>
    %299 = arith.addf %294, %298 : vector<32x256xf32>
    %c0_156 = arith.constant 0 : index
    %c18 = arith.constant 18 : index
    %c0_157 = arith.constant 0 : index
    %c0_158 = arith.constant 0 : index
    %300 = vector.load %arg7[%c0_156, %c18, %c0_157, %c0_158] : memref<1x32x32x256xf32, #tpu.memory_space<vmem>>, vector<1x1x32x256xf32>
    %301 = vector.shape_cast %300 : vector<1x1x32x256xf32> to vector<32x256xf32>
    %302 = vector.shape_cast %299 : vector<32x256xf32> to vector<1x1x32x256xf32>
    tpu.vector_store %arg7[%c0_156, %c18, %c0_157, %c0_158], %302 {strides = array<i32>} : memref<1x32x32x256xf32, #tpu.memory_space<vmem>>, vector<1x1x32x256xf32>,
    %303 = vector.extract_strided_slice %81 {offsets = [9, 0, 0], sizes = [1, 32, 256], strides = [1, 1, 1]} : vector<16x32x256xf32> to vector<1x32x256xf32>
    %304 = vector.shape_cast %303 : vector<1x32x256xf32> to vector<32x256xf32>
    %cst_159 = arith.constant 0.806451618 : f32
    %305 = vector.broadcast %cst_159 : f32 to vector<32x256xf32>
    %306 = arith.mulf %305, %304 : vector<32x256xf32>
    %307 = vector.extract_strided_slice %81 {offsets = [10, 0, 0], sizes = [1, 32, 256], strides = [1, 1, 1]} : vector<16x32x256xf32> to vector<1x32x256xf32>
    %308 = vector.shape_cast %307 : vector<1x32x256xf32> to vector<32x256xf32>
    %cst_160 = arith.constant 0.193548381 : f32
    %309 = vector.broadcast %cst_160 : f32 to vector<32x256xf32>
    %310 = arith.mulf %309, %308 : vector<32x256xf32>
    %311 = arith.addf %306, %310 : vector<32x256xf32>
    %c0_161 = arith.constant 0 : index
    %c19 = arith.constant 19 : index
    %c0_162 = arith.constant 0 : index
    %c0_163 = arith.constant 0 : index
    %312 = vector.load %arg7[%c0_161, %c19, %c0_162, %c0_163] : memref<1x32x32x256xf32, #tpu.memory_space<vmem>>, vector<1x1x32x256xf32>
    %313 = vector.shape_cast %312 : vector<1x1x32x256xf32> to vector<32x256xf32>
    %314 = vector.shape_cast %311 : vector<32x256xf32> to vector<1x1x32x256xf32>
    tpu.vector_store %arg7[%c0_161, %c19, %c0_162, %c0_163], %314 {strides = array<i32>} : memref<1x32x32x256xf32, #tpu.memory_space<vmem>>, vector<1x1x32x256xf32>,
    %315 = vector.extract_strided_slice %81 {offsets = [9, 0, 0], sizes = [1, 32, 256], strides = [1, 1, 1]} : vector<16x32x256xf32> to vector<1x32x256xf32>
    %316 = vector.shape_cast %315 : vector<1x32x256xf32> to vector<32x256xf32>
    %cst_164 = arith.constant 0.322580636 : f32
    %317 = vector.broadcast %cst_164 : f32 to vector<32x256xf32>
    %318 = arith.mulf %317, %316 : vector<32x256xf32>
    %319 = vector.extract_strided_slice %81 {offsets = [10, 0, 0], sizes = [1, 32, 256], strides = [1, 1, 1]} : vector<16x32x256xf32> to vector<1x32x256xf32>
    %320 = vector.shape_cast %319 : vector<1x32x256xf32> to vector<32x256xf32>
    %cst_165 = arith.constant 0.677419364 : f32
    %321 = vector.broadcast %cst_165 : f32 to vector<32x256xf32>
    %322 = arith.mulf %321, %320 : vector<32x256xf32>
    %323 = arith.addf %318, %322 : vector<32x256xf32>
    %c0_166 = arith.constant 0 : index
    %c20 = arith.constant 20 : index
    %c0_167 = arith.constant 0 : index
    %c0_168 = arith.constant 0 : index
    %324 = vector.load %arg7[%c0_166, %c20, %c0_167, %c0_168] : memref<1x32x32x256xf32, #tpu.memory_space<vmem>>, vector<1x1x32x256xf32>
    %325 = vector.shape_cast %324 : vector<1x1x32x256xf32> to vector<32x256xf32>
    %326 = vector.shape_cast %323 : vector<32x256xf32> to vector<1x1x32x256xf32>
    tpu.vector_store %arg7[%c0_166, %c20, %c0_167, %c0_168], %326 {strides = array<i32>} : memref<1x32x32x256xf32, #tpu.memory_space<vmem>>, vector<1x1x32x256xf32>,
    %327 = vector.extract_strided_slice %81 {offsets = [10, 0, 0], sizes = [1, 32, 256], strides = [1, 1, 1]} : vector<16x32x256xf32> to vector<1x32x256xf32>
    %328 = vector.shape_cast %327 : vector<1x32x256xf32> to vector<32x256xf32>
    %cst_169 = arith.constant 0.838709652 : f32
    %329 = vector.broadcast %cst_169 : f32 to vector<32x256xf32>
    %330 = arith.mulf %329, %328 : vector<32x256xf32>
    %331 = vector.extract_strided_slice %81 {offsets = [11, 0, 0], sizes = [1, 32, 256], strides = [1, 1, 1]} : vector<16x32x256xf32> to vector<1x32x256xf32>
    %332 = vector.shape_cast %331 : vector<1x32x256xf32> to vector<32x256xf32>
    %cst_170 = arith.constant 0.161290318 : f32
    %333 = vector.broadcast %cst_170 : f32 to vector<32x256xf32>
    %334 = arith.mulf %333, %332 : vector<32x256xf32>
    %335 = arith.addf %330, %334 : vector<32x256xf32>
    %c0_171 = arith.constant 0 : index
    %c21 = arith.constant 21 : index
    %c0_172 = arith.constant 0 : index
    %c0_173 = arith.constant 0 : index
    %336 = vector.load %arg7[%c0_171, %c21, %c0_172, %c0_173] : memref<1x32x32x256xf32, #tpu.memory_space<vmem>>, vector<1x1x32x256xf32>
    %337 = vector.shape_cast %336 : vector<1x1x32x256xf32> to vector<32x256xf32>
    %338 = vector.shape_cast %335 : vector<32x256xf32> to vector<1x1x32x256xf32>
    tpu.vector_store %arg7[%c0_171, %c21, %c0_172, %c0_173], %338 {strides = array<i32>} : memref<1x32x32x256xf32, #tpu.memory_space<vmem>>, vector<1x1x32x256xf32>,
    %339 = vector.extract_strided_slice %81 {offsets = [10, 0, 0], sizes = [1, 32, 256], strides = [1, 1, 1]} : vector<16x32x256xf32> to vector<1x32x256xf32>
    %340 = vector.shape_cast %339 : vector<1x32x256xf32> to vector<32x256xf32>
    %cst_174 = arith.constant 0.354838699 : f32
    %341 = vector.broadcast %cst_174 : f32 to vector<32x256xf32>
    %342 = arith.mulf %341, %340 : vector<32x256xf32>
    %343 = vector.extract_strided_slice %81 {offsets = [11, 0, 0], sizes = [1, 32, 256], strides = [1, 1, 1]} : vector<16x32x256xf32> to vector<1x32x256xf32>
    %344 = vector.shape_cast %343 : vector<1x32x256xf32> to vector<32x256xf32>
    %cst_175 = arith.constant 0.645161271 : f32
    %345 = vector.broadcast %cst_175 : f32 to vector<32x256xf32>
    %346 = arith.mulf %345, %344 : vector<32x256xf32>
    %347 = arith.addf %342, %346 : vector<32x256xf32>
    %c0_176 = arith.constant 0 : index
    %c22 = arith.constant 22 : index
    %c0_177 = arith.constant 0 : index
    %c0_178 = arith.constant 0 : index
    %348 = vector.load %arg7[%c0_176, %c22, %c0_177, %c0_178] : memref<1x32x32x256xf32, #tpu.memory_space<vmem>>, vector<1x1x32x256xf32>
    %349 = vector.shape_cast %348 : vector<1x1x32x256xf32> to vector<32x256xf32>
    %350 = vector.shape_cast %347 : vector<32x256xf32> to vector<1x1x32x256xf32>
    tpu.vector_store %arg7[%c0_176, %c22, %c0_177, %c0_178], %350 {strides = array<i32>} : memref<1x32x32x256xf32, #tpu.memory_space<vmem>>, vector<1x1x32x256xf32>,
    %351 = vector.extract_strided_slice %81 {offsets = [11, 0, 0], sizes = [1, 32, 256], strides = [1, 1, 1]} : vector<16x32x256xf32> to vector<1x32x256xf32>
    %352 = vector.shape_cast %351 : vector<1x32x256xf32> to vector<32x256xf32>
    %cst_179 = arith.constant 0.870967745 : f32
    %353 = vector.broadcast %cst_179 : f32 to vector<32x256xf32>
    %354 = arith.mulf %353, %352 : vector<32x256xf32>
    %355 = vector.extract_strided_slice %81 {offsets = [12, 0, 0], sizes = [1, 32, 256], strides = [1, 1, 1]} : vector<16x32x256xf32> to vector<1x32x256xf32>
    %356 = vector.shape_cast %355 : vector<1x32x256xf32> to vector<32x256xf32>
    %cst_180 = arith.constant 0.129032254 : f32
    %357 = vector.broadcast %cst_180 : f32 to vector<32x256xf32>
    %358 = arith.mulf %357, %356 : vector<32x256xf32>
    %359 = arith.addf %354, %358 : vector<32x256xf32>
    %c0_181 = arith.constant 0 : index
    %c23 = arith.constant 23 : index
    %c0_182 = arith.constant 0 : index
    %c0_183 = arith.constant 0 : index
    %360 = vector.load %arg7[%c0_181, %c23, %c0_182, %c0_183] : memref<1x32x32x256xf32, #tpu.memory_space<vmem>>, vector<1x1x32x256xf32>
    %361 = vector.shape_cast %360 : vector<1x1x32x256xf32> to vector<32x256xf32>
    %362 = vector.shape_cast %359 : vector<32x256xf32> to vector<1x1x32x256xf32>
    tpu.vector_store %arg7[%c0_181, %c23, %c0_182, %c0_183], %362 {strides = array<i32>} : memref<1x32x32x256xf32, #tpu.memory_space<vmem>>, vector<1x1x32x256xf32>,
    %363 = vector.extract_strided_slice %81 {offsets = [11, 0, 0], sizes = [1, 32, 256], strides = [1, 1, 1]} : vector<16x32x256xf32> to vector<1x32x256xf32>
    %364 = vector.shape_cast %363 : vector<1x32x256xf32> to vector<32x256xf32>
    %cst_184 = arith.constant 0.387096763 : f32
    %365 = vector.broadcast %cst_184 : f32 to vector<32x256xf32>
    %366 = arith.mulf %365, %364 : vector<32x256xf32>
    %367 = vector.extract_strided_slice %81 {offsets = [12, 0, 0], sizes = [1, 32, 256], strides = [1, 1, 1]} : vector<16x32x256xf32> to vector<1x32x256xf32>
    %368 = vector.shape_cast %367 : vector<1x32x256xf32> to vector<32x256xf32>
    %cst_185 = arith.constant 0.612903237 : f32
    %369 = vector.broadcast %cst_185 : f32 to vector<32x256xf32>
    %370 = arith.mulf %369, %368 : vector<32x256xf32>
    %371 = arith.addf %366, %370 : vector<32x256xf32>
    %c0_186 = arith.constant 0 : index
    %c24 = arith.constant 24 : index
    %c0_187 = arith.constant 0 : index
    %c0_188 = arith.constant 0 : index
    %372 = vector.load %arg7[%c0_186, %c24, %c0_187, %c0_188] : memref<1x32x32x256xf32, #tpu.memory_space<vmem>>, vector<1x1x32x256xf32>
    %373 = vector.shape_cast %372 : vector<1x1x32x256xf32> to vector<32x256xf32>
    %374 = vector.shape_cast %371 : vector<32x256xf32> to vector<1x1x32x256xf32>
    tpu.vector_store %arg7[%c0_186, %c24, %c0_187, %c0_188], %374 {strides = array<i32>} : memref<1x32x32x256xf32, #tpu.memory_space<vmem>>, vector<1x1x32x256xf32>,
    %375 = vector.extract_strided_slice %81 {offsets = [12, 0, 0], sizes = [1, 32, 256], strides = [1, 1, 1]} : vector<16x32x256xf32> to vector<1x32x256xf32>
    %376 = vector.shape_cast %375 : vector<1x32x256xf32> to vector<32x256xf32>
    %cst_189 = arith.constant 0.903225779 : f32
    %377 = vector.broadcast %cst_189 : f32 to vector<32x256xf32>
    %378 = arith.mulf %377, %376 : vector<32x256xf32>
    %379 = vector.extract_strided_slice %81 {offsets = [13, 0, 0], sizes = [1, 32, 256], strides = [1, 1, 1]} : vector<16x32x256xf32> to vector<1x32x256xf32>
    %380 = vector.shape_cast %379 : vector<1x32x256xf32> to vector<32x256xf32>
    %cst_190 = arith.constant 0.0967741906 : f32
    %381 = vector.broadcast %cst_190 : f32 to vector<32x256xf32>
    %382 = arith.mulf %381, %380 : vector<32x256xf32>
    %383 = arith.addf %378, %382 : vector<32x256xf32>
    %c0_191 = arith.constant 0 : index
    %c25 = arith.constant 25 : index
    %c0_192 = arith.constant 0 : index
    %c0_193 = arith.constant 0 : index
    %384 = vector.load %arg7[%c0_191, %c25, %c0_192, %c0_193] : memref<1x32x32x256xf32, #tpu.memory_space<vmem>>, vector<1x1x32x256xf32>
    %385 = vector.shape_cast %384 : vector<1x1x32x256xf32> to vector<32x256xf32>
    %386 = vector.shape_cast %383 : vector<32x256xf32> to vector<1x1x32x256xf32>
    tpu.vector_store %arg7[%c0_191, %c25, %c0_192, %c0_193], %386 {strides = array<i32>} : memref<1x32x32x256xf32, #tpu.memory_space<vmem>>, vector<1x1x32x256xf32>,
    %387 = vector.extract_strided_slice %81 {offsets = [12, 0, 0], sizes = [1, 32, 256], strides = [1, 1, 1]} : vector<16x32x256xf32> to vector<1x32x256xf32>
    %388 = vector.shape_cast %387 : vector<1x32x256xf32> to vector<32x256xf32>
    %cst_194 = arith.constant 0.419354826 : f32
    %389 = vector.broadcast %cst_194 : f32 to vector<32x256xf32>
    %390 = arith.mulf %389, %388 : vector<32x256xf32>
    %391 = vector.extract_strided_slice %81 {offsets = [13, 0, 0], sizes = [1, 32, 256], strides = [1, 1, 1]} : vector<16x32x256xf32> to vector<1x32x256xf32>
    %392 = vector.shape_cast %391 : vector<1x32x256xf32> to vector<32x256xf32>
    %cst_195 = arith.constant 0.580645144 : f32
    %393 = vector.broadcast %cst_195 : f32 to vector<32x256xf32>
    %394 = arith.mulf %393, %392 : vector<32x256xf32>
    %395 = arith.addf %390, %394 : vector<32x256xf32>
    %c0_196 = arith.constant 0 : index
    %c26 = arith.constant 26 : index
    %c0_197 = arith.constant 0 : index
    %c0_198 = arith.constant 0 : index
    %396 = vector.load %arg7[%c0_196, %c26, %c0_197, %c0_198] : memref<1x32x32x256xf32, #tpu.memory_space<vmem>>, vector<1x1x32x256xf32>
    %397 = vector.shape_cast %396 : vector<1x1x32x256xf32> to vector<32x256xf32>
    %398 = vector.shape_cast %395 : vector<32x256xf32> to vector<1x1x32x256xf32>
    tpu.vector_store %arg7[%c0_196, %c26, %c0_197, %c0_198], %398 {strides = array<i32>} : memref<1x32x32x256xf32, #tpu.memory_space<vmem>>, vector<1x1x32x256xf32>,
    %399 = vector.extract_strided_slice %81 {offsets = [13, 0, 0], sizes = [1, 32, 256], strides = [1, 1, 1]} : vector<16x32x256xf32> to vector<1x32x256xf32>
    %400 = vector.shape_cast %399 : vector<1x32x256xf32> to vector<32x256xf32>
    %cst_199 = arith.constant 0.935483872 : f32
    %401 = vector.broadcast %cst_199 : f32 to vector<32x256xf32>
    %402 = arith.mulf %401, %400 : vector<32x256xf32>
    %403 = vector.extract_strided_slice %81 {offsets = [14, 0, 0], sizes = [1, 32, 256], strides = [1, 1, 1]} : vector<16x32x256xf32> to vector<1x32x256xf32>
    %404 = vector.shape_cast %403 : vector<1x32x256xf32> to vector<32x256xf32>
    %cst_200 = arith.constant 0.0645161271 : f32
    %405 = vector.broadcast %cst_200 : f32 to vector<32x256xf32>
    %406 = arith.mulf %405, %404 : vector<32x256xf32>
    %407 = arith.addf %402, %406 : vector<32x256xf32>
    %c0_201 = arith.constant 0 : index
    %c27 = arith.constant 27 : index
    %c0_202 = arith.constant 0 : index
    %c0_203 = arith.constant 0 : index
    %408 = vector.load %arg7[%c0_201, %c27, %c0_202, %c0_203] : memref<1x32x32x256xf32, #tpu.memory_space<vmem>>, vector<1x1x32x256xf32>
    %409 = vector.shape_cast %408 : vector<1x1x32x256xf32> to vector<32x256xf32>
    %410 = vector.shape_cast %407 : vector<32x256xf32> to vector<1x1x32x256xf32>
    tpu.vector_store %arg7[%c0_201, %c27, %c0_202, %c0_203], %410 {strides = array<i32>} : memref<1x32x32x256xf32, #tpu.memory_space<vmem>>, vector<1x1x32x256xf32>,
    %411 = vector.extract_strided_slice %81 {offsets = [13, 0, 0], sizes = [1, 32, 256], strides = [1, 1, 1]} : vector<16x32x256xf32> to vector<1x32x256xf32>
    %412 = vector.shape_cast %411 : vector<1x32x256xf32> to vector<32x256xf32>
    %cst_204 = arith.constant 0.45161289 : f32
    %413 = vector.broadcast %cst_204 : f32 to vector<32x256xf32>
    %414 = arith.mulf %413, %412 : vector<32x256xf32>
    %415 = vector.extract_strided_slice %81 {offsets = [14, 0, 0], sizes = [1, 32, 256], strides = [1, 1, 1]} : vector<16x32x256xf32> to vector<1x32x256xf32>
    %416 = vector.shape_cast %415 : vector<1x32x256xf32> to vector<32x256xf32>
    %cst_205 = arith.constant 0.54838711 : f32
    %417 = vector.broadcast %cst_205 : f32 to vector<32x256xf32>
    %418 = arith.mulf %417, %416 : vector<32x256xf32>
    %419 = arith.addf %414, %418 : vector<32x256xf32>
    %c0_206 = arith.constant 0 : index
    %c28 = arith.constant 28 : index
    %c0_207 = arith.constant 0 : index
    %c0_208 = arith.constant 0 : index
    %420 = vector.load %arg7[%c0_206, %c28, %c0_207, %c0_208] : memref<1x32x32x256xf32, #tpu.memory_space<vmem>>, vector<1x1x32x256xf32>
    %421 = vector.shape_cast %420 : vector<1x1x32x256xf32> to vector<32x256xf32>
    %422 = vector.shape_cast %419 : vector<32x256xf32> to vector<1x1x32x256xf32>
    tpu.vector_store %arg7[%c0_206, %c28, %c0_207, %c0_208], %422 {strides = array<i32>} : memref<1x32x32x256xf32, #tpu.memory_space<vmem>>, vector<1x1x32x256xf32>,
    %423 = vector.extract_strided_slice %81 {offsets = [14, 0, 0], sizes = [1, 32, 256], strides = [1, 1, 1]} : vector<16x32x256xf32> to vector<1x32x256xf32>
    %424 = vector.shape_cast %423 : vector<1x32x256xf32> to vector<32x256xf32>
    %cst_209 = arith.constant 0.967741906 : f32
    %425 = vector.broadcast %cst_209 : f32 to vector<32x256xf32>
    %426 = arith.mulf %425, %424 : vector<32x256xf32>
    %427 = vector.extract_strided_slice %81 {offsets = [15, 0, 0], sizes = [1, 32, 256], strides = [1, 1, 1]} : vector<16x32x256xf32> to vector<1x32x256xf32>
    %428 = vector.shape_cast %427 : vector<1x32x256xf32> to vector<32x256xf32>
    %cst_210 = arith.constant 0.0322580636 : f32
    %429 = vector.broadcast %cst_210 : f32 to vector<32x256xf32>
    %430 = arith.mulf %429, %428 : vector<32x256xf32>
    %431 = arith.addf %426, %430 : vector<32x256xf32>
    %c0_211 = arith.constant 0 : index
    %c29 = arith.constant 29 : index
    %c0_212 = arith.constant 0 : index
    %c0_213 = arith.constant 0 : index
    %432 = vector.load %arg7[%c0_211, %c29, %c0_212, %c0_213] : memref<1x32x32x256xf32, #tpu.memory_space<vmem>>, vector<1x1x32x256xf32>
    %433 = vector.shape_cast %432 : vector<1x1x32x256xf32> to vector<32x256xf32>
    %434 = vector.shape_cast %431 : vector<32x256xf32> to vector<1x1x32x256xf32>
    tpu.vector_store %arg7[%c0_211, %c29, %c0_212, %c0_213], %434 {strides = array<i32>} : memref<1x32x32x256xf32, #tpu.memory_space<vmem>>, vector<1x1x32x256xf32>,
    %435 = vector.extract_strided_slice %81 {offsets = [14, 0, 0], sizes = [1, 32, 256], strides = [1, 1, 1]} : vector<16x32x256xf32> to vector<1x32x256xf32>
    %436 = vector.shape_cast %435 : vector<1x32x256xf32> to vector<32x256xf32>
    %cst_214 = arith.constant 0.483870953 : f32
    %437 = vector.broadcast %cst_214 : f32 to vector<32x256xf32>
    %438 = arith.mulf %437, %436 : vector<32x256xf32>
    %439 = vector.extract_strided_slice %81 {offsets = [15, 0, 0], sizes = [1, 32, 256], strides = [1, 1, 1]} : vector<16x32x256xf32> to vector<1x32x256xf32>
    %440 = vector.shape_cast %439 : vector<1x32x256xf32> to vector<32x256xf32>
    %cst_215 = arith.constant 5.161290e-01 : f32
    %441 = vector.broadcast %cst_215 : f32 to vector<32x256xf32>
    %442 = arith.mulf %441, %440 : vector<32x256xf32>
    %443 = arith.addf %438, %442 : vector<32x256xf32>
    %c0_216 = arith.constant 0 : index
    %c30 = arith.constant 30 : index
    %c0_217 = arith.constant 0 : index
    %c0_218 = arith.constant 0 : index
    %444 = vector.load %arg7[%c0_216, %c30, %c0_217, %c0_218] : memref<1x32x32x256xf32, #tpu.memory_space<vmem>>, vector<1x1x32x256xf32>
    %445 = vector.shape_cast %444 : vector<1x1x32x256xf32> to vector<32x256xf32>
    %446 = vector.shape_cast %443 : vector<32x256xf32> to vector<1x1x32x256xf32>
    tpu.vector_store %arg7[%c0_216, %c30, %c0_217, %c0_218], %446 {strides = array<i32>} : memref<1x32x32x256xf32, #tpu.memory_space<vmem>>, vector<1x1x32x256xf32>,
    %447 = vector.extract_strided_slice %81 {offsets = [15, 0, 0], sizes = [1, 32, 256], strides = [1, 1, 1]} : vector<16x32x256xf32> to vector<1x32x256xf32>
    %448 = vector.shape_cast %447 : vector<1x32x256xf32> to vector<32x256xf32>
    %c0_219 = arith.constant 0 : index
    %c31 = arith.constant 31 : index
    %c0_220 = arith.constant 0 : index
    %c0_221 = arith.constant 0 : index
    %449 = vector.load %arg7[%c0_219, %c31, %c0_220, %c0_221] : memref<1x32x32x256xf32, #tpu.memory_space<vmem>>, vector<1x1x32x256xf32>
    %450 = vector.shape_cast %449 : vector<1x1x32x256xf32> to vector<32x256xf32>
    %451 = vector.shape_cast %448 : vector<32x256xf32> to vector<1x1x32x256xf32>
    tpu.vector_store %arg7[%c0_219, %c31, %c0_220, %c0_221], %451 {strides = array<i32>} : memref<1x32x32x256xf32, #tpu.memory_space<vmem>>, vector<1x1x32x256xf32>,
    return
  }
  func.func @transform_0(%arg0: i32) -> (i32, i32, i32, i32) {
    %c0_i32 = arith.constant 0 : i32
    %c0_i32_0 = arith.constant 0 : i32
    %c0_i32_1 = arith.constant 0 : i32
    %c0_i32_2 = arith.constant 0 : i32
    return %arg0, %c0_i32, %c0_i32_0, %c0_i32_1 : i32, i32, i32, i32
  }
  func.func @transform_1(%arg0: i32) -> (i32, i32, i32) {
    %c0_i32 = arith.constant 0 : i32
    %c0_i32_0 = arith.constant 0 : i32
    %c0_i32_1 = arith.constant 0 : i32
    %c0_i32_2 = arith.constant 0 : i32
    return %c0_i32, %c0_i32_0, %c0_i32_1 : i32, i32, i32
  }
  func.func @transform_2(%arg0: i32) -> (i32, i32) {
    %c0_i32 = arith.constant 0 : i32
    %c0_i32_0 = arith.constant 0 : i32
    %c0_i32_1 = arith.constant 0 : i32
    return %c0_i32, %c0_i32_0 : i32, i32
  }
  func.func @transform_3(%arg0: i32) -> (i32, i32, i32) {
    %c0_i32 = arith.constant 0 : i32
    %c0_i32_0 = arith.constant 0 : i32
    %c0_i32_1 = arith.constant 0 : i32
    %c0_i32_2 = arith.constant 0 : i32
    return %c0_i32, %c0_i32_0, %c0_i32_1 : i32, i32, i32
  }
  func.func @transform_4(%arg0: i32) -> (i32, i32) {
    %c0_i32 = arith.constant 0 : i32
    %c0_i32_0 = arith.constant 0 : i32
    %c0_i32_1 = arith.constant 0 : i32
    return %c0_i32, %c0_i32_0 : i32, i32
  }
  func.func @transform_5(%arg0: i32) -> (i32, i32) {
    %c0_i32 = arith.constant 0 : i32
    %c0_i32_0 = arith.constant 0 : i32
    %c0_i32_1 = arith.constant 0 : i32
    return %c0_i32, %c0_i32_0 : i32, i32
  }
  func.func @transform_6(%arg0: i32) -> (i32, i32, i32, i32) {
    %c0_i32 = arith.constant 0 : i32
    %c0_i32_0 = arith.constant 0 : i32
    %c0_i32_1 = arith.constant 0 : i32
    %c0_i32_2 = arith.constant 0 : i32
    return %arg0, %c0_i32, %c0_i32_0, %c0_i32_1 : i32, i32, i32, i32
  }
}

</mosaic_0001>

<bundles_post_ra>
// kernel: feature_map_net.1
= control target key start
LH: loop header
LB: loop body
LE: loop exit
PB: predicated region body
PF: predicated region fallthrough
CT: control target
= control target key end

     0   :  { %11 = vsyncpa [#allocation5], 0  ;;  %s14986_s0 = inlined_call_operand.vmem [shape: bf16[2,16,16,64], index: 0, kind: input, shape index: {}]   ;;  %s14987_s1 = inlined_call_operand.vmem [shape: bf16[3,192,128], index: 1, kind: input, shape index: {}]   ;;  %s14988_s2 = inlined_call_operand.vmem [shape: f32[1,128], index: 2, kind: input, shape index: {}]   ;;  %s14989_s3 = inlined_call_operand.vmem [shape: bf16[3,384,256], index: 3, kind: input, shape index: {}]   ;;  %s14990_s4 = inlined_call_operand.vmem [shape: f32[1,256], index: 4, kind: input, shape index: {}]   ;;  %s14991_s5 = inlined_call_operand.vmem [shape: f32[32,16], index: 5, kind: input, shape index: {}]   ;;  %s14992_s6 = inlined_call_operand.hbm [shape: f32[2,32,32,256], index: 6, kind: output, shape index: {}]  }
   0x1   :  { %13 = vsyncpa [#allocation5 + $0x1], 0  ;;  %s11200_s21 = smov 0   ;;  %s11202_s22 = smov 0  }
   0x2   :  { %s11204_s23 = smov 0   ;;  %s11206_s24 = smov 0  }
   0x3 LB: > { %s11221_s25 = sadd.s32 4294967295, %s11157_s24   ;;  %s9064_s26 = sadd.s32 4294967294, %s11157_s24   ;;  %s11157_s24 = sphi %s11206_s24, %s15100_s24   ;;  %s11153_s23 = sphi %s11204_s23, %s15099_s23   ;;  %s11149_s22 = sphi %s11202_s22, %s15098_s22   ;;  %s11145_s21 = sphi %s11200_s21, %s15097_s21  }
   0x4   : > { %s11225_s27 = sadd.s32 1, %s11157_s24   ;;  %s157_s28 = sadd.s32 1, %s11153_s23 }
   0x5   : > { %s154_s29 = ssub.s32 %s11157_s24, %s11225_s27  ;;  %p167_p0 = scmp.ne.s32.totalorder %s11153_s23, %s11149_s22 }
   0x6   : > { %p155_p1 = scmp.eq.s32.totalorder %s154_s29, 0  ;;  %p168_p2 = scmp.eq.s32.totalorder %s11221_s25, 1 }
   0x7   : > { %p173_p3 = scmp.ne.s32.totalorder %s11149_s22, %s11145_s21  ;;  %p174_p4 = scmp.eq.s32.totalorder %s9064_s26, 1 }
   0x8   : > { %s11236_s30 = scalar_select %p155_p1, %s11153_s23, %s157_s28  }
   0x9   : > { %p11238_p5 = por %p168_p2, %p167_p0  ;;  %p11242_p6 = por %p174_p4, %p173_p3 }
   0xa   : > { %p9067_p7 = scmp.ge.s32.totalorder %s11157_s24, 1  ;;  %p215_p8 = scmp.lt.s32.totalorder %s11157_s24, 3 }
   0xc   : > { %p216_p9 = pnand %p9067_p7, %p215_p8 }
   0xe   : > { %219 = sbr.rel (%p216_p9) target bundleno = 2042 (0x7fa), region = 44 }
  0x15   : > { %p245_p10 = scmp.lt.s32.totalorder %s11221_s25, 1  ;;  %vm251_vm0 = vcmask 519168   ;;  %v14993_v0 = vmov 0   ;;  %vm339_vm1 = vsmask.f32 256  ;;  %vm254_vm2 = vcmask 516096  }
  0x16   : > { %256 = vst.msk [vmem:[#allocation2 + $0xc] sm:$0xf] %vm251_vm0, %v14993_v0  ;;  %257 = vst.msk [vmem:[#allocation2 + $0x10] sm:$0xf] %vm251_vm0, %v14993_v0  ;;  %1140 = vmatprep.subr.bf16.mxu0 %v14993_v0  ;;  %v10675_v1 = vld [vmem:[%s14987_s1] sm:$0xff]   ;;  %v10678_v2 = vld [vmem:[%s14987_s1 + $0x8] sm:$0xff]  }
  0x17   : > { %252 = vst.msk [vmem:[#allocation2] sm:$0xf] %vm251_vm0, %v14993_v0  ;;  %253 = vst.msk [vmem:[#allocation2 + $0x4] sm:$0xf] %vm251_vm0, %v14993_v0  ;;  %s246_s11 = scalar_select %p245_p10, %s11221_s25, 1  ;;  %1141 = vmatpush1.bf16.msra.mxu0 %v10675_v1  ;;  %v10681_v3 = vld [vmem:[%s14987_s1 + $0x10] sm:$0xff]  }
  0x18   : > { %259 = vst.msk [vmem:[#allocation2 + $0x18] sm:$0xf] %vm251_vm0, %v14993_v0  ;;  %260 = vst.msk [vmem:[#allocation2 + $0x1c] sm:$0xf] %vm251_vm0, %v14993_v0  ;;  %vm340_vm3 = vsmask.f32 4368  ;;  %1142 = vmatprep.subr.bf16.mxu0 %v14993_v0 }
  0x19   : > { %262 = vst.msk [vmem:[#allocation2 + $0x24] sm:$0xf] %vm251_vm0, %v14993_v0  ;;  %263 = vst.msk [vmem:[#allocation2 + $0x28] sm:$0xf] %vm251_vm0, %v14993_v0  ;;  %s9937_s12 = sshll.u32 %s246_s11, 7  ;;  %v15013_v16 = vmov 0 }
  0x1a   : > { %265 = vst.msk [vmem:[#allocation2 + $0x30] sm:$0xf] %vm251_vm0, %v14993_v0  ;;  %266 = vst.msk [vmem:[#allocation2 + $0x34] sm:$0xf] %vm251_vm0, %v14993_v0  ;;  %vm664_vm4 = vsmask.f32 7938  ;;  %s11425_s17 = scalar_lea.vmem %s14986_s0, %s9937_s12 }
  0x1b   : > { %268 = vst.msk [vmem:[#allocation2 + $0x3c] sm:$0xf] %vm251_vm0, %v14993_v0  ;;  %269 = vst.msk [vmem:[#allocation2 + $0x40] sm:$0xf] %vm251_vm0, %v14993_v0  ;;  %v307_v4 = vld [vmem:[%s11425_s17] sm:$0xf]  ;;  %1143 = vmatpush1.bf16.msra.mxu0 %v10678_v2 }
  0x1c   : > { %271 = vst.msk [vmem:[#allocation2 + $0x48] sm:$0xf] %vm251_vm0, %v14993_v0  ;;  %272 = vst.msk [vmem:[#allocation2 + $0x4c] sm:$0xf] %vm251_vm0, %v14993_v0  ;;  %v308_v5 = vld [vmem:[%s11425_s17 + $0x4] sm:$0xf]  ;;  %1144 = vmatprep.subr.bf16.mxu0 %v14993_v0 }
  0x1d   : > { %274 = vst.msk [vmem:[#allocation2 + $0x54] sm:$0xf] %vm251_vm0, %v14993_v0  ;;  %275 = vst.msk [vmem:[#allocation2 + $0x58] sm:$0xf] %vm251_vm0, %v14993_v0  ;;  %v309_v6 = vld [vmem:[%s11425_s17 + $0x8] sm:$0xf] }
  0x1e   : > { %277 = vst.msk [vmem:[#allocation2 + $0x60] sm:$0xf] %vm251_vm0, %v14993_v0  ;;  %278 = vst.msk [vmem:[#allocation2 + $0x64] sm:$0xf] %vm251_vm0, %v14993_v0  ;;  %v343_v7 = vshrl.u32 %v307_v4, 16  ;;  %v346_v8 = vshll.u32 %v307_v4, 16 }
  0x1f   : > { %280 = vst.msk [vmem:[#allocation2 + $0x6c] sm:$0xf] %vm251_vm0, %v14993_v0  ;;  %281 = vst.msk [vmem:[#allocation2 + $0x70] sm:$0xf] %vm251_vm0, %v14993_v0  ;;  %v351_v9 = vshrl.u32 %v308_v5, 16  ;;  %v354_v10 = vshll.u32 %v308_v5, 16  ;;  %1145 = vmatpush1.bf16.msra.mxu0 %v10681_v3 }
  0x20   : > { %283 = vst.msk [vmem:[#allocation2 + $0x78] sm:$0xf] %vm251_vm0, %v14993_v0  ;;  %284 = vst.msk [vmem:[#allocation2 + $0x7c] sm:$0xf] %vm251_vm0, %v14993_v0  ;;  %v310_v11 = vld [vmem:[%s11425_s17 + $0xc] sm:$0xf]  ;;  %1146 = vmatprep.subr.bf16.mxu0 %v14993_v0 }
  0x21   : > { %286 = vst.msk [vmem:[#allocation2 + $0x84] sm:$0xf] %vm251_vm0, %v14993_v0  ;;  %287 = vst.msk [vmem:[#allocation2 + $0x88] sm:$0xf] %vm251_vm0, %v14993_v0  ;;  %v360_v12 = vshrl.u32 %v309_v6, 16  ;;  %v363_v13 = vshll.u32 %v309_v6, 16 }
  0x22   : > { %289 = vst.msk [vmem:[#allocation2 + $0x90] sm:$0xf] %vm251_vm0, %v14993_v0  ;;  %290 = vst.msk [vmem:[#allocation2 + $0x94] sm:$0xf] %vm251_vm0, %v14993_v0  ;;  %v368_v14 = vshrl.u32 %v310_v11, 16  ;;  %v371_v15 = vshll.u32 %v310_v11, 16 }
  0x23   : > { %292 = vst.msk [vmem:[#allocation2 + $0x9c] sm:$0xf] %vm251_vm0, %v14993_v0  ;;  %293 = vst.msk [vmem:[#allocation2 + $0xa0] sm:$0xf] %vm251_vm0, %v14993_v0  ;;  %v345_v17 = vrot.slane %v343_v7, 7  ;;  %v11441_v18 = vrot.slane %v351_v9, 7 }
  0x24   : > { %295 = vst.msk [vmem:[#allocation2 + $0xa8] sm:$0xf] %vm251_vm0, %v14993_v0  ;;  %296 = vst.msk [vmem:[#allocation2 + $0xac] sm:$0xf] %vm251_vm0, %v14993_v0  ;;  %v666_v19 = vld [vmem:[#allocation2 + $0xc] sm:$0xf] }
  0x25   : > { %298 = vst.msk [vmem:[#allocation2 + $0xb4] sm:$0xf] %vm251_vm0, %v14993_v0  ;;  %299 = vst.msk [vmem:[#allocation2 + $0xb8] sm:$0xf] %vm251_vm0, %v14993_v0  ;;  %v311_v20 = vld [vmem:[%s11425_s17 + $0x10] sm:$0xf]  ;;  %v348_v27 = vor.u32 %v346_v8, %v345_v17  ;;  %v356_v29 = vor.u32 %v354_v10, %v11441_v18 }
  0x26   : > { %301 = vst.msk [vmem:[#allocation2 + $0xc0] sm:$0xf] %vm251_vm0, %v14993_v0  ;;  %302 = vst.msk [vmem:[#allocation2 + $0xc4] sm:$0xf] %vm251_vm0, %v14993_v0  ;;  %v362_v22 = vrot.slane %v360_v12, 7  ;;  %v11450_v23 = vrot.slane %v368_v14, 7 }
  0x27   : > { %304 = vst.msk [vmem:[#allocation2 + $0xcc] sm:$0xf] %vm251_vm0, %v14993_v0  ;;  %305 = vst.msk [vmem:[#allocation2 + $0xd0] sm:$0xf] %vm251_vm0, %v14993_v0  ;;  %v312_v24 = vld [vmem:[%s11425_s17 + $0x14] sm:$0xf] }
  0x28   : > { %3005 = vst [vmem:[#allocation3] sm:$0xf] %v14993_v0  ;;  %3006 = vst [vmem:[#allocation3 + $0x4] sm:$0xf] %v14993_v0  ;;  %v377_v25 = vshrl.u32 %v311_v20, 16  ;;  %v380_v26 = vshll.u32 %v311_v20, 16  ;;  %v365_v32 = vor.u32 %v363_v13, %v362_v22  ;;  %v373_v34 = vor.u32 %v371_v15, %v11450_v23 }
  0x29   : > { %3007 = vst [vmem:[#allocation3 + $0x8] sm:$0x1] %v14993_v0  ;;  %3008 = vst [vmem:[#allocation3 + $0xc] sm:$0xf] %v14993_v0  ;;  %v349_v28 = vrot.slane %v345_v17, 4  ;;  %v385_v31 = vshrl.u32 %v312_v24, 16 }
  0x2a   : > { %3009 = vst [vmem:[#allocation3 + $0x10] sm:$0xf] %v14993_v0  ;;  %3010 = vst [vmem:[#allocation3 + $0x14] sm:$0x1] %v14993_v0  ;;  %v675_v30 = vld [vmem:[#allocation2 + $0x18] sm:$0xf] }
  0x2b   : > { %3011 = vst [vmem:[#allocation3 + $0x18] sm:$0xf] %v14993_v0  ;;  %3012 = vst [vmem:[#allocation3 + $0x1c] sm:$0xf] %v14993_v0  ;;  %v366_v33 = vrot.slane %v362_v22, 4  ;;  %v379_v35 = vrot.slane %v377_v25, 7 }
  0x2c   : > { %3013 = vst [vmem:[#allocation3 + $0x20] sm:$0x1] %v14993_v0  ;;  %3014 = vst [vmem:[#allocation3 + $0x24] sm:$0xf] %v14993_v0  ;;  %v313_v36 = vld [vmem:[%s11425_s17 + $0x18] sm:$0xf] }
  0x2d   : > { %3015 = vst [vmem:[#allocation3 + $0x28] sm:$0xf] %v14993_v0  ;;  %3016 = vst [vmem:[#allocation3 + $0x2c] sm:$0x1] %v14993_v0  ;;  %v314_v37 = vld [vmem:[%s11425_s17 + $0x1c] sm:$0xf]  ;;  %v382_v46 = vor.u32 %v380_v26, %v379_v35 }
  0x2e   : > { %3017 = vst [vmem:[#allocation3 + $0x30] sm:$0xf] %v14993_v0  ;;  %3018 = vst [vmem:[#allocation3 + $0x34] sm:$0xf] %v14993_v0  ;;  %v11462_v40 = vrot.slane %v385_v31, 7  ;;  %v388_v41 = vshll.u32 %v312_v24, 16 }
  0x2f   : > { %3019 = vst [vmem:[#allocation3 + $0x38] sm:$0x1] %v14993_v0  ;;  %3020 = vst [vmem:[#allocation3 + $0x3c] sm:$0xf] %v14993_v0  ;;  %v682_v42 = vld [vmem:[#allocation2 + $0x24] sm:$0xf] }
  0x30   : > { %3021 = vst [vmem:[#allocation3 + $0x40] sm:$0xf] %v14993_v0  ;;  %3022 = vst [vmem:[#allocation3 + $0x44] sm:$0x1] %v14993_v0  ;;  %v315_v43 = vld [vmem:[%s11425_s17 + $0x20] sm:$0xf]  ;;  %v390_v50 = vor.u32 %v388_v41, %v11462_v40 }
  0x31   : > { %3023 = vst [vmem:[#allocation3 + $0x48] sm:$0xf] %v14993_v0  ;;  %3024 = vst [vmem:[#allocation3 + $0x4c] sm:$0xf] %v14993_v0  ;;  %v383_v47 = vrot.slane %v379_v35, 4  ;;  %v10684_v49 = vld [vmem:[%s14987_s1 + $0x18] sm:$0xff]  }
  0x32   : > { %3025 = vst [vmem:[#allocation3 + $0x50] sm:$0x1] %v14993_v0  ;;  %3026 = vst [vmem:[#allocation3 + $0x54] sm:$0xf] %v14993_v0  ;;  %v316_v48 = vld [vmem:[%s11425_s17 + $0x24] sm:$0xf]  ;;  %1147 = vmatpush1.bf16.msra.mxu0 %v10684_v49 }
  0x33   : > { %3027 = vst [vmem:[#allocation3 + $0x58] sm:$0xf] %v14993_v0  ;;  %3028 = vst [vmem:[#allocation3 + $0x5c] sm:$0x1] %v14993_v0  ;;  %v394_v51 = vshrl.u32 %v313_v36, 16  ;;  %v397_v52 = vshll.u32 %v313_v36, 16  ;;  %1148 = vmatprep.subr.bf16.mxu0 %v14993_v0 }
  0x34   : > { %3029 = vst [vmem:[#allocation3 + $0x60] sm:$0xf] %v14993_v0  ;;  %3030 = vst [vmem:[#allocation3 + $0x64] sm:$0xf] %v14993_v0  ;;  %v402_v53 = vshrl.u32 %v314_v37, 16  ;;  %v405_v56 = vshll.u32 %v314_v37, 16 }
  0x35   : > { %3031 = vst [vmem:[#allocation3 + $0x68] sm:$0x1] %v14993_v0  ;;  %3032 = vst [vmem:[#allocation3 + $0x6c] sm:$0xf] %v14993_v0  ;;  %v319_v54 = vld [vmem:[%s11425_s17 + $0x30] sm:$0xf] }
  0x36   : > { %3033 = vst [vmem:[#allocation3 + $0x70] sm:$0xf] %v14993_v0  ;;  %3034 = vst [vmem:[#allocation3 + $0x74] sm:$0x1] %v14993_v0  ;;  %v689_v57 = vld [vmem:[#allocation2 + $0x30] sm:$0xf] }
  0x37   : > { %3035 = vst [vmem:[#allocation3 + $0x78] sm:$0xf] %v14993_v0  ;;  %3036 = vst [vmem:[#allocation3 + $0x7c] sm:$0xf] %v14993_v0  ;;  %v411_v58 = vshrl.u32 %v315_v43, 16  ;;  %v414_v59 = vshll.u32 %v315_v43, 16 }
  0x38   : > { %3037 = vst [vmem:[#allocation3 + $0x80] sm:$0x1] %v14993_v0  ;;  %3038 = vst [vmem:[#allocation3 + $0x84] sm:$0xf] %v14993_v0  ;;  %v10687_v60 = vld [vmem:[%s14987_s1 + $0x20] sm:$0xff]   ;;  %v396_v62 = vrot.slane %v394_v51, 7 }
  0x39   : > { %3039 = vst [vmem:[#allocation3 + $0x88] sm:$0xf] %v14993_v0  ;;  %3040 = vst [vmem:[#allocation3 + $0x8c] sm:$0x1] %v14993_v0  ;;  %v11484_v63 = vrot.slane %v402_v53, 7  ;;  %v419_v1 = vshrl.u32 %v316_v48, 16  ;;  %1149 = vmatpush1.bf16.msra.mxu0 %v10687_v60 }
  0x3a   : > { %3041 = vst [vmem:[#allocation3 + $0x90] sm:$0xf] %v14993_v0  ;;  %3042 = vst [vmem:[#allocation3 + $0x94] sm:$0xf] %v14993_v0  ;;  %v696_v2 = vld [vmem:[#allocation2 + $0x3c] sm:$0xf]  ;;  %v399_v9 = vor.u32 %v397_v52, %v396_v62  ;;  %1150 = vmatprep.subr.bf16.mxu0 %v14993_v0 }
  0x3b   : > { %3043 = vst [vmem:[#allocation3 + $0x98] sm:$0x1] %v14993_v0  ;;  %3044 = vst [vmem:[#allocation3 + $0x9c] sm:$0xf] %v14993_v0  ;;  %v320_v3 = vld [vmem:[%s11425_s17 + $0x34] sm:$0xf]  ;;  %v407_v11 = vor.u32 %v405_v56, %v11484_v63 }
  0x3c   : > { %3045 = vst [vmem:[#allocation3 + $0xa0] sm:$0xf] %v14993_v0  ;;  %3046 = vst [vmem:[#allocation3 + $0xa4] sm:$0x1] %v14993_v0  ;;  %v413_v4 = vrot.slane %v411_v58, 7  ;;  %v422_v5 = vshll.u32 %v316_v48, 16 }
  0x3d   : > { %3047 = vst [vmem:[#allocation3 + $0xa8] sm:$0xf] %v14993_v0  ;;  %3048 = vst [vmem:[#allocation3 + $0xac] sm:$0xf] %v14993_v0  ;;  %v445_v6 = vshrl.u32 %v319_v54, 16  ;;  %v448_v7 = vshll.u32 %v319_v54, 16 }
  0x3e   : > { %3049 = vst [vmem:[#allocation3 + $0xb0] sm:$0x1] %v14993_v0  ;;  %3050 = vst [vmem:[#allocation3 + $0xb4] sm:$0xf] %v14993_v0  ;;  %v317_v8 = vld [vmem:[%s11425_s17 + $0x28] sm:$0xf]  ;;  %v416_v17 = vor.u32 %v414_v59, %v413_v4 }
  0x3f   : > { %3051 = vst [vmem:[#allocation3 + $0xb8] sm:$0xf] %v14993_v0  ;;  %3052 = vst [vmem:[#allocation3 + $0xbc] sm:$0x1] %v14993_v0  ;;  %v400_v10 = vrot.slane %v396_v62, 4  ;;  %v11491_v12 = vrot.slane %v419_v1, 7 }
  0x40   : > { %3053 = vst [vmem:[#allocation3 + $0xc0] sm:$0xf] %v14993_v0  ;;  %3054 = vst [vmem:[#allocation3 + $0xc4] sm:$0xf] %v14993_v0  ;;  %v710_v13 = vld [vmem:[#allocation2 + $0x54] sm:$0xf] }
  0x41   : > { %3055 = vst [vmem:[#allocation3 + $0xc8] sm:$0x1] %v14993_v0  ;;  %3056 = vst [vmem:[#allocation3 + $0xcc] sm:$0xf] %v14993_v0  ;;  %v318_v14 = vld [vmem:[%s11425_s17 + $0x2c] sm:$0xf] }
  0x42   : > { %3057 = vst [vmem:[#allocation3 + $0xd0] sm:$0xf] %v14993_v0  ;;  %3058 = vst [vmem:[#allocation3 + $0xd4] sm:$0x1] %v14993_v0  ;;  %v323_v15 = vld [vmem:[%s11425_s17 + $0x40] sm:$0xf] }
  0x43   : > { %258 = vst.msk [vmem:[#allocation2 + $0x14] sm:$0x1] %vm254_vm2, %v14993_v0  ;;  %255 = vst.msk [vmem:[#allocation2 + $0x8] sm:$0x1] %vm254_vm2, %v14993_v0  ;;  %v447_v20 = vrot.slane %v445_v6, 7  ;;  %v453_v22 = vshrl.u32 %v320_v3, 16 }
  0x44   : > { %261 = vst.msk [vmem:[#allocation2 + $0x20] sm:$0x1] %vm254_vm2, %v14993_v0  ;;  %264 = vst.msk [vmem:[#allocation2 + $0x2c] sm:$0x1] %vm254_vm2, %v14993_v0  ;;  %v324_v24 = vld [vmem:[%s11425_s17 + $0x44] sm:$0xf] }
  0x45   : > { %267 = vst.msk [vmem:[#allocation2 + $0x38] sm:$0x1] %vm254_vm2, %v14993_v0  ;;  %270 = vst.msk [vmem:[#allocation2 + $0x44] sm:$0x1] %vm254_vm2, %v14993_v0  ;;  %v10690_v25 = vld [vmem:[%s14987_s1 + $0x28] sm:$0xff]   ;;  %s11160_s11 = smov 64  }
  0x46   : > { %273 = vst.msk [vmem:[#allocation2 + $0x50] sm:$0x1] %vm254_vm2, %v14993_v0  ;;  %276 = vst.msk [vmem:[#allocation2 + $0x5c] sm:$0x1] %vm254_vm2, %v14993_v0  ;;  %v11513_v36 = vrot.slane %v453_v22, 7  ;;  %v428_v37 = vshrl.u32 %v317_v8, 16  ;;  %1151 = vmatpush1.bf16.msra.mxu0 %v10690_v25 }
  0x47   : > { %279 = vst.msk [vmem:[#allocation2 + $0x68] sm:$0x1] %vm254_vm2, %v14993_v0  ;;  %282 = vst.msk [vmem:[#allocation2 + $0x74] sm:$0x1] %vm254_vm2, %v14993_v0  ;;  %v436_v41 = vshrl.u32 %v318_v14, 16  ;;  %v482_v49 = vshll.u32 %v323_v15, 16  ;;  %1152 = vmatprep.subr.bf16.mxu0 %v14993_v0 }
  0x48   : > { %285 = vst.msk [vmem:[#allocation2 + $0x80] sm:$0x1] %vm254_vm2, %v14993_v0  ;;  %288 = vst.msk [vmem:[#allocation2 + $0x8c] sm:$0x1] %vm254_vm2, %v14993_v0  ;;  %v703_v43 = vld [vmem:[#allocation2 + $0x48] sm:$0xf] }
  0x49   : > { %291 = vst.msk [vmem:[#allocation2 + $0x98] sm:$0x1] %vm254_vm2, %v14993_v0  ;;  %294 = vst.msk [vmem:[#allocation2 + $0xa4] sm:$0x1] %vm254_vm2, %v14993_v0  ;;  %v430_v48 = vrot.slane %v428_v37, 7  ;;  %v11523_v51 = vrot.slane %v436_v41, 7 }
  0x4a   : > { %297 = vst.msk [vmem:[#allocation2 + $0xb0] sm:$0x1] %vm254_vm2, %v14993_v0  ;;  %300 = vst.msk [vmem:[#allocation2 + $0xbc] sm:$0x1] %vm254_vm2, %v14993_v0  ;;  %v490_v53 = vshll.u32 %v324_v24, 16  ;;  %vm945_vm8 = vcmask 523264  }
  0x4b   : > { %303 = vst.msk [vmem:[#allocation2 + $0xc8] sm:$0x1] %vm254_vm2, %v14993_v0  ;;  %306 = vst.msk [vmem:[#allocation2 + $0xd4] sm:$0x1] %vm254_vm2, %v14993_v0  ;;  %v321_v54 = vld [vmem:[%s11425_s17 + $0x38] sm:$0xf] }
  0x4c   : > { %vm11437_vm5 = vmor %vm339_vm1, %vm340_vm3  ;;  %v434_v58 = vrot.slane %v430_v48, 4  ;;  %v724_v60 = vld [vmem:[#allocation2 + $0x6c] sm:$0xf]  ;;  %vm2554_vm9 = vcmask 1046528   ;;  %vm1691_vm10 = vsmask.f32 7424 }
  0x4d   : > { %v15014_v16 = vsel %vm11437_vm5, 4294967295, %v15013_v16  ;;  %vm11446_vm6 = vmand %vm251_vm0, %vm664_vm4  ;;  %v357_v38 = vsel %vm11437_vm5, %v349_v28, %v356_v29  ;;  %v374_v44 = vsel %vm11437_vm5, %v366_v33, %v373_v34  ;;  %v391_v61 = vsel %vm11437_vm5, %v383_v47, %v390_v50  ;;  %v686_v21 = vld [vmem:[#allocation2 + $0x2c] sm:$0x1]  ;;  %s242_s15 = sand.u32 1, %s11149_s22   ;;  %s9970_s19 = sshll.u32 %s11221_s25, 15 }
  0x4e   : > { %15015 = vst [vmem:[#allocation7_spill] sm:$0xff] %v15014_v16  ;;  %v667_v39 = vsel %vm11446_vm6, %v348_v27, %v666_v19  ;;  %669 = vst.msk [vmem:[#allocation2 + $0x10] sm:$0xf] %vm251_vm0, %v357_v38  ;;  %v676_v45 = vsel %vm11446_vm6, %v365_v32, %v675_v30  ;;  %v683_v55 = vsel %vm11446_vm6, %v382_v46, %v682_v42  ;;  %v417_v19 = vrot.slane %v413_v4, 4  ;;  %v327_v4 = vld [vmem:[%s11425_s17 + $0x50] sm:$0xf]  ;;  %s14935_s28 = scalar_lea.hbm %s14992_s6, %s9970_s19 }
  0x4f   : > { %668 = vst [vmem:[#allocation2 + $0xc] sm:$0xf] %v667_v39  ;;  %677 = vst [vmem:[#allocation2 + $0x18] sm:$0xf] %v676_v45  ;;  %v408_v27 = vsel %vm11437_vm5, %v400_v10, %v407_v11  ;;  %v690_v28 = vsel %vm11446_vm6, %v399_v9, %v689_v57  ;;  %v424_v29 = vor.u32 %v422_v5, %v11491_v12  ;;  %v456_v30 = vshll.u32 %v320_v3, 16  ;;  %v10693_v45 = vld [vmem:[%s14987_s1 + $0x30] sm:$0xff]  }
  0x50   : > { %678 = vst.msk [vmem:[#allocation2 + $0x1c] sm:$0xf] %vm251_vm0, %v374_v44  ;;  %684 = vst [vmem:[#allocation2 + $0x24] sm:$0xf] %v683_v55  ;;  %v697_v31 = vsel %vm11446_vm6, %v416_v17, %v696_v2  ;;  %v450_v32 = vor.u32 %v448_v7, %v447_v20  ;;  %v451_v33 = vrot.slane %v447_v20, 4  ;;  %v431_v38 = vshll.u32 %v317_v8, 16  ;;  %1153 = vmatpush1.bf16.msra.mxu0 %v10693_v45 }
  0x51   : > { %685 = vst.msk [vmem:[#allocation2 + $0x28] sm:$0xf] %vm251_vm0, %v391_v61  ;;  %691 = vst [vmem:[#allocation2 + $0x30] sm:$0xf] %v690_v28  ;;  %v425_v35 = vsel %vm11437_vm5, %v417_v19, %v424_v29  ;;  %v439_v42 = vshll.u32 %v318_v14, 16  ;;  %v479_v44 = vshrl.u32 %v323_v15, 16  ;;  %v458_v47 = vor.u32 %v456_v30, %v11513_v36  ;;  %1154 = vmatprep.subr.bf16.mxu0 %v14993_v0 }
  0x52   : > { %692 = vst.msk [vmem:[#allocation2 + $0x34] sm:$0xf] %vm251_vm0, %v408_v27  ;;  %698 = vst [vmem:[#allocation2 + $0x3c] sm:$0xf] %v697_v31  ;;  %v711_v39 = vsel %vm11446_vm6, %v450_v32, %v710_v13  ;;  %v487_v50 = vshrl.u32 %v324_v24, 16  ;;  %v10696_v55 = vld [vmem:[%s14987_s1 + $0x38] sm:$0xff]   ;;  %v433_v57 = vor.u32 %v431_v38, %v430_v48 }
  0x53   : > { %699 = vst.msk [vmem:[#allocation2 + $0x40] sm:$0xf] %vm251_vm0, %v425_v35  ;;  %712 = vst [vmem:[#allocation2 + $0x54] sm:$0xf] %v711_v39  ;;  %v481_v52 = vrot.slane %v479_v44, 7  ;;  %v459_v56 = vsel %vm11437_vm5, %v451_v33, %v458_v47  ;;  %v441_v62 = vor.u32 %v439_v42, %v11523_v51  ;;  %v462_v3 = vshrl.u32 %v321_v54, 16 }
  0x54   : > { %v11534_v59 = vrot.slane %v487_v50, 7  ;;  %v322_v61 = vld [vmem:[%s11425_s17 + $0x3c] sm:$0xf]  ;;  %713 = vst.msk [vmem:[#allocation2 + $0x58] sm:$0xf] %vm251_vm0, %v459_v56  ;;  %v704_v7 = vsel %vm11446_vm6, %v433_v57, %v703_v43  ;;  %v465_v9 = vshll.u32 %v321_v54, 16  ;;  %1155 = vmatpush1.bf16.msra.mxu0 %v10696_v55  ;;  %vm11644_vm7 = vmand %vm254_vm2, %vm339_vm1 }
  0x55   : > { %v484_v1 = vor.u32 %v482_v49, %v481_v52  ;;  %v485_v2 = vrot.slane %v481_v52, 4  ;;  %v328_v5 = vld [vmem:[%s11425_s17 + $0x54] sm:$0xf]  ;;  %v442_v10 = vsel %vm11437_vm5, %v434_v58, %v441_v62  ;;  %705 = vst [vmem:[#allocation2 + $0x48] sm:$0xf] %v704_v7  ;;  %v464_v13 = vrot.slane %v462_v3, 7  ;;  %1156 = vmatprep.subr.bf16.mxu0 %v14993_v0 }
  0x56   : > { %v10655_v26 = vld [vmem:[#allocation2 + $0xc] sm:$0xff]   ;;  %v492_v8 = vor.u32 %v490_v53, %v11534_v59  ;;  %v470_v14 = vshrl.u32 %v322_v61, 16  ;;  %v717_v15 = vld [vmem:[#allocation2 + $0x60] sm:$0xf]  ;;  %706 = vst.msk [vmem:[#allocation2 + $0x4c] sm:$0xf] %vm251_vm0, %v442_v10 }
  0x57   : > { %908 = vrot.lane.b32.xlu0 %v10655_v26, %s11160_s11  ;;  %v11509_v34 = vld [vmem:[#allocation2 + $0x18] sm:$0xff]   ;;  %v725_v11 = vsel %vm11446_vm6, %v484_v1, %v724_v60  ;;  %v473_v20 = vshll.u32 %v322_v61, 16  ;;  %v513_v22 = vshrl.u32 %v327_v4, 16  ;;  %v516_v24 = vshll.u32 %v327_v4, 16  ;;  %v10699_v29 = vld [vmem:[%s14987_s1 + $0x40] sm:$0xff]   ;;  %v10702_v43 = vld [vmem:[%s14987_s1 + $0x48] sm:$0xff]  }
  0x58   : > { %v10657_v46 = vld [vmem:[#allocation2 + $0x24] sm:$0xff]   ;;  %v493_v19 = vsel %vm11437_vm5, %v485_v2, %v492_v8  ;;  %726 = vst [vmem:[#allocation2 + $0x6c] sm:$0xf] %v725_v11  ;;  %v467_v25 = vor.u32 %v465_v9, %v464_v13  ;;  %v468_v26 = vrot.slane %v464_v13, 4  ;;  %v11554_v27 = vrot.slane %v470_v14, 7  ;;  %1157 = vmatpush1.bf16.msra.mxu0 %v10699_v29  ;;  %v10705_v3 = vld [vmem:[%s14987_s1 + $0x50] sm:$0xff]   ;;  %9102 = vmatprep.mubr.msk.bf16.mxu0 %vm945_vm8, %v11509_v34 }
  0x59   : > { %912 = vrot.lane.b32.xlu1 %v10657_v46, %s11160_s11  ;;  %v10658_v6 = vld [vmem:[#allocation2 + $0x30] sm:$0xff]   ;;  %727 = vst.msk [vmem:[#allocation2 + $0x70] sm:$0xf] %vm251_vm0, %v493_v19  ;;  %v521_v28 = vshrl.u32 %v328_v5, 16  ;;  %v515_v30 = vrot.slane %v513_v22, 7  ;;  %v524_v31 = vshll.u32 %v328_v5, 16  ;;  %1158 = vmatprep.subr.bf16.mxu0 %v14993_v0 }
  0x5a   : > { %v10659_v17 = vld [vmem:[#allocation2 + $0x3c] sm:$0xff]   ;;  %v325_v32 = vld [vmem:[%s11425_s17 + $0x48] sm:$0xf]  ;;  %v326_v33 = vld [vmem:[%s11425_s17 + $0x4c] sm:$0xf]  ;;  %v475_v35 = vor.u32 %v473_v20, %v11554_v27  ;;  %v718_v37 = vsel %vm11446_vm6, %v467_v25, %v717_v15  ;;  %vm3476_vm11 = vcmask 1043456  }
  0x5b   : > { %910 = vrot.lane.b32.xlu0 %v11509_v34, %s11160_s11  ;;  %v11566_v38 = vrot.slane %v521_v28, 7  ;;  %v738_v39 = vld [vmem:[#allocation2 + $0x84] sm:$0xf]  ;;  %v496_v41 = vshrl.u32 %v325_v32, 16  ;;  %v331_v42 = vld [vmem:[%s11425_s17 + $0x60] sm:$0xf]  ;;  %v518_v45 = vor.u32 %v516_v24, %v515_v30  ;;  %vm12580_vm13 = vmand %vm3476_vm11, %vm664_vm4 }
  0x5c   : > { %v10660_v44 = vld [vmem:[#allocation2 + $0x54] sm:$0xff]   ;;  %719 = vst [vmem:[#allocation2 + $0x60] sm:$0xf] %v718_v37  ;;  %v519_v46 = vrot.slane %v515_v30, 4  ;;  %v499_v47 = vshll.u32 %v325_v32, 16  ;;  %v504_v48 = vshrl.u32 %v326_v33, 16  ;;  %v476_v49 = vsel %vm11437_vm5, %v468_v26, %v475_v35  ;;  %1159 = vmatpush1.bf16.msra.mxu0 %v10702_v43 }
  0x5d   : > { %914 = vrot.lane.b32.xlu1 %v10658_v6, %s11160_s11  ;;  %v526_v50 = vor.u32 %v524_v31, %v11566_v38  ;;  %v498_v52 = vrot.slane %v496_v41, 7  ;;  %v507_v53 = vshll.u32 %v326_v33, 16  ;;  %v731_v54 = vld [vmem:[#allocation2 + $0x78] sm:$0xf]  ;;  %v332_v55 = vld [vmem:[%s11425_s17 + $0x64] sm:$0xf]  ;;  %v739_v56 = vsel %vm11446_vm6, %v518_v45, %v738_v39  ;;  %1160 = vmatprep.subr.bf16.mxu0 %v14993_v0 }
  0x5e   : > { %720 = vst.msk [vmem:[#allocation2 + $0x64] sm:$0xf] %vm251_vm0, %v476_v49  ;;  %v11580_v57 = vrot.slane %v504_v48, 7  ;;  %v547_v58 = vshrl.u32 %v331_v42, 16  ;;  %v550_v60 = vshll.u32 %v331_v42, 16  ;;  %v10661_v61 = vld [vmem:[#allocation2 + $0x48] sm:$0xff]  }
  0x5f   : > { %916 = vrot.lane.b32.xlu0 %v10659_v17, %s11160_s11  ;;  %v527_v62 = vsel %vm11437_vm5, %v519_v46, %v526_v50  ;;  %740 = vst [vmem:[#allocation2 + $0x84] sm:$0xf] %v739_v56  ;;  %v501_v1 = vor.u32 %v499_v47, %v498_v52  ;;  %v502_v2 = vrot.slane %v498_v52, 4  ;;  %v555_v7 = vshrl.u32 %v332_v55, 16  ;;  %v752_v10 = vld [vmem:[#allocation2 + $0x9c] sm:$0xf] }
  0x60   : > { %v10662_v4 = vld [vmem:[#allocation2 + $0x6c] sm:$0xff]   ;;  %741 = vst.msk [vmem:[#allocation2 + $0x88] sm:$0xf] %vm251_vm0, %v527_v62  ;;  %v509_v5 = vor.u32 %v507_v53, %v11580_v57  ;;  %v549_v6 = vrot.slane %v547_v58, 7  ;;  %v558_v8 = vshll.u32 %v332_v55, 16  ;;  %v10708_v29 = vld [vmem:[%s14987_s1 + $0x58] sm:$0xff]   ;;  %1161 = vmatpush1.bf16.msra.mxu0 %v10705_v3 }
  0x61   : > { %918 = vrot.lane.b32.xlu1 %v10661_v61, %s11160_s11  ;;  %v732_v9 = vsel %vm11446_vm6, %v501_v1, %v731_v54  ;;  %v329_v11 = vld [vmem:[%s11425_s17 + $0x58] sm:$0xf]  ;;  %v330_v13 = vld [vmem:[%s11425_s17 + $0x5c] sm:$0xf]  ;;  %v11598_v19 = vrot.slane %v555_v7, 7  ;;  %1162 = vmatprep.subr.bf16.mxu0 %v14993_v0  ;;  %v511_v34 = vrot.slane %v11580_v57, 4 }
  0x62   : > { %v510_v14 = vsel %vm11437_vm5, %v502_v2, %v509_v5  ;;  %733 = vst [vmem:[#allocation2 + $0x78] sm:$0xf] %v732_v9  ;;  %v552_v15 = vor.u32 %v550_v60, %v549_v6  ;;  %v553_v17 = vrot.slane %v549_v6, 4  ;;  %v335_v20 = vld [vmem:[%s11425_s17 + $0x70] sm:$0xf]  ;;  %v530_v24 = vshrl.u32 %v329_v11, 16 }
  0x63   : > { %920 = vrot.lane.b32.xlu0 %v10660_v44, %s11160_s11  ;;  %v336_v22 = vld [vmem:[%s11425_s17 + $0x74] sm:$0xf]  ;;  %734 = vst.msk [vmem:[#allocation2 + $0x7c] sm:$0xf] %vm251_vm0, %v510_v14  ;;  %v533_v25 = vshll.u32 %v329_v11, 16  ;;  %v538_v26 = vshrl.u32 %v330_v13, 16  ;;  %v560_v30 = vor.u32 %v558_v8, %v11598_v19 }
  0x64   : > { %v541_v28 = vshll.u32 %v330_v13, 16  ;;  %v753_v31 = vsel %vm11446_vm6, %v552_v15, %v752_v10  ;;  %v745_v32 = vld [vmem:[#allocation2 + $0x90] sm:$0xf]  ;;  %v581_v33 = vshrl.u32 %v335_v20, 16  ;;  %v584_v35 = vshll.u32 %v335_v20, 16  ;;  %1163 = vmatpush1.bf16.msra.mxu0 %v10708_v29  ;;  %s9068_s16 = sshll.u32 %s242_s15, 11 }
  0x65   : > { %v333_v37 = vld [vmem:[%s11425_s17 + $0x68] sm:$0xf]  ;;  %v10663_v39 = vld [vmem:[#allocation2 + $0x60] sm:$0xff]   ;;  %754 = vst [vmem:[#allocation2 + $0x9c] sm:$0xf] %v753_v31  ;;  %v532_v41 = vrot.slane %v530_v24, 7  ;;  %v561_v45 = vsel %vm11437_vm5, %v553_v17, %v560_v30  ;;  %2177 = vmatprep.subr.bf16.mxu0 %v14993_v0 }
  0x66   : > { %v11611_v42 = vrot.slane %v538_v26, 7  ;;  %v589_v43 = vshrl.u32 %v336_v22, 16  ;;  %v766_v44 = vld [vmem:[#allocation2 + $0xb4] sm:$0xf]  ;;  %v583_v46 = vrot.slane %v581_v33, 7  ;;  %v592_v47 = vshll.u32 %v336_v22, 16  ;;  %922 = vrot.lane.b32.xlu1 %v10663_v39, %s11160_s11 }
  0x67   : > { %924 = vrot.lane.b32.xlu0 %v10662_v4, %s11160_s11  ;;  %v334_v48 = vld [vmem:[%s11425_s17 + $0x6c] sm:$0xf]  ;;  %v10664_v49 = vld [vmem:[#allocation2 + $0x84] sm:$0xff]   ;;  %755 = vst.msk [vmem:[#allocation2 + $0xa0] sm:$0xf] %vm251_vm0, %v561_v45  ;;  %v535_v50 = vor.u32 %v533_v25, %v532_v41  ;;  %v536_v52 = vrot.slane %v532_v41, 4 }
  0x68   : > { %v543_v53 = vor.u32 %v541_v28, %v11611_v42  ;;  %v11620_v54 = vrot.slane %v589_v43, 7  ;;  %v586_v55 = vor.u32 %v584_v35, %v583_v46  ;;  %v587_v56 = vrot.slane %v583_v46, 4  ;;  %v759_v9 = vld [vmem:[#allocation2 + $0xa8] sm:$0xf]  ;;  %v337_v10 = vld [vmem:[%s11425_s17 + $0x78] sm:$0xf] }
  0x69   : > { %v564_v58 = vshrl.u32 %v333_v37, 16  ;;  %v567_v60 = vshll.u32 %v333_v37, 16  ;;  %v746_v62 = vsel %vm11446_vm6, %v535_v50, %v745_v32  ;;  %v572_v2 = vshrl.u32 %v334_v48, 16  ;;  %v338_v15 = vld [vmem:[%s11425_s17 + $0x7c] sm:$0xf]  ;;  %s13966_s18 = scalar_lea.vmem [#allocation4], %s9068_s16 }
  0x6a   : > { %v544_v61 = vsel %vm11437_vm5, %v536_v52, %v543_v53  ;;  %v594_v1 = vor.u32 %v592_v47, %v11620_v54  ;;  %v10665_v3 = vld [vmem:[#allocation2 + $0x78] sm:$0xff]   ;;  %747 = vst [vmem:[#allocation2 + $0x90] sm:$0xf] %v746_v62  ;;  %v767_v4 = vsel %vm11446_vm6, %v586_v55, %v766_v44  ;;  %v575_v6 = vshll.u32 %v334_v48, 16  ;;  %v773_v32 = vld [vmem:[#allocation2 + $0xc0] sm:$0xf] }
  0x6b   : > { %928 = vrot.lane.b32.xlu0 %v10664_v49, %s11160_s11  ;;  %748 = vst.msk [vmem:[#allocation2 + $0x94] sm:$0xf] %vm251_vm0, %v544_v61  ;;  %v566_v5 = vrot.slane %v564_v58, 7  ;;  %768 = vst [vmem:[#allocation2 + $0xb4] sm:$0xf] %v767_v4  ;;  %v11634_v8 = vrot.slane %v572_v2, 7  ;;  %926 = vrot.lane.b32.xlu1 %v10665_v3, %s11160_s11 }
  0x6c   : > { %v595_v7 = vsel %vm11437_vm5, %v587_v56, %v594_v1  ;;  %v358_v11 = vrot.slane %v11441_v18, 4  ;;  %v598_v17 = vshrl.u32 %v337_v10, 16  ;;  %v601_v22 = vshll.u32 %v337_v10, 16  ;;  %v672_v33 = vld [vmem:[#allocation2 + $0x14] sm:$0x1]  ;;  %s9002_s20 = sshll.u32 %s13966_s18, 4  ;;  %s14937_s20 = int_to_ptr.vmem [resolvable:$true] %s9002_s20 }
  0x6d   : > { %769 = vst.msk [vmem:[#allocation2 + $0xb8] sm:$0xf] %vm251_vm0, %v595_v7  ;;  %v569_v13 = vor.u32 %v567_v60, %v566_v5  ;;  %v570_v14 = vrot.slane %v566_v5, 4  ;;  %v577_v20 = vor.u32 %v575_v6, %v11634_v8  ;;  %v606_v24 = vshrl.u32 %v338_v15, 16  ;;  %v1336_v37 = vld [vmem:[#allocation2 + $0xc] sm:$0xf] }
  0x6e   : > { %v609_v25 = vshll.u32 %v338_v15, 16  ;;  %v10666_v18 = vld [vmem:[#allocation2 + $0x9c] sm:$0xff]   ;;  %v600_v29 = vrot.slane %v598_v17, 7  ;;  %v375_v35 = vrot.slane %v11450_v23, 4  ;;  %v11657_v39 = vld [vmem:[#allocation2 + $0x10] sm:$0xf]  ;;  %v673_v44 = vsel %vm11644_vm7, %v358_v11, %v672_v33 }
  0x6f   : > { %v760_v28 = vsel %vm11446_vm6, %v569_v13, %v759_v9  ;;  %v578_v30 = vsel %vm11437_vm5, %v570_v14, %v577_v20  ;;  %v11652_v31 = vrot.slane %v606_v24, 7  ;;  %932 = vrot.lane.b32.xlu0 %v10666_v18, %s11160_s11  ;;  %674 = vst [vmem:[#allocation2 + $0x14] sm:$0x1] %v673_v44  ;;  %v392_v47 = vrot.slane %v11462_v40, 4  ;;  %v679_v48 = vld [vmem:[#allocation2 + $0x20] sm:$0x1] }
  0x70   : > { %761 = vst [vmem:[#allocation2 + $0xa8] sm:$0xf] %v760_v28  ;;  %762 = vst.msk [vmem:[#allocation2 + $0xac] sm:$0xf] %vm251_vm0, %v578_v30  ;;  %v603_v41 = vor.u32 %v601_v22, %v600_v29  ;;  %v604_v43 = vrot.slane %v600_v29, 4  ;;  %v409_v49 = vrot.slane %v11484_v63, 4  ;;  %v680_v53 = vsel %vm11644_vm7, %v375_v35, %v679_v48 }
  0x71   : > { %v611_v46 = vor.u32 %v609_v25, %v11652_v31  ;;  %v426_v55 = vrot.slane %v11491_v12, 4  ;;  %681 = vst [vmem:[#allocation2 + $0x20] sm:$0x1] %v680_v53  ;;  %v11675_v40 = vcombine.low %v1336_v37, %v11657_v39  ;;  %v1339_v63 = vld [vmem:[#allocation2 + $0x18] sm:$0xf]  ;;  %v687_v58 = vsel %vm11644_vm7, %v392_v47, %v686_v21  ;;  %s14945_s29 = scalar_lea.sflag [#allocation5], %s242_s15 }
  0x72   : > { %v10667_v45 = vld [vmem:[#allocation2 + $0x90] sm:$0xff]   ;;  %v774_v23 = vsel %vm11446_vm6, %v603_v41, %v773_v32  ;;  %v11677_v56 = vld [vmem:[#allocation2 + $0x1c] sm:$0xf]  ;;  %v693_v60 = vld [vmem:[#allocation2 + $0x38] sm:$0x1]  ;;  %v443_v2 = vrot.slane %v11523_v51, 4 }
  0x73   : > { %930 = vrot.lane.b32.xlu1 %v10667_v45, %s11160_s11  ;;  %v612_v52 = vsel %vm11437_vm5, %v604_v43, %v611_v46  ;;  %775 = vst [vmem:[#allocation2 + $0xc0] sm:$0xf] %v774_v23  ;;  %688 = vst [vmem:[#allocation2 + $0x2c] sm:$0x1] %v687_v58  ;;  %v694_v12 = vsel %vm11644_vm7, %v409_v49, %v693_v60  ;;  %v700_v61 = vld [vmem:[#allocation2 + $0x44] sm:$0x1]  ;;  %v11690_v3 = vcombine.low %v1339_v63, %v11677_v56 }
  0x74   : > { %v10668_v50 = vld [vmem:[#allocation2 + $0xb4] sm:$0xff]   ;;  %776 = vst.msk [vmem:[#allocation2 + $0xc4] sm:$0xf] %vm251_vm0, %v612_v52  ;;  %695 = vst [vmem:[#allocation2 + $0x38] sm:$0x1] %v694_v12  ;;  %v701_v1 = vsel %vm11644_vm7, %v426_v55, %v700_v61  ;;  %v460_v11 = vrot.slane %v11513_v36, 4 }
  0x75   : > { %936 = vrot.lane.b32.xlu0 %v10668_v50, %s11160_s11  ;;  %702 = vst [vmem:[#allocation2 + $0x44] sm:$0x1] %v701_v1  ;;  %v1342_v4 = vld [vmem:[#allocation2 + $0x24] sm:$0xf]  ;;  %v11692_v5 = vld [vmem:[#allocation2 + $0x28] sm:$0xf] }
  0x76   : > { %v707_v6 = vld [vmem:[#allocation2 + $0x50] sm:$0x1]  ;;  %v10673_v51 = vld [vmem:[#allocation2 + $0x14] ss:$0 sps:$4 sm:$0x11]   ;;  %v11700_v10 = vcombine.low %v1342_v4, %v11692_v5  ;;  %v477_v15 = vrot.slane %v11554_v27, 4 }
  0x77   : > { %v10669_v62 = vld [vmem:[#allocation2 + $0xa8] sm:$0xff]   ;;  %v708_v9 = vsel %vm11644_vm7, %v443_v2, %v707_v6  ;;  %v1345_v13 = vld [vmem:[#allocation2 + $0x30] sm:$0xf]  ;;  %v11703_v14 = vld [vmem:[#allocation2 + $0x34] sm:$0xf]  ;;  %v494_v18 = vrot.slane %v11534_v59, 4 }
  0x78   : > { %934 = vrot.lane.b32.xlu1 %v10669_v62, %s11160_s11  ;;  %709 = vst [vmem:[#allocation2 + $0x50] sm:$0x1] %v708_v9  ;;  %v1348_v17 = vld [vmem:[#allocation2 + $0x3c] sm:$0xf]  ;;  %v11706_v20 = vld [vmem:[#allocation2 + $0x40] sm:$0xf]  ;;  %v11714_v36 = vcombine.low %v1345_v13, %v11703_v14 }
  0x79   : > { %1523 = vrot.lane.b32.xlu0 %v11675_v40, %s11160_s11  ;;  %v714_v22 = vld [vmem:[#allocation2 + $0x5c] sm:$0x1]  ;;  %v10676_v24 = vld [vmem:[#allocation2 + $0x20] ss:$0 sps:$4 sm:$0x11]   ;;  %v11730_v33 = vcombine.low %v1348_v17, %v11706_v20  ;;  %v528_v35 = vrot.slane %v11566_v38, 4 }
  0x7a   : > { %v715_v27 = vsel %vm11644_vm7, %v460_v11, %v714_v22  ;;  %v721_v25 = vld [vmem:[#allocation2 + $0x68] sm:$0x1]  ;;  %v11722_v30 = vld [vmem:[#allocation2 + $0x4c] sm:$0xf]  ;;  %v728_v59 = vld [vmem:[#allocation2 + $0x74] sm:$0x1] }
  0x7b   : > { %v10671_v7 = vld [vmem:[#allocation2 + $0xc0] sm:$0xff]   ;;  %716 = vst [vmem:[#allocation2 + $0x5c] sm:$0x1] %v715_v27  ;;  %v722_v28 = vsel %vm11644_vm7, %v477_v15, %v721_v25  ;;  %v1351_v29 = vld [vmem:[#allocation2 + $0x48] sm:$0xf]  ;;  %v729_v57 = vsel %vm11644_vm7, %v494_v18, %v728_v59  ;;  %v545_v23 = vrot.slane %v11611_v42, 4 }
  0x7c   : > { %938 = vrot.lane.b32.xlu1 %v10671_v7, %s11160_s11  ;;  %723 = vst [vmem:[#allocation2 + $0x68] sm:$0x1] %v722_v28  ;;  %v11727_v32 = vld [vmem:[#allocation2 + $0x2c] ss:$0 sps:$4 sm:$0x11]   ;;  %v11744_v46 = vcombine.low %v1351_v29, %v11722_v30  ;;  %v562_v48 = vrot.slane %v11598_v19, 4 }
  0x7d   : > { %1527 = vrot.lane.b32.xlu0 %v11690_v3, %s11160_s11  ;;  %v735_v37 = vld [vmem:[#allocation2 + $0x80] sm:$0x1]  ;;  %730 = vst [vmem:[#allocation2 + $0x74] sm:$0x1] %v729_v57  ;;  %v1354_v43 = vld [vmem:[#allocation2 + $0x54] sm:$0xf] }
  0x7e   : > { %v736_v41 = vsel %vm11644_vm7, %v511_v34, %v735_v37  ;;  %v11737_v44 = vld [vmem:[#allocation2 + $0x58] sm:$0xf]  ;;  %v742_v45 = vld [vmem:[#allocation2 + $0x8c] sm:$0x1]  ;;  %v756_v55 = vld [vmem:[#allocation2 + $0xa4] sm:$0x1] }
  0x7f   : > { %737 = vst [vmem:[#allocation2 + $0x80] sm:$0x1] %v736_v41  ;;  %v10682_v38 = vld [vmem:[#allocation2 + $0x38] ss:$0 sps:$4 sm:$0x11]   ;;  %v743_v47 = vsel %vm11644_vm7, %v528_v35, %v742_v45  ;;  %v11754_v52 = vcombine.low %v1354_v43, %v11737_v44  ;;  %v757_v19 = vsel %vm11644_vm7, %v562_v48, %v756_v55  ;;  %v579_v42 = vrot.slane %v11634_v8, 4 }
  0x80   : > { %1525 = vrot.lane.b32.xlu1 %v10673_v51, %s11160_s11  ;;  %744 = vst [vmem:[#allocation2 + $0x8c] sm:$0x1] %v743_v47  ;;  %v10685_v49 = vld [vmem:[#allocation2 + $0x44] ss:$0 sps:$4 sm:$0x11]   ;;  %v596_v60 = vrot.slane %v11620_v54, 4 }
  0x81   : > { %1531 = vrot.lane.b32.xlu0 %v11700_v10, %s11160_s11  ;;  %v749_v50 = vld [vmem:[#allocation2 + $0x98] sm:$0x1]  ;;  %v1357_v21 = vld [vmem:[#allocation2 + $0x60] sm:$0xf]  ;;  %v11758_v63 = vld [vmem:[#allocation2 + $0x64] sm:$0xf] }
  0x82   : > { %v750_v53 = vsel %vm11644_vm7, %v545_v23, %v749_v50  ;;  %758 = vst [vmem:[#allocation2 + $0xa4] sm:$0x1] %v757_v19  ;;  %v10688_v58 = vld [vmem:[#allocation2 + $0x50] ss:$0 sps:$4 sm:$0x11]   ;;  %v11768_v12 = vcombine.low %v1357_v21, %v11758_v63  ;;  %v613_v62 = vrot.slane %v11652_v31, 4 }
  0x83   : > { %751 = vst [vmem:[#allocation2 + $0x98] sm:$0x1] %v750_v53  ;;  %v1360_v61 = vld [vmem:[#allocation2 + $0x6c] sm:$0xf]  ;;  %v11771_v1 = vld [vmem:[#allocation2 + $0x70] sm:$0xf] }
  0x84   : > { %1529 = vrot.lane.b32.xlu1 %v10676_v24, %s11160_s11  ;;  %v763_v2 = vld [vmem:[#allocation2 + $0xb0] sm:$0x1]  ;;  %v770_v4 = vld [vmem:[#allocation2 + $0xbc] sm:$0x1]  ;;  %v777_v6 = vld [vmem:[#allocation2 + $0xc8] sm:$0x1]  ;;  %v11781_v31 = vcombine.low %v1360_v61, %v11771_v1 }
  0x85   : > { %1535 = vrot.lane.b32.xlu0 %v11714_v36, %s11160_s11  ;;  %v764_v8 = vsel %vm11644_vm7, %v579_v42, %v763_v2  ;;  %v771_v54 = vsel %vm11644_vm7, %v596_v60, %v770_v4  ;;  %v10691_v7 = vld [vmem:[#allocation2 + $0x5c] ss:$0 sps:$4 sm:$0x11]   ;;  %v778_v9 = vsel %vm11644_vm7, %v613_v62, %v777_v6  ;;  %v1363_v51 = vld [vmem:[#allocation2 + $0x78] sm:$0xf]  ;;  %vm3482_vm12 = vcmask 1040384  }
  0x86   : > { %765 = vst [vmem:[#allocation2 + $0xb0] sm:$0x1] %v764_v8  ;;  %772 = vst [vmem:[#allocation2 + $0xbc] sm:$0x1] %v771_v54  ;;  %v11785_v11 = vld [vmem:[#allocation2 + $0x7c] sm:$0xf] }
  0x87   : > { %779 = vst [vmem:[#allocation2 + $0xc8] sm:$0x1] %v778_v9  ;;  %v10694_v13 = vld [vmem:[#allocation2 + $0x68] ss:$0 sps:$4 sm:$0x11]   ;;  %v11791_v15 = vcombine.low %v1363_v51, %v11785_v11  ;;  %v10711_v8 = vld [vmem:[#allocation2] sm:$0xff]   ;;  %vm12586_vm14 = vmand %vm3482_vm12, %vm339_vm1 }
  0x88   : > { %1533 = vrot.lane.b32.xlu1 %v11727_v32, %s11160_s11  ;;  %v1366_v17 = vld [vmem:[#allocation2 + $0x84] sm:$0xf]  ;;  %v11793_v22 = vld [vmem:[#allocation2 + $0x88] sm:$0xf]  ;;  %v1369_v24 = vld [vmem:[#allocation2 + $0x90] sm:$0xf] }
  0x89   : > { %1539 = vrot.lane.b32.xlu0 %v11730_v33, %s11160_s11  ;;  %v10697_v26 = vld [vmem:[#allocation2 + $0x74] ss:$0 sps:$4 sm:$0x11]   ;;  %v11799_v27 = vcombine.low %v1366_v17, %v11793_v22  ;;  %v10700_v18 = vld [vmem:[#allocation2 + $0x80] ss:$0 sps:$4 sm:$0x11]  }
  0x8a   : > { %v11801_v25 = vld [vmem:[#allocation2 + $0x94] sm:$0xf]  ;;  %v1372_v28 = vld [vmem:[#allocation2 + $0x9c] sm:$0xf]  ;;  %v11809_v29 = vld [vmem:[#allocation2 + $0xa0] sm:$0xf] }
  0x8b   : > { %v11807_v34 = vcombine.low %v1369_v24, %v11801_v25  ;;  %v10703_v59 = vld [vmem:[#allocation2 + $0x8c] ss:$0 sps:$4 sm:$0x11]   ;;  %v1375_v35 = vld [vmem:[#allocation2 + $0xa8] sm:$0xf]  ;;  %v11817_v37 = vcombine.low %v1372_v28, %v11809_v29  ;;  %vm6544_vm15 = vcmask 130048  }
  0x8c   : > { %1537 = vrot.lane.b32.xlu1 %v10682_v38, %s11160_s11  ;;  %v11811_v57 = vld [vmem:[#allocation2 + $0xac] sm:$0xf]  ;;  %v10706_v41 = vld [vmem:[#allocation2 + $0x98] ss:$0 sps:$4 sm:$0x11]   ;;  %v11042_v24 = vld [vmem:[#allocation2 + $0x24] sm:$0xff]  }
  0x8d   : > { %1543 = vrot.lane.b32.xlu0 %v11744_v46, %s11160_s11  ;;  %v1378_v43 = vld [vmem:[#allocation2 + $0xb4] sm:$0xf]  ;;  %v11819_v45 = vld [vmem:[#allocation2 + $0xb8] sm:$0xf]  ;;  %v11825_v38 = vcombine.low %v1375_v35, %v11811_v57  ;;  %v1381_v23 = vld [vmem:[#allocation2 + $0xc0] sm:$0xf] }
  0x8e   : > { %v10709_v47 = vld [vmem:[#allocation2 + $0xa4] ss:$0 sps:$4 sm:$0x11]   ;;  %v10712_v50 = vld [vmem:[#allocation2 + $0xb0] ss:$0 sps:$4 sm:$0x11]  }
  0x8f   : > { %v11827_v48 = vld [vmem:[#allocation2 + $0xc4] sm:$0xf]  ;;  %v2371_v53 = vld [vmem:[#allocation2 + $0xc] sm:$0xe]  ;;  %v2372_v60 = vld [vmem:[#allocation2 + $0x18] sm:$0xe] }
  0x90   : > { %1541 = vrot.lane.b32.xlu1 %v10685_v49, %s11160_s11  ;;  %v11833_v49 = vcombine.low %v1378_v43, %v11819_v45  ;;  %v11839_v55 = vcombine.low %v1381_v23, %v11827_v48  ;;  %v10714_v21 = vld [vmem:[#allocation2 + $0xbc] ss:$0 sps:$4 sm:$0x11]   ;;  %v2373_v19 = vld [vmem:[#allocation2 + $0x24] sm:$0xe]  ;;  %v11845_v42 = vcombine.low %v2371_v53, %v11657_v39  ;;  %v11855_v4 = vcombine.low %v2372_v60, %v11677_v56  ;;  %v10723_v17 = vld [vmem:[%s14987_s1 + $0x68] sm:$0xff]  }
  0x91   : > { %1547 = vrot.lane.b32.xlu0 %v11754_v52, %s11160_s11  ;;  %v2375_v61 = vld [vmem:[#allocation2 + $0x3c] sm:$0xe]  ;;  %v11851_v62 = vcombine.low %v2373_v19, %v11692_v5  ;;  %v2374_v2 = vld [vmem:[#allocation2 + $0x30] sm:$0xe]  ;;  %v2377_v54 = vld [vmem:[#allocation2 + $0x54] sm:$0xe] }
  0x92   : > { %v11860_v39 = vcombine.low %v2375_v61, %v11706_v20  ;;  %v2376_v6 = vld [vmem:[#allocation2 + $0x48] sm:$0xe]  ;;  %v10721_v5 = vld [vmem:[%s14987_s1 + $0x60] sm:$0xff]   ;;  %v2379_v56 = vld [vmem:[#allocation2 + $0x6c] sm:$0xe]  ;;  %v11873_v20 = vcombine.low %v2377_v54, %v11737_v44  ;;  %s11095_s9 = scalar_lea.vmem %s14937_s20, 32768 }
  0x93   : > { %v2380_v28 = vld [vmem:[#allocation2 + $0x78] sm:$0xe]  ;;  %v11043_v35 = vld [vmem:[#allocation2 + $0xc] sm:$0xff]   ;;  %v2383_v43 = vld [vmem:[#allocation2 + $0x9c] sm:$0xe]  ;;  %p11096_p11 = scmp.ne.s32.totalorder %s14937_s20, %s11095_s9  ;;  %s11162_s17 = smov [#allocation4]  }
  0x94   : > { %1545 = vrot.lane.b32.xlu1 %v10688_v58, %s11160_s11  ;;  %v10715_v58 = vld [vmem:[#allocation2 + $0xc8] ss:$0 sps:$4 sm:$0x11]   ;;  %v10725_v23 = vld [vmem:[%s14987_s1 + $0x78] sm:$0xff]   ;;  %v11044_v53 = vld [vmem:[#allocation2 + $0x30] sm:$0xff]   ;;  %v11918_v19 = vcombine.low %v2383_v43, %v11809_v29  ;;  %s11099_s10 = sshll.u32 %s11162_s17, 4  ;;  %s11100_s10 = int_to_ptr.vmem [resolvable:$false] %s11099_s10 }
  0x95   : > { %1551 = vrot.lane.b32.xlu0 %v11768_v12, %s11160_s11  ;;  %v10727_v60 = vld [vmem:[%s14987_s1 + $0x80] sm:$0xff]   ;;  %v2384_v61 = vld [vmem:[#allocation2 + $0xa8] sm:$0xe]  ;;  %p11097_p12 = pnand %p11096_p11, %p11238_p5  ;;  %s11101_s12 = scalar_lea.vmem %s11100_s10, 65536 }
  0x96   : > { %15022 = vst [vmem:[#allocation10_spill] sm:$0xff] %v11918_v19  ;;  %v10728_v54 = vld [vmem:[%s14987_s1 + $0x88] sm:$0xff]   ;;  %p11102_p0 = scmp.lt.s32.totalorder %s14937_s20, %s11100_s10  ;;  %p11103_p1 = scmp.lt.s32.totalorder %s11101_s12, %s11095_s9 }
  0x97   : > { %p11098_p13 = pneg %p11097_p12 }
  0x98   : > { %1549 = vrot.lane.b32.xlu1 %v10691_v7, %s11160_s11  ;;  %v11868_v7 = vcombine.low %v2374_v2, %v11703_v14  ;;  %v11883_v14 = vcombine.low %v2376_v6, %v11722_v30  ;;  %v2386_v6 = vld [vmem:[#allocation2 + $0xc0] sm:$0xe]  ;;  %p11104_p2 = por %p11103_p1, %p11102_p0 }
  0x99   : > { %1555 = vrot.lane.b32.xlu0 %v11781_v31, %s11160_s11 }
  0x9a   : > { %p11105_p3 = pnand %p11104_p2, %p11098_p13 }
  0x9c   : > { %1553 = vrot.lane.b32.xlu1 %v10694_v13, %s11160_s11  ;;  %v2378_v13 = vld [vmem:[#allocation2 + $0x60] sm:$0xe] }
  0x9d   : > { %1559 = vrot.lane.b32.xlu0 %v11791_v15, %s11160_s11 }
  0xa0   : > { %1557 = vrot.lane.b32.xlu1 %v10697_v26, %s11160_s11  ;;  %v2381_v26 = vld [vmem:[#allocation2 + $0x84] sm:$0xe] }
  0xa1   : > { %1563 = vrot.lane.b32.xlu0 %v11799_v27, %s11160_s11 }
  0xa4   : > { %1561 = vrot.lane.b32.xlu1 %v10700_v18, %s11160_s11  ;;  %v11888_v18 = vcombine.low %v2379_v56, %v11771_v1  ;;  %v11903_v1 = vcombine.low %v2381_v26, %v11793_v22  ;;  %v2385_v22 = vld [vmem:[#allocation2 + $0xb4] sm:$0xe]  ;;  %v11047_v26 = vld [vmem:[#allocation2 + $0x48] sm:$0xff]  }
  0xa5   : > { %1567 = vrot.lane.b32.xlu0 %v11807_v34, %s11160_s11  ;;  %v11935_v29 = vcombine.low %v2385_v22, %v11819_v45 }
  0xa6   : > { %15020 = vst [vmem:[#allocation8_spill] sm:$0xff] %v11903_v1 }
  0xa7   : > { %15024 = vst [vmem:[#allocation12_spill] sm:$0xff] %v11935_v29 }
  0xa8   : > { %1565 = vrot.lane.b32.xlu1 %v10703_v59, %s11160_s11  ;;  %v10724_v59 = vld [vmem:[%s14987_s1 + $0x70] sm:$0xff]  }
  0xa9   : > { %1571 = vrot.lane.b32.xlu0 %v11817_v37, %s11160_s11 }
  0xac   : > { %1569 = vrot.lane.b32.xlu1 %v10706_v41, %s11160_s11  ;;  %v11898_v41 = vcombine.low %v2378_v13, %v11758_v63  ;;  %v11913_v63 = vcombine.low %v2380_v28, %v11785_v11  ;;  %v11045_v11 = vld [vmem:[#allocation2 + $0x18] sm:$0xff]  }
  0xad   : > { %1575 = vrot.lane.b32.xlu0 %v11825_v38, %s11160_s11  ;;  %v11048_v28 = vld [vmem:[#allocation2 + $0x54] sm:$0xff]  }
  0xae   : > { %15021 = vst [vmem:[#allocation9_spill] sm:$0xff] %v11913_v63 }
  0xb0   : > { %1573 = vrot.lane.b32.xlu1 %v10709_v47, %s11160_s11 }
  0xb1   : > { %1579 = vrot.lane.b32.xlu0 %v11833_v49, %s11160_s11 }
  0xb4   : > { %1577 = vrot.lane.b32.xlu1 %v10712_v50, %s11160_s11  ;;  %v2382_v50 = vld [vmem:[#allocation2 + $0x90] sm:$0xe] }
  0xb5   : > { %1583 = vrot.lane.b32.xlu0 %v11839_v55, %s11160_s11 }
  0xb8   : > { %1581 = vrot.lane.b32.xlu1 %v10714_v21, %s11160_s11 }
  0xb9   : > { %2439 = vrot.lane.b32.xlu0 %v11845_v42, %s11160_s11 }
  0xbc   : > { %1585 = vrot.lane.b32.xlu1 %v10715_v58, %s11160_s11 }
  0xbd   : > { %2443 = vrot.lane.b32.xlu0 %v11851_v62, %s11160_s11 }
  0xc0   : > { %2441 = vrot.lane.b32.xlu1 %v11855_v4, %s11160_s11 }
  0xc1   : > { %2447 = vrot.lane.b32.xlu0 %v11860_v39, %s11160_s11 }
  0xc4   : > { %2445 = vrot.lane.b32.xlu1 %v11868_v7, %s11160_s11 }
  0xc5   : > { %2451 = vrot.lane.b32.xlu0 %v11873_v20, %s11160_s11 }
  0xc8   : > { %2449 = vrot.lane.b32.xlu1 %v11883_v14, %s11160_s11 }
  0xc9   : > { %v909_v9 = vpop.permute.xlu0 %908  ;;  %2455 = vrot.lane.b32.xlu0 %v11888_v18, %s11160_s11 }
  0xca   : > { %v948_v51 = vsel %vm945_vm8, %v10711_v8, %v909_v9  ;;  %v11930_v8 = vcombine.low %v2382_v50, %v11801_v25  ;;  %v11945_v25 = vcombine.low %v2384_v61, %v11811_v57  ;;  %v10729_v9 = vld [vmem:[%s14987_s1 + $0x90] sm:$0xff]   ;;  %v11957_v57 = vcombine.low %v2386_v6, %v11827_v48  ;;  %v10732_v48 = vld [vmem:[%s14987_s1 + $0xa0] sm:$0xff]  }
  0xcb   : > { %1173 = vmatmul.mubr.bf16.vlgmr.msra.gmra.mrb[0].mxu0 %v948_v51  ;;  %v913_v21 = vpop.permute.xlu1 %912  ;;  %v11049_v50 = vld [vmem:[#allocation2 + $0x60] sm:$0xff]   ;;  %v11050_v61 = vld [vmem:[#allocation2 + $0x6c] sm:$0xff]  }
  0xcc   : > { %9103 = vmatprep.mubr.msk.bf16.mxu0 %vm945_vm8, %v11042_v24  ;;  %2178 = vmatpush1.bf16.msra.mxu0 %v10721_v5  ;;  %v956_v2 = vsel %vm945_vm8, %v11045_v11, %v913_v21  ;;  %15023 = vst [vmem:[#allocation11_spill] sm:$0xff] %v11930_v8  ;;  %v11046_v5 = vld [vmem:[#allocation2 + $0x3c] sm:$0xff]   ;;  %15025 = vst [vmem:[#allocation13_spill] sm:$0xff] %v11945_v25 }
  0xcd   : > { %v911_v44 = vpop.permute.xlu0 %910  ;;  %2179 = vmatprep.subr.bf16.mxu0 %v14993_v0  ;;  %2453 = vrot.lane.b32.xlu1 %v11898_v41, %s11160_s11  ;;  %15026 = vst [vmem:[#allocation14_spill] sm:$0xff] %v11957_v57 }
  0xce   : > { %v952_v30 = vsel %vm945_vm8, %v11043_v35, %v911_v44  ;;  %2459 = vrot.lane.b32.xlu0 %v11903_v1, %s11160_s11  ;;  %v10733_v35 = vld [vmem:[%s14987_s1 + $0xa8] sm:$0xff]  }
  0xcf   : > { %v915_v56 = vpop.permute.xlu1 %914 }
  0xd0   : > { %2180 = vmatpush1.bf16.msra.mxu0 %v10723_v17  ;;  %v960_v51 = vsel %vm945_vm8, %v11042_v24, %v915_v56  ;;  %v10730_v17 = vld [vmem:[%s14987_s1 + $0x98] sm:$0xff]  }
  0xd1   : > { %2181 = vmatprep.subr.bf16.mxu0 %v14993_v0  ;;  %v917_v47 = vpop.permute.xlu0 %916  ;;  %2457 = vrot.lane.b32.xlu1 %v11913_v63, %s11160_s11 }
  0xd2   : > { %2463 = vrot.lane.b32.xlu0 %v11918_v19, %s11160_s11  ;;  %v964_v24 = vsel %vm945_vm8, %v11044_v53, %v917_v47  ;;  %v10735_v47 = vld [vmem:[%s14987_s1 + $0xb0] sm:$0xff]  }
  0xd3   : > { %1181 = vmatmul.mubr.bf16.gmra.mrb[4].mxu0 %v952_v30 }
  0xd4   : > { %9104 = vmatprep.mubr.msk.bf16.mxu0 %vm945_vm8, %v11044_v53  ;;  %2182 = vmatpush1.bf16.msra.mxu0 %v10724_v59  ;;  %v919_v59 = vpop.permute.xlu1 %918  ;;  %v10737_v53 = vld [vmem:[%s14987_s1 + $0xb8] sm:$0xff]  }
  0xd5   : > { %2183 = vmatprep.subr.bf16.mxu0 %v14993_v0  ;;  %v11921_v58 = vpop.permute.xlu0 %920  ;;  %2461 = vrot.lane.b32.xlu1 %v11930_v8, %s11160_s11  ;;  %v968_v43 = vsel %vm945_vm8, %v11046_v5, %v919_v59  ;;  %v1704_v8 = vshll.u32 %v11690_v3, 16 }
  0xd6   : > { %2467 = vrot.lane.b32.xlu0 %v11935_v29, %s11160_s11  ;;  %v972_v21 = vsel %vm945_vm8, %v11047_v26, %v11921_v58 }
  0xd8   : > { %2184 = vmatpush1.bf16.msra.mxu0 %v10725_v23 }
  0xd9   : > { %2185 = vmatprep.subr.bf16.mxu0 %v14993_v0  ;;  %v925_v45 = vpop.permute.xlu0 %924  ;;  %2465 = vrot.lane.b32.xlu1 %v11945_v25, %s11160_s11  ;;  %v11057_v25 = vld [vmem:[#allocation2 + $0xc0] sm:$0xff]  }
  0xda   : > { %v980_v56 = vsel %vm945_vm8, %v11049_v50, %v925_v45 }
  0xdb   : > { %1189 = vmatmul.mubr.bf16.gmra.mrb[8].mxu0 %v956_v2  ;;  %v923_v2 = vpop.permute.xlu1 %922 }
  0xdc   : > { %9105 = vmatprep.mubr.msk.bf16.mxu0 %vm945_vm8, %v11046_v5  ;;  %2186 = vmatpush1.bf16.msra.mxu0 %v10727_v60  ;;  %v11051_v5 = vld [vmem:[#allocation2 + $0x78] sm:$0xff]  }
  0xdd   : > { %2187 = vmatprep.subr.bf16.mxu0 %v14993_v0  ;;  %v929_v13 = vpop.permute.xlu0 %928  ;;  %2469 = vrot.lane.b32.xlu1 %v11957_v57, %s11160_s11 }
  0xde   : > { %v988_v45 = vsel %vm945_vm8, %v11051_v5, %v929_v13 }
  0xe0   : > { %2188 = vmatpush1.bf16.msra.mxu0 %v10728_v54  ;;  %v976_v54 = vsel %vm945_vm8, %v11048_v28, %v923_v2  ;;  %v11055_v2 = vld [vmem:[#allocation2 + $0xa8] sm:$0xff]  }
  0xe1   : > { %2189 = vmatprep.subr.bf16.mxu0 %v14993_v0  ;;  %v11971_v44 = vpop.permute.xlu0 %932 }
  0xe3   : > { %1197 = vmatmul.mubr.bf16.gmra.mrb[12].mxu0 %v960_v51  ;;  %v11052_v51 = vld [vmem:[#allocation2 + $0x84] sm:$0xff]  }
  0xe4   : > { %9106 = vmatprep.mubr.msk.bf16.mxu0 %vm945_vm8, %v11047_v26  ;;  %2190 = vmatpush1.bf16.msra.mxu0 %v10729_v9  ;;  %v927_v26 = vpop.permute.xlu1 %926 }
  0xe5   : > { %2191 = vmatprep.subr.bf16.mxu0 %v14993_v0 }
  0xe7   : > { %v11978_v30 = vpop.permute.xlu0 %936 }
  0xe8   : > { %2192 = vmatpush1.bf16.msra.mxu0 %v10730_v17 }
  0xe9   : > { %2193 = vmatprep.subr.bf16.mxu0 %v14993_v0 }
  0xeb   : > { %1205 = vmatmul.mubr.bf16.gmra.mrb[16].mxu0 %v964_v24  ;;  %v11985_v23 = vpop.permute.xlu0 %1523 }
  0xec   : > { %9107 = vmatprep.mubr.msk.bf16.mxu0 %vm945_vm8, %v11048_v28  ;;  %2194 = vmatpush1.bf16.msra.mxu0 %v10732_v48  ;;  %v984_v48 = vsel %vm945_vm8, %v11050_v61, %v927_v26  ;;  %v11053_v28 = vld [vmem:[#allocation2 + $0x90] sm:$0xff]  }
  0xed   : > { %2195 = vmatprep.subr.bf16.mxu0 %v14993_v0  ;;  %v996_v13 = vsel %vm945_vm8, %v11053_v28, %v11971_v44  ;;  %v11056_v26 = vld [vmem:[#allocation2 + $0xb4] sm:$0xff]  }
  0xef   : > { %v11992_v22 = vpop.permute.xlu0 %1527 }
  0xf0   : > { %2196 = vmatpush1.bf16.msra.mxu0 %v10733_v35 }
  0xf1   : > { %2197 = vmatprep.subr.bf16.mxu0 %v14993_v0 }
  0xf3   : > { %1213 = vmatmul.mubr.bf16.gmra.mrb[20].mxu0 %v968_v43  ;;  %v11997_v60 = vpop.permute.xlu0 %1531  ;;  %v11054_v43 = vld [vmem:[#allocation2 + $0x9c] sm:$0xff]  }
  0xf4   : > { %9108 = vmatprep.mubr.msk.bf16.mxu0 %vm945_vm8, %v11049_v50  ;;  %2198 = vmatpush1.bf16.msra.mxu0 %v10735_v47  ;;  %v931_v47 = vpop.permute.xlu1 %930 }
  0xf5   : > { %2199 = vmatprep.subr.bf16.mxu0 %v14993_v0 }
  0xf7   : > { %v12001_v11 = vpop.permute.xlu0 %1535 }
  0xf8   : > { %2200 = vmatpush1.bf16.msra.mxu0 %v10737_v53  ;;  %v992_v53 = vsel %vm945_vm8, %v11052_v51, %v931_v47 }
  0xf9   : > { %2812 = vmatprep.subr.bf16.mxu0 %v14993_v0 }
  0xfb   : > { %1221 = vmatmul.mubr.bf16.gmra.mrb[24].mxu0 %v972_v21  ;;  %v12004_v6 = vpop.permute.xlu0 %1539 }
  0xfc   : > { %9109 = vmatprep.mubr.msk.bf16.mxu0 %vm945_vm8, %v11050_v61  ;;  %v935_v61 = vpop.permute.xlu1 %934 }
  0xfd   : > { %v1000_v16 = vsel %vm945_vm8, %v11054_v43, %v935_v61  ;;  %v1706_v61 = vrot.slane %v1704_v8, 1 }
  0xff   : > { %v12007_v58 = vpop.permute.xlu0 %1543 }
 0x103   : > { %1229 = vmatmul.mubr.bf16.gmra.mrb[28].mxu0 %v976_v54  ;;  %v12010_v9 = vpop.permute.xlu0 %1547 }
 0x104   : > { %9110 = vmatprep.mubr.msk.bf16.mxu0 %vm945_vm8, %v11051_v5  ;;  %v939_v5 = vpop.permute.xlu1 %938 }
 0x107   : > { %v12013_v17 = vpop.permute.xlu0 %1551 }
 0x108   : > { %v1526_v0 = vpop.permute.xlu1 %1525 }
 0x10b   : > { %1237 = vmatmul.mubr.bf16.gmra.mrb[32].mxu0 %v980_v56  ;;  %v12016_v24 = vpop.permute.xlu0 %1555 }
 0x10c   : > { %9111 = vmatprep.mubr.msk.bf16.mxu0 %vm945_vm8, %v11052_v51  ;;  %v2370_v51 = vld [vmem:[#allocation2] sm:$0xe] }
 0x10f   : > { %v12019_v59 = vpop.permute.xlu0 %1559 }
 0x113   : > { %1245 = vmatmul.mubr.bf16.gmra.mrb[36].mxu0 %v984_v48  ;;  %v12022_v35 = vpop.permute.xlu0 %1563  ;;  %v10720_v48 = vld [vmem:[#allocation2 + $0x8] ss:$0 sps:$4 sm:$0x11]  }
 0x114   : > { %9112 = vmatprep.mubr.msk.bf16.mxu0 %vm945_vm8, %v11053_v28  ;;  %v1600_v57 = vsel %vm945_vm8, %v10720_v48, %v1526_v0  ;;  %v1004_v0 = vsel %vm945_vm8, %v11055_v2, %v11978_v30  ;;  %v12051_v48 = vld [vmem:[#allocation2 + $0x20] ss:$0 sps:$4 sm:$0x11]   ;;  %v1008_v30 = vsel %vm945_vm8, %v11056_v26, %v939_v5  ;;  %v1744_v5 = vshll.u32 %v11714_v36, 16 }
 0x115   : > { %v2556_v29 = vrot.slane %v1600_v57, 1 }
 0x117   : > { %v12025_v50 = vpop.permute.xlu0 %1567 }
 0x11b   : > { %1253 = vmatmul.mubr.bf16.gmra.mrb[40].mxu0 %v988_v45  ;;  %v12028_v21 = vpop.permute.xlu0 %1571  ;;  %v1334_v45 = vld [vmem:[#allocation2 + $0x4] sm:$0xf] }
 0x11c   : > { %9113 = vmatprep.mubr.msk.bf16.mxu0 %vm945_vm8, %v11054_v43  ;;  %v10734_v43 = vld [vmem:[#allocation2 + $0xcc] sm:$0xff]  }
 0x11f   : > { %v12031_v54 = vpop.permute.xlu0 %1575 }
 0x123   : > { %1261 = vmatmul.mubr.bf16.gmra.mrb[44].mxu0 %v992_v53  ;;  %v12035_v56 = vpop.permute.xlu0 %1579  ;;  %v9206_v53 = vcombine.low %v2370_v51, %v1334_v45 }
 0x124   : > { %9114 = vmatprep.mubr.msk.bf16.mxu0 %vm945_vm8, %v11055_v2  ;;  %v1722_v2 = vshrl.u32 %v11700_v10, 16 }
 0x127   : > { %v12038_v47 = vpop.permute.xlu0 %1583 }
 0x12b   : > { %1269 = vmatmul.mubr.bf16.gmra.mrb[48].mxu0 %v996_v13  ;;  %v2440_v44 = vpop.permute.xlu0 %2439  ;;  %v1333_v13 = vld [vmem:[#allocation2] sm:$0xf] }
 0x12c   : > { %9115 = vmatprep.mubr.msk.bf16.mxu0 %vm945_vm8, %v11056_v26  ;;  %v2476_v28 = vsel %vm945_vm8, %v9206_v53, %v2440_v44  ;;  %v9118_v1 = vcombine.low %v1333_v13, %v1334_v45  ;;  %v1708_v53 = vshll.u32 %v12051_v48, 16  ;;  %v1724_v45 = vshll.u32 %v11700_v10, 16 }
 0x12d   : > { %v2555_v19 = vrot.slane %v2476_v28, 1  ;;  %v1728_v13 = vshll.u32 %v11727_v32, 16 }
 0x12e   : > { %v1726_v28 = vrot.slane %v1724_v45, 1  ;;  %v12075_v45 = vld [vmem:[#allocation2 + $0x38] ss:$0 sps:$4 sm:$0x11]  }
 0x12f   : > { %v12046_v51 = vsel %vm2554_vm9, %v2555_v19, %v2556_v29  ;;  %v1710_v29 = vrot.slane %v1708_v53, 1 }
 0x133   : > { %1277 = vmatmul.mubr.bf16.gmra.mrb[52].mxu0 %v1000_v16  ;;  %v1702_v16 = vshrl.u32 %v11690_v3, 16 }
 0x134   : > { %9116 = vmatprep.mubr.msk.bf16.mxu0 %vm945_vm8, %v11057_v25  ;;  %v1597_v25 = vsel %vm945_vm8, %v9118_v1, %v11985_v23  ;;  %v1698_v23 = vshll.u32 %v1600_v57, 16  ;;  %v10739_v57 = vld [vmem:[%s14987_s1 + $0xc0] sm:$0xff]  }
 0x135   : > { %v1707_v19 = vor.u32 %v1706_v61, %v1702_v16  ;;  %v1694_v44 = vshll.u32 %v1597_v25, 16  ;;  %v1692_v63 = vshrl.u32 %v1597_v25, 16  ;;  %v1730_v16 = vrot.slane %v1728_v13, 1  ;;  %v10740_v13 = vld [vmem:[%s14987_s1 + $0xc8] sm:$0xff]  }
 0x136   : > { %v1700_v53 = vrot.slane %v1698_v23, 1  ;;  %v1746_v25 = vrot.slane %v1744_v5, 1 }
 0x137   : > { %v1711_v8 = vsel %vm1691_vm10, %v1707_v19, %v1710_v29  ;;  %v1696_v1 = vrot.slane %v1694_v44, 1  ;;  %v1530_v19 = vpop.permute.xlu1 %1529  ;;  %v11059_v29 = vld [vmem:[#allocation2 + $0x14] ss:$0 sps:$4 sm:$0x11]  }
 0x138   : > { %v12068_v32 = vsel %vm945_vm8, %v11059_v29, %v1530_v19  ;;  %v1762_v19 = vshrl.u32 %v11730_v33, 16 }
 0x139   : > { %v1697_v26 = vor.u32 %v1696_v1, %v1692_v63  ;;  %v1748_v63 = vshll.u32 %v12075_v45, 16 }
 0x13b   : > { %1285 = vmatmul.mubr.bf16.gmra.mrb[56].mxu0 %v1004_v0  ;;  %v1603_v0 = vsel %vm945_vm8, %v11675_v40, %v11992_v22  ;;  %v1742_v22 = vshrl.u32 %v11714_v36, 16  ;;  %v1750_v23 = vrot.slane %v1748_v63, 1 }
 0x13c   : > { %9117 = vmatprep.mubr.msk.bf16.mxu0 %vm945_vm8, %v10734_v43  ;;  %v1727_v43 = vor.u32 %v1726_v28, %v1722_v2  ;;  %v1714_v61 = vshll.u32 %v1603_v0, 16  ;;  %v1712_v44 = vshrl.u32 %v1603_v0, 16  ;;  %v1701_v2 = vsel %vm1691_vm10, %v1697_v26, %v1700_v53 }
 0x13d   : > { %v1609_v28 = vsel %vm945_vm8, %v11690_v3, %v11997_v60  ;;  %v1747_v1 = vor.u32 %v1746_v25, %v1742_v22  ;;  %v1764_v0 = vshll.u32 %v11730_v33, 16  ;;  %v10741_v60 = vld [vmem:[%s14987_s1 + $0xd0] sm:$0xff]  }
 0x13e   : > { %v1731_v40 = vsel %vm1691_vm10, %v1727_v43, %v1730_v16  ;;  %v15027_v43 = vmov 0   ;;  %v1734_v5 = vshll.u32 %v1609_v28, 16  ;;  %v1732_v22 = vshrl.u32 %v1609_v28, 16 }
 0x13f   : > { %v1751_v53 = vsel %vm1691_vm10, %v1747_v1, %v1750_v23  ;;  %v1766_v29 = vrot.slane %v1764_v0, 1  ;;  %v1784_v28 = vshll.u32 %v11744_v46, 16 }
 0x140   : > { %v1736_v25 = vrot.slane %v1734_v5, 1  ;;  %v12113_v5 = vld [vmem:[#allocation2 + $0x2c] ss:$0 sps:$4 sm:$0x11]  }
 0x142   : > { %v1737_v1 = vor.u32 %v1736_v25, %v1732_v22 }
 0x143   : > { %1293 = vmatmul.mubr.bf16.gmra.mrb[60].mxu0 %v1008_v30  ;;  %v1716_v30 = vrot.slane %v1714_v61, 1  ;;  %v1534_v61 = vpop.permute.xlu1 %1533 }
 0x144   : > { %9190 = vmatprep.mubr.msk.bf16.mxu0 %vm945_vm8, %v1711_v8  ;;  %v1718_v8 = vshll.u32 %v12068_v32, 16  ;;  %v12091_v3 = vsel %vm945_vm8, %v12051_v48, %v1534_v61  ;;  %v1782_v61 = vshrl.u32 %v11744_v46, 16 }
 0x145   : > { %v1717_v16 = vor.u32 %v1716_v30, %v1712_v44  ;;  %v1738_v63 = vshll.u32 %v12091_v3, 16  ;;  %v1615_v30 = vsel %vm945_vm8, %v11700_v10, %v12001_v11  ;;  %v10743_v11 = vld [vmem:[%s14987_s1 + $0xe0] sm:$0xff]  }
 0x146   : > { %v1720_v26 = vrot.slane %v1718_v8, 1  ;;  %v10742_v8 = vld [vmem:[%s14987_s1 + $0xd8] sm:$0xff]   ;;  %v1754_v23 = vshll.u32 %v1615_v30, 16 }
 0x147   : > { %v1740_v0 = vrot.slane %v1738_v63, 1  ;;  %v1621_v63 = vsel %vm945_vm8, %v11714_v36, %v12004_v6  ;;  %v10745_v6 = vld [vmem:[%s14987_s1 + $0xf0] sm:$0xff]  }
 0x148   : > { %v1721_v44 = vsel %vm1691_vm10, %v1717_v16, %v1720_v26  ;;  %v1538_v16 = vpop.permute.xlu1 %1537 }
 0x149   : > { %v12117_v10 = vsel %vm945_vm8, %v12113_v5, %v1538_v16  ;;  %v1741_v25 = vsel %vm1691_vm10, %v1737_v1, %v1740_v0  ;;  %v1802_v16 = vshrl.u32 %v11754_v52, 16 }
 0x14a   : > { %v1758_v22 = vshll.u32 %v12117_v10, 16 }
 0x14b   : > { %2210 = vmatmul.mubr.bf16.vlgmr.msra.gmra.mrb[0].mxu0 %v1701_v2  ;;  %v1767_v2 = vor.u32 %v1766_v29, %v1762_v19  ;;  %v1752_v29 = vshrl.u32 %v1615_v30, 16  ;;  %v1804_v30 = vshll.u32 %v11754_v52, 16 }
 0x14c   : > { %9191 = vmatprep.mubr.msk.bf16.mxu0 %vm945_vm8, %v1731_v40  ;;  %2813 = vmatpush1.bf16.msra.mxu0 %v10739_v57  ;;  %v12098_v57 = vld [vmem:[#allocation2 + $0x44] ss:$0 sps:$4 sm:$0x11]   ;;  %v1760_v1 = vrot.slane %v1758_v22, 1  ;;  %v1627_v22 = vsel %vm945_vm8, %v11730_v33, %v12007_v58 }
 0x14d   : > { %2814 = vmatprep.subr.bf16.mxu0 %v15027_v43  ;;  %v1768_v40 = vshll.u32 %v12098_v57, 16  ;;  %v10747_v58 = vld [vmem:[%s14987_s1 + $0x100] sm:$0xff]  }
 0x150   : > { %2815 = vmatpush1.bf16.msra.mxu0 %v10740_v13  ;;  %v1770_v13 = vrot.slane %v1768_v40, 1  ;;  %v1756_v40 = vrot.slane %v1754_v23, 1  ;;  %v1542_v23 = vpop.permute.xlu1 %1541 }
 0x151   : > { %2816 = vmatprep.subr.bf16.mxu0 %v15027_v43  ;;  %v12141_v36 = vsel %vm945_vm8, %v12075_v45, %v1542_v23  ;;  %v1822_v23 = vshrl.u32 %v11768_v12, 16 }
 0x152   : > { %v1771_v26 = vsel %vm1691_vm10, %v1767_v2, %v1770_v13  ;;  %v1757_v13 = vor.u32 %v1756_v40, %v1752_v29  ;;  %v1778_v29 = vshll.u32 %v12141_v36, 16 }
 0x153   : > { %2218 = vmatmul.mubr.bf16.gmra.mrb[4].mxu0 %v1721_v44  ;;  %v10744_v44 = vld [vmem:[%s14987_s1 + $0xe8] sm:$0xff]  }
 0x154   : > { %9192 = vmatprep.mubr.msk.bf16.mxu0 %vm945_vm8, %v1751_v53  ;;  %2817 = vmatpush1.bf16.msra.mxu0 %v10741_v60  ;;  %v1786_v60 = vrot.slane %v1784_v28, 1  ;;  %v12124_v53 = vld [vmem:[#allocation2 + $0x50] ss:$0 sps:$4 sm:$0x11]   ;;  %v1774_v28 = vshll.u32 %v1621_v63, 16  ;;  %v1761_v40 = vsel %vm1691_vm10, %v1757_v13, %v1760_v1  ;;  %v1780_v13 = vrot.slane %v1778_v29, 1 }
 0x155   : > { %2818 = vmatprep.subr.bf16.mxu0 %v15027_v43  ;;  %v1788_v19 = vshll.u32 %v12124_v53, 16  ;;  %v1633_v29 = vsel %vm945_vm8, %v11744_v46, %v12010_v9  ;;  %v10751_v9 = vld [vmem:[%s14987_s1 + $0x110] sm:$0xff]  }
 0x157   : > { %v1790_v2 = vrot.slane %v1788_v19, 1  ;;  %v1776_v19 = vrot.slane %v1774_v28, 1  ;;  %v1546_v28 = vpop.permute.xlu1 %1545 }
 0x158   : > { %2819 = vmatpush1.bf16.msra.mxu0 %v10742_v8  ;;  %v1787_v8 = vor.u32 %v1786_v60, %v1782_v61  ;;  %v1772_v60 = vshrl.u32 %v1621_v63, 16  ;;  %v1824_v63 = vshll.u32 %v11768_v12, 16  ;;  %v12165_v33 = vsel %vm945_vm8, %v12098_v57, %v1546_v28 }
 0x159   : > { %2820 = vmatprep.subr.bf16.mxu0 %v15027_v43  ;;  %v1842_v28 = vshrl.u32 %v11781_v31, 16 }
 0x15a   : > { %v1791_v0 = vsel %vm1691_vm10, %v1787_v8, %v1790_v2  ;;  %v1777_v2 = vor.u32 %v1776_v19, %v1772_v60  ;;  %v1798_v60 = vshll.u32 %v12165_v33, 16 }
 0x15b   : > { %2226 = vmatmul.mubr.bf16.gmra.mrb[8].mxu0 %v1741_v25  ;;  %v10746_v25 = vld [vmem:[%s14987_s1 + $0xf8] sm:$0xff]  }
 0x15c   : > { %9193 = vmatprep.mubr.msk.bf16.mxu0 %vm945_vm8, %v1771_v26  ;;  %2821 = vmatpush1.bf16.msra.mxu0 %v10743_v11  ;;  %v1806_v11 = vrot.slane %v1804_v30, 1  ;;  %v12148_v26 = vld [vmem:[#allocation2 + $0x5c] ss:$0 sps:$4 sm:$0x11]   ;;  %v1794_v30 = vshll.u32 %v1627_v22, 16  ;;  %v1781_v19 = vsel %vm1691_vm10, %v1777_v2, %v1780_v13  ;;  %v1800_v2 = vrot.slane %v1798_v60, 1 }
 0x15d   : > { %2822 = vmatprep.subr.bf16.mxu0 %v15027_v43  ;;  %v1808_v61 = vshll.u32 %v12148_v26, 16  ;;  %v1639_v60 = vsel %vm945_vm8, %v11754_v52, %v12013_v17 }
 0x15f   : > { %v1810_v8 = vrot.slane %v1808_v61, 1  ;;  %v1796_v61 = vrot.slane %v1794_v30, 1  ;;  %v1550_v30 = vpop.permute.xlu1 %1549 }
 0x160   : > { %2823 = vmatpush1.bf16.msra.mxu0 %v10744_v44  ;;  %v1807_v44 = vor.u32 %v1806_v11, %v1802_v16  ;;  %v1792_v11 = vshrl.u32 %v1627_v22, 16  ;;  %v1844_v22 = vshll.u32 %v11781_v31, 16  ;;  %v12189_v46 = vsel %vm945_vm8, %v12124_v53, %v1550_v30 }
 0x161   : > { %2824 = vmatprep.subr.bf16.mxu0 %v15027_v43 }
 0x162   : > { %v1811_v1 = vsel %vm1691_vm10, %v1807_v44, %v1810_v8  ;;  %v1797_v8 = vor.u32 %v1796_v61, %v1792_v11  ;;  %v1818_v11 = vshll.u32 %v12189_v46, 16 }
 0x163   : > { %2234 = vmatmul.mubr.bf16.gmra.mrb[12].mxu0 %v1761_v40  ;;  %v10748_v40 = vld [vmem:[%s14987_s1 + $0x108] sm:$0xff]  }
 0x164   : > { %9194 = vmatprep.mubr.msk.bf16.mxu0 %vm945_vm8, %v1791_v0  ;;  %2825 = vmatpush1.bf16.msra.mxu0 %v10745_v6  ;;  %v1826_v6 = vrot.slane %v1824_v63, 1  ;;  %v12172_v0 = vld [vmem:[#allocation2 + $0x68] ss:$0 sps:$4 sm:$0x11]   ;;  %v1814_v63 = vshll.u32 %v1633_v29, 16  ;;  %v1801_v61 = vsel %vm1691_vm10, %v1797_v8, %v1800_v2  ;;  %v1820_v8 = vrot.slane %v1818_v11, 1 }
 0x165   : > { %2826 = vmatprep.subr.bf16.mxu0 %v15027_v43  ;;  %v1828_v16 = vshll.u32 %v12172_v0, 16  ;;  %v1862_v2 = vshrl.u32 %v11791_v15, 16 }
 0x167   : > { %v1830_v44 = vrot.slane %v1828_v16, 1  ;;  %v1816_v16 = vrot.slane %v1814_v63, 1  ;;  %v1554_v63 = vpop.permute.xlu1 %1553 }
 0x168   : > { %2827 = vmatpush1.bf16.msra.mxu0 %v10746_v25  ;;  %v1827_v25 = vor.u32 %v1826_v6, %v1822_v23  ;;  %v1812_v6 = vshrl.u32 %v1633_v29, 16  ;;  %v1864_v29 = vshll.u32 %v11791_v15, 16  ;;  %v12213_v52 = vsel %vm945_vm8, %v12148_v26, %v1554_v63 }
 0x169   : > { %2828 = vmatprep.subr.bf16.mxu0 %v15027_v43 }
 0x16a   : > { %v1831_v13 = vsel %vm1691_vm10, %v1827_v25, %v1830_v44  ;;  %v1817_v44 = vor.u32 %v1816_v16, %v1812_v6  ;;  %v1866_v30 = vrot.slane %v1864_v29, 1  ;;  %v1645_v16 = vsel %vm945_vm8, %v11768_v12, %v12016_v24  ;;  %v12233_v24 = vld [vmem:[#allocation2 + $0x8c] ss:$0 sps:$4 sm:$0x11]  }
 0x16b   : > { %2242 = vmatmul.mubr.bf16.gmra.mrb[16].mxu0 %v1781_v19  ;;  %v10752_v19 = vld [vmem:[%s14987_s1 + $0x118] sm:$0xff]   ;;  %v1888_v63 = vshll.u32 %v12233_v24, 16 }
 0x16c   : > { %9195 = vmatprep.mubr.msk.bf16.mxu0 %vm945_vm8, %v1811_v1  ;;  %2829 = vmatpush1.bf16.msra.mxu0 %v10747_v58  ;;  %v1846_v58 = vrot.slane %v1844_v22, 1  ;;  %v12196_v1 = vld [vmem:[#allocation2 + $0x74] ss:$0 sps:$4 sm:$0x11]   ;;  %v1834_v22 = vshll.u32 %v1639_v60, 16  ;;  %v1821_v6 = vsel %vm1691_vm10, %v1817_v44, %v1820_v8  ;;  %v1867_v11 = vor.u32 %v1866_v30, %v1862_v2 }
 0x16d   : > { %2830 = vmatprep.subr.bf16.mxu0 %v15027_v43  ;;  %v1848_v23 = vshll.u32 %v12196_v1, 16  ;;  %v1882_v8 = vshrl.u32 %v11799_v27, 16 }
 0x16f   : > { %v1850_v25 = vrot.slane %v1848_v23, 1  ;;  %v1838_v23 = vshll.u32 %v12213_v52, 16 }
 0x170   : > { %2831 = vmatpush1.bf16.msra.mxu0 %v10748_v40  ;;  %v1847_v40 = vor.u32 %v1846_v58, %v1842_v28  ;;  %v1832_v28 = vshrl.u32 %v1639_v60, 16  ;;  %v1836_v58 = vrot.slane %v1834_v22, 1  ;;  %v1558_v60 = vpop.permute.xlu1 %1557 }
 0x171   : > { %2832 = vmatprep.subr.bf16.mxu0 %v15027_v43  ;;  %v1840_v29 = vrot.slane %v1838_v23, 1  ;;  %v12229_v22 = vsel %vm945_vm8, %v12172_v0, %v1558_v60  ;;  %v1890_v23 = vrot.slane %v1888_v63, 1 }
 0x172   : > { %v1851_v17 = vsel %vm1691_vm10, %v1847_v40, %v1850_v25  ;;  %v1837_v40 = vor.u32 %v1836_v58, %v1832_v28  ;;  %v1854_v25 = vshll.u32 %v1645_v16, 16  ;;  %v1858_v30 = vshll.u32 %v12229_v22, 16 }
 0x173   : > { %2250 = vmatmul.mubr.bf16.gmra.mrb[20].mxu0 %v1801_v61  ;;  %v1651_v28 = vsel %vm945_vm8, %v11781_v31, %v12019_v59  ;;  %v12249_v59 = vld [vmem:[#allocation2 + $0x98] ss:$0 sps:$4 sm:$0x11]  }
 0x174   : > { %9196 = vmatprep.mubr.msk.bf16.mxu0 %vm945_vm8, %v1831_v13  ;;  %2833 = vmatpush1.bf16.msra.mxu0 %v10751_v9  ;;  %v12217_v9 = vld [vmem:[#allocation2 + $0x80] ss:$0 sps:$4 sm:$0x11]   ;;  %v1856_v2 = vrot.slane %v1854_v25, 1  ;;  %v1908_v60 = vshll.u32 %v12249_v59, 16 }
 0x175   : > { %2834 = vmatprep.subr.bf16.mxu0 %v15027_v43  ;;  %v1868_v13 = vshll.u32 %v12217_v9, 16 }
 0x177   : > { %v1870_v61 = vrot.slane %v1868_v13, 1  ;;  %v1841_v13 = vsel %vm1691_vm10, %v1837_v40, %v1840_v29  ;;  %v1902_v29 = vshrl.u32 %v11807_v34, 16 }
 0x178   : > { %2835 = vmatpush1.bf16.msra.mxu0 %v10752_v19  ;;  %v1884_v19 = vshll.u32 %v11799_v27, 16 }
 0x179   : > { %v1871_v44 = vsel %vm1691_vm10, %v1867_v11, %v1870_v61  ;;  %v1874_v61 = vshll.u32 %v1651_v28, 16 }
 0x17a   : > { %v1886_v12 = vrot.slane %v1884_v19, 1  ;;  %v1860_v19 = vrot.slane %v1858_v30, 1  ;;  %v1910_v30 = vrot.slane %v1908_v60, 1 }
 0x17b   : > { %2258 = vmatmul.mubr.bf16.gmra.mrb[24].mxu0 %v1821_v6  ;;  %v1904_v6 = vshll.u32 %v11807_v34, 16 }
 0x17c   : > { %9197 = vmatprep.mubr.msk.bf16.mxu0 %vm945_vm8, %v1851_v17  ;;  %v1852_v17 = vshrl.u32 %v1645_v16, 16  ;;  %v1887_v58 = vor.u32 %v1886_v12, %v1882_v8  ;;  %v1562_v16 = vpop.permute.xlu1 %1561  ;;  %v1876_v8 = vrot.slane %v1874_v61, 1 }
 0x17d   : > { %v12245_v25 = vsel %vm945_vm8, %v12196_v1, %v1562_v16  ;;  %v1906_v31 = vrot.slane %v1904_v6, 1 }
 0x17e   : > { %v1857_v11 = vor.u32 %v1856_v2, %v1852_v17  ;;  %v1891_v40 = vsel %vm1691_vm10, %v1887_v58, %v1890_v23  ;;  %v1878_v12 = vshll.u32 %v12245_v25, 16  ;;  %v1657_v17 = vsel %vm945_vm8, %v11791_v15, %v12022_v35  ;;  %v12265_v35 = vld [vmem:[#allocation2 + $0xa4] ss:$0 sps:$4 sm:$0x11]  }
 0x17f   : > { %v1907_v2 = vor.u32 %v1906_v31, %v1902_v29  ;;  %v1894_v23 = vshll.u32 %v1657_v17, 16  ;;  %v1928_v16 = vshll.u32 %v12265_v35, 16 }
 0x180   : > { %v1861_v63 = vsel %vm1691_vm10, %v1857_v11, %v1860_v19  ;;  %v1880_v6 = vrot.slane %v1878_v12, 1  ;;  %v1922_v19 = vshrl.u32 %v11817_v37, 16 }
 0x181   : > { %v1911_v11 = vsel %vm1691_vm10, %v1907_v2, %v1910_v30  ;;  %v1896_v29 = vrot.slane %v1894_v23, 1  ;;  %v1930_v12 = vrot.slane %v1928_v16, 1 }
 0x183   : > { %2266 = vmatmul.mubr.bf16.gmra.mrb[28].mxu0 %v1841_v13  ;;  %v1924_v13 = vshll.u32 %v11817_v37, 16 }
 0x184   : > { %9198 = vmatprep.mubr.msk.bf16.mxu0 %vm945_vm8, %v1871_v44  ;;  %v1872_v44 = vshrl.u32 %v1651_v28, 16  ;;  %v1566_v28 = vpop.permute.xlu1 %1565 }
 0x185   : > { %v12261_v61 = vsel %vm945_vm8, %v12217_v9, %v1566_v28  ;;  %v1926_v15 = vrot.slane %v1924_v13, 1 }
 0x186   : > { %v1877_v58 = vor.u32 %v1876_v8, %v1872_v44  ;;  %v1898_v31 = vshll.u32 %v12261_v61, 16  ;;  %v1663_v44 = vsel %vm945_vm8, %v11799_v27, %v12025_v50  ;;  %v12281_v50 = vld [vmem:[#allocation2 + $0xb0] ss:$0 sps:$4 sm:$0x11]  }
 0x187   : > { %v1927_v8 = vor.u32 %v1926_v15, %v1922_v19  ;;  %v1914_v30 = vshll.u32 %v1663_v44, 16  ;;  %v1948_v28 = vshll.u32 %v12281_v50, 16 }
 0x188   : > { %v1881_v60 = vsel %vm1691_vm10, %v1877_v58, %v1880_v6  ;;  %v1900_v13 = vrot.slane %v1898_v31, 1  ;;  %v1942_v6 = vshrl.u32 %v11825_v38, 16 }
 0x189   : > { %v1931_v58 = vsel %vm1691_vm10, %v1927_v8, %v1930_v12  ;;  %v1916_v19 = vrot.slane %v1914_v30, 1  ;;  %v1950_v31 = vrot.slane %v1948_v28, 1 }
 0x18b   : > { %2274 = vmatmul.mubr.bf16.gmra.mrb[32].mxu0 %v1861_v63  ;;  %v1944_v63 = vshll.u32 %v11825_v38, 16 }
 0x18c   : > { %9199 = vmatprep.mubr.msk.bf16.mxu0 %vm945_vm8, %v1891_v40  ;;  %v1892_v40 = vshrl.u32 %v1657_v17, 16  ;;  %v1570_v17 = vpop.permute.xlu1 %1569 }
 0x18d   : > { %v12277_v23 = vsel %vm945_vm8, %v12233_v24, %v1570_v17  ;;  %v1946_v27 = vrot.slane %v1944_v63, 1 }
 0x18e   : > { %v1897_v2 = vor.u32 %v1896_v29, %v1892_v40  ;;  %v1918_v15 = vshll.u32 %v12277_v23, 16  ;;  %v1669_v40 = vsel %vm945_vm8, %v11807_v34, %v12028_v21  ;;  %v12297_v21 = vld [vmem:[#allocation2 + $0xbc] ss:$0 sps:$4 sm:$0x11]  }
 0x18f   : > { %v1947_v29 = vor.u32 %v1946_v27, %v1942_v6  ;;  %v1934_v12 = vshll.u32 %v1669_v40, 16  ;;  %v1968_v17 = vshll.u32 %v12297_v21, 16 }
 0x190   : > { %v1901_v16 = vsel %vm1691_vm10, %v1897_v2, %v1900_v13  ;;  %v1920_v63 = vrot.slane %v1918_v15, 1  ;;  %v1962_v13 = vshrl.u32 %v11833_v49, 16 }
 0x191   : > { %v1951_v2 = vsel %vm1691_vm10, %v1947_v29, %v1950_v31  ;;  %v1936_v6 = vrot.slane %v1934_v12, 1  ;;  %v1384_v12 = vld [vmem:[#allocation2 + $0xcc] sm:$0xf] }
 0x193   : > { %2282 = vmatmul.mubr.bf16.gmra.mrb[36].mxu0 %v1881_v60  ;;  %v1964_v60 = vshll.u32 %v11833_v49, 16 }
 0x194   : > { %9200 = vmatprep.mubr.msk.bf16.mxu0 %vm945_vm8, %v1911_v11  ;;  %v1912_v11 = vshrl.u32 %v1663_v44, 16  ;;  %v1574_v44 = vpop.permute.xlu1 %1573 }
 0x195   : > { %v12293_v30 = vsel %vm945_vm8, %v12249_v59, %v1574_v44  ;;  %v1966_v34 = vrot.slane %v1964_v60, 1  ;;  %v12307_v44 = vld [vmem:[#allocation2 + $0xd0] sm:$0xf] }
 0x196   : > { %v1917_v8 = vor.u32 %v1916_v19, %v1912_v11  ;;  %v1938_v27 = vshll.u32 %v12293_v30, 16  ;;  %v1675_v11 = vsel %vm945_vm8, %v11817_v37, %v12031_v54  ;;  %v1985_v19 = vshll.u32 %v11839_v55, 16 }
 0x197   : > { %v1967_v15 = vor.u32 %v1966_v34, %v1962_v13  ;;  %v1954_v31 = vshll.u32 %v1675_v11, 16  ;;  %v1983_v37 = vshrl.u32 %v11839_v55, 16  ;;  %v9152_v34 = vcombine.low %v1384_v12, %v12307_v44 }
 0x198   : > { %v1921_v28 = vsel %vm1691_vm10, %v1917_v8, %v1920_v63  ;;  %v1940_v60 = vrot.slane %v1938_v27, 1  ;;  %v1987_v54 = vrot.slane %v1985_v19, 1 }
 0x19a   : > { %v1988_v55 = vor.u32 %v1987_v54, %v1983_v37 }
 0x19b   : > { %2290 = vmatmul.mubr.bf16.gmra.mrb[40].mxu0 %v1901_v16  ;;  %v1970_v16 = vrot.slane %v1968_v17, 1  ;;  %v1952_v17 = vshrl.u32 %v1675_v11, 16 }
 0x19c   : > { %9201 = vmatprep.mubr.msk.bf16.mxu0 %vm945_vm8, %v1931_v58  ;;  %v1932_v58 = vshrl.u32 %v1669_v40, 16  ;;  %v1578_v40 = vpop.permute.xlu1 %1577 }
 0x19d   : > { %v12311_v8 = vsel %vm945_vm8, %v12265_v35, %v1578_v40  ;;  %v1971_v63 = vsel %vm1691_vm10, %v1967_v15, %v1970_v16  ;;  %v12325_v15 = vld [vmem:[#allocation2 + $0xd4] ss:$0 sps:$4 sm:$0x11]   ;;  %v2007_v16 = vshll.u32 %v9152_v34, 16 }
 0x19e   : > { %v1937_v29 = vor.u32 %v1936_v6, %v1932_v58  ;;  %v1956_v58 = vrot.slane %v1954_v31, 1  ;;  %v1958_v6 = vshll.u32 %v12311_v8, 16 }
 0x1a0   : > { %v1941_v27 = vsel %vm1691_vm10, %v1937_v29, %v1940_v60  ;;  %v1957_v40 = vor.u32 %v1956_v58, %v1952_v17  ;;  %v1960_v11 = vrot.slane %v1958_v6, 1  ;;  %v1582_v31 = vpop.permute.xlu1 %1581  ;;  %v2005_v60 = vshrl.u32 %v9152_v34, 16 }
 0x1a1   : > { %v12329_v43 = vsel %vm945_vm8, %v12281_v50, %v1582_v31  ;;  %v1687_v17 = vsel %vm945_vm8, %v11833_v49, %v12038_v47  ;;  %v2558_v47 = vrot.slane %v11855_v4, 1  ;;  %v2559_v31 = vrot.slane %v12051_v48, 1 }
 0x1a2   : > { %v1978_v54 = vshll.u32 %v12329_v43, 16  ;;  %v1996_v34 = vshll.u32 %v1687_v17, 16  ;;  %v2565_v48 = vrot.slane %v12113_v5, 1 }
 0x1a3   : > { %2298 = vmatmul.mubr.bf16.gmra.mrb[44].mxu0 %v1921_v28  ;;  %v1681_v28 = vsel %vm945_vm8, %v11825_v38, %v12035_v56  ;;  %v2009_v38 = vrot.slane %v2007_v16, 1  ;;  %v2012_v56 = vshll.u32 %v12325_v15, 16 }
 0x1a4   : > { %9202 = vmatprep.mubr.msk.bf16.mxu0 %vm945_vm8, %v1951_v2  ;;  %v12315_v2 = vld [vmem:[#allocation2 + $0xc8] ss:$0 sps:$4 sm:$0x11]   ;;  %v1974_v12 = vshll.u32 %v1681_v28, 16 }
 0x1a5   : > { %v1990_v13 = vshll.u32 %v12315_v2, 16  ;;  %v2010_v58 = vor.u32 %v2009_v38, %v2005_v60  ;;  %v2014_v6 = vrot.slane %v2012_v56, 1  ;;  %v2560_v38 = vsel %vm2554_vm9, %v2558_v47, %v2559_v31  ;;  %v10766_v47 = vld [vmem:[%s14989_s3 + $0x40] ss:$8 sps:$4 sm:$0xff]  }
 0x1a6   : > { %v1976_v37 = vrot.slane %v1974_v12, 1  ;;  %v1998_v12 = vrot.slane %v1996_v34, 1  ;;  %v10760_v34 = vld [vmem:[%s14989_s3 + $0x20] ss:$8 sps:$4 sm:$0xff]   ;;  %v2576_v31 = vrot.slane %v11860_v39, 1 }
 0x1a7   : > { %v1992_v19 = vrot.slane %v1990_v13, 1  ;;  %v1961_v13 = vsel %vm1691_vm10, %v1957_v40, %v1960_v11  ;;  %v2015_v16 = vsel %vm1691_vm10, %v2010_v58, %v2014_v6  ;;  %v1994_v40 = vshrl.u32 %v1687_v17, 16  ;;  %v10757_v58 = vld [vmem:[%s14989_s3 + $0x10] ss:$8 sps:$4 sm:$0xff]  }
 0x1a9   : > { %v1993_v29 = vsel %vm1691_vm10, %v1988_v55, %v1992_v19  ;;  %v1980_v55 = vrot.slane %v1978_v54, 1  ;;  %v1586_v19 = vpop.permute.xlu1 %1585  ;;  %v2564_v54 = vrot.slane %v11851_v62, 1 }
 0x1ab   : > { %2306 = vmatmul.mubr.bf16.gmra.mrb[48].mxu0 %v1941_v27  ;;  %v2566_v6 = vsel %vm2554_vm9, %v2564_v54, %v2565_v48  ;;  %v10772_v48 = vld [vmem:[%s14989_s3 + $0x60] ss:$8 sps:$4 sm:$0xff]  }
 0x1ac   : > { %9203 = vmatprep.mubr.msk.bf16.mxu0 %vm945_vm8, %v1971_v63  ;;  %v1972_v63 = vshrl.u32 %v1681_v28, 16  ;;  %v12341_v28 = vsel %vm945_vm8, %v12297_v21, %v1586_v19  ;;  %v2571_v19 = vrot.slane %v12075_v45, 1  ;;  %v10768_v45 = vld [vmem:[%s14989_s3 + $0x44] ss:$8 sps:$4 sm:$0xff]  }
 0x1ad   : > { %v2000_v11 = vshll.u32 %v12341_v28, 16  ;;  %v2442_v17 = vpop.permute.xlu1 %2441 }
 0x1ae   : > { %v1977_v27 = vor.u32 %v1976_v37, %v1972_v63  ;;  %v10756_v63 = vld [vmem:[%s14989_s3 + $0x4] ss:$8 sps:$4 sm:$0xff]   ;;  %v10754_v37 = vld [vmem:[%s14989_s3] ss:$8 sps:$4 sm:$0xff]   ;;  %v2479_v5 = vsel %vm945_vm8, %v11845_v42, %v2442_v17  ;;  %v2562_v42 = vrot.slane %v12068_v32, 1  ;;  %v2583_v17 = vrot.slane %v12124_v53, 1 }
 0x1af   : > { %v2002_v60 = vrot.slane %v2000_v11, 1  ;;  %4036 = vmatprep.subr.bf16.mxu0 %v10756_v63  ;;  %10035 = vmatprep.subr.bf16.mxu1 %v10756_v63  ;;  %v10769_v63 = vld [vmem:[%s14989_s3 + $0x50] ss:$8 sps:$4 sm:$0xff]   ;;  %v10780_v53 = vld [vmem:[%s14989_s3 + $0x84] ss:$8 sps:$4 sm:$0xff]  }
 0x1b0   : > { %v1981_v49 = vsel %vm1691_vm10, %v1977_v27, %v1980_v55  ;;  %10051 = vmatpush1.bf16.msra.mxu1 %v10754_v37  ;;  %v10762_v27 = vld [vmem:[%s14989_s3 + $0x24] ss:$8 sps:$4 sm:$0xff]   ;;  %v2570_v55 = vrot.slane %v11868_v7, 1 }
 0x1b2   : > { %v2572_v11 = vsel %vm2554_vm9, %v2570_v55, %v2571_v19  ;;  %v10778_v19 = vld [vmem:[%s14989_s3 + $0x80] ss:$8 sps:$4 sm:$0xff]  }
 0x1b3   : > { %2314 = vmatmul.mubr.bf16.gmra.mrb[52].mxu0 %v1961_v13  ;;  %v10759_v13 = vld [vmem:[%s14989_s3 + $0x14] ss:$8 sps:$4 sm:$0xff]  }
 0x1b4   : > { %9204 = vmatprep.mubr.msk.bf16.mxu0 %vm945_vm8, %v1993_v29  ;;  %v1999_v29 = vor.u32 %v1998_v12, %v1994_v40  ;;  %10036 = vmatprep.subr.bf16.mxu1 %v10759_v13  ;;  %v2444_v40 = vpop.permute.xlu0 %2443  ;;  %v10763_v12 = vld [vmem:[%s14989_s3 + $0x30] ss:$8 sps:$4 sm:$0xff]  }
 0x1b5   : > { %10052 = vmatpush1.bf16.msra.mxu1 %v10757_v58  ;;  %v2482_v32 = vsel %vm945_vm8, %v11855_v4, %v2444_v40  ;;  %v2568_v4 = vrot.slane %v12091_v3, 1 }
 0x1b6   : > { %v2003_v56 = vsel %vm1691_vm10, %v1999_v29, %v2002_v60  ;;  %10037 = vmatprep.subr.bf16.mxu1 %v10762_v27  ;;  %v2577_v29 = vrot.slane %v12098_v57, 1  ;;  %v10771_v60 = vld [vmem:[%s14989_s3 + $0x54] ss:$8 sps:$4 sm:$0xff]   ;;  %v10774_v57 = vld [vmem:[%s14989_s3 + $0x64] ss:$8 sps:$4 sm:$0xff]  }
 0x1b9   : > { %10053 = vmatpush1.bf16.msra.mxu1 %v10760_v34 }
 0x1bb   : > { %2322 = vmatmul.mubr.bf16.gmra.mrb[56].mxu0 %v1981_v49 }
 0x1bc   : > { %9205 = vmatprep.mubr.msk.bf16.mxu0 %vm945_vm8, %v2015_v16  ;;  %v10765_v16 = vld [vmem:[%s14989_s3 + $0x34] ss:$8 sps:$4 sm:$0xff]  }
 0x1bd   : > { %10038 = vmatprep.subr.bf16.mxu1 %v10765_v16 }
 0x1be   : > { %10054 = vmatpush1.bf16.msra.mxu1 %v10763_v12 }
 0x1bf   : > { %10039 = vmatprep.subr.bf16.mxu1 %v10768_v45 }
 0x1c2   : > { %10055 = vmatpush1.bf16.msra.mxu1 %v10766_v47 }
 0x1c3   : > { %2330 = vmatmul.mubr.bf16.gmra.mrb[60].mxu0 %v2003_v56  ;;  %10040 = vmatprep.subr.bf16.mxu1 %v10771_v60  ;;  %v2446_v56 = vpop.permute.xlu1 %2445 }
 0x1c4   : > { %9260 = vmatprep.mubr.msk.bf16.mxu0 %vm945_vm8, %v2560_v38  ;;  %v2567_v38 = vrot.slane %v2482_v32, 1  ;;  %v2485_v3 = vsel %vm945_vm8, %v11851_v62, %v2446_v56  ;;  %v2574_v62 = vrot.slane %v12117_v10, 1  ;;  %v2595_v32 = vrot.slane %v12172_v0, 1 }
 0x1c5   : > { %v2601_v0 = vrot.slane %v12196_v1, 1  ;;  %v2592_v56 = vrot.slane %v12189_v46, 1  ;;  %v2598_v1 = vrot.slane %v12213_v52, 1 }
 0x1c6   : > { %v2569_v54 = vsel %vm2554_vm9, %v2567_v38, %v2568_v4  ;;  %10056 = vmatpush1.bf16.msra.mxu1 %v10769_v63  ;;  %v2600_v38 = vrot.slane %v11888_v18, 1 }
 0x1c7   : > { %10041 = vmatprep.subr.bf16.mxu1 %v10774_v57 }
 0x1ca   : > { %10057 = vmatpush1.bf16.msra.mxu1 %v10772_v48 }
 0x1cb   : > { %2845 = vmatmul.mubr.bf16.vlgmr.msra.gmra.mrb[0].mxu0 %v12046_v51  ;;  %v2561_v51 = vrot.slane %v2479_v5, 1  ;;  %v10775_v5 = vld [vmem:[%s14989_s3 + $0x70] ss:$8 sps:$4 sm:$0xff]  }
 0x1cc   : > { %9261 = vmatprep.mubr.msk.bf16.mxu0 %vm945_vm8, %v2566_v6  ;;  %4037 = vmatpush1.bf16.msra.mxu0 %v10754_v37  ;;  %v2578_v37 = vsel %vm2554_vm9, %v2576_v31, %v2577_v29  ;;  %v2573_v6 = vrot.slane %v2485_v3, 1 }
 0x1cd   : > { %4038 = vmatprep.subr.bf16.mxu0 %v10759_v13  ;;  %v2563_v49 = vsel %vm2554_vm9, %v2561_v51, %v2562_v42  ;;  %v2582_v13 = vrot.slane %v11883_v14, 1  ;;  %v2589_v42 = vrot.slane %v12148_v26, 1  ;;  %v10783_v51 = vld [vmem:[%s14989_s3 + $0x94] ss:$8 sps:$4 sm:$0xff]  }
 0x1ce   : > { %v2575_v55 = vsel %vm2554_vm9, %v2573_v6, %v2574_v62 }
 0x1d0   : > { %4039 = vmatpush1.bf16.msra.mxu0 %v10757_v58  ;;  %v10777_v58 = vld [vmem:[%s14989_s3 + $0x74] ss:$8 sps:$4 sm:$0xff]  }
 0x1d1   : > { %4040 = vmatprep.subr.bf16.mxu0 %v10762_v27  ;;  %10042 = vmatprep.subr.bf16.mxu1 %v10777_v58  ;;  %v2448_v27 = vpop.permute.xlu0 %2447 }
 0x1d2   : > { %10058 = vmatpush1.bf16.msra.mxu1 %v10775_v5  ;;  %v2488_v10 = vsel %vm945_vm8, %v11868_v7, %v2448_v27  ;;  %v2580_v7 = vrot.slane %v12141_v36, 1  ;;  %v2594_v36 = vrot.slane %v11898_v41, 1  ;;  %v2613_v27 = vrot.slane %v12233_v24, 1 }
 0x1d3   : > { %2853 = vmatmul.mubr.bf16.gmra.mrb[4].mxu0 %v2563_v49  ;;  %10043 = vmatprep.subr.bf16.mxu1 %v10780_v53  ;;  %v2579_v40 = vrot.slane %v2488_v10, 1  ;;  %v2610_v24 = vrot.slane %v12245_v25, 1 }
 0x1d4   : > { %9262 = vmatprep.mubr.msk.bf16.mxu0 %vm945_vm8, %v2572_v11  ;;  %4041 = vmatpush1.bf16.msra.mxu0 %v10760_v34  ;;  %v2584_v34 = vsel %vm2554_vm9, %v2582_v13, %v2583_v17  ;;  %v10781_v11 = vld [vmem:[%s14989_s3 + $0x90] ss:$8 sps:$4 sm:$0xff]  }
 0x1d5   : > { %4042 = vmatprep.subr.bf16.mxu0 %v10765_v16  ;;  %v2588_v16 = vrot.slane %v11873_v20, 1  ;;  %v2581_v26 = vsel %vm2554_vm9, %v2579_v40, %v2580_v7  ;;  %v2452_v29 = vpop.permute.xlu0 %2451 }
 0x1d6   : > { %10059 = vmatpush1.bf16.msra.mxu1 %v10778_v19 }
 0x1d7   : > { %10044 = vmatprep.subr.bf16.mxu1 %v10783_v51 }
 0x1d8   : > { %4043 = vmatpush1.bf16.msra.mxu0 %v10763_v12  ;;  %v2450_v12 = vpop.permute.xlu1 %2449 }
 0x1d9   : > { %4044 = vmatprep.subr.bf16.mxu0 %v10768_v45  ;;  %v2590_v45 = vsel %vm2554_vm9, %v2588_v16, %v2589_v42  ;;  %v2491_v49 = vsel %vm945_vm8, %v11860_v39, %v2450_v12  ;;  %v2494_v39 = vsel %vm945_vm8, %v11883_v14, %v2452_v29  ;;  %v15028_v14 = vld [vmem:[#allocation9_spill] sm:$0xff]  ;;  %v2456_v46 = vpop.permute.xlu0 %2455  ;;  %v2625_v12 = vrot.slane %v12265_v35, 1 }
 0x1da   : > { %10060 = vmatpush1.bf16.msra.mxu1 %v10781_v11  ;;  %v2585_v31 = vrot.slane %v2491_v49, 1  ;;  %v2606_v3 = vrot.slane %v15028_v14, 1  ;;  %v2500_v62 = vsel %vm945_vm8, %v11898_v41, %v2456_v46  ;;  %v15030_v41 = vld [vmem:[#allocation11_spill] sm:$0xff] }
 0x1db   : > { %2861 = vmatmul.mubr.bf16.gmra.mrb[8].mxu0 %v2569_v54  ;;  %v2618_v10 = vrot.slane %v15030_v41, 1 }
 0x1dc   : > { %9263 = vmatprep.mubr.msk.bf16.mxu0 %vm945_vm8, %v2578_v37  ;;  %4045 = vmatpush1.bf16.msra.mxu0 %v10766_v47  ;;  %v2586_v47 = vrot.slane %v12165_v33, 1  ;;  %v2591_v33 = vrot.slane %v2494_v39, 1  ;;  %v2602_v37 = vsel %vm2554_vm9, %v2600_v38, %v2601_v0  ;;  %v10792_v0 = vld [vmem:[%s14989_s3 + $0xc4] ss:$8 sps:$4 sm:$0xff]  }
 0x1dd   : > { %4046 = vmatprep.subr.bf16.mxu0 %v10771_v60  ;;  %v2596_v60 = vsel %vm2554_vm9, %v2594_v36, %v2595_v32  ;;  %v10786_v36 = vld [vmem:[%s14989_s3 + $0xa4] ss:$8 sps:$4 sm:$0xff]  }
 0x1de   : > { %v2587_v4 = vsel %vm2554_vm9, %v2585_v31, %v2586_v47  ;;  %v15032_v32 = vld [vmem:[#allocation13_spill] sm:$0xff]  ;;  %v2622_v31 = vrot.slane %v12277_v23, 1  ;;  %10045 = vmatprep.subr.bf16.mxu1 %v10786_v36 }
 0x1df   : > { %v2630_v35 = vrot.slane %v15032_v32, 1  ;;  %v10784_v47 = vld [vmem:[%s14989_s3 + $0xa0] ss:$8 sps:$4 sm:$0xff]  }
 0x1e0   : > { %4047 = vmatpush1.bf16.msra.mxu0 %v10769_v63  ;;  %v2454_v63 = vpop.permute.xlu1 %2453  ;;  %10061 = vmatpush1.bf16.msra.mxu1 %v10784_v47 }
 0x1e1   : > { %4048 = vmatprep.subr.bf16.mxu0 %v10774_v57  ;;  %v2593_v57 = vsel %vm2554_vm9, %v2591_v33, %v2592_v56  ;;  %v2497_v54 = vsel %vm945_vm8, %v11873_v20, %v2454_v63  ;;  %v15029_v20 = vld [vmem:[#allocation8_spill] sm:$0xff]  ;;  %v2637_v63 = vrot.slane %v12297_v21, 1 }
 0x1e2   : > { %v2597_v13 = vrot.slane %v2497_v54, 1  ;;  %v2612_v6 = vrot.slane %v15029_v20, 1  ;;  %v15033_v56 = vld [vmem:[#allocation12_spill] sm:$0xff] }
 0x1e3   : > { %2869 = vmatmul.mubr.bf16.gmra.mrb[12].mxu0 %v2575_v55  ;;  %v2636_v33 = vrot.slane %v15033_v56, 1 }
 0x1e4   : > { %9264 = vmatprep.mubr.msk.bf16.mxu0 %vm945_vm8, %v2584_v34  ;;  %4049 = vmatpush1.bf16.msra.mxu0 %v10772_v48  ;;  %v2607_v48 = vrot.slane %v12217_v9, 1  ;;  %v2604_v9 = vrot.slane %v12229_v22, 1  ;;  %v2458_v52 = vpop.permute.xlu1 %2457  ;;  %v2614_v34 = vsel %vm2554_vm9, %v2612_v6, %v2613_v27  ;;  %v2460_v22 = vpop.permute.xlu0 %2459  ;;  %v2387_v6 = vld [vmem:[#allocation2 + $0xcc] sm:$0xe]  ;;  %v10796_v27 = vld [vmem:[%s14989_s3 + $0xe0] ss:$8 sps:$4 sm:$0xff]  }
 0x1e5   : > { %4050 = vmatprep.subr.bf16.mxu0 %v10777_v58  ;;  %v2599_v58 = vsel %vm2554_vm9, %v2597_v13, %v2598_v1  ;;  %v2503_v55 = vsel %vm945_vm8, %v11888_v18, %v2458_v52  ;;  %v2506_v7 = vsel %vm945_vm8, %v15028_v14, %v2460_v22  ;;  %v15031_v18 = vld [vmem:[#allocation10_spill] sm:$0xff]  ;;  %v10793_v1 = vld [vmem:[%s14989_s3 + $0xd0] ss:$8 sps:$4 sm:$0xff]   ;;  %v10801_v52 = vld [vmem:[%s14989_s3 + $0xf4] ss:$8 sps:$4 sm:$0xff]  }
 0x1e6   : > { %v2608_v17 = vsel %vm2554_vm9, %v2606_v3, %v2607_v48  ;;  %v2609_v16 = vrot.slane %v2503_v55, 1  ;;  %v2624_v40 = vrot.slane %v15031_v18, 1  ;;  %v2638_v3 = vsel %vm2554_vm9, %v2636_v33, %v2637_v63  ;;  %v10795_v48 = vld [vmem:[%s14989_s3 + $0xd4] ss:$8 sps:$4 sm:$0xff]   ;;  %v15034_v13 = vld [vmem:[#allocation14_spill] sm:$0xff] }
 0x1e7   : > { %v2642_v46 = vrot.slane %v15034_v13, 1  ;;  %v2649_v55 = vrot.slane %v12325_v15, 1 }
 0x1e8   : > { %4051 = vmatpush1.bf16.msra.mxu0 %v10775_v5  ;;  %v2603_v5 = vrot.slane %v2500_v62, 1  ;;  %v2462_v25 = vpop.permute.xlu1 %2461  ;;  %v2634_v62 = vrot.slane %v12311_v8, 1 }
 0x1e9   : > { %4052 = vmatprep.subr.bf16.mxu0 %v10780_v53  ;;  %v2509_v49 = vsel %vm945_vm8, %v15029_v20, %v2462_v25 }
 0x1ea   : > { %v2605_v53 = vsel %vm2554_vm9, %v2603_v5, %v2604_v9  ;;  %v2621_v29 = vrot.slane %v2509_v49, 1  ;;  %v9223_v5 = vcombine.low %v2387_v6, %v12307_v44 }
 0x1eb   : > { %2877 = vmatmul.mubr.bf16.gmra.mrb[16].mxu0 %v2581_v26 }
 0x1ec   : > { %9265 = vmatprep.mubr.msk.bf16.mxu0 %vm945_vm8, %v2590_v45  ;;  %4053 = vmatpush1.bf16.msra.mxu0 %v10778_v19  ;;  %v2619_v19 = vrot.slane %v12249_v59, 1  ;;  %v2616_v59 = vrot.slane %v12261_v61, 1  ;;  %v2626_v45 = vsel %vm2554_vm9, %v2624_v40, %v2625_v12  ;;  %v2631_v61 = vrot.slane %v12281_v50, 1  ;;  %v10787_v50 = vld [vmem:[%s14989_s3 + $0xb0] ss:$8 sps:$4 sm:$0xff]   ;;  %v2466_v14 = vpop.permute.xlu1 %2465 }
 0x1ed   : > { %4054 = vmatprep.subr.bf16.mxu0 %v10783_v51  ;;  %v2611_v51 = vsel %vm2554_vm9, %v2609_v16, %v2610_v24  ;;  %v2623_v38 = vsel %vm2554_vm9, %v2621_v29, %v2622_v31  ;;  %v2648_v44 = vrot.slane %v9223_v5, 1 }
 0x1ee   : > { %v2620_v42 = vsel %vm2554_vm9, %v2618_v10, %v2619_v19  ;;  %v2632_v39 = vsel %vm2554_vm9, %v2630_v35, %v2631_v61  ;;  %v3478_v61 = vld [vmem:[#allocation3 + $0xc] sm:$0xf] }
 0x1ef   : > { %v2650_v24 = vsel %vm2554_vm9, %v2648_v44, %v2649_v55 }
 0x1f0   : > { %4055 = vmatpush1.bf16.msra.mxu0 %v10781_v11  ;;  %v2615_v11 = vrot.slane %v2506_v7, 1  ;;  %v2470_v19 = vpop.permute.xlu1 %2469  ;;  %v12575_v7 = vld [vmem:[%s14988_s2] ss:$0 sm:$0xff] }
 0x1f1   : > { %4056 = vmatprep.subr.bf16.mxu0 %v10786_v36  ;;  %v2521_v22 = vsel %vm945_vm8, %v15033_v56, %v2470_v19 }
 0x1f2   : > { %v2617_v26 = vsel %vm2554_vm9, %v2615_v11, %v2616_v59 }
 0x1f3   : > { %2885 = vmatmul.mubr.bf16.gmra.mrb[20].mxu0 %v2587_v4  ;;  %v10789_v4 = vld [vmem:[%s14989_s3 + $0xb4] ss:$8 sps:$4 sm:$0xff]  }
 0x1f4   : > { %9266 = vmatprep.mubr.msk.bf16.mxu0 %vm945_vm8, %v2596_v60  ;;  %4057 = vmatpush1.bf16.msra.mxu0 %v10784_v47  ;;  %v2464_v60 = vpop.permute.xlu0 %2463 }
 0x1f5   : > { %4058 = vmatprep.subr.bf16.mxu0 %v10789_v4  ;;  %10046 = vmatprep.subr.bf16.mxu1 %v10789_v4  ;;  %v2512_v23 = vsel %vm945_vm8, %v15030_v41, %v2464_v60  ;;  %v2640_v41 = vrot.slane %v12329_v43, 1  ;;  %v10818_v43 = vld [vmem:[%s14989_s3 + $0x104] ss:$8 sps:$4 sm:$0xff]  }
 0x1f6   : > { %10062 = vmatpush1.bf16.msra.mxu1 %v10787_v50  ;;  %v2627_v54 = vrot.slane %v2512_v23, 1  ;;  %v3484_v23 = vld [vmem:[#allocation3 + $0x14] sm:$0x1] }
 0x1f7   : > { %10047 = vmatprep.subr.bf16.mxu1 %v10792_v0 }
 0x1f8   : > { %4059 = vmatpush1.bf16.msra.mxu0 %v10787_v50  ;;  %v2468_v9 = vpop.permute.xlu0 %2467 }
 0x1f9   : > { %4060 = vmatprep.subr.bf16.mxu0 %v10792_v0 }
 0x1fb   : > { %2893 = vmatmul.mubr.bf16.gmra.mrb[24].mxu0 %v2593_v57  ;;  %v2628_v57 = vrot.slane %v12293_v30, 1  ;;  %v2515_v30 = vsel %vm945_vm8, %v15031_v18, %v2466_v14 }
 0x1fc   : > { %9267 = vmatprep.mubr.msk.bf16.mxu0 %vm945_vm8, %v2602_v37  ;;  %v10790_v37 = vld [vmem:[%s14989_s3 + $0xc0] ss:$8 sps:$4 sm:$0xff]   ;;  %v2633_v20 = vrot.slane %v2515_v30, 1 }
 0x1fd   : > { %10063 = vmatpush1.bf16.msra.mxu1 %v10790_v37  ;;  %4061 = vmatpush1.bf16.msra.mxu0 %v10790_v37  ;;  %v2629_v21 = vsel %vm2554_vm9, %v2627_v54, %v2628_v57 }
 0x1fe   : > { %4062 = vmatprep.subr.bf16.mxu0 %v10795_v48  ;;  %10048 = vmatprep.subr.bf16.mxu1 %v10795_v48  ;;  %v2635_v8 = vsel %vm2554_vm9, %v2633_v20, %v2634_v62 }
 0x201   : > { %4063 = vmatpush1.bf16.msra.mxu0 %v10793_v1  ;;  %10064 = vmatpush1.bf16.msra.mxu1 %v10793_v1 }
 0x203   : > { %2901 = vmatmul.mubr.bf16.gmra.mrb[28].mxu0 %v2599_v58  ;;  %v10798_v58 = vld [vmem:[%s14989_s3 + $0xe4] ss:$8 sps:$4 sm:$0xff]  }
 0x204   : > { %9268 = vmatprep.mubr.msk.bf16.mxu0 %vm945_vm8, %v2608_v17  ;;  %v2643_v17 = vrot.slane %v12315_v2, 1  ;;  %4064 = vmatprep.subr.bf16.mxu0 %v10798_v58 }
 0x205   : > { %10049 = vmatprep.subr.bf16.mxu1 %v10798_v58  ;;  %4065 = vmatpush1.bf16.msra.mxu0 %v10796_v27 }
 0x206   : > { %v2644_v2 = vsel %vm2554_vm9, %v2642_v46, %v2643_v17  ;;  %10065 = vmatpush1.bf16.msra.mxu1 %v10796_v27  ;;  %4066 = vmatprep.subr.bf16.mxu0 %v10801_v52  ;;  %v3487_v46 = vld [vmem:[#allocation3 + $0x18] sm:$0xf] }
 0x207   : > { %10050 = vmatprep.subr.bf16.mxu1 %v10801_v52  ;;  %v3491_v52 = vld [vmem:[#allocation3 + $0x20] sm:$0x1] }
 0x20b   : > { %2909 = vmatmul.mubr.bf16.gmra.mrb[32].mxu0 %v2605_v53  ;;  %v2518_v53 = vsel %vm945_vm8, %v15032_v32, %v2468_v9 }
 0x20c   : > { %9269 = vmatprep.mubr.msk.bf16.mxu0 %vm945_vm8, %v2614_v34  ;;  %v10799_v34 = vld [vmem:[%s14989_s3 + $0xf0] ss:$8 sps:$4 sm:$0xff]   ;;  %v2639_v10 = vrot.slane %v2518_v53, 1 }
 0x20d   : > { %4067 = vmatpush1.bf16.msra.mxu0 %v10799_v34  ;;  %10066 = vmatpush1.bf16.msra.mxu1 %v10799_v34 }
 0x20e   : > { %v2641_v16 = vsel %vm2554_vm9, %v2639_v10, %v2640_v41  ;;  %4229 = vmatprep.subr.bf16.mxu1 %v10818_v43  ;;  %v10803_v10 = vld [vmem:[#allocation3] sm:$0xff]  }
 0x213   : > { %2917 = vmatmul.mubr.bf16.gmra.mrb[36].mxu0 %v2611_v51  ;;  %v2645_v51 = vrot.slane %v2521_v22, 1 }
 0x214   : > { %9270 = vmatprep.mubr.msk.bf16.mxu0 %vm945_vm8, %v2620_v42  ;;  %v2646_v42 = vrot.slane %v12341_v28, 1 }
 0x216   : > { %v2647_v15 = vsel %vm2554_vm9, %v2645_v51, %v2646_v42 }
 0x21b   : > { %2925 = vmatmul.mubr.bf16.gmra.mrb[40].mxu0 %v2617_v26 }
 0x21c   : > { %9271 = vmatprep.mubr.msk.bf16.mxu0 %vm945_vm8, %v2626_v45 }
 0x223   : > { %2933 = vmatmul.mubr.bf16.gmra.mrb[44].mxu0 %v2623_v38 }
 0x224   : > { %9272 = vmatprep.mubr.msk.bf16.mxu0 %vm945_vm8, %v2632_v39 }
 0x22b   : > { %2941 = vmatmul.mubr.bf16.gmra.mrb[48].mxu0 %v2629_v21 }
 0x22c   : > { %9273 = vmatprep.mubr.msk.bf16.mxu0 %vm945_vm8, %v2638_v3 }
 0x233   : > { %2949 = vmatmul.mubr.bf16.gmra.mrb[52].mxu0 %v2635_v8 }
 0x234   : > { %9274 = vmatprep.mubr.msk.bf16.mxu0 %vm945_vm8, %v2644_v2 }
 0x23b   : > { %2957 = vmatmul.mubr.bf16.gmra.mrb[56].mxu0 %v2641_v16 }
 0x23c   : > { %9275 = vmatprep.mubr.msk.bf16.mxu0 %vm945_vm8, %v2650_v24 }
 0x243   : > { %2965 = vmatmul.mubr.bf16.gmra.mrb[60].mxu0 %v2647_v15 }
 0x29e   : > { %v2846_v18 = vpop.f32.mrb[0].mxu0 }
 0x29f   : > { %v10067_v40 = vadd.f32 %v12575_v7, %v2846_v18  ;;  %v2848_v12 = vpop.f32.mrb[1].mxu0 }
 0x2a0   : > { %v2849_v59 = vpop.f32.mrb[2].mxu0  ;;  %v3494_v12 = vld [vmem:[#allocation3 + $0x24] sm:$0xf] }
 0x2a1   : > { %v9938_v28 = vpack.c.bf16 %v10067_v40, %v10067_v40  ;;  %v10068_v11 = vadd.f32 %v12575_v7, %v2849_v59  ;;  %v2851_v25 = vpop.f32.mrb[3].mxu0 }
 0x2a3   : > { %v3156_v45 = vshrl.u32 %v9938_v28, 16  ;;  %v9939_v26 = vpack.c.bf16 %v10068_v11, %v10068_v11  ;;  %v3159_v36 = vshll.u32 %v9938_v28, 16 }
 0x2a5   : > { %v3158_v49 = vrot.slane %v3156_v45, 7  ;;  %v3164_v32 = vshrl.u32 %v9939_v26, 16  ;;  %v3167_v60 = vshll.u32 %v9939_v26, 16 }
 0x2a6   : > { %v2854_v47 = vpop.f32.mrb[4].mxu0 }
 0x2a7   : > { %v3161_v31 = vor.u32 %v3159_v36, %v3158_v49  ;;  %v3166_v29 = vrot.slane %v3164_v32, 7  ;;  %v10069_v4 = vadd.f32 %v12575_v7, %v2854_v47  ;;  %v2856_v39 = vpop.f32.mrb[5].mxu0  ;;  %v3162_v50 = vrot.slane %v3158_v49, 4 }
 0x2a8   : > { %v2857_v0 = vpop.f32.mrb[6].mxu0 }
 0x2a9   : > { %v3479_v56 = vsel %vm12580_vm13, %v3161_v31, %v3478_v61  ;;  %v3169_v33 = vor.u32 %v3167_v60, %v3166_v29  ;;  %v3171_v63 = vrot.slane %v3166_v29, 4  ;;  %v9940_v37 = vpack.c.bf16 %v10069_v4, %v10069_v4  ;;  %v2859_v57 = vpop.f32.mrb[7].mxu0  ;;  %v3498_v61 = vld [vmem:[#allocation3 + $0x2c] sm:$0x1] }
 0x2aa   : > { %3480 = vst [vmem:[#allocation3 + $0xc] sm:$0xf] %v3479_v56  ;;  %v10070_v54 = vadd.f32 %v12575_v7, %v2857_v0 }
 0x2ab   : > { %v3170_v3 = vsel %vm11437_vm5, %v3162_v50, %v3169_v33  ;;  %v3485_v48 = vsel %vm12586_vm14, %v3171_v63, %v3484_v23  ;;  %v3173_v21 = vshrl.u32 %v9940_v37, 16  ;;  %v3176_v13 = vshll.u32 %v9940_v37, 16 }
 0x2ac   : > { %3481 = vst [vmem:[#allocation3 + $0x10] sm:$0xf] %v3170_v3  ;;  %3486 = vst [vmem:[#allocation3 + $0x14] sm:$0x1] %v3485_v48  ;;  %v9941_v1 = vpack.c.bf16 %v10070_v54, %v10070_v54 }
 0x2ad   : > { %v3175_v30 = vrot.slane %v3173_v21, 7 }
 0x2ae   : > { %v3181_v17 = vshrl.u32 %v9941_v1, 16  ;;  %v2862_v58 = vpop.f32.mrb[8].mxu0  ;;  %v3184_v9 = vshll.u32 %v9941_v1, 16 }
 0x2af   : > { %v3178_v62 = vor.u32 %v3176_v13, %v3175_v30  ;;  %v10071_v20 = vadd.f32 %v12575_v7, %v2862_v58  ;;  %v2864_v6 = vpop.f32.mrb[9].mxu0  ;;  %v3179_v44 = vrot.slane %v3175_v30, 4 }
 0x2b0   : > { %v3183_v27 = vrot.slane %v3181_v17, 7  ;;  %v2865_v2 = vpop.f32.mrb[10].mxu0 }
 0x2b1   : > { %v3488_v5 = vsel %vm12580_vm13, %v3178_v62, %v3487_v46  ;;  %v9942_v8 = vpack.c.bf16 %v10071_v20, %v10071_v20  ;;  %v10072_v34 = vadd.f32 %v12575_v7, %v2865_v2  ;;  %v2867_v53 = vpop.f32.mrb[11].mxu0  ;;  %v5658_v40 = vld [vmem:[#allocation3 + $0xc] sm:$0xe]  ;;  %v3501_v46 = vld [vmem:[#allocation3 + $0x30] sm:$0xf] }
 0x2b2   : > { %3489 = vst [vmem:[#allocation3 + $0x18] sm:$0xf] %v3488_v5  ;;  %v3186_v55 = vor.u32 %v3184_v9, %v3183_v27  ;;  %v3188_v41 = vrot.slane %v3183_v27, 4 }
 0x2b3   : > { %v3190_v19 = vshrl.u32 %v9942_v8, 16  ;;  %v9943_v24 = vpack.c.bf16 %v10072_v34, %v10072_v34  ;;  %v10802_v16 = vld [vmem:[#allocation3 + $0xc] sm:$0xff]   ;;  %v3193_v43 = vshll.u32 %v9942_v8, 16  ;;  %v10890_v28 = vld [vmem:[#allocation3 + $0x14] ss:$0 sps:$4 sm:$0x11]  }
 0x2b4   : > { %v3187_v22 = vsel %vm11437_vm5, %v3179_v44, %v3186_v55  ;;  %v3492_v42 = vsel %vm12586_vm14, %v3188_v41, %v3491_v52  ;;  %v4490_v51 = vld [vmem:[#allocation3 + $0x10] sm:$0xf]  ;;  %4068 = vmatprep.mubr.bf16.mxu0 %v10802_v16  ;;  %v5733_v0 = vrot.slane %v10890_v28, 1  ;;  %v3505_v8 = vld [vmem:[#allocation3 + $0x38] sm:$0x1] }
 0x2b5   : > { %3490 = vst [vmem:[#allocation3 + $0x1c] sm:$0xf] %v3187_v22  ;;  %3493 = vst [vmem:[#allocation3 + $0x20] sm:$0x1] %v3492_v42  ;;  %v3192_v15 = vrot.slane %v3190_v19, 7  ;;  %v3198_v18 = vshrl.u32 %v9943_v24, 16  ;;  %4069 = vmatmul.mubr.bf16.vlgmr.msra.gmra.mrb[64].mxu0 %v10803_v10  ;;  %v9507_v11 = vcombine.low %v5658_v40, %v4490_v51 }
 0x2b6   : > { %v2870_v59 = vpop.f32.mrb[12].mxu0  ;;  %v3201_v26 = vshll.u32 %v9943_v24, 16  ;;  %v3508_v28 = vld [vmem:[#allocation3 + $0x3c] sm:$0xf] }
 0x2b7   : > { %v3195_v25 = vor.u32 %v3193_v43, %v3192_v15  ;;  %v3200_v45 = vrot.slane %v3198_v18, 7  ;;  %v10073_v49 = vadd.f32 %v12575_v7, %v2870_v59  ;;  %v2872_v36 = vpop.f32.mrb[13].mxu0  ;;  %v3196_v32 = vrot.slane %v3192_v15, 4 }
 0x2b8   : > { %v2873_v47 = vpop.f32.mrb[14].mxu0  ;;  %v5732_v31 = vrot.slane %v9507_v11, 1 }
 0x2b9   : > { %v3495_v29 = vsel %vm12580_vm13, %v3195_v25, %v3494_v12  ;;  %v3203_v60 = vor.u32 %v3201_v26, %v3200_v45  ;;  %v3205_v4 = vrot.slane %v3200_v45, 4  ;;  %v9944_v39 = vpack.c.bf16 %v10073_v49, %v10073_v49  ;;  %v2875_v50 = vpop.f32.mrb[15].mxu0  ;;  %v5659_v37 = vld [vmem:[#allocation3 + $0x18] sm:$0xe] }
 0x2ba   : > { %3496 = vst [vmem:[#allocation3 + $0x24] sm:$0xf] %v3495_v29  ;;  %v10074_v23 = vadd.f32 %v12575_v7, %v2873_v47  ;;  %v12614_v21 = vsel %vm2554_vm9, %v5732_v31, %v5733_v0  ;;  %v3512_v31 = vld [vmem:[#allocation3 + $0x44] sm:$0x1] }
 0x2bb   : > { %v3204_v56 = vsel %vm11437_vm5, %v3196_v32, %v3203_v60  ;;  %v3499_v33 = vsel %vm12586_vm14, %v3205_v4, %v3498_v61  ;;  %v3207_v63 = vshrl.u32 %v9944_v39, 16  ;;  %v3210_v57 = vshll.u32 %v9944_v39, 16 }
 0x2bc   : > { %3497 = vst [vmem:[#allocation3 + $0x28] sm:$0xf] %v3204_v56  ;;  %3500 = vst [vmem:[#allocation3 + $0x2c] sm:$0x1] %v3499_v33  ;;  %v9945_v54 = vpack.c.bf16 %v10074_v23, %v10074_v23  ;;  %v10804_v3 = vld [vmem:[#allocation3 + $0x18] sm:$0xff]  }
 0x2bd   : > { %v4493_v48 = vld [vmem:[#allocation3 + $0x1c] sm:$0xf]  ;;  %v3209_v1 = vrot.slane %v3207_v63, 7  ;;  %v10897_v30 = vld [vmem:[#allocation3 + $0x20] ss:$0 sps:$4 sm:$0x11]   ;;  %4078 = vmatprep.mubr.bf16.mxu0 %v10804_v3 }
 0x2be   : > { %v9508_v13 = vcombine.low %v5659_v37, %v4493_v48  ;;  %v3215_v17 = vshrl.u32 %v9945_v54, 16  ;;  %v2878_v58 = vpop.f32.mrb[16].mxu0  ;;  %4079 = vmatmul.mubr.bf16.gmra.mrb[68].mxu0 %v10802_v16  ;;  %v3218_v9 = vshll.u32 %v9945_v54, 16  ;;  %v5736_v55 = vrot.slane %v10897_v30, 1 }
 0x2bf   : > { %v3212_v62 = vor.u32 %v3210_v57, %v3209_v1  ;;  %v10075_v20 = vadd.f32 %v12575_v7, %v2878_v58  ;;  %v2880_v6 = vpop.f32.mrb[17].mxu0  ;;  %v3213_v41 = vrot.slane %v3209_v1, 4 }
 0x2c0   : > { %v3217_v27 = vrot.slane %v3215_v17, 7  ;;  %v2881_v2 = vpop.f32.mrb[18].mxu0  ;;  %v5735_v5 = vrot.slane %v9508_v13, 1 }
 0x2c1   : > { %v3502_v52 = vsel %vm12580_vm13, %v3212_v62, %v3501_v46  ;;  %v9946_v34 = vpack.c.bf16 %v10075_v20, %v10075_v20  ;;  %v10076_v53 = vadd.f32 %v12575_v7, %v2881_v2  ;;  %v2883_v44 = vpop.f32.mrb[19].mxu0  ;;  %v5660_v59 = vld [vmem:[#allocation3 + $0x24] sm:$0xe]  ;;  %v3515_v62 = vld [vmem:[#allocation3 + $0x48] sm:$0xf] }
 0x2c2   : > { %3503 = vst [vmem:[#allocation3 + $0x30] sm:$0xf] %v3502_v52  ;;  %v3220_v10 = vor.u32 %v3218_v9, %v3217_v27  ;;  %v3222_v19 = vrot.slane %v3217_v27, 4  ;;  %v12621_v42 = vsel %vm2554_vm9, %v5735_v5, %v5736_v55  ;;  %v3519_v44 = vld [vmem:[#allocation3 + $0x50] sm:$0x1] }
 0x2c3   : > { %v3224_v24 = vshrl.u32 %v9946_v34, 16  ;;  %v9947_v22 = vpack.c.bf16 %v10076_v53, %v10076_v53  ;;  %v10805_v16 = vld [vmem:[#allocation3 + $0x24] sm:$0xff]   ;;  %v3227_v40 = vshll.u32 %v9946_v34, 16  ;;  %v10899_v25 = vld [vmem:[#allocation3 + $0x2c] ss:$0 sps:$4 sm:$0x11]  }
 0x2c4   : > { %v3221_v51 = vsel %vm11437_vm5, %v3213_v41, %v3220_v10  ;;  %v3506_v15 = vsel %vm12586_vm14, %v3222_v19, %v3505_v8  ;;  %v4496_v43 = vld [vmem:[#allocation3 + $0x28] sm:$0xf]  ;;  %4088 = vmatprep.mubr.bf16.mxu0 %v10805_v16  ;;  %v5739_v33 = vrot.slane %v10899_v25, 1 }
 0x2c5   : > { %3504 = vst [vmem:[#allocation3 + $0x34] sm:$0xf] %v3221_v51  ;;  %3507 = vst [vmem:[#allocation3 + $0x38] sm:$0x1] %v3506_v15  ;;  %v3226_v18 = vrot.slane %v3224_v24, 7  ;;  %v3232_v12 = vshrl.u32 %v9947_v22, 16  ;;  %v9509_v45 = vcombine.low %v5660_v59, %v4496_v43 }
 0x2c6   : > { %v2886_v11 = vpop.f32.mrb[20].mxu0  ;;  %v3235_v36 = vshll.u32 %v9947_v22, 16  ;;  %4089 = vmatmul.mubr.bf16.gmra.mrb[72].mxu0 %v10804_v3 }
 0x2c7   : > { %v3229_v26 = vor.u32 %v3227_v40, %v3226_v18  ;;  %v3234_v49 = vrot.slane %v3232_v12, 7  ;;  %v10077_v32 = vadd.f32 %v12575_v7, %v2886_v11  ;;  %v2888_v61 = vpop.f32.mrb[21].mxu0  ;;  %v3230_v47 = vrot.slane %v3226_v18, 4 }
 0x2c8   : > { %v2889_v29 = vpop.f32.mrb[22].mxu0  ;;  %v5738_v60 = vrot.slane %v9509_v45, 1 }
 0x2c9   : > { %v3509_v4 = vsel %vm12580_vm13, %v3229_v26, %v3508_v28  ;;  %v3237_v39 = vor.u32 %v3235_v36, %v3234_v49  ;;  %v3239_v50 = vrot.slane %v3234_v49, 4  ;;  %v9948_v23 = vpack.c.bf16 %v10077_v32, %v10077_v32  ;;  %v2891_v0 = vpop.f32.mrb[23].mxu0  ;;  %v5661_v54 = vld [vmem:[#allocation3 + $0x30] sm:$0xe]  ;;  %v3522_v26 = vld [vmem:[#allocation3 + $0x54] sm:$0xf] }
 0x2ca   : > { %3510 = vst [vmem:[#allocation3 + $0x3c] sm:$0xf] %v3509_v4  ;;  %v10078_v56 = vadd.f32 %v12575_v7, %v2889_v29  ;;  %v12638_v13 = vsel %vm2554_vm9, %v5738_v60, %v5739_v33 }
 0x2cb   : > { %v3238_v63 = vsel %vm11437_vm5, %v3230_v47, %v3237_v39  ;;  %v3513_v37 = vsel %vm12586_vm14, %v3239_v50, %v3512_v31  ;;  %v3241_v57 = vshrl.u32 %v9948_v23, 16  ;;  %v3244_v3 = vshll.u32 %v9948_v23, 16  ;;  %v3526_v39 = vld [vmem:[#allocation3 + $0x5c] sm:$0x1] }
 0x2cc   : > { %3511 = vst [vmem:[#allocation3 + $0x40] sm:$0xf] %v3238_v63  ;;  %3514 = vst [vmem:[#allocation3 + $0x44] sm:$0x1] %v3513_v37  ;;  %v9949_v48 = vpack.c.bf16 %v10078_v56, %v10078_v56  ;;  %v12635_v1 = vld [vmem:[#allocation3 + $0x30] sm:$0xff]  }
 0x2cd   : > { %v4499_v30 = vld [vmem:[#allocation3 + $0x34] sm:$0xf]  ;;  %v3243_v46 = vrot.slane %v3241_v57, 7  ;;  %v10901_v17 = vld [vmem:[#allocation3 + $0x38] ss:$0 sps:$4 sm:$0x11]   ;;  %4098 = vmatprep.mubr.bf16.mxu0 %v12635_v1 }
 0x2ce   : > { %v9510_v58 = vcombine.low %v5661_v54, %v4499_v30  ;;  %v3249_v20 = vshrl.u32 %v9949_v48, 16  ;;  %v2894_v6 = vpop.f32.mrb[24].mxu0  ;;  %4099 = vmatmul.mubr.bf16.gmra.mrb[76].mxu0 %v10805_v16  ;;  %v3252_v52 = vshll.u32 %v9949_v48, 16  ;;  %v5742_v19 = vrot.slane %v10901_v17, 1 }
 0x2cf   : > { %v3246_v27 = vor.u32 %v3244_v3, %v3243_v46  ;;  %v10079_v9 = vadd.f32 %v12575_v7, %v2894_v6  ;;  %v2896_v2 = vpop.f32.mrb[25].mxu0  ;;  %v3247_v24 = vrot.slane %v3243_v46, 4 }
 0x2d0   : > { %v3251_v5 = vrot.slane %v3249_v20, 7  ;;  %v2897_v8 = vpop.f32.mrb[26].mxu0  ;;  %v5741_v34 = vrot.slane %v9510_v58, 1 }
 0x2d1   : > { %v3516_v53 = vsel %vm12580_vm13, %v3246_v27, %v3515_v62  ;;  %v9950_v55 = vpack.c.bf16 %v10079_v9, %v10079_v9  ;;  %v10080_v41 = vadd.f32 %v12575_v7, %v2897_v8  ;;  %v2899_v10 = vpop.f32.mrb[27].mxu0  ;;  %v5662_v45 = vld [vmem:[#allocation3 + $0x3c] sm:$0xe] }
 0x2d2   : > { %3517 = vst [vmem:[#allocation3 + $0x48] sm:$0xf] %v3516_v53  ;;  %v3254_v22 = vor.u32 %v3252_v52, %v3251_v5  ;;  %v3256_v51 = vrot.slane %v3251_v5, 4  ;;  %v12648_v18 = vsel %vm2554_vm9, %v5741_v34, %v5742_v19  ;;  %v3529_v5 = vld [vmem:[#allocation3 + $0x60] sm:$0xf] }
 0x2d3   : > { %v3258_v15 = vshrl.u32 %v9950_v55, 16  ;;  %v9951_v43 = vpack.c.bf16 %v10080_v41, %v10080_v41  ;;  %v12645_v16 = vld [vmem:[#allocation3 + $0x3c] sm:$0xff]   ;;  %v3261_v11 = vshll.u32 %v9950_v55, 16  ;;  %v10903_v36 = vld [vmem:[#allocation3 + $0x44] ss:$0 sps:$4 sm:$0x11]  }
 0x2d4   : > { %v3255_v40 = vsel %vm11437_vm5, %v3247_v24, %v3254_v22  ;;  %v3520_v12 = vsel %vm12586_vm14, %v3256_v51, %v3519_v44  ;;  %v4502_v59 = vld [vmem:[#allocation3 + $0x40] sm:$0xf]  ;;  %4108 = vmatprep.mubr.bf16.mxu0 %v12645_v16  ;;  %v5745_v54 = vrot.slane %v10903_v36, 1  ;;  %v3533_v22 = vld [vmem:[#allocation3 + $0x68] sm:$0x1] }
 0x2d5   : > { %3518 = vst [vmem:[#allocation3 + $0x4c] sm:$0xf] %v3255_v40  ;;  %3521 = vst [vmem:[#allocation3 + $0x50] sm:$0x1] %v3520_v12  ;;  %v3260_v28 = vrot.slane %v3258_v15, 7  ;;  %v3266_v25 = vshrl.u32 %v9951_v43, 16  ;;  %v9511_v32 = vcombine.low %v5662_v45, %v4502_v59 }
 0x2d6   : > { %v2902_v49 = vpop.f32.mrb[28].mxu0  ;;  %v3269_v31 = vshll.u32 %v9951_v43, 16  ;;  %4109 = vmatmul.mubr.bf16.gmra.mrb[80].mxu0 %v12635_v1 }
 0x2d7   : > { %v3263_v61 = vor.u32 %v3261_v11, %v3260_v28  ;;  %v3268_v47 = vrot.slane %v3266_v25, 7  ;;  %v10081_v29 = vadd.f32 %v12575_v7, %v2902_v49  ;;  %v2904_v60 = vpop.f32.mrb[29].mxu0  ;;  %v3264_v4 = vrot.slane %v3260_v28, 4 }
 0x2d8   : > { %v2905_v50 = vpop.f32.mrb[30].mxu0  ;;  %v5744_v23 = vrot.slane %v9511_v32, 1  ;;  %v3536_v60 = vld [vmem:[#allocation3 + $0x6c] sm:$0xf] }
 0x2d9   : > { %v3523_v0 = vsel %vm12580_vm13, %v3263_v61, %v3522_v26  ;;  %v3271_v56 = vor.u32 %v3269_v31, %v3268_v47  ;;  %v3273_v33 = vrot.slane %v3268_v47, 4  ;;  %v9952_v63 = vpack.c.bf16 %v10081_v29, %v10081_v29  ;;  %v2907_v37 = vpop.f32.mrb[31].mxu0  ;;  %v5663_v46 = vld [vmem:[#allocation3 + $0x48] sm:$0xe] }
 0x2da   : > { %3524 = vst [vmem:[#allocation3 + $0x54] sm:$0xf] %v3523_v0  ;;  %v10082_v57 = vadd.f32 %v12575_v7, %v2905_v50  ;;  %v12667_v6 = vsel %vm2554_vm9, %v5744_v23, %v5745_v54 }
 0x2db   : > { %v3272_v3 = vsel %vm11437_vm5, %v3264_v4, %v3271_v56  ;;  %v3527_v48 = vsel %vm12586_vm14, %v3273_v33, %v3526_v39  ;;  %v3275_v30 = vshrl.u32 %v9952_v63, 16  ;;  %v3278_v17 = vshll.u32 %v9952_v63, 16 }
 0x2dc   : > { %3525 = vst [vmem:[#allocation3 + $0x58] sm:$0xf] %v3272_v3  ;;  %3528 = vst [vmem:[#allocation3 + $0x5c] sm:$0x1] %v3527_v48  ;;  %v9953_v58 = vpack.c.bf16 %v10082_v57, %v10082_v57  ;;  %v12664_v62 = vld [vmem:[#allocation3 + $0x48] sm:$0xff]  }
 0x2dd   : > { %v4505_v20 = vld [vmem:[#allocation3 + $0x4c] sm:$0xf]  ;;  %v3277_v27 = vrot.slane %v3275_v30, 7  ;;  %v10905_v9 = vld [vmem:[#allocation3 + $0x50] ss:$0 sps:$4 sm:$0x11]   ;;  %4118 = vmatprep.mubr.bf16.mxu0 %v12664_v62 }
 0x2de   : > { %v9512_v2 = vcombine.low %v5663_v46, %v4505_v20  ;;  %v3283_v52 = vshrl.u32 %v9953_v58, 16  ;;  %v2910_v8 = vpop.f32.mrb[32].mxu0  ;;  %4119 = vmatmul.mubr.bf16.gmra.mrb[84].mxu0 %v12645_v16  ;;  %v3286_v41 = vshll.u32 %v9953_v58, 16  ;;  %v5748_v40 = vrot.slane %v10905_v9, 1  ;;  %v3540_v57 = vld [vmem:[#allocation3 + $0x74] sm:$0x1] }
 0x2df   : > { %v3280_v34 = vor.u32 %v3278_v17, %v3277_v27  ;;  %v10083_v53 = vadd.f32 %v12575_v7, %v2910_v8  ;;  %v2912_v44 = vpop.f32.mrb[33].mxu0  ;;  %v3281_v12 = vrot.slane %v3277_v27, 4 }
 0x2e0   : > { %v3285_v55 = vrot.slane %v3283_v52, 7  ;;  %v2913_v10 = vpop.f32.mrb[34].mxu0  ;;  %v5747_v19 = vrot.slane %v9512_v2, 1 }
 0x2e1   : > { %v3530_v24 = vsel %vm12580_vm13, %v3280_v34, %v3529_v5  ;;  %v9954_v51 = vpack.c.bf16 %v10083_v53, %v10083_v53  ;;  %v10084_v15 = vadd.f32 %v12575_v7, %v2913_v10  ;;  %v2915_v43 = vpop.f32.mrb[35].mxu0  ;;  %v5664_v29 = vld [vmem:[#allocation3 + $0x54] sm:$0xe] }
 0x2e2   : > { %3531 = vst [vmem:[#allocation3 + $0x60] sm:$0xf] %v3530_v24  ;;  %v3288_v59 = vor.u32 %v3286_v41, %v3285_v55  ;;  %v3290_v28 = vrot.slane %v3285_v55, 4  ;;  %v12678_v26 = vsel %vm2554_vm9, %v5747_v19, %v5748_v40  ;;  %v3543_v24 = vld [vmem:[#allocation3 + $0x78] sm:$0xf] }
 0x2e3   : > { %v3292_v11 = vshrl.u32 %v9954_v51, 16  ;;  %v9955_v25 = vpack.c.bf16 %v10084_v15, %v10084_v15  ;;  %v12675_v45 = vld [vmem:[#allocation3 + $0x54] sm:$0xff]   ;;  %v3295_v47 = vshll.u32 %v9954_v51, 16  ;;  %v10907_v39 = vld [vmem:[#allocation3 + $0x5c] ss:$0 sps:$4 sm:$0x11]  }
 0x2e4   : > { %v3289_v49 = vsel %vm11437_vm5, %v3281_v12, %v3288_v59  ;;  %v3534_v36 = vsel %vm12586_vm14, %v3290_v28, %v3533_v22  ;;  %v4508_v32 = vld [vmem:[#allocation3 + $0x58] sm:$0xf]  ;;  %4128 = vmatprep.mubr.bf16.mxu0 %v12675_v45  ;;  %v5751_v27 = vrot.slane %v10907_v39, 1 }
 0x2e5   : > { %3532 = vst [vmem:[#allocation3 + $0x64] sm:$0xf] %v3289_v49  ;;  %3535 = vst [vmem:[#allocation3 + $0x68] sm:$0x1] %v3534_v36  ;;  %v3294_v61 = vrot.slane %v3292_v11, 7  ;;  %v3300_v31 = vshrl.u32 %v9955_v25, 16  ;;  %v9513_v50 = vcombine.low %v5664_v29, %v4508_v32 }
 0x2e6   : > { %v2918_v4 = vpop.f32.mrb[36].mxu0  ;;  %v3303_v56 = vshll.u32 %v9955_v25, 16  ;;  %4129 = vmatmul.mubr.bf16.gmra.mrb[88].mxu0 %v12664_v62  ;;  %v3547_v49 = vld [vmem:[#allocation3 + $0x80] sm:$0x1] }
 0x2e7   : > { %v3297_v23 = vor.u32 %v3295_v47, %v3294_v61  ;;  %v3302_v0 = vrot.slane %v3300_v31, 7  ;;  %v10085_v33 = vadd.f32 %v12575_v7, %v2918_v4  ;;  %v2920_v63 = vpop.f32.mrb[37].mxu0  ;;  %v3298_v37 = vrot.slane %v3294_v61, 4 }
 0x2e8   : > { %v2921_v54 = vpop.f32.mrb[38].mxu0  ;;  %v5750_v3 = vrot.slane %v9513_v50, 1 }
 0x2e9   : > { %v3537_v48 = vsel %vm12580_vm13, %v3297_v23, %v3536_v60  ;;  %v3305_v30 = vor.u32 %v3303_v56, %v3302_v0  ;;  %v3307_v46 = vrot.slane %v3302_v0, 4  ;;  %v9956_v17 = vpack.c.bf16 %v10085_v33, %v10085_v33  ;;  %v2923_v58 = vpop.f32.mrb[39].mxu0  ;;  %v5665_v52 = vld [vmem:[#allocation3 + $0x60] sm:$0xe] }
 0x2ea   : > { %3538 = vst [vmem:[#allocation3 + $0x6c] sm:$0xf] %v3537_v48  ;;  %v10086_v20 = vadd.f32 %v12575_v7, %v2921_v54  ;;  %v12697_v55 = vsel %vm2554_vm9, %v5750_v3, %v5751_v27  ;;  %v3550_v3 = vld [vmem:[#allocation3 + $0x84] sm:$0xf] }
 0x2eb   : > { %v3306_v9 = vsel %vm11437_vm5, %v3298_v37, %v3305_v30  ;;  %v3541_v2 = vsel %vm12586_vm14, %v3307_v46, %v3540_v57  ;;  %v3309_v5 = vshrl.u32 %v9956_v17, 16  ;;  %v3312_v8 = vshll.u32 %v9956_v17, 16 }
 0x2ec   : > { %3539 = vst [vmem:[#allocation3 + $0x70] sm:$0xf] %v3306_v9  ;;  %3542 = vst [vmem:[#allocation3 + $0x74] sm:$0x1] %v3541_v2  ;;  %v9957_v34 = vpack.c.bf16 %v10086_v20, %v10086_v20  ;;  %v12694_v53 = vld [vmem:[#allocation3 + $0x60] sm:$0xff]  }
 0x2ed   : > { %v4511_v44 = vld [vmem:[#allocation3 + $0x64] sm:$0xf]  ;;  %v3311_v41 = vrot.slane %v3309_v5, 7  ;;  %v10909_v10 = vld [vmem:[#allocation3 + $0x68] ss:$0 sps:$4 sm:$0x11]   ;;  %4138 = vmatprep.mubr.bf16.mxu0 %v12694_v53 }
 0x2ee   : > { %v9514_v19 = vcombine.low %v5665_v52, %v4511_v44  ;;  %v3317_v22 = vshrl.u32 %v9957_v34, 16  ;;  %v2926_v51 = vpop.f32.mrb[40].mxu0  ;;  %4139 = vmatmul.mubr.bf16.gmra.mrb[92].mxu0 %v12675_v45  ;;  %v3320_v59 = vshll.u32 %v9957_v34, 16  ;;  %v5754_v47 = vrot.slane %v10909_v10, 1  ;;  %v3554_v20 = vld [vmem:[#allocation3 + $0x8c] sm:$0x1] }
 0x2ef   : > { %v3314_v15 = vor.u32 %v3312_v8, %v3311_v41  ;;  %v10087_v43 = vadd.f32 %v12575_v7, %v2926_v51  ;;  %v2928_v40 = vpop.f32.mrb[41].mxu0  ;;  %v3315_v31 = vrot.slane %v3311_v41, 4 }
 0x2f0   : > { %v3319_v12 = vrot.slane %v3317_v22, 7  ;;  %v2929_v28 = vpop.f32.mrb[42].mxu0  ;;  %v5753_v11 = vrot.slane %v9514_v19, 1  ;;  %v10821_v40 = vld [vmem:[%s14989_s3 + $0x114] ss:$8 sps:$4 sm:$0xff]  }
 0x2f1   : > { %v3544_v25 = vsel %vm12580_vm13, %v3314_v15, %v3543_v24  ;;  %v9958_v36 = vpack.c.bf16 %v10087_v43, %v10087_v43  ;;  %v10088_v32 = vadd.f32 %v12575_v7, %v2929_v28  ;;  %v2931_v61 = vpop.f32.mrb[43].mxu0  ;;  %v5666_v54 = vld [vmem:[#allocation3 + $0x6c] sm:$0xe]  ;;  %v10816_v43 = vld [vmem:[%s14989_s3 + $0x100] ss:$8 sps:$4 sm:$0xff]  }
 0x2f2   : > { %3545 = vst [vmem:[#allocation3 + $0x78] sm:$0xf] %v3544_v25  ;;  %v3322_v29 = vor.u32 %v3320_v59, %v3319_v12  ;;  %v3324_v60 = vrot.slane %v3319_v12, 4  ;;  %v12708_v23 = vsel %vm2554_vm9, %v5753_v11, %v5754_v47 }
 0x2f3   : > { %v3326_v4 = vshrl.u32 %v9958_v36, 16  ;;  %v9959_v39 = vpack.c.bf16 %v10088_v32, %v10088_v32  ;;  %v12705_v50 = vld [vmem:[#allocation3 + $0x6c] sm:$0xff]   ;;  %v3329_v37 = vshll.u32 %v9958_v36, 16  ;;  %v10911_v52 = vld [vmem:[#allocation3 + $0x74] ss:$0 sps:$4 sm:$0x11]  }
 0x2f4   : > { %v3323_v0 = vsel %vm11437_vm5, %v3315_v31, %v3322_v29  ;;  %v3548_v56 = vsel %vm12586_vm14, %v3324_v60, %v3547_v49  ;;  %v4514_v33 = vld [vmem:[#allocation3 + $0x70] sm:$0xf]  ;;  %4148 = vmatprep.mubr.bf16.mxu0 %v12705_v50  ;;  %v5757_v11 = vrot.slane %v10911_v52, 1 }
 0x2f5   : > { %3546 = vst [vmem:[#allocation3 + $0x7c] sm:$0xf] %v3323_v0  ;;  %3549 = vst [vmem:[#allocation3 + $0x80] sm:$0x1] %v3548_v56  ;;  %v3328_v63 = vrot.slane %v3326_v4, 7  ;;  %v3334_v57 = vshrl.u32 %v9959_v39, 16  ;;  %v9515_v30 = vcombine.low %v5666_v54, %v4514_v33 }
 0x2f6   : > { %v2934_v48 = vpop.f32.mrb[44].mxu0  ;;  %v3337_v58 = vshll.u32 %v9959_v39, 16  ;;  %4149 = vmatmul.mubr.bf16.gmra.mrb[96].mxu0 %v12694_v53  ;;  %v3557_v32 = vld [vmem:[#allocation3 + $0x90] sm:$0xf]  ;;  %v3561_v4 = vld [vmem:[#allocation3 + $0x98] sm:$0x1] }
 0x2f7   : > { %v3331_v46 = vor.u32 %v3329_v37, %v3328_v63  ;;  %v3336_v17 = vrot.slane %v3334_v57, 7  ;;  %v10089_v27 = vadd.f32 %v12575_v7, %v2934_v48  ;;  %v2936_v9 = vpop.f32.mrb[45].mxu0  ;;  %v3332_v2 = vrot.slane %v3328_v63, 4  ;;  %v10819_v56 = vld [vmem:[%s14989_s3 + $0x110] ss:$8 sps:$4 sm:$0xff]  }
 0x2f8   : > { %v2937_v5 = vpop.f32.mrb[46].mxu0  ;;  %v5756_v24 = vrot.slane %v9515_v30, 1 }
 0x2f9   : > { %v3551_v8 = vsel %vm12580_vm13, %v3331_v46, %v3550_v3  ;;  %v3339_v34 = vor.u32 %v3337_v58, %v3336_v17  ;;  %v3341_v44 = vrot.slane %v3336_v17, 4  ;;  %v9960_v41 = vpack.c.bf16 %v10089_v27, %v10089_v27  ;;  %v2939_v10 = vpop.f32.mrb[47].mxu0  ;;  %v5667_v36 = vld [vmem:[#allocation3 + $0x78] sm:$0xe]  ;;  %v10825_v46 = vld [vmem:[%s14989_s3 + $0x124] ss:$8 sps:$4 sm:$0xff]  }
 0x2fa   : > { %3552 = vst [vmem:[#allocation3 + $0x84] sm:$0xf] %v3551_v8  ;;  %v10090_v19 = vadd.f32 %v12575_v7, %v2937_v5  ;;  %v12736_v31 = vsel %vm2554_vm9, %v5756_v24, %v5757_v11  ;;  %v10828_v24 = vld [vmem:[%s14989_s3 + $0x134] ss:$8 sps:$4 sm:$0xff]  }
 0x2fb   : > { %v3340_v22 = vsel %vm11437_vm5, %v3332_v2, %v3339_v34  ;;  %v3555_v51 = vsel %vm12586_vm14, %v3341_v44, %v3554_v20  ;;  %v3343_v15 = vshrl.u32 %v9960_v41, 16  ;;  %v3346_v49 = vshll.u32 %v9960_v41, 16  ;;  %v10823_v34 = vld [vmem:[%s14989_s3 + $0x120] ss:$8 sps:$4 sm:$0xff]  }
 0x2fc   : > { %3553 = vst [vmem:[#allocation3 + $0x88] sm:$0xf] %v3340_v22  ;;  %3556 = vst [vmem:[#allocation3 + $0x8c] sm:$0x1] %v3555_v51  ;;  %v9961_v12 = vpack.c.bf16 %v10090_v19, %v10090_v19  ;;  %v12730_v59 = vld [vmem:[#allocation3 + $0x78] sm:$0xff]  }
 0x2fd   : > { %v12732_v28 = vld [vmem:[#allocation3 + $0x7c] sm:$0xf]  ;;  %v3345_v25 = vrot.slane %v3343_v15, 7  ;;  %4158 = vmatprep.mubr.bf16.mxu1 %v12730_v59  ;;  %v12744_v57 = vld [vmem:[#allocation3 + $0x80] ss:$0 sps:$4 sm:$0x11]  }
 0x2fe   : > { %v3351_v61 = vshrl.u32 %v9961_v12, 16  ;;  %v2942_v47 = vpop.f32.mrb[48].mxu0  ;;  %v9516_v29 = vcombine.low %v5667_v36, %v12732_v28  ;;  %4159 = vmatmul.mubr.bf16.vlgmr.msra.gmra.mrb[0].mxu1 %v12705_v50  ;;  %v3354_v63 = vshll.u32 %v9961_v12, 16  ;;  %v5760_v44 = vrot.slane %v12744_v57, 1  ;;  %v3564_v22 = vld [vmem:[#allocation3 + $0x9c] sm:$0xf] }
 0x2ff   : > { %v3348_v60 = vor.u32 %v3346_v49, %v3345_v25  ;;  %v10091_v39 = vadd.f32 %v12575_v7, %v2942_v47  ;;  %v2944_v0 = vpop.f32.mrb[49].mxu0  ;;  %4230 = vmatpush1.bf16.msra.mxu1 %v10816_v43  ;;  %v3349_v17 = vrot.slane %v3345_v25, 4  ;;  %v3568_v36 = vld [vmem:[#allocation3 + $0xa4] sm:$0x1] }
 0x300   : > { %v3353_v33 = vrot.slane %v3351_v61, 7  ;;  %v2945_v37 = vpop.f32.mrb[50].mxu0  ;;  %4231 = vmatprep.subr.bf16.mxu1 %v10821_v40  ;;  %v5759_v27 = vrot.slane %v9516_v29, 1  ;;  %v10826_v61 = vld [vmem:[%s14989_s3 + $0x130] ss:$8 sps:$4 sm:$0xff]  }
 0x301   : > { %v3558_v54 = vsel %vm12580_vm13, %v3348_v60, %v3557_v32  ;;  %v9962_v3 = vpack.c.bf16 %v10091_v39, %v10091_v39  ;;  %v10092_v48 = vadd.f32 %v12575_v7, %v2945_v37  ;;  %v2947_v30 = vpop.f32.mrb[51].mxu0  ;;  %v10832_v0 = vld [vmem:[%s14989_s3 + $0x144] ss:$8 sps:$4 sm:$0xff]  }
 0x302   : > { %3559 = vst [vmem:[#allocation3 + $0x90] sm:$0xf] %v3558_v54  ;;  %v3356_v58 = vor.u32 %v3354_v63, %v3353_v33  ;;  %v3358_v20 = vrot.slane %v3353_v33, 4  ;;  %v12767_v15 = vsel %vm2554_vm9, %v5759_v27, %v5760_v44  ;;  %v10830_v30 = vld [vmem:[%s14989_s3 + $0x140] ss:$8 sps:$4 sm:$0xff]  }
 0x303   : > { %v3360_v9 = vshrl.u32 %v9962_v3, 16  ;;  %v9963_v2 = vpack.c.bf16 %v10092_v48, %v10092_v48  ;;  %v12752_v5 = vld [vmem:[#allocation3 + $0x84] sm:$0xff]   ;;  %4232 = vmatpush1.bf16.msra.mxu1 %v10819_v56  ;;  %v3363_v10 = vshll.u32 %v9962_v3, 16 }
 0x304   : > { %v3357_v52 = vsel %vm11437_vm5, %v3349_v17, %v3356_v58  ;;  %v3562_v8 = vsel %vm12586_vm14, %v3358_v20, %v3561_v4  ;;  %4168 = vmatprep.mubr.bf16.mxu1 %v12752_v5  ;;  %4233 = vmatprep.subr.bf16.mxu1 %v10825_v46  ;;  %v12784_v54 = vld [vmem:[#allocation3 + $0x88] sm:$0xf]  ;;  %v10835_v17 = vld [vmem:[%s14989_s3 + $0x154] ss:$8 sps:$4 sm:$0xff]  }
 0x305   : > { %3560 = vst [vmem:[#allocation3 + $0x94] sm:$0xf] %v3357_v52  ;;  %3563 = vst [vmem:[#allocation3 + $0x98] sm:$0x1] %v3562_v8  ;;  %v3362_v41 = vrot.slane %v3360_v9, 7  ;;  %v3368_v19 = vshrl.u32 %v9963_v2, 16 }
 0x306   : > { %v2950_v51 = vpop.f32.mrb[52].mxu0  ;;  %v3371_v12 = vshll.u32 %v9963_v2, 16  ;;  %4169 = vmatmul.mubr.bf16.gmra.mrb[4].mxu1 %v12730_v59  ;;  %v5668_v58 = vld [vmem:[#allocation3 + $0x84] sm:$0xe]  ;;  %v3571_v20 = vld [vmem:[#allocation3 + $0xa8] sm:$0xf] }
 0x307   : > { %v3365_v43 = vor.u32 %v3363_v10, %v3362_v41  ;;  %v3370_v40 = vrot.slane %v3368_v19, 7  ;;  %v10093_v11 = vadd.f32 %v12575_v7, %v2950_v51  ;;  %v2952_v25 = vpop.f32.mrb[53].mxu0  ;;  %v3366_v49 = vrot.slane %v3362_v41, 4  ;;  %4234 = vmatpush1.bf16.msra.mxu1 %v10823_v34  ;;  %v10833_v2 = vld [vmem:[%s14989_s3 + $0x150] ss:$8 sps:$4 sm:$0xff]  }
 0x308   : > { %v2953_v32 = vpop.f32.mrb[54].mxu0  ;;  %4235 = vmatprep.subr.bf16.mxu1 %v10828_v24  ;;  %v9517_v52 = vcombine.low %v5668_v58, %v12784_v54  ;;  %v3575_v34 = vld [vmem:[#allocation3 + $0xb0] sm:$0x1]  ;;  %v12802_v44 = vld [vmem:[%s14988_s2] ss:$0 sm:$0xff] }
 0x309   : > { %v3565_v47 = vsel %vm12580_vm13, %v3365_v43, %v3564_v22  ;;  %v3373_v29 = vor.u32 %v3371_v12, %v3370_v40  ;;  %v3375_v60 = vrot.slane %v3370_v40, 4  ;;  %v9964_v4 = vpack.c.bf16 %v10093_v11, %v10093_v11  ;;  %v2955_v39 = vpop.f32.mrb[55].mxu0  ;;  %v10839_v19 = vld [vmem:[%s14989_s3 + $0x164] ss:$8 sps:$4 sm:$0xff]   ;;  %v10842_v58 = vld [vmem:[%s14989_s3 + $0x174] ss:$8 sps:$4 sm:$0xff]  }
 0x30a   : > { %3566 = vst [vmem:[#allocation3 + $0x9c] sm:$0xf] %v3565_v47  ;;  %v10094_v56 = vadd.f32 %v12575_v7, %v2953_v32  ;;  %v12811_v40 = vld [vmem:[#allocation3 + $0x8c] ss:$0 sps:$4 sm:$0x11]  }
 0x30b   : > { %v3374_v33 = vsel %vm11437_vm5, %v3366_v49, %v3373_v29  ;;  %v3569_v63 = vsel %vm12586_vm14, %v3375_v60, %v3568_v36  ;;  %v3377_v37 = vshrl.u32 %v9964_v4, 16  ;;  %4236 = vmatpush1.bf16.msra.mxu1 %v10826_v61  ;;  %v3380_v46 = vshll.u32 %v9964_v4, 16  ;;  %v5669_v32 = vld [vmem:[#allocation3 + $0x90] sm:$0xe] }
 0x30c   : > { %3567 = vst [vmem:[#allocation3 + $0xa0] sm:$0xf] %v3374_v33  ;;  %3570 = vst [vmem:[#allocation3 + $0xa4] sm:$0x1] %v3569_v63  ;;  %v9965_v3 = vpack.c.bf16 %v10094_v56, %v10094_v56  ;;  %v12786_v48 = vld [vmem:[#allocation3 + $0x90] sm:$0xff]   ;;  %4237 = vmatprep.subr.bf16.mxu1 %v10832_v0  ;;  %v5762_v29 = vrot.slane %v9517_v52, 1 }
 0x30d   : > { %v3379_v7 = vrot.slane %v3377_v37, 7  ;;  %4178 = vmatprep.mubr.bf16.mxu1 %v12786_v48  ;;  %v12809_v24 = vld [vmem:[#allocation3 + $0x94] sm:$0xf]  ;;  %v10837_v37 = vld [vmem:[%s14989_s3 + $0x160] ss:$8 sps:$4 sm:$0xff]  }
 0x30e   : > { %v3385_v27 = vshrl.u32 %v9965_v3, 16  ;;  %v2958_v9 = vpop.f32.mrb[56].mxu0  ;;  %4179 = vmatmul.mubr.bf16.gmra.mrb[8].mxu1 %v12752_v5  ;;  %v3388_v51 = vshll.u32 %v9965_v3, 16  ;;  %v9518_v60 = vcombine.low %v5669_v32, %v12809_v24  ;;  %v3578_v63 = vld [vmem:[#allocation3 + $0xb4] sm:$0xf] }
 0x30f   : > { %v3382_v8 = vor.u32 %v3380_v46, %v3379_v7  ;;  %v10095_v41 = vadd.f32 %v12802_v44, %v2958_v9  ;;  %v2960_v10 = vpop.f32.mrb[57].mxu0  ;;  %4238 = vmatpush1.bf16.msra.mxu1 %v10830_v30  ;;  %v3383_v12 = vrot.slane %v3379_v7, 4  ;;  %v12826_v3 = vld [vmem:[#allocation3 + $0x98] ss:$0 sps:$4 sm:$0x11]   ;;  %v5763_v30 = vrot.slane %v12811_v40, 1 }
 0x310   : > { %v3387_v22 = vrot.slane %v3385_v27, 7  ;;  %v2961_v43 = vpop.f32.mrb[58].mxu0  ;;  %4239 = vmatprep.subr.bf16.mxu1 %v10835_v17  ;;  %v10840_v9 = vld [vmem:[%s14989_s3 + $0x170] ss:$8 sps:$4 sm:$0xff]   ;;  %v5765_v52 = vrot.slane %v9518_v60, 1 }
 0x311   : > { %v3572_v11 = vsel %vm12580_vm13, %v3382_v8, %v3571_v20  ;;  %v9966_v25 = vpack.c.bf16 %v10095_v41, %v10095_v41  ;;  %v10096_v49 = vadd.f32 %v12802_v44, %v2961_v43  ;;  %v2963_v36 = vpop.f32.mrb[59].mxu0  ;;  %v3582_v20 = vld [vmem:[#allocation3 + $0xbc] sm:$0x1] }
 0x312   : > { %3573 = vst [vmem:[#allocation3 + $0xa8] sm:$0xf] %v3572_v11  ;;  %v3390_v61 = vor.u32 %v3388_v51, %v3387_v22  ;;  %v3392_v47 = vrot.slane %v3387_v22, 4  ;;  %v10845_v22 = vld [vmem:[%s14989_s3 + $0x184] ss:$8 sps:$4 sm:$0xff]   ;;  %v5766_v11 = vrot.slane %v12826_v3, 1 }
 0x313   : > { %v3394_v4 = vshrl.u32 %v9966_v25, 16  ;;  %v9967_v39 = vpack.c.bf16 %v10096_v49, %v10096_v49  ;;  %v12817_v0 = vld [vmem:[#allocation3 + $0x9c] sm:$0xff]   ;;  %4240 = vmatpush1.bf16.msra.mxu1 %v10833_v2  ;;  %v3397_v46 = vshll.u32 %v9966_v25, 16  ;;  %v12837_v2 = vsel %vm2554_vm9, %v5762_v29, %v5763_v30 }
 0x314   : > { %v3391_v56 = vsel %vm11437_vm5, %v3383_v12, %v3390_v61  ;;  %v3576_v33 = vsel %vm12586_vm14, %v3392_v47, %v3575_v34  ;;  %4188 = vmatprep.mubr.bf16.mxu1 %v12817_v0  ;;  %4241 = vmatprep.subr.bf16.mxu1 %v10839_v19  ;;  %v12844_v12 = vld [vmem:[#allocation3 + $0xa4] ss:$0 sps:$4 sm:$0x11]   ;;  %v12849_v47 = vld [vmem:[#allocation3 + $0xa0] sm:$0xf]  ;;  %v12853_v60 = vsel %vm2554_vm9, %v5765_v52, %v5766_v11 }
 0x315   : > { %3574 = vst [vmem:[#allocation3 + $0xac] sm:$0xf] %v3391_v56  ;;  %3577 = vst [vmem:[#allocation3 + $0xb0] sm:$0x1] %v3576_v33  ;;  %v3396_v7 = vrot.slane %v3394_v4, 7  ;;  %v3402_v17 = vshrl.u32 %v9967_v39, 16 }
 0x316   : > { %v2966_v27 = vpop.f32.mrb[60].mxu0  ;;  %v3405_v41 = vshll.u32 %v9967_v39, 16  ;;  %4189 = vmatmul.mubr.bf16.gmra.mrb[12].mxu1 %v12786_v48  ;;  %v5670_v33 = vld [vmem:[#allocation3 + $0x9c] sm:$0xe] }
 0x317   : > { %v3399_v8 = vor.u32 %v3397_v46, %v3396_v7  ;;  %v3404_v34 = vrot.slane %v3402_v17, 7  ;;  %v10097_v10 = vadd.f32 %v12802_v44, %v2966_v27  ;;  %v2968_v19 = vpop.f32.mrb[61].mxu0  ;;  %v3400_v51 = vrot.slane %v3396_v7, 4  ;;  %4242 = vmatpush1.bf16.msra.mxu1 %v10837_v37  ;;  %v3585_v27 = vld [vmem:[#allocation3 + $0xc0] sm:$0xf] }
 0x318   : > { %v2969_v43 = vpop.f32.mrb[62].mxu0  ;;  %4243 = vmatprep.subr.bf16.mxu1 %v10842_v58  ;;  %v5769_v58 = vrot.slane %v12844_v12, 1 }
 0x319   : > { %v3579_v25 = vsel %vm12580_vm13, %v3399_v8, %v3578_v63  ;;  %v3407_v49 = vor.u32 %v3405_v41, %v3404_v34  ;;  %v3409_v36 = vrot.slane %v3404_v34, 4  ;;  %v9968_v32 = vpack.c.bf16 %v10097_v10, %v10097_v10  ;;  %v2971_v61 = vpop.f32.mrb[63].mxu0  ;;  %v5671_v63 = vld [vmem:[#allocation3 + $0xa8] sm:$0xe] }
 0x31a   : > { %3580 = vst [vmem:[#allocation3 + $0xb4] sm:$0xf] %v3579_v25  ;;  %v10098_v29 = vadd.f32 %v12802_v44, %v2969_v43  ;;  %v9519_v44 = vcombine.low %v5670_v33, %v12849_v47  ;;  %v3589_v43 = vld [vmem:[#allocation3 + $0xc8] sm:$0x1] }
 0x31b   : > { %v3408_v4 = vsel %vm11437_vm5, %v3400_v51, %v3407_v49  ;;  %v3583_v39 = vsel %vm12586_vm14, %v3409_v36, %v3582_v20  ;;  %v3411_v56 = vshrl.u32 %v9968_v32, 16  ;;  %4244 = vmatpush1.bf16.msra.mxu1 %v10840_v9  ;;  %v3414_v17 = vshll.u32 %v9968_v32, 16 }
 0x31c   : > { %3581 = vst [vmem:[#allocation3 + $0xb8] sm:$0xf] %v3408_v4  ;;  %3584 = vst [vmem:[#allocation3 + $0xbc] sm:$0x1] %v3583_v39  ;;  %v9969_v37 = vpack.c.bf16 %v10098_v29, %v10098_v29  ;;  %v12859_v30 = vld [vmem:[#allocation3 + $0xa8] sm:$0xff]   ;;  %5207 = vmatprep.subr.bf16.mxu1 %v10845_v22  ;;  %v5768_v8 = vrot.slane %v9519_v44, 1 }
 0x31d   : > { %v12861_v7 = vld [vmem:[#allocation3 + $0xac] sm:$0xf]  ;;  %v3413_v46 = vrot.slane %v3411_v56, 7  ;;  %4198 = vmatprep.mubr.bf16.mxu1 %v12859_v30  ;;  %v12868_v9 = vld [vmem:[#allocation3 + $0xb0] ss:$0 sps:$4 sm:$0x11]  }
 0x31e   : > { %v9520_v20 = vcombine.low %v5671_v63, %v12861_v7  ;;  %v3419_v52 = vshrl.u32 %v9969_v37, 16  ;;  %4199 = vmatmul.mubr.bf16.gmra.mrb[16].mxu1 %v12817_v0  ;;  %v3422_v10 = vshll.u32 %v9969_v37, 16  ;;  %v12871_v19 = vsel %vm2554_vm9, %v5768_v8, %v5769_v58 }
 0x31f   : > { %v3416_v34 = vor.u32 %v3414_v17, %v3413_v46  ;;  %v3417_v11 = vrot.slane %v3413_v46, 4  ;;  %v5772_v36 = vrot.slane %v12868_v9, 1 }
 0x320   : > { %v3421_v41 = vrot.slane %v3419_v52, 7  ;;  %v5771_v22 = vrot.slane %v9520_v20, 1  ;;  %v15040_v20 = vmov 0  }
 0x321   : > { %v3586_v51 = vsel %vm12580_vm13, %v3416_v34, %v3585_v27  ;;  %v5672_v56 = vld [vmem:[#allocation3 + $0xb4] sm:$0xe]  ;;  %v10843_v34 = vld [vmem:[%s14989_s3 + $0x180] ss:$8 sps:$4 sm:$0xff]  }
 0x322   : > { %3587 = vst [vmem:[#allocation3 + $0xc0] sm:$0xf] %v3586_v51  ;;  %v3424_v25 = vor.u32 %v3422_v10, %v3421_v41  ;;  %v3426_v49 = vrot.slane %v3421_v41, 4  ;;  %v12887_v35 = vsel %vm2554_vm9, %v5771_v22, %v5772_v36  ;;  %v10848_v41 = vld [vmem:[%s14989_s3 + $0x194] ss:$8 sps:$4 sm:$0xff]  }
 0x323   : > { %v12876_v32 = vld [vmem:[#allocation3 + $0xb4] sm:$0xff]   ;;  %v12884_v39 = vld [vmem:[#allocation3 + $0xbc] ss:$0 sps:$4 sm:$0x11]  }
 0x324   : > { %v12878_v61 = vld [vmem:[#allocation3 + $0xb8] sm:$0xf]  ;;  %v3425_v29 = vsel %vm11437_vm5, %v3417_v11, %v3424_v25  ;;  %v3590_v4 = vsel %vm12586_vm14, %v3426_v49, %v3589_v43  ;;  %4208 = vmatprep.mubr.bf16.mxu1 %v12876_v32  ;;  %v5775_v14 = vrot.slane %v12884_v39, 1  ;;  %v10851_v51 = vld [vmem:[%s14989_s3 + $0x1a4] ss:$8 sps:$4 sm:$0xff]   ;;  %v11076_v25 = vld [vmem:[#allocation3 + $0x24] sm:$0xff]  }
 0x325   : > { %3588 = vst [vmem:[#allocation3 + $0xc4] sm:$0xf] %v3425_v29  ;;  %3591 = vst [vmem:[#allocation3 + $0xc8] sm:$0x1] %v3590_v4  ;;  %v9521_v33 = vcombine.low %v5672_v56, %v12878_v61  ;;  %v11075_v10 = vld [vmem:[#allocation3 + $0x18] sm:$0xff]  }
 0x326   : > { %4209 = vmatmul.mubr.bf16.gmra.mrb[20].mxu1 %v12859_v30  ;;  %v10846_v22 = vld [vmem:[%s14989_s3 + $0x190] ss:$8 sps:$4 sm:$0xff]   ;;  %v10849_v43 = vld [vmem:[%s14989_s3 + $0x1a0] ss:$8 sps:$4 sm:$0xff]   ;;  %v10854_v11 = vld [vmem:[%s14989_s3 + $0x1b4] ss:$8 sps:$4 sm:$0xff]  }
 0x327   : > { %v5774_v63 = vrot.slane %v9521_v33, 1  ;;  %v10852_v49 = vld [vmem:[%s14989_s3 + $0x1b0] ss:$8 sps:$4 sm:$0xff]   ;;  %v10857_v36 = vld [vmem:[%s14989_s3 + $0x1c4] ss:$8 sps:$4 sm:$0xff]  }
 0x328   : > { %v10855_v29 = vld [vmem:[%s14989_s3 + $0x1c0] ss:$8 sps:$4 sm:$0xff]   ;;  %v10860_v4 = vld [vmem:[%s14989_s3 + $0x1d4] ss:$8 sps:$4 sm:$0xff]   ;;  %v10858_v56 = vld [vmem:[%s14989_s3 + $0x1d0] ss:$8 sps:$4 sm:$0xff]  }
 0x329   : > { %v12894_v38 = vsel %vm2554_vm9, %v5774_v63, %v5775_v14  ;;  %v5673_v37 = vld [vmem:[#allocation3 + $0xc0] sm:$0xe]  ;;  %v10863_v33 = vld [vmem:[%s14989_s3 + $0x1e4] ss:$8 sps:$4 sm:$0xff]   ;;  %v10861_v14 = vld [vmem:[%s14989_s3 + $0x1e0] ss:$8 sps:$4 sm:$0xff]  }
 0x32a   : > { %v10864_v63 = vld [vmem:[%s14989_s3 + $0x1f0] ss:$8 sps:$4 sm:$0xff]  }
 0x32c   : > { %v12896_v44 = vld [vmem:[#allocation3 + $0xc0] sm:$0xff]   ;;  %v12902_v58 = vld [vmem:[#allocation3 + $0xc8] ss:$0 sps:$4 sm:$0x11]  }
 0x32d   : > { %v12898_v46 = vld [vmem:[#allocation3 + $0xc4] sm:$0xf]  ;;  %4218 = vmatprep.mubr.bf16.mxu1 %v12896_v44  ;;  %v5778_v52 = vrot.slane %v12902_v58, 1 }
 0x32e   : > { %v9522_v17 = vcombine.low %v5673_v37, %v12898_v46  ;;  %4219 = vmatmul.mubr.bf16.gmra.mrb[24].mxu1 %v12876_v32  ;;  %v10869_v37 = vld [vmem:[%s14989_s3 + $0x204] ss:$8 sps:$4 sm:$0xff]  }
 0x32f   : > { %4261 = vmatprep.mubr.bf16.mxu1 %v15040_v20 }
 0x330   : > { %v5777_v27 = vrot.slane %v9522_v17, 1  ;;  %v10867_v17 = vld [vmem:[%s14989_s3 + $0x200] ss:$8 sps:$4 sm:$0xff]  }
 0x332   : > { %v12908_v8 = vsel %vm2554_vm9, %v5777_v27, %v5778_v52  ;;  %v10870_v27 = vld [vmem:[%s14989_s3 + $0x210] ss:$8 sps:$4 sm:$0xff]   ;;  %v10875_v52 = vld [vmem:[%s14989_s3 + $0x224] ss:$8 sps:$4 sm:$0xff]  }
 0x336   : > { %4262 = vmatmul.mubr.bf16.vlgmr.msra.gmra.mrb[28].mxu1 %v11075_v10  ;;  %v10881_v10 = vld [vmem:[%s14989_s3 + $0x244] ss:$8 sps:$4 sm:$0xff]  }
 0x337   : > { %4271 = vmatprep.mubr.bf16.mxu1 %v15040_v20  ;;  %5208 = vmatpush1.bf16.msra.mxu1 %v10843_v34  ;;  %v10873_v34 = vld [vmem:[%s14989_s3 + $0x220] ss:$8 sps:$4 sm:$0xff]  }
 0x338   : > { %5209 = vmatprep.subr.bf16.mxu1 %v10848_v41  ;;  %v10876_v41 = vld [vmem:[%s14989_s3 + $0x230] ss:$8 sps:$4 sm:$0xff]  }
 0x33b   : > { %5210 = vmatpush1.bf16.msra.mxu1 %v10846_v22  ;;  %v10879_v22 = vld [vmem:[%s14989_s3 + $0x240] ss:$8 sps:$4 sm:$0xff]  }
 0x33c   : > { %5211 = vmatprep.subr.bf16.mxu1 %v10851_v51  ;;  %v10882_v51 = vld [vmem:[%s14989_s3 + $0x250] ss:$8 sps:$4 sm:$0xff]  }
 0x33e   : > { %4272 = vmatmul.mubr.bf16.gmra.mrb[32].mxu1 %v11076_v25  ;;  %v10891_v25 = vld [vmem:[%s14989_s3 + $0x270] ss:$8 sps:$4 sm:$0xff]  }
 0x33f   : > { %4281 = vmatprep.mubr.bf16.mxu1 %v15040_v20  ;;  %5212 = vmatpush1.bf16.msra.mxu1 %v10849_v43  ;;  %v10888_v43 = vld [vmem:[%s14989_s3 + $0x264] ss:$8 sps:$4 sm:$0xff]  }
 0x340   : > { %5213 = vmatprep.subr.bf16.mxu1 %v10854_v11  ;;  %v10886_v11 = vld [vmem:[%s14989_s3 + $0x260] ss:$8 sps:$4 sm:$0xff]  }
 0x343   : > { %5214 = vmatpush1.bf16.msra.mxu1 %v10852_v49  ;;  %v10916_v49 = vld [vmem:[%s14989_s3 + $0x284] ss:$8 sps:$4 sm:$0xff]  }
 0x344   : > { %5215 = vmatprep.subr.bf16.mxu1 %v10857_v36 }
 0x346   : > { %4282 = vmatmul.mubr.bf16.gmra.mrb[36].mxu1 %v12635_v1  ;;  %v10866_v1 = vld [vmem:[%s14989_s3 + $0x1f4] ss:$8 sps:$4 sm:$0xff]  }
 0x347   : > { %4291 = vmatprep.mubr.bf16.mxu1 %v15040_v20  ;;  %5216 = vmatpush1.bf16.msra.mxu1 %v10855_v29 }
 0x348   : > { %5217 = vmatprep.subr.bf16.mxu1 %v10860_v4 }
 0x34b   : > { %5218 = vmatpush1.bf16.msra.mxu1 %v10858_v56 }
 0x34c   : > { %5219 = vmatprep.subr.bf16.mxu1 %v10863_v33 }
 0x34e   : > { %4292 = vmatmul.mubr.bf16.gmra.mrb[40].mxu1 %v12645_v16  ;;  %v10872_v16 = vld [vmem:[%s14989_s3 + $0x214] ss:$8 sps:$4 sm:$0xff]  }
 0x34f   : > { %4301 = vmatprep.mubr.bf16.mxu1 %v15040_v20  ;;  %5220 = vmatpush1.bf16.msra.mxu1 %v10861_v14 }
 0x350   : > { %5221 = vmatprep.subr.bf16.mxu1 %v10866_v1 }
 0x353   : > { %5222 = vmatpush1.bf16.msra.mxu1 %v10864_v63  ;;  %v4489_v63 = vld [vmem:[#allocation3 + $0xc] sm:$0xf] }
 0x354   : > { %5223 = vmatprep.subr.bf16.mxu1 %v10869_v37  ;;  %v11077_v37 = vld [vmem:[#allocation3 + $0x10] sm:$0xf] }
 0x356   : > { %4302 = vmatmul.mubr.bf16.gmra.mrb[44].mxu1 %v12664_v62  ;;  %v10878_v62 = vld [vmem:[%s14989_s3 + $0x234] ss:$8 sps:$4 sm:$0xff]  }
 0x357   : > { %4311 = vmatprep.mubr.bf16.mxu1 %v15040_v20  ;;  %5224 = vmatpush1.bf16.msra.mxu1 %v10867_v17  ;;  %v9376_v17 = vcombine.low %v4489_v63, %v11077_v37 }
 0x358   : > { %5225 = vmatprep.subr.bf16.mxu1 %v10872_v16  ;;  %v4486_v16 = vld [vmem:[#allocation3] sm:$0xf] }
 0x35b   : > { %5226 = vmatpush1.bf16.msra.mxu1 %v10870_v27  ;;  %v13056_v27 = vld [vmem:[#allocation3 + $0x4] sm:$0xf] }
 0x35c   : > { %5227 = vmatprep.subr.bf16.mxu1 %v10875_v52 }
 0x35e   : > { %4312 = vmatmul.mubr.bf16.gmra.mrb[48].mxu1 %v12675_v45  ;;  %v10884_v45 = vld [vmem:[%s14989_s3 + $0x254] ss:$8 sps:$4 sm:$0xff]  }
 0x35f   : > { %4321 = vmatprep.mubr.bf16.mxu1 %v15040_v20  ;;  %5228 = vmatpush1.bf16.msra.mxu1 %v10873_v34  ;;  %v4699_v34 = vshll.u32 %v9376_v17, 16 }
 0x360   : > { %5229 = vmatprep.subr.bf16.mxu1 %v10878_v62 }
 0x363   : > { %5230 = vmatpush1.bf16.msra.mxu1 %v10876_v41  ;;  %v9374_v41 = vcombine.low %v4486_v16, %v13056_v27  ;;  %v10885_v16 = vld [vmem:[#allocation3 + $0xcc] sm:$0xff]  }
 0x364   : > { %5231 = vmatprep.subr.bf16.mxu1 %v10881_v10 }
 0x366   : > { %4322 = vmatmul.mubr.bf16.gmra.mrb[52].mxu1 %v12694_v53  ;;  %v10893_v53 = vld [vmem:[%s14989_s3 + $0x274] ss:$8 sps:$4 sm:$0xff]  }
 0x367   : > { %4331 = vmatprep.mubr.bf16.mxu1 %v15040_v20  ;;  %5232 = vmatpush1.bf16.msra.mxu1 %v10879_v22  ;;  %v4492_v22 = vld [vmem:[#allocation3 + $0x18] sm:$0xf] }
 0x368   : > { %5233 = vmatprep.subr.bf16.mxu1 %v10884_v45  ;;  %v11078_v45 = vld [vmem:[#allocation3 + $0x1c] sm:$0xf] }
 0x36b   : > { %5234 = vmatpush1.bf16.msra.mxu1 %v10882_v51  ;;  %v9378_v51 = vcombine.low %v4492_v22, %v11078_v45 }
 0x36c   : > { %5235 = vmatprep.subr.bf16.mxu1 %v10888_v43  ;;  %v13069_v43 = vld [vmem:[#allocation3 + $0x8] ss:$0 sps:$4 sm:$0x11]  }
 0x36d   : > { %v4692_v22 = vshll.u32 %v13069_v43, 16 }
 0x36e   : > { %4332 = vmatmul.mubr.bf16.gmra.mrb[56].mxu1 %v12705_v50 }
 0x36f   : > { %4341 = vmatprep.mubr.bf16.mxu1 %v15040_v20  ;;  %5236 = vmatpush1.bf16.msra.mxu1 %v10886_v11  ;;  %v4687_v11 = vshll.u32 %v9374_v41, 16 }
 0x370   : > { %5237 = vmatprep.subr.bf16.mxu1 %v10893_v53  ;;  %v4697_v53 = vshrl.u32 %v9376_v17, 16 }
 0x373   : > { %5238 = vmatpush1.bf16.msra.mxu1 %v10891_v25  ;;  %v11079_v25 = vld [vmem:[#allocation3 + $0x14] ss:$0 sps:$4 sm:$0x11]  }
 0x374   : > { %5400 = vmatprep.subr.bf16.mxu1 %v10916_v49  ;;  %v4704_v49 = vshll.u32 %v11079_v25, 16 }
 0x376   : > { %4342 = vmatmul.mubr.bf16.gmra.mrb[60].mxu1 %v12730_v59 }
 0x377   : > { %4351 = vmatprep.mubr.bf16.mxu1 %v15040_v20 }
 0x37e   : > { %4352 = vmatmul.mubr.bf16.gmra.mrb[0].mxu1 %v12752_v5 }
 0x37f   : > { %4361 = vmatprep.mubr.bf16.mxu1 %v15040_v20 }
 0x386   : > { %4362 = vmatmul.mubr.bf16.gmra.mrb[4].mxu1 %v12786_v48 }
 0x387   : > { %4371 = vmatprep.mubr.bf16.mxu1 %v15040_v20 }
 0x388   : > { %v13026_v50 = vpop.f32.mrb[64].mxu0 }
 0x389   : > { %v13028_v36 = vpop.f32.mrb[65].mxu0 }
 0x38a   : > { %v13030_v59 = vpop.f32.mrb[66].mxu0 }
 0x38b   : > { %v13032_v29 = vpop.f32.mrb[67].mxu0 }
 0x38e   : > { %4372 = vmatmul.mubr.bf16.gmra.mrb[8].mxu1 %v12817_v0 }
 0x38f   : > { %4381 = vmatprep.mubr.bf16.mxu1 %v15040_v20 }
 0x391   : > { %v13036_v4 = vpop.f32.mrb[68].mxu0 }
 0x392   : > { %v13038_v5 = vpop.f32.mrb[69].mxu0 }
 0x393   : > { %v13040_v56 = vpop.f32.mrb[70].mxu0 }
 0x394   : > { %v13042_v48 = vpop.f32.mrb[71].mxu0 }
 0x396   : > { %4382 = vmatmul.mubr.bf16.gmra.mrb[12].mxu1 %v12859_v30 }
 0x397   : > { %4391 = vmatprep.mubr.bf16.mxu1 %v15040_v20 }
 0x399   : > { %v13046_v33 = vpop.f32.mrb[72].mxu0 }
 0x39a   : > { %15041 = vst [vmem:[#allocation9_spill] sm:$0xff] %v13046_v33  ;;  %v13048_v14 = vpop.f32.mrb[73].mxu0 }
 0x39b   : > { %15042 = vst [vmem:[#allocation8_spill] sm:$0xff] %v13048_v14  ;;  %v13050_v1 = vpop.f32.mrb[74].mxu0  ;;  %v11081_v14 = vld [vmem:[#allocation3 + $0x20] ss:$0 sps:$4 sm:$0x11]  }
 0x39c   : > { %15043 = vst [vmem:[#allocation11_spill] sm:$0xff] %v13050_v1  ;;  %v13052_v0 = vpop.f32.mrb[75].mxu0 }
 0x39d   : > { %15044 = vst [vmem:[#allocation10_spill] sm:$0xff] %v13052_v0  ;;  %v4495_v0 = vld [vmem:[#allocation3 + $0x24] sm:$0xf] }
 0x39e   : > { %4392 = vmatmul.mubr.bf16.gmra.mrb[16].mxu1 %v12876_v32  ;;  %v4701_v32 = vrot.slane %v4699_v34, 1  ;;  %v4689_v34 = vrot.slane %v4687_v11, 1 }
 0x39f   : > { %4401 = vmatprep.mubr.bf16.mxu1 %v15040_v20 }
 0x3a1   : > { %v13058_v30 = vpop.f32.mrb[76].mxu0 }
 0x3a2   : > { %15045 = vst [vmem:[#allocation13_spill] sm:$0xff] %v13058_v30  ;;  %v13060_v52 = vpop.f32.mrb[77].mxu0  ;;  %v4706_v30 = vrot.slane %v4704_v49, 1 }
 0x3a3   : > { %15046 = vst [vmem:[#allocation12_spill] sm:$0xff] %v13060_v52  ;;  %v13062_v62 = vpop.f32.mrb[78].mxu0 }
 0x3a4   : > { %15047 = vst [vmem:[#allocation14_spill] sm:$0xff] %v13062_v62  ;;  %v13065_v10 = vpop.f32.mrb[79].mxu0  ;;  %v4711_v62 = vshll.u32 %v9378_v51, 16 }
 0x3a5   : > { %15048 = vst [vmem:[#allocation7_spill] sm:$0xff] %v13065_v10  ;;  %v4702_v10 = vor.u32 %v4701_v32, %v4697_v53  ;;  %v4694_v32 = vrot.slane %v4692_v22, 1  ;;  %v4709_v53 = vshrl.u32 %v9378_v51, 16  ;;  %v11083_v22 = vld [vmem:[#allocation3 + $0x2c] ss:$0 sps:$4 sm:$0x11]  }
 0x3a6   : > { %4402 = vmatmul.mubr.bf16.gmra.mrb[20].mxu1 %v12896_v44  ;;  %v4685_v44 = vshrl.u32 %v9374_v41, 16  ;;  %v4713_v25 = vrot.slane %v4711_v62, 1 }
 0x3a7   : > { %4411 = vmatprep.mubr.bf16.mxu1 %v15040_v20  ;;  %v4707_v17 = vsel %vm1691_vm10, %v4702_v10, %v4706_v30  ;;  %v4498_v10 = vld [vmem:[#allocation3 + $0x30] sm:$0xf] }
 0x3a8   : > { %v4714_v33 = vor.u32 %v4713_v25, %v4709_v53  ;;  %v4728_v25 = vshll.u32 %v11083_v22, 16  ;;  %v11084_v22 = vld [vmem:[#allocation3 + $0x40] sm:$0xf] }
 0x3a9   : > { %v13071_v63 = vpop.f32.mrb[80].mxu0 }
 0x3aa   : > { %15049 = vst [vmem:[#allocation15_spill] sm:$0xff] %v13071_v63  ;;  %v13073_v37 = vpop.f32.mrb[81].mxu0  ;;  %v11080_v63 = vld [vmem:[#allocation3 + $0x28] sm:$0xf] }
 0x3ab   : > { %15050 = vst [vmem:[#allocation16_spill] sm:$0xff] %v13073_v37  ;;  %v13075_v52 = vpop.f32.mrb[82].mxu0  ;;  %v9380_v1 = vcombine.low %v4495_v0, %v11080_v63  ;;  %v4690_v37 = vor.u32 %v4689_v34, %v4685_v44  ;;  %v10914_v0 = vld [vmem:[%s14989_s3 + $0x280] ss:$8 sps:$4 sm:$0xff]   ;;  %v11082_v44 = vld [vmem:[#allocation3 + $0x34] sm:$0xf] }
 0x3ac   : > { %15051 = vst [vmem:[#allocation17_spill] sm:$0xff] %v13075_v52  ;;  %v13078_v45 = vpop.f32.mrb[83].mxu0  ;;  %v4716_v52 = vshll.u32 %v11081_v14, 16  ;;  %v10923_v14 = vld [vmem:[%s14989_s3 + $0x294] ss:$8 sps:$4 sm:$0xff]   ;;  %v9382_v34 = vcombine.low %v4498_v10, %v11082_v44 }
 0x3ad   : > { %15052 = vst [vmem:[#allocation18_spill] sm:$0xff] %v13078_v45  ;;  %v4723_v45 = vshll.u32 %v9380_v1, 16  ;;  %v10935_v10 = vld [vmem:[%s14989_s3 + $0x2b4] ss:$8 sps:$4 sm:$0xff]  }
 0x3ae   : > { %4412 = vmatmul.mubr.bf16.gmra.mrb[24].mxu1 %v10885_v16  ;;  %v4695_v16 = vsel %vm1691_vm10, %v4690_v37, %v4694_v32  ;;  %v4718_v62 = vrot.slane %v4716_v52, 1  ;;  %v10921_v37 = vld [vmem:[%s14989_s3 + $0x290] ss:$8 sps:$4 sm:$0xff]   ;;  %v4721_v52 = vshrl.u32 %v9380_v1, 16  ;;  %v10930_v32 = vld [vmem:[%s14989_s3 + $0x2a4] ss:$8 sps:$4 sm:$0xff]  }
 0x3af   : > { %5239 = vmatprep.mubr.bf16.mxu1 %v4707_v17  ;;  %v4725_v63 = vrot.slane %v4723_v45, 1  ;;  %v10928_v1 = vld [vmem:[%s14989_s3 + $0x2a0] ss:$8 sps:$4 sm:$0xff]   ;;  %v4501_v44 = vld [vmem:[#allocation3 + $0x3c] sm:$0xf] }
 0x3b0   : > { %v13097_v51 = vsel %vm1691_vm10, %v4714_v33, %v4718_v62 }
 0x3b1   : > { %v13081_v41 = vpop.f32.mrb[84].mxu0  ;;  %v4726_v53 = vor.u32 %v4725_v63, %v4721_v52 }
 0x3b2   : > { %15053 = vst [vmem:[#allocation19_spill] sm:$0xff] %v13081_v41  ;;  %v13083_v11 = vpop.f32.mrb[85].mxu0 }
 0x3b3   : > { %15054 = vst [vmem:[#allocation20_spill] sm:$0xff] %v13083_v11  ;;  %v13085_v49 = vpop.f32.mrb[86].mxu0 }
 0x3b4   : > { %15055 = vst [vmem:[#allocation21_spill] sm:$0xff] %v13085_v49  ;;  %v13091_v30 = vpop.f32.mrb[87].mxu0 }
 0x3b5   : > { %15056 = vst [vmem:[#allocation22_spill] sm:$0xff] %v13091_v30 }
 0x3b6   : > { %5240 = vmatmul.mubr.bf16.vlgmr.msra.gmra.mrb[28].mxu1 %v4695_v16  ;;  %v4735_v16 = vshll.u32 %v9382_v34, 16 }
 0x3b7   : > { %5249 = vmatprep.mubr.bf16.mxu1 %v13097_v51  ;;  %5401 = vmatpush1.bf16.msra.mxu1 %v10914_v0 }
 0x3b8   : > { %5402 = vmatprep.subr.bf16.mxu1 %v10923_v14  ;;  %v4730_v14 = vrot.slane %v4728_v25, 1  ;;  %v4737_v52 = vrot.slane %v4735_v16, 1  ;;  %v10933_v25 = vld [vmem:[%s14989_s3 + $0x2b0] ss:$8 sps:$4 sm:$0xff]  }
 0x3b9   : > { %v13106_v33 = vpop.f32.mrb[88].mxu0 }
 0x3ba   : > { %15057 = vst [vmem:[#allocation23_spill] sm:$0xff] %v13106_v33  ;;  %v13108_v45 = vpop.f32.mrb[89].mxu0  ;;  %v13121_v63 = vsel %vm1691_vm10, %v4726_v53, %v4730_v14 }
 0x3bb   : > { %15058 = vst [vmem:[#allocation24_spill] sm:$0xff] %v13108_v45  ;;  %v13110_v62 = vpop.f32.mrb[90].mxu0  ;;  %5403 = vmatpush1.bf16.msra.mxu1 %v10921_v37  ;;  %v9384_v37 = vcombine.low %v4501_v44, %v11084_v22  ;;  %v10946_v45 = vld [vmem:[%s14989_s3 + $0x2e4] ss:$8 sps:$4 sm:$0xff]  }
 0x3bc   : > { %15059 = vst [vmem:[#allocation25_spill] sm:$0xff] %v13110_v62  ;;  %v13115_v0 = vpop.f32.mrb[91].mxu0  ;;  %5404 = vmatprep.subr.bf16.mxu1 %v10930_v32  ;;  %v4733_v32 = vshrl.u32 %v9382_v34, 16  ;;  %v10936_v34 = vld [vmem:[%s14989_s3 + $0x2c0] ss:$8 sps:$4 sm:$0xff]  }
 0x3bd   : > { %15060 = vst [vmem:[#allocation26_spill] sm:$0xff] %v13115_v0  ;;  %v11085_v0 = vld [vmem:[#allocation3 + $0x38] ss:$0 sps:$4 sm:$0x11]   ;;  %v4747_v44 = vshll.u32 %v9384_v37, 16 }
 0x3be   : > { %5250 = vmatmul.mubr.bf16.gmra.mrb[32].mxu1 %v4707_v17  ;;  %v4740_v62 = vshll.u32 %v11085_v0, 16  ;;  %v10938_v17 = vld [vmem:[%s14989_s3 + $0x2c4] ss:$8 sps:$4 sm:$0xff]   ;;  %v4738_v14 = vor.u32 %v4737_v52, %v4733_v32 }
 0x3bf   : > { %5259 = vmatprep.mubr.bf16.mxu1 %v13121_v63  ;;  %5405 = vmatpush1.bf16.msra.mxu1 %v10928_v1  ;;  %v4749_v32 = vrot.slane %v4747_v44, 1 }
 0x3c0   : > { %5406 = vmatprep.subr.bf16.mxu1 %v10935_v10  ;;  %v4742_v0 = vrot.slane %v4740_v62, 1  ;;  %v10943_v10 = vld [vmem:[%s14989_s3 + $0x2d4] ss:$8 sps:$4 sm:$0xff]   ;;  %v10941_v62 = vld [vmem:[%s14989_s3 + $0x2d0] ss:$8 sps:$4 sm:$0xff]  }
 0x3c1   : > { %v13130_v53 = vpop.f32.mrb[92].mxu0 }
 0x3c2   : > { %15061 = vst [vmem:[#allocation27_spill] sm:$0xff] %v13130_v53  ;;  %v13132_v16 = vpop.f32.mrb[93].mxu0  ;;  %v4504_v53 = vld [vmem:[#allocation3 + $0x48] sm:$0xf]  ;;  %v13146_v52 = vsel %vm1691_vm10, %v4738_v14, %v4742_v0 }
 0x3c3   : > { %15062 = vst [vmem:[#allocation28_spill] sm:$0xff] %v13132_v16  ;;  %v13134_v22 = vpop.f32.mrb[94].mxu0  ;;  %5407 = vmatpush1.bf16.msra.mxu1 %v10933_v25  ;;  %v11086_v25 = vld [vmem:[#allocation3 + $0x4c] sm:$0xf] }
 0x3c4   : > { %15063 = vst [vmem:[#allocation29_spill] sm:$0xff] %v13134_v22  ;;  %v13139_v1 = vpop.f32.mrb[95].mxu0  ;;  %5408 = vmatprep.subr.bf16.mxu1 %v10938_v17  ;;  %v9386_v22 = vcombine.low %v4504_v53, %v11086_v25  ;;  %v4745_v17 = vshrl.u32 %v9384_v37, 16  ;;  %v10944_v37 = vld [vmem:[%s14989_s3 + $0x2e0] ss:$8 sps:$4 sm:$0xff]  }
 0x3c5   : > { %15064 = vst [vmem:[#allocation30_spill] sm:$0xff] %v13139_v1  ;;  %v11087_v1 = vld [vmem:[#allocation3 + $0x44] ss:$0 sps:$4 sm:$0x11]  }
 0x3c6   : > { %5260 = vmatmul.mubr.bf16.gmra.mrb[36].mxu1 %v13097_v51  ;;  %v4752_v16 = vshll.u32 %v11087_v1, 16  ;;  %v4750_v53 = vor.u32 %v4749_v32, %v4745_v17  ;;  %v4759_v0 = vshll.u32 %v9386_v22, 16 }
 0x3c7   : > { %5269 = vmatprep.mubr.bf16.mxu1 %v13146_v52  ;;  %5409 = vmatpush1.bf16.msra.mxu1 %v10936_v34 }
 0x3c8   : > { %5410 = vmatprep.subr.bf16.mxu1 %v10943_v10  ;;  %v4754_v1 = vrot.slane %v4752_v16, 1  ;;  %v10949_v10 = vld [vmem:[%s14989_s3 + $0x2f4] ss:$8 sps:$4 sm:$0xff]   ;;  %v4761_v17 = vrot.slane %v4759_v0, 1  ;;  %v4757_v16 = vshrl.u32 %v9386_v22, 16 }
 0x3c9   : > { %v13155_v14 = vpop.f32.mrb[96].mxu0  ;;  %v11091_v22 = vld [vmem:[#allocation3 + $0x5c] ss:$0 sps:$4 sm:$0x11]  }
 0x3ca   : > { %15065 = vst [vmem:[#allocation31_spill] sm:$0xff] %v13155_v14  ;;  %v13157_v44 = vpop.f32.mrb[97].mxu0  ;;  %v4507_v14 = vld [vmem:[#allocation3 + $0x54] sm:$0xf]  ;;  %v13171_v32 = vsel %vm1691_vm10, %v4750_v53, %v4754_v1  ;;  %v4762_v33 = vor.u32 %v4761_v17, %v4757_v16  ;;  %v4510_v53 = vld [vmem:[#allocation3 + $0x60] sm:$0xf] }
 0x3cb   : > { %15066 = vst [vmem:[#allocation32_spill] sm:$0xff] %v13157_v44  ;;  %v13159_v25 = vpop.f32.mrb[98].mxu0  ;;  %5411 = vmatpush1.bf16.msra.mxu1 %v10941_v62  ;;  %v11088_v62 = vld [vmem:[#allocation3 + $0x58] sm:$0xf]  ;;  %v4776_v11 = vshll.u32 %v11091_v22, 16 }
 0x3cc   : > { %15067 = vst [vmem:[#allocation33_spill] sm:$0xff] %v13159_v25  ;;  %v13164_v34 = vpop.f32.mrb[99].mxu0  ;;  %5412 = vmatprep.subr.bf16.mxu1 %v10946_v45  ;;  %v9388_v25 = vcombine.low %v4507_v14, %v11088_v62  ;;  %v10947_v45 = vld [vmem:[%s14989_s3 + $0x2f0] ss:$8 sps:$4 sm:$0xff]   ;;  %v4513_v16 = vld [vmem:[#allocation3 + $0x6c] sm:$0xf] }
 0x3cd   : > { %15068 = vst [vmem:[#allocation34_spill] sm:$0xff] %v13164_v34  ;;  %v11089_v34 = vld [vmem:[#allocation3 + $0x50] ss:$0 sps:$4 sm:$0x11]   ;;  %v4778_v17 = vrot.slane %v4776_v11, 1 }
 0x3ce   : > { %5270 = vmatmul.mubr.bf16.gmra.mrb[40].mxu1 %v13121_v63  ;;  %v4764_v44 = vshll.u32 %v11089_v34, 16  ;;  %v4771_v30 = vshll.u32 %v9388_v25, 16  ;;  %v4769_v62 = vshrl.u32 %v9388_v25, 16 }
 0x3cf   : > { %5279 = vmatprep.mubr.bf16.mxu1 %v13171_v32  ;;  %5413 = vmatpush1.bf16.msra.mxu1 %v10944_v37  ;;  %v11090_v37 = vld [vmem:[#allocation3 + $0x64] sm:$0xf] }
 0x3d0   : > { %5414 = vmatprep.subr.bf16.mxu1 %v10949_v10  ;;  %v4766_v49 = vrot.slane %v4764_v44, 1  ;;  %v4773_v0 = vrot.slane %v4771_v30, 1  ;;  %v9390_v1 = vcombine.low %v4510_v53, %v11090_v37  ;;  %v11093_v53 = vld [vmem:[#allocation3 + $0x68] ss:$0 sps:$4 sm:$0x11]  }
 0x3d1   : > { %v4788_v37 = vshll.u32 %v11093_v53, 16 }
 0x3d2   : > { %v13179_v14 = vsel %vm1691_vm10, %v4762_v33, %v4766_v49  ;;  %v4774_v34 = vor.u32 %v4773_v0, %v4769_v62  ;;  %v4783_v10 = vshll.u32 %v9390_v1, 16  ;;  %v11092_v49 = vld [vmem:[#allocation3 + $0x70] sm:$0xf]  ;;  %v4781_v30 = vshrl.u32 %v9390_v1, 16  ;;  %v4516_v0 = vld [vmem:[#allocation3 + $0x78] sm:$0xf] }
 0x3d3   : > { %5415 = vmatpush1.bf16.msra.mxu1 %v10947_v45  ;;  %v9392_v33 = vcombine.low %v4513_v16, %v11092_v49  ;;  %v4790_v22 = vrot.slane %v4788_v37, 1 }
 0x3d4   : > { %v13184_v44 = vsel %vm1691_vm10, %v4774_v34, %v4778_v17  ;;  %v4785_v45 = vrot.slane %v4783_v10, 1  ;;  %v9394_v34 = vcombine.low %v4516_v0, %v12732_v28  ;;  %v11094_v17 = vld [vmem:[#allocation3 + $0x74] ss:$0 sps:$4 sm:$0x11]  }
 0x3d5   : > { %v4795_v41 = vshll.u32 %v9392_v33, 16  ;;  %v4793_v10 = vshrl.u32 %v9392_v33, 16  ;;  %v4800_v16 = vshll.u32 %v11094_v17, 16 }
 0x3d6   : > { %5280 = vmatmul.mubr.bf16.gmra.mrb[44].mxu1 %v13146_v52  ;;  %v4786_v25 = vor.u32 %v4785_v45, %v4781_v30  ;;  %v4807_v49 = vshll.u32 %v9394_v34, 16  ;;  %v4519_v45 = vld [vmem:[#allocation3 + $0x84] sm:$0xf]  ;;  %v4805_v28 = vshrl.u32 %v9394_v34, 16 }
 0x3d7   : > { %5289 = vmatprep.mubr.bf16.mxu1 %v13179_v14  ;;  %v4797_v62 = vrot.slane %v4795_v41, 1  ;;  %v4802_v53 = vrot.slane %v4800_v16, 1  ;;  %v4812_v41 = vshll.u32 %v12744_v57, 16  ;;  %v4824_v57 = vshll.u32 %v12811_v40, 16 }
 0x3d8   : > { %v13189_v11 = vsel %vm1691_vm10, %v4786_v25, %v4790_v22  ;;  %v4809_v37 = vrot.slane %v4807_v49, 1  ;;  %v9396_v25 = vcombine.low %v4519_v45, %v12784_v54  ;;  %v10952_v54 = vld [vmem:[%s14989_s3 + $0x304] ss:$8 sps:$4 sm:$0xff]   ;;  %v4525_v45 = vld [vmem:[#allocation3 + $0x9c] sm:$0xf] }
 0x3d9   : > { %v4798_v1 = vor.u32 %v4797_v62, %v4793_v10  ;;  %v4814_v0 = vrot.slane %v4812_v41, 1  ;;  %v4522_v62 = vld [vmem:[#allocation3 + $0x90] sm:$0xf]  ;;  %6090 = vmatprep.subr.bf16.mxu1 %v10952_v54 }
 0x3da   : > { %v4810_v33 = vor.u32 %v4809_v37, %v4805_v28  ;;  %v4819_v22 = vshll.u32 %v9396_v25, 16  ;;  %v9398_v16 = vcombine.low %v4522_v62, %v12809_v24  ;;  %v4817_v34 = vshrl.u32 %v9396_v25, 16 }
 0x3db   : > { %v13195_v30 = vsel %vm1691_vm10, %v4798_v1, %v4802_v53  ;;  %v4826_v53 = vrot.slane %v4824_v57, 1  ;;  %v9400_v28 = vcombine.low %v4525_v45, %v12849_v47  ;;  %v4836_v25 = vshll.u32 %v12826_v3, 16 }
 0x3dc   : > { %v13202_v10 = vsel %vm1691_vm10, %v4810_v33, %v4814_v0  ;;  %v4821_v17 = vrot.slane %v4819_v22, 1  ;;  %v4831_v49 = vshll.u32 %v9398_v16, 16  ;;  %v4829_v41 = vshrl.u32 %v9398_v16, 16  ;;  %v4528_v0 = vld [vmem:[#allocation3 + $0xa8] sm:$0xf] }
 0x3dd   : > { %v4843_v40 = vshll.u32 %v9400_v28, 16  ;;  %v4838_v22 = vrot.slane %v4836_v25, 1  ;;  %v9402_v54 = vcombine.low %v4528_v0, %v12861_v7  ;;  %v4841_v47 = vshrl.u32 %v9400_v28, 16  ;;  %v4534_v25 = vld [vmem:[#allocation3 + $0xc0] sm:$0xf] }
 0x3de   : > { %5290 = vmatmul.mubr.bf16.gmra.mrb[48].mxu1 %v13171_v32  ;;  %v4822_v1 = vor.u32 %v4821_v17, %v4817_v34  ;;  %v4833_v24 = vrot.slane %v4831_v49, 1  ;;  %v4848_v34 = vshll.u32 %v12844_v12, 16  ;;  %v4872_v0 = vshll.u32 %v12884_v39, 16 }
 0x3df   : > { %5299 = vmatprep.mubr.bf16.mxu1 %v13184_v44  ;;  %v4845_v17 = vrot.slane %v4843_v40, 1  ;;  %v4855_v57 = vshll.u32 %v9402_v54, 16  ;;  %v4853_v7 = vshrl.u32 %v9402_v54, 16 }
 0x3e0   : > { %v13212_v37 = vsel %vm1691_vm10, %v4822_v1, %v4826_v53  ;;  %v4834_v33 = vor.u32 %v4833_v24, %v4829_v41  ;;  %v4850_v3 = vrot.slane %v4848_v34, 1  ;;  %v4531_v1 = vld [vmem:[#allocation3 + $0xb4] sm:$0xf]  ;;  %v4860_v24 = vshll.u32 %v12868_v9, 16 }
 0x3e1   : > { %v4846_v16 = vor.u32 %v4845_v17, %v4841_v47  ;;  %v4857_v53 = vrot.slane %v4855_v57, 1  ;;  %v9404_v45 = vcombine.low %v4531_v1, %v12878_v61  ;;  %v4874_v9 = vrot.slane %v4872_v0, 1  ;;  %v10950_v1 = vld [vmem:[%s14989_s3 + $0x300] ss:$8 sps:$4 sm:$0xff]  }
 0x3e2   : > { %v13219_v62 = vsel %vm1691_vm10, %v4834_v33, %v4838_v22  ;;  %v4862_v12 = vrot.slane %v4860_v24, 1  ;;  %v9406_v22 = vcombine.low %v4534_v25, %v12898_v46  ;;  %v4884_v57 = vshll.u32 %v12902_v58, 16  ;;  %v10955_v58 = vld [vmem:[%s14989_s3 + $0x314] ss:$8 sps:$4 sm:$0xff]   ;;  %v10959_v24 = vld [vmem:[%s14989_s3 + $0x330] ss:$8 sps:$4 sm:$0xff]  }
 0x3e3   : > { %v13226_v49 = vsel %vm1691_vm10, %v4846_v16, %v4850_v3  ;;  %v4858_v28 = vor.u32 %v4857_v53, %v4853_v7  ;;  %v4867_v41 = vshll.u32 %v9404_v45, 16  ;;  %v4865_v61 = vshrl.u32 %v9404_v45, 16  ;;  %v10953_v53 = vld [vmem:[%s14989_s3 + $0x310] ss:$8 sps:$4 sm:$0xff]   ;;  %v10958_v45 = vld [vmem:[%s14989_s3 + $0x324] ss:$8 sps:$4 sm:$0xff]  }
 0x3e4   : > { %v4879_v54 = vshll.u32 %v9406_v22, 16  ;;  %v4877_v16 = vshrl.u32 %v9406_v22, 16  ;;  %v4886_v3 = vrot.slane %v4884_v57, 1  ;;  %v10956_v7 = vld [vmem:[%s14989_s3 + $0x320] ss:$8 sps:$4 sm:$0xff]  }
 0x3e5   : > { %v13233_v33 = vsel %vm1691_vm10, %v4858_v28, %v4862_v12  ;;  %v4869_v40 = vrot.slane %v4867_v41, 1  ;;  %v10964_v28 = vld [vmem:[%s14989_s3 + $0x344] ss:$8 sps:$4 sm:$0xff]   ;;  %v10962_v41 = vld [vmem:[%s14989_s3 + $0x340] ss:$8 sps:$4 sm:$0xff]  }
 0x3e6   : > { %5300 = vmatmul.mubr.bf16.gmra.mrb[52].mxu1 %v13179_v14  ;;  %v4881_v34 = vrot.slane %v4879_v54, 1  ;;  %v10965_v12 = vld [vmem:[%s14989_s3 + $0x350] ss:$8 sps:$4 sm:$0xff]   ;;  %v10970_v25 = vld [vmem:[%s14989_s3 + $0x364] ss:$8 sps:$4 sm:$0xff]  }
 0x3e7   : > { %5309 = vmatprep.mubr.bf16.mxu1 %v13189_v11  ;;  %v4870_v17 = vor.u32 %v4869_v40, %v4865_v61  ;;  %v10968_v40 = vld [vmem:[%s14989_s3 + $0x360] ss:$8 sps:$4 sm:$0xff]   ;;  %v10971_v22 = vld [vmem:[%s14989_s3 + $0x370] ss:$8 sps:$4 sm:$0xff]   ;;  %v10976_v61 = vld [vmem:[%s14989_s3 + $0x384] ss:$8 sps:$4 sm:$0xff]  }
 0x3e8   : > { %v4882_v46 = vor.u32 %v4881_v34, %v4877_v16  ;;  %v10974_v0 = vld [vmem:[%s14989_s3 + $0x380] ss:$8 sps:$4 sm:$0xff]   ;;  %v10982_v54 = vld [vmem:[%s14989_s3 + $0x3a4] ss:$8 sps:$4 sm:$0xff]   ;;  %v10983_v34 = vld [vmem:[%s14989_s3 + $0x3b0] ss:$8 sps:$4 sm:$0xff]  }
 0x3e9   : > { %v13240_v47 = vsel %vm1691_vm10, %v4870_v17, %v4874_v9  ;;  %v10977_v17 = vld [vmem:[%s14989_s3 + $0x390] ss:$8 sps:$4 sm:$0xff]   ;;  %v10980_v9 = vld [vmem:[%s14989_s3 + $0x3a0] ss:$8 sps:$4 sm:$0xff]   ;;  %v10988_v16 = vld [vmem:[%s14989_s3 + $0x3c4] ss:$8 sps:$4 sm:$0xff]  }
 0x3ea   : > { %v13246_v39 = vsel %vm1691_vm10, %v4882_v46, %v4886_v3  ;;  %v10986_v57 = vld [vmem:[%s14989_s3 + $0x3c0] ss:$8 sps:$4 sm:$0xff]   ;;  %v10989_v46 = vld [vmem:[%s14989_s3 + $0x3d0] ss:$8 sps:$4 sm:$0xff]   ;;  %v10996_v3 = vld [vmem:[%s14989_s3 + $0x3e4] ss:$8 sps:$4 sm:$0xff]  }
 0x3ee   : > { %5310 = vmatmul.mubr.bf16.gmra.mrb[56].mxu1 %v13184_v44 }
 0x3ef   : > { %5319 = vmatprep.mubr.bf16.mxu1 %v13195_v30 }
 0x3f6   : > { %5320 = vmatmul.mubr.bf16.gmra.mrb[60].mxu1 %v13189_v11 }
 0x3f7   : > { %5329 = vmatprep.mubr.bf16.mxu1 %v13202_v10 }
 0x3fe   : > { %5330 = vmatmul.mubr.bf16.gmra.mrb[0].mxu1 %v13195_v30 }
 0x3ff   : > { %5339 = vmatprep.mubr.bf16.mxu1 %v13212_v37 }
 0x406   : > { %5340 = vmatmul.mubr.bf16.gmra.mrb[4].mxu1 %v13202_v10 }
 0x407   : > { %5349 = vmatprep.mubr.bf16.mxu1 %v13219_v62 }
 0x40e   : > { %5350 = vmatmul.mubr.bf16.gmra.mrb[8].mxu1 %v13212_v37 }
 0x40f   : > { %5359 = vmatprep.mubr.bf16.mxu1 %v13226_v49 }
 0x416   : > { %5360 = vmatmul.mubr.bf16.gmra.mrb[12].mxu1 %v13219_v62 }
 0x417   : > { %5369 = vmatprep.mubr.bf16.mxu1 %v13233_v33 }
 0x41e   : > { %5370 = vmatmul.mubr.bf16.gmra.mrb[16].mxu1 %v13226_v49 }
 0x41f   : > { %5379 = vmatprep.mubr.bf16.mxu1 %v13240_v47 }
 0x426   : > { %5380 = vmatmul.mubr.bf16.gmra.mrb[20].mxu1 %v13233_v33 }
 0x427   : > { %5389 = vmatprep.mubr.bf16.mxu1 %v13246_v39 }
 0x42e   : > { %5390 = vmatmul.mubr.bf16.gmra.mrb[24].mxu1 %v13240_v47 }
 0x42f   : > { %5432 = vmatprep.mubr.bf16.mxu1 %v15040_v20 }
 0x436   : > { %5433 = vmatmul.mubr.bf16.vlgmr.msra.gmra.mrb[28].mxu1 %v13097_v51  ;;  %v10961_v51 = vld [vmem:[%s14989_s3 + $0x334] ss:$8 sps:$4 sm:$0xff]  }
 0x437   : > { %5442 = vmatprep.mubr.bf16.mxu1 %v15040_v20  ;;  %6091 = vmatpush1.bf16.msra.mxu1 %v10950_v1  ;;  %v10994_v1 = vld [vmem:[%s14989_s3 + $0x3e0] ss:$8 sps:$4 sm:$0xff]  }
 0x438   : > { %6092 = vmatprep.subr.bf16.mxu1 %v10955_v58  ;;  %v10998_v58 = vld [vmem:[%s14989_s3 + $0x3f0] ss:$8 sps:$4 sm:$0xff]  }
 0x43b   : > { %6093 = vmatpush1.bf16.msra.mxu1 %v10953_v53  ;;  %v11013_v53 = vld [vmem:[%s14989_s3 + $0x404] ss:$8 sps:$4 sm:$0xff]  }
 0x43c   : > { %6094 = vmatprep.subr.bf16.mxu1 %v10958_v45 }
 0x43e   : > { %5443 = vmatmul.mubr.bf16.gmra.mrb[32].mxu1 %v13121_v63  ;;  %v10967_v63 = vld [vmem:[%s14989_s3 + $0x354] ss:$8 sps:$4 sm:$0xff]  }
 0x43f   : > { %5452 = vmatprep.mubr.bf16.mxu1 %v15040_v20  ;;  %6095 = vmatpush1.bf16.msra.mxu1 %v10956_v7 }
 0x440   : > { %6096 = vmatprep.subr.bf16.mxu1 %v10961_v51 }
 0x443   : > { %6097 = vmatpush1.bf16.msra.mxu1 %v10959_v24 }
 0x444   : > { %6098 = vmatprep.subr.bf16.mxu1 %v10964_v28  ;;  %v5657_v28 = vld [vmem:[#allocation3] sm:$0xe] }
 0x446   : > { %5453 = vmatmul.mubr.bf16.gmra.mrb[36].mxu1 %v13146_v52  ;;  %v10973_v52 = vld [vmem:[%s14989_s3 + $0x374] ss:$8 sps:$4 sm:$0xff]  }
 0x447   : > { %5462 = vmatprep.mubr.bf16.mxu1 %v15040_v20  ;;  %6099 = vmatpush1.bf16.msra.mxu1 %v10962_v41 }
 0x448   : > { %6100 = vmatprep.subr.bf16.mxu1 %v10967_v63 }
 0x44b   : > { %6101 = vmatpush1.bf16.msra.mxu1 %v10965_v12  ;;  %v5730_v12 = vrot.slane %v13069_v43, 1  ;;  %v11023_v43 = vld [vmem:[%s14989_s3 + $0x424] ss:$8 sps:$4 sm:$0xff]  }
 0x44c   : > { %6102 = vmatprep.subr.bf16.mxu1 %v10970_v25 }
 0x44e   : > { %5463 = vmatmul.mubr.bf16.gmra.mrb[40].mxu1 %v13171_v32  ;;  %v10979_v32 = vld [vmem:[%s14989_s3 + $0x394] ss:$8 sps:$4 sm:$0xff]  }
 0x44f   : > { %5472 = vmatprep.mubr.bf16.mxu1 %v15040_v20  ;;  %6103 = vmatpush1.bf16.msra.mxu1 %v10968_v40  ;;  %v11018_v40 = vld [vmem:[%s14989_s3 + $0x414] ss:$8 sps:$4 sm:$0xff]  }
 0x450   : > { %6104 = vmatprep.subr.bf16.mxu1 %v10973_v52  ;;  %v11021_v52 = vld [vmem:[%s14989_s3 + $0x420] ss:$8 sps:$4 sm:$0xff]  }
 0x453   : > { %6105 = vmatpush1.bf16.msra.mxu1 %v10971_v22  ;;  %v11027_v22 = vld [vmem:[%s14989_s3 + $0x434] ss:$8 sps:$4 sm:$0xff]  }
 0x454   : > { %6106 = vmatprep.subr.bf16.mxu1 %v10976_v61  ;;  %v11025_v61 = vld [vmem:[%s14989_s3 + $0x430] ss:$8 sps:$4 sm:$0xff]  }
 0x456   : > { %5473 = vmatmul.mubr.bf16.gmra.mrb[44].mxu1 %v13179_v14  ;;  %v10985_v14 = vld [vmem:[%s14989_s3 + $0x3b4] ss:$8 sps:$4 sm:$0xff]  }
 0x457   : > { %5482 = vmatprep.mubr.bf16.mxu1 %v15040_v20  ;;  %6107 = vmatpush1.bf16.msra.mxu1 %v10974_v0  ;;  %v11030_v0 = vld [vmem:[%s14989_s3 + $0x444] ss:$8 sps:$4 sm:$0xff]  }
 0x458   : > { %6108 = vmatprep.subr.bf16.mxu1 %v10979_v32  ;;  %v11028_v32 = vld [vmem:[%s14989_s3 + $0x440] ss:$8 sps:$4 sm:$0xff]  }
 0x45b   : > { %6109 = vmatpush1.bf16.msra.mxu1 %v10977_v17  ;;  %v11032_v17 = vld [vmem:[%s14989_s3 + $0x450] ss:$8 sps:$4 sm:$0xff]  }
 0x45c   : > { %6110 = vmatprep.subr.bf16.mxu1 %v10982_v54  ;;  %v11037_v54 = vld [vmem:[%s14989_s3 + $0x464] ss:$8 sps:$4 sm:$0xff]  }
 0x45e   : > { %5483 = vmatmul.mubr.bf16.gmra.mrb[48].mxu1 %v13184_v44  ;;  %v10991_v44 = vld [vmem:[%s14989_s3 + $0x3d4] ss:$8 sps:$4 sm:$0xff]  }
 0x45f   : > { %5492 = vmatprep.mubr.bf16.mxu1 %v15040_v20  ;;  %6111 = vmatpush1.bf16.msra.mxu1 %v10980_v9  ;;  %v11035_v9 = vld [vmem:[%s14989_s3 + $0x460] ss:$8 sps:$4 sm:$0xff]  }
 0x460   : > { %6112 = vmatprep.subr.bf16.mxu1 %v10985_v14  ;;  %v11040_v14 = vld [vmem:[%s14989_s3 + $0x474] ss:$8 sps:$4 sm:$0xff]  }
 0x463   : > { %6113 = vmatpush1.bf16.msra.mxu1 %v10983_v34  ;;  %v11038_v34 = vld [vmem:[%s14989_s3 + $0x470] ss:$8 sps:$4 sm:$0xff]  }
 0x464   : > { %6114 = vmatprep.subr.bf16.mxu1 %v10988_v16 }
 0x466   : > { %5493 = vmatmul.mubr.bf16.gmra.mrb[52].mxu1 %v13189_v11  ;;  %v11000_v11 = vld [vmem:[%s14989_s3 + $0x3f4] ss:$8 sps:$4 sm:$0xff]  }
 0x467   : > { %5502 = vmatprep.mubr.bf16.mxu1 %v15040_v20  ;;  %6115 = vmatpush1.bf16.msra.mxu1 %v10986_v57 }
 0x468   : > { %6116 = vmatprep.subr.bf16.mxu1 %v10991_v44 }
 0x46b   : > { %6117 = vmatpush1.bf16.msra.mxu1 %v10989_v46 }
 0x46c   : > { %6118 = vmatprep.subr.bf16.mxu1 %v10996_v3 }
 0x46e   : > { %5503 = vmatmul.mubr.bf16.gmra.mrb[56].mxu1 %v13195_v30  ;;  %v4537_v30 = vld [vmem:[#allocation3 + $0xcc] sm:$0xf] }
 0x46f   : > { %5512 = vmatprep.mubr.bf16.mxu1 %v15040_v20  ;;  %6119 = vmatpush1.bf16.msra.mxu1 %v10994_v1 }
 0x470   : > { %6120 = vmatprep.subr.bf16.mxu1 %v11000_v11 }
 0x473   : > { %6121 = vmatpush1.bf16.msra.mxu1 %v10998_v58 }
 0x474   : > { %6283 = vmatprep.subr.bf16.mxu1 %v11013_v53 }
 0x476   : > { %5513 = vmatmul.mubr.bf16.gmra.mrb[60].mxu1 %v13202_v10  ;;  %v13373_v10 = vld [vmem:[#allocation3 + $0xd0] sm:$0xf] }
 0x477   : > { %5522 = vmatprep.mubr.bf16.mxu1 %v15040_v20  ;;  %v9408_v45 = vcombine.low %v4537_v30, %v13373_v10 }
 0x479   : > { %v4889_v7 = vshrl.u32 %v9408_v45, 16 }
 0x47e   : > { %5523 = vmatmul.mubr.bf16.gmra.mrb[0].mxu1 %v13212_v37  ;;  %v13378_v37 = vld [vmem:[#allocation3 + $0xd4] ss:$0 sps:$4 sm:$0x11]  }
 0x47f   : > { %5532 = vmatprep.mubr.bf16.mxu1 %v15040_v20  ;;  %v4896_v51 = vshll.u32 %v13378_v37, 16 }
 0x481   : > { %v4898_v24 = vrot.slane %v4896_v51, 1 }
 0x486   : > { %5533 = vmatmul.mubr.bf16.gmra.mrb[4].mxu1 %v13219_v62  ;;  %v4891_v62 = vshll.u32 %v9408_v45, 16 }
 0x487   : > { %5542 = vmatprep.mubr.bf16.mxu1 %v15040_v20 }
 0x48e   : > { %5543 = vmatmul.mubr.bf16.gmra.mrb[8].mxu1 %v13226_v49  ;;  %v4893_v49 = vrot.slane %v4891_v62, 1  ;;  %v13522_v62 = vld [vmem:[%s14991_s5] sm:$0xff] }
 0x48f   : > { %5552 = vmatprep.mubr.bf16.mxu1 %v15040_v20 }
 0x496   : > { %5553 = vmatmul.mubr.bf16.gmra.mrb[12].mxu1 %v13233_v33  ;;  %v4894_v33 = vor.u32 %v4893_v49, %v4889_v7 }
 0x497   : > { %5562 = vmatprep.mubr.bf16.mxu1 %v15040_v20 }
 0x498   : > { %v4899_v41 = vsel %vm1691_vm10, %v4894_v33, %v4898_v24  ;;  %v13532_v24 = vld [vmem:[%s14991_s5 + $0x8] sm:$0xff] }
 0x49e   : > { %5563 = vmatmul.mubr.bf16.gmra.mrb[16].mxu1 %v13240_v47  ;;  %v9506_v47 = vcombine.low %v5657_v28, %v13056_v27  ;;  %v11016_v27 = vld [vmem:[%s14989_s3 + $0x410] ss:$8 sps:$4 sm:$0xff]  }
 0x49f   : > { %5572 = vmatprep.mubr.bf16.mxu1 %v15040_v20 }
 0x4a0   : > { %v5729_v63 = vrot.slane %v9506_v47, 1  ;;  %v15070_v47 = vld [vmem:[#allocation8_spill] sm:$0xff] }
 0x4a2   : > { %v5731_v25 = vsel %vm2554_vm9, %v5729_v63, %v5730_v12 }
 0x4a6   : > { %5573 = vmatmul.mubr.bf16.gmra.mrb[20].mxu1 %v13246_v39  ;;  %v11011_v39 = vld [vmem:[%s14989_s3 + $0x400] ss:$8 sps:$4 sm:$0xff]  }
 0x4a7   : > { %5582 = vmatprep.mubr.bf16.mxu1 %v15040_v20 }
 0x4ae   : > { %5583 = vmatmul.mubr.bf16.gmra.mrb[24].mxu1 %v4899_v41  ;;  %v15069_v41 = vld [vmem:[#allocation9_spill] sm:$0xff] }
 0x4af   : > { %6122 = vmatprep.mubr.bf16.mxu1 %v12614_v21 }
 0x4b6   : > { %6123 = vmatmul.mubr.bf16.vlgmr.msra.gmra.mrb[28].mxu1 %v5731_v25  ;;  %v15071_v25 = vld [vmem:[#allocation11_spill] sm:$0xff] }
 0x4b7   : > { %6132 = vmatprep.mubr.bf16.mxu1 %v12621_v42  ;;  %6284 = vmatpush1.bf16.msra.mxu1 %v11011_v39 }
 0x4b8   : > { %6285 = vmatprep.subr.bf16.mxu1 %v11018_v40 }
 0x4bb   : > { %6286 = vmatpush1.bf16.msra.mxu1 %v11016_v27 }
 0x4bc   : > { %6287 = vmatprep.subr.bf16.mxu1 %v11023_v43  ;;  %v13546_v43 = vld [vmem:[%s14991_s5 + $0x10] sm:$0xff] }
 0x4be   : > { %6133 = vmatmul.mubr.bf16.gmra.mrb[32].mxu1 %v12614_v21  ;;  %v11034_v21 = vld [vmem:[%s14989_s3 + $0x454] ss:$8 sps:$4 sm:$0xff]  }
 0x4bf   : > { %6142 = vmatprep.mubr.bf16.mxu1 %v12638_v13  ;;  %6288 = vmatpush1.bf16.msra.mxu1 %v11021_v52  ;;  %v15072_v52 = vld [vmem:[#allocation10_spill] sm:$0xff] }
 0x4c0   : > { %6289 = vmatprep.subr.bf16.mxu1 %v11027_v22 }
 0x4c3   : > { %6290 = vmatpush1.bf16.msra.mxu1 %v11025_v61 }
 0x4c4   : > { %6291 = vmatprep.subr.bf16.mxu1 %v11030_v0 }
 0x4c6   : > { %6143 = vmatmul.mubr.bf16.gmra.mrb[36].mxu1 %v12621_v42 }
 0x4c7   : > { %6152 = vmatprep.mubr.bf16.mxu1 %v12648_v18  ;;  %6292 = vmatpush1.bf16.msra.mxu1 %v11028_v32 }
 0x4c8   : > { %6293 = vmatprep.subr.bf16.mxu1 %v11034_v21 }
 0x4cb   : > { %6294 = vmatpush1.bf16.msra.mxu1 %v11032_v17 }
 0x4cc   : > { %6295 = vmatprep.subr.bf16.mxu1 %v11037_v54 }
 0x4ce   : > { %6153 = vmatmul.mubr.bf16.gmra.mrb[40].mxu1 %v12638_v13 }
 0x4cf   : > { %6162 = vmatprep.mubr.bf16.mxu1 %v12667_v6  ;;  %6296 = vmatpush1.bf16.msra.mxu1 %v11035_v9  ;;  %v13556_v9 = vld [vmem:[%s14991_s5 + $0x18] sm:$0xff] }
 0x4d0   : > { %6297 = vmatprep.subr.bf16.mxu1 %v11040_v14 }
 0x4d3   : > { %6298 = vmatpush1.bf16.msra.mxu1 %v11038_v34  ;;  %v15073_v34 = vld [vmem:[#allocation13_spill] sm:$0xff] }
 0x4d6   : > { %6163 = vmatmul.mubr.bf16.gmra.mrb[44].mxu1 %v12648_v18 }
 0x4d7   : > { %6172 = vmatprep.mubr.bf16.mxu1 %v12678_v26 }
 0x4de   : > { %6173 = vmatmul.mubr.bf16.gmra.mrb[48].mxu1 %v12667_v6 }
 0x4df   : > { %6182 = vmatprep.mubr.bf16.mxu1 %v12697_v55 }
 0x4e6   : > { %6183 = vmatmul.mubr.bf16.gmra.mrb[52].mxu1 %v12678_v26 }
 0x4e7   : > { %6192 = vmatprep.mubr.bf16.mxu1 %v12708_v23 }
 0x4ee   : > { %6193 = vmatmul.mubr.bf16.gmra.mrb[56].mxu1 %v12697_v55 }
 0x4ef   : > { %6202 = vmatprep.mubr.bf16.mxu1 %v12736_v31 }
 0x4f6   : > { %6203 = vmatmul.mubr.bf16.gmra.mrb[60].mxu1 %v12708_v23 }
 0x4f7   : > { %6212 = vmatprep.mubr.bf16.mxu1 %v12767_v15 }
 0x4fe   : > { %6213 = vmatmul.mubr.bf16.gmra.mrb[0].mxu1 %v12736_v31 }
 0x4ff   : > { %6222 = vmatprep.mubr.bf16.mxu1 %v12837_v2 }
 0x506   : > { %6223 = vmatmul.mubr.bf16.gmra.mrb[4].mxu1 %v12767_v15 }
 0x507   : > { %6232 = vmatprep.mubr.bf16.mxu1 %v12853_v60 }
 0x50e   : > { %6233 = vmatmul.mubr.bf16.gmra.mrb[8].mxu1 %v12837_v2 }
 0x50f   : > { %6242 = vmatprep.mubr.bf16.mxu1 %v12871_v19 }
 0x516   : > { %6243 = vmatmul.mubr.bf16.gmra.mrb[12].mxu1 %v12853_v60 }
 0x517   : > { %6252 = vmatprep.mubr.bf16.mxu1 %v12887_v35 }
 0x51e   : > { %6253 = vmatmul.mubr.bf16.gmra.mrb[16].mxu1 %v12871_v19 }
 0x51f   : > { %6262 = vmatprep.mubr.bf16.mxu1 %v12894_v38 }
 0x526   : > { %6263 = vmatmul.mubr.bf16.gmra.mrb[20].mxu1 %v12887_v35 }
 0x527   : > { %6272 = vmatprep.mubr.bf16.mxu1 %v12908_v8 }
 0x52e   : > { %6273 = vmatmul.mubr.bf16.gmra.mrb[24].mxu1 %v12894_v38 }
 0x52f   : > { %6315 = vmatprep.mubr.bf16.mxu1 %v15040_v20 }
 0x536   : > { %6316 = vmatmul.mubr.bf16.vlgmr.msra.gmra.mrb[28].mxu1 %v12621_v42  ;;  %v11161_v42 = vmov 0.0  }
 0x537   : > { %6325 = vmatprep.mubr.bf16.mxu1 %v15040_v20  ;;  %6621 = vmatprep.mubr.f32.mxu0 %v11161_v42 }
 0x53e   : > { %6326 = vmatmul.mubr.bf16.gmra.mrb[32].mxu1 %v12638_v13  ;;  %v5674_v13 = vld [vmem:[#allocation3 + $0xcc] sm:$0xe] }
 0x53f   : > { %6335 = vmatprep.mubr.bf16.mxu1 %v15040_v20 }
 0x546   : > { %6336 = vmatmul.mubr.bf16.gmra.mrb[36].mxu1 %v12648_v18  ;;  %v9523_v18 = vcombine.low %v5674_v13, %v13373_v10 }
 0x547   : > { %6345 = vmatprep.mubr.bf16.mxu1 %v15040_v20 }
 0x54e   : > { %6346 = vmatmul.mubr.bf16.gmra.mrb[40].mxu1 %v12667_v6  ;;  %v5780_v6 = vrot.slane %v9523_v18, 1  ;;  %v15074_v18 = vld [vmem:[#allocation12_spill] sm:$0xff] }
 0x54f   : > { %6355 = vmatprep.mubr.bf16.mxu1 %v15040_v20 }
 0x556   : > { %6356 = vmatmul.mubr.bf16.gmra.mrb[44].mxu1 %v12678_v26  ;;  %v5781_v26 = vrot.slane %v13378_v37, 1 }
 0x557   : > { %6365 = vmatprep.mubr.bf16.mxu1 %v15040_v20 }
 0x55e   : > { %6366 = vmatmul.mubr.bf16.gmra.mrb[48].mxu1 %v12697_v55  ;;  %v5782_v55 = vsel %vm2554_vm9, %v5780_v6, %v5781_v26 }
 0x55f   : > { %6375 = vmatprep.mubr.bf16.mxu1 %v15040_v20 }
 0x566   : > { %6376 = vmatmul.mubr.bf16.gmra.mrb[52].mxu1 %v12708_v23  ;;  %v3594_v23 = vlaneseq }
 0x567   : > { %6385 = vmatprep.mubr.bf16.mxu1 %v15040_v20 }
 0x56e   : > { %6386 = vmatmul.mubr.bf16.gmra.mrb[56].mxu1 %v12736_v31  ;;  %v3595_v31 = vshrl.u32 %v3594_v23, 7 }
 0x56f   : > { %6395 = vmatprep.mubr.bf16.mxu1 %v15040_v20 }
 0x576   : > { %6396 = vmatmul.mubr.bf16.gmra.mrb[60].mxu1 %v12767_v15  ;;  %v3596_v15 = vsub.s32 0, %v3595_v31 }
 0x577   : > { %6405 = vmatprep.mubr.bf16.mxu1 %v15040_v20 }
 0x57e   : > { %6406 = vmatmul.mubr.bf16.gmra.mrb[0].mxu1 %v12837_v2  ;;  %v3592_v2 = vld [vmem:[%s14990_s4] sm:$0x3] }
 0x57f   : > { %6415 = vmatprep.mubr.bf16.mxu1 %v15040_v20 }
 0x586   : > { %6416 = vmatmul.mubr.bf16.gmra.mrb[4].mxu1 %v12853_v60  ;;  %v3600_v60 = vsub.s32 1, %v3595_v31 }
 0x587   : > { %6425 = vmatprep.mubr.bf16.mxu1 %v15040_v20 }
 0x58e   : > { %6426 = vmatmul.mubr.bf16.gmra.mrb[8].mxu1 %v12871_v19  ;;  %v13501_v19 = vrot.slane %v3592_v2, %v3596_v15 }
 0x58f   : > { %6435 = vmatprep.mubr.bf16.mxu1 %v15040_v20 }
 0x590   : > { %v10103_v16 = vadd.f32 %v13030_v59, %v13501_v19  ;;  %v10111_v59 = vadd.f32 %v13040_v56, %v13501_v19  ;;  %v10119_v39 = vadd.f32 %v15071_v25, %v13501_v19  ;;  %v10123_v13 = vadd.f32 %v15073_v34, %v13501_v19 }
 0x596   : > { %6436 = vmatmul.mubr.bf16.gmra.mrb[12].mxu1 %v12887_v35  ;;  %v13503_v35 = vrot.slane %v3592_v2, %v3600_v60  ;;  %v15076_v2 = vld [vmem:[#allocation7_spill] sm:$0xff] }
 0x597   : > { %6445 = vmatprep.mubr.bf16.mxu1 %v15040_v20 }
 0x598   : > { %v10105_v46 = vadd.f32 %v13032_v29, %v13503_v35  ;;  %v10117_v63 = vadd.f32 %v15070_v47, %v13503_v35  ;;  %v10121_v22 = vadd.f32 %v15072_v52, %v13503_v35  ;;  %v10125_v6 = vadd.f32 %v15074_v18, %v13503_v35  ;;  %v15083_v47 = vld [vmem:[#allocation21_spill] sm:$0xff] }
 0x599   : > { %v10129_v60 = vadd.f32 %v15076_v2, %v13503_v35  ;;  %v15087_v18 = vld [vmem:[#allocation25_spill] sm:$0xff] }
 0x59e   : > { %6446 = vmatmul.mubr.bf16.gmra.mrb[16].mxu1 %v12894_v38  ;;  %v10099_v38 = vadd.f32 %v13026_v50, %v13501_v19  ;;  %v10107_v50 = vadd.f32 %v13036_v4, %v13501_v19  ;;  %v10113_v4 = vadd.f32 %v13042_v48, %v13503_v35  ;;  %v10115_v48 = vadd.f32 %v15069_v41, %v13501_v19 }
 0x59f   : > { %6455 = vmatprep.mubr.bf16.mxu1 %v15040_v20 }
 0x5a6   : > { %6456 = vmatmul.mubr.bf16.gmra.mrb[20].mxu1 %v12908_v8 }
 0x5a7   : > { %6465 = vmatprep.mubr.bf16.mxu1 %v15040_v20  ;;  %v10101_v20 = vadd.f32 %v13028_v36, %v13503_v35  ;;  %v10109_v36 = vadd.f32 %v13038_v5, %v13503_v35 }
 0x5ae   : > { %6466 = vmatmul.mubr.bf16.gmra.mrb[24].mxu1 %v5782_v55  ;;  %v15075_v55 = vld [vmem:[#allocation14_spill] sm:$0xff] }
 0x5af   : > { %v10127_v23 = vadd.f32 %v15075_v55, %v13501_v19 }
 0x609   : > { %v6317_v8 = vpop.f32.mrb[28].mxu1 }
 0x60a   : > { %v10100_v57 = vadd.f32 %v10099_v38, %v6317_v8  ;;  %v6319_v44 = vpop.f32.mrb[29].mxu1 }
 0x60b   : > { %v10102_v3 = vadd.f32 %v10101_v20, %v6319_v44  ;;  %v6321_v1 = vpop.f32.mrb[30].mxu1 }
 0x60c   : > { %v10104_v11 = vadd.f32 %v10103_v16, %v6321_v1  ;;  %v6323_v58 = vpop.f32.mrb[31].mxu1 }
 0x60d   : > { %v10106_v53 = vadd.f32 %v10105_v46, %v6323_v58 }
 0x60e   : > { %v9973_v30 = vpack.c.bf16 %v10104_v11, %v10100_v57  ;;  %v15078_v11 = vld [vmem:[#allocation16_spill] sm:$0xff] }
 0x60f   : > { %v9971_v10 = vpack.c.bf16 %v10106_v53, %v10102_v3  ;;  %v15077_v3 = vld [vmem:[#allocation15_spill] sm:$0xff]  ;;  %v10133_v58 = vadd.f32 %v15078_v11, %v13503_v35  ;;  %v15091_v11 = vld [vmem:[#allocation29_spill] sm:$0xff] }
 0x610   : > { %v10131_v1 = vadd.f32 %v15077_v3, %v13501_v19 }
 0x611   : > { %v6327_v45 = vpop.f32.mrb[32].mxu1  ;;  %9972 = vmatprep.subr.bf16.mxu0 %v9971_v10 }
 0x612   : > { %v10108_v37 = vadd.f32 %v10107_v50, %v6327_v45  ;;  %v6329_v29 = vpop.f32.mrb[33].mxu1  ;;  %9974 = vmatpush1.bf16.msra.mxu0 %v9973_v30  ;;  %v15079_v30 = vld [vmem:[#allocation17_spill] sm:$0xff]  ;;  %v15080_v45 = vld [vmem:[#allocation18_spill] sm:$0xff] }
 0x613   : > { %v10110_v7 = vadd.f32 %v10109_v36, %v6329_v29  ;;  %v6331_v49 = vpop.f32.mrb[34].mxu1  ;;  %v10135_v10 = vadd.f32 %v15079_v30, %v13501_v19 }
 0x614   : > { %v10112_v5 = vadd.f32 %v10111_v59, %v6331_v49  ;;  %v6333_v51 = vpop.f32.mrb[35].mxu1  ;;  %v10137_v59 = vadd.f32 %v15080_v45, %v13503_v35 }
 0x615   : > { %v10114_v33 = vadd.f32 %v10113_v4, %v6333_v51  ;;  %9620 = vmatmul.mubr.msk.f32.vlgmr.msra.gmra.mrb[100].mxu0 %vm6544_vm15, %v13522_v62 }
 0x616   : > { %v9977_v56 = vpack.c.bf16 %v10112_v5, %v10108_v37  ;;  %6627 = vmatprep.mubr.f32.mxu0 %v11161_v42 }
 0x617   : > { %v9975_v28 = vpack.c.bf16 %v10114_v33, %v10110_v7  ;;  %v15081_v33 = vld [vmem:[#allocation19_spill] sm:$0xff] }
 0x619   : > { %v6337_v12 = vpop.f32.mrb[36].mxu1  ;;  %9621 = vmatmul.mubr.msk.f32.gmra.mrb[102].mxu0 %vm6544_vm15, %v13532_v24  ;;  %9976 = vmatprep.subr.bf16.mxu0 %v9975_v28  ;;  %v15082_v28 = vld [vmem:[#allocation20_spill] sm:$0xff] }
 0x61a   : > { %v10116_v40 = vadd.f32 %v10115_v48, %v6337_v12  ;;  %v6339_v27 = vpop.f32.mrb[37].mxu1  ;;  %9978 = vmatpush1.bf16.msra.mxu0 %v9977_v56  ;;  %6633 = vmatprep.mubr.f32.mxu0 %v11161_v42  ;;  %v10139_v56 = vadd.f32 %v15081_v33, %v13501_v19  ;;  %v10141_v41 = vadd.f32 %v15082_v28, %v13503_v35  ;;  %v15094_v33 = vld [vmem:[#allocation32_spill] sm:$0xff] }
 0x61b   : > { %v10118_v61 = vadd.f32 %v10117_v63, %v6339_v27  ;;  %v6341_v0 = vpop.f32.mrb[38].mxu1  ;;  %v10143_v63 = vadd.f32 %v15083_v47, %v13501_v19 }
 0x61c   : > { %v10120_v32 = vadd.f32 %v10119_v39, %v6341_v0  ;;  %v6343_v21 = vpop.f32.mrb[39].mxu1  ;;  %v15084_v39 = vld [vmem:[#allocation22_spill] sm:$0xff] }
 0x61d   : > { %v10122_v17 = vadd.f32 %v10121_v22, %v6343_v21  ;;  %9622 = vmatmul.mubr.msk.f32.gmra.mrb[104].mxu0 %vm6544_vm15, %v13546_v43 }
 0x61e   : > { %v9981_v54 = vpack.c.bf16 %v10120_v32, %v10116_v40  ;;  %6639 = vmatprep.mubr.f32.mxu0 %v11161_v42  ;;  %v10145_v40 = vadd.f32 %v15084_v39, %v13503_v35 }
 0x61f   : > { %v9979_v14 = vpack.c.bf16 %v10122_v17, %v10118_v61  ;;  %v15085_v17 = vld [vmem:[#allocation23_spill] sm:$0xff] }
 0x621   : > { %v6347_v26 = vpop.f32.mrb[40].mxu1  ;;  %9623 = vmatmul.mubr.msk.f32.gmra.mrb[106].mxu0 %vm6544_vm15, %v13556_v9  ;;  %9980 = vmatprep.subr.bf16.mxu0 %v9979_v14  ;;  %v15086_v14 = vld [vmem:[#allocation24_spill] sm:$0xff] }
 0x622   : > { %v10124_v31 = vadd.f32 %v10123_v13, %v6347_v26  ;;  %v6349_v15 = vpop.f32.mrb[41].mxu1  ;;  %6710 = vmatprep.mubr.f32.mxu0 %v11161_v42  ;;  %v10149_v34 = vadd.f32 %v15086_v14, %v13503_v35 }
 0x623   : > { %v10126_v38 = vadd.f32 %v10125_v6, %v6349_v15  ;;  %v6351_v20 = vpop.f32.mrb[42].mxu1  ;;  %v10151_v6 = vadd.f32 %v15087_v18, %v13501_v19 }
 0x624   : > { %v10128_v8 = vadd.f32 %v10127_v23, %v6351_v20  ;;  %v6353_v16 = vpop.f32.mrb[43].mxu1  ;;  %v15088_v23 = vld [vmem:[#allocation26_spill] sm:$0xff] }
 0x625   : > { %v10130_v57 = vadd.f32 %v10129_v60, %v6353_v16  ;;  %9624 = vmatmul.mubr.msk.f32.vlgmr.msra.gmra.mrb[108].mxu0 %vm6544_vm15, %v13522_v62 }
 0x626   : > { %v9985_v44 = vpack.c.bf16 %v10128_v8, %v10124_v31  ;;  %9982 = vmatpush1.bf16.msra.mxu0 %v9981_v54  ;;  %6716 = vmatprep.mubr.f32.mxu0 %v11161_v42  ;;  %v10147_v54 = vadd.f32 %v15085_v17, %v13501_v19  ;;  %v10153_v31 = vadd.f32 %v15088_v23, %v13503_v35 }
 0x627   : > { %v9983_v46 = vpack.c.bf16 %v10130_v57, %v10126_v38  ;;  %v15089_v57 = vld [vmem:[#allocation27_spill] sm:$0xff] }
 0x629   : > { %v6357_v53 = vpop.f32.mrb[44].mxu1  ;;  %9625 = vmatmul.mubr.msk.f32.gmra.mrb[110].mxu0 %vm6544_vm15, %v13532_v24  ;;  %9984 = vmatprep.subr.bf16.mxu0 %v9983_v46  ;;  %v15090_v46 = vld [vmem:[#allocation28_spill] sm:$0xff] }
 0x62a   : > { %v13580_v50 = vadd.f32 %v10131_v1, %v6357_v53  ;;  %v6359_v36 = vpop.f32.mrb[45].mxu1  ;;  %6722 = vmatprep.mubr.f32.mxu0 %v11161_v42  ;;  %v10157_v3 = vadd.f32 %v15090_v46, %v13503_v35 }
 0x62b   : > { %v10134_v37 = vadd.f32 %v10133_v58, %v6359_v36  ;;  %v6361_v29 = vpop.f32.mrb[46].mxu1  ;;  %v10159_v58 = vadd.f32 %v15091_v11, %v13501_v19 }
 0x62c   : > { %v10136_v4 = vadd.f32 %v10135_v10, %v6361_v29  ;;  %v6363_v7 = vpop.f32.mrb[47].mxu1  ;;  %v15092_v10 = vld [vmem:[#allocation30_spill] sm:$0xff] }
 0x62d   : > { %v10138_v49 = vadd.f32 %v10137_v59, %v6363_v7  ;;  %9626 = vmatmul.mubr.msk.f32.gmra.mrb[112].mxu0 %vm6544_vm15, %v13546_v43 }
 0x62e   : > { %v9989_v5 = vpack.c.bf16 %v10136_v4, %v13580_v50  ;;  %6728 = vmatprep.mubr.f32.mxu0 %v11161_v42  ;;  %v10161_v50 = vadd.f32 %v15092_v10, %v13503_v35 }
 0x62f   : > { %v9987_v51 = vpack.c.bf16 %v10138_v49, %v10134_v37  ;;  %v15093_v49 = vld [vmem:[#allocation31_spill] sm:$0xff] }
 0x631   : > { %v6367_v48 = vpop.f32.mrb[48].mxu1  ;;  %9627 = vmatmul.mubr.msk.f32.gmra.mrb[114].mxu0 %vm6544_vm15, %v13556_v9 }
 0x632   : > { %v13597_v12 = vadd.f32 %v10139_v56, %v6367_v48  ;;  %v6369_v25 = vpop.f32.mrb[49].mxu1  ;;  %6799 = vmatprep.mubr.f32.mxu0 %v11161_v42  ;;  %v10165_v56 = vadd.f32 %v15094_v33, %v13503_v35 }
 0x633   : > { %v10142_v27 = vadd.f32 %v10141_v41, %v6369_v25  ;;  %v6371_v52 = vpop.f32.mrb[50].mxu1  ;;  %v15095_v41 = vld [vmem:[#allocation33_spill] sm:$0xff] }
 0x634   : > { %v13602_v22 = vadd.f32 %v10143_v63, %v6371_v52  ;;  %v6373_v61 = vpop.f32.mrb[51].mxu1  ;;  %v10167_v48 = vadd.f32 %v15095_v41, %v13501_v19  ;;  %v15096_v63 = vld [vmem:[#allocation34_spill] sm:$0xff] }
 0x635   : > { %v10146_v0 = vadd.f32 %v10145_v40, %v6373_v61  ;;  %9628 = vmatmul.mubr.msk.f32.vlgmr.msra.gmra.mrb[116].mxu0 %vm6544_vm15, %v13522_v62  ;;  %v10169_v25 = vadd.f32 %v15096_v63, %v13503_v35 }
 0x636   : > { %v9993_v32 = vpack.c.bf16 %v13602_v22, %v13597_v12  ;;  %9986 = vmatpush1.bf16.msra.mxu0 %v9985_v44  ;;  %6805 = vmatprep.mubr.f32.mxu0 %v11161_v42  ;;  %v10155_v44 = vadd.f32 %v15089_v57, %v13501_v19 }
 0x637   : > { %v9991_v21 = vpack.c.bf16 %v10146_v0, %v10142_v27  ;;  %9988 = vmatprep.subr.bf16.mxu0 %v9987_v51  ;;  %v10163_v51 = vadd.f32 %v15093_v49, %v13501_v19 }
 0x639   : > { %v6377_v13 = vpop.f32.mrb[52].mxu1  ;;  %9629 = vmatmul.mubr.msk.f32.gmra.mrb[118].mxu0 %vm6544_vm15, %v13532_v24 }
 0x63a   : > { %v13617_v26 = vadd.f32 %v10147_v54, %v6377_v13  ;;  %v6379_v55 = vpop.f32.mrb[53].mxu1  ;;  %6811 = vmatprep.mubr.f32.mxu0 %v11161_v42 }
 0x63b   : > { %v10150_v15 = vadd.f32 %v10149_v34, %v6379_v55  ;;  %v6381_v2 = vpop.f32.mrb[54].mxu1 }
 0x63c   : > { %v13622_v60 = vadd.f32 %v10151_v6, %v6381_v2  ;;  %v6383_v38 = vpop.f32.mrb[55].mxu1 }
 0x63d   : > { %v10154_v20 = vadd.f32 %v10153_v31, %v6383_v38  ;;  %9630 = vmatmul.mubr.msk.f32.gmra.mrb[120].mxu0 %vm6544_vm15, %v13546_v43 }
 0x63e   : > { %v9997_v8 = vpack.c.bf16 %v13622_v60, %v13617_v26  ;;  %6817 = vmatprep.mubr.f32.mxu0 %v11161_v42 }
 0x63f   : > { %v9995_v16 = vpack.c.bf16 %v10154_v20, %v10150_v15 }
 0x641   : > { %v6387_v1 = vpop.f32.mrb[56].mxu1  ;;  %9631 = vmatmul.mubr.msk.f32.gmra.mrb[122].mxu0 %vm6544_vm15, %v13556_v9 }
 0x642   : > { %v13637_v53 = vadd.f32 %v10155_v44, %v6387_v1  ;;  %v6389_v30 = vpop.f32.mrb[57].mxu1  ;;  %6888 = vmatprep.mubr.f32.mxu0 %v11161_v42 }
 0x643   : > { %v13642_v36 = vadd.f32 %v10157_v3, %v6389_v30  ;;  %v6391_v45 = vpop.f32.mrb[58].mxu1 }
 0x644   : > { %v13644_v59 = vadd.f32 %v10159_v58, %v6391_v45  ;;  %v6393_v37 = vpop.f32.mrb[59].mxu1 }
 0x645   : > { %v13646_v29 = vadd.f32 %v10161_v50, %v6393_v37  ;;  %9632 = vmatmul.mubr.msk.f32.vlgmr.msra.gmra.mrb[124].mxu0 %vm6544_vm15, %v13522_v62 }
 0x646   : > { %v10001_v4 = vpack.c.bf16 %v13644_v59, %v13637_v53  ;;  %9990 = vmatpush1.bf16.msra.mxu0 %v9989_v5  ;;  %6894 = vmatprep.mubr.f32.mxu0 %v11161_v42 }
 0x647   : > { %v9999_v7 = vpack.c.bf16 %v13646_v29, %v13642_v36  ;;  %9992 = vmatprep.subr.bf16.mxu0 %v9991_v21 }
 0x649   : > { %v6397_v28 = vpop.f32.mrb[60].mxu1  ;;  %9633 = vmatmul.mubr.msk.f32.gmra.mrb[126].mxu0 %vm6544_vm15, %v13532_v24 }
 0x64a   : > { %v13663_v5 = vadd.f32 %v10163_v51, %v6397_v28  ;;  %v6399_v47 = vpop.f32.mrb[61].mxu1  ;;  %6900 = vmatprep.mubr.f32.mxu0 %v11161_v42 }
 0x64b   : > { %v13668_v39 = vadd.f32 %v10165_v56, %v6399_v47  ;;  %v6401_v40 = vpop.f32.mrb[62].mxu1 }
 0x64c   : > { %v13670_v27 = vadd.f32 %v10167_v48, %v6401_v40  ;;  %v6403_v52 = vpop.f32.mrb[63].mxu1 }
 0x64d   : > { %v13672_v61 = vadd.f32 %v10169_v25, %v6403_v52  ;;  %9634 = vmatmul.mubr.msk.f32.gmra.mrb[128].mxu0 %vm6544_vm15, %v13546_v43 }
 0x64e   : > { %v10005_v0 = vpack.c.bf16 %v13670_v27, %v13663_v5  ;;  %6906 = vmatprep.mubr.f32.mxu0 %v11161_v42 }
 0x64f   : > { %v10003_v21 = vpack.c.bf16 %v13672_v61, %v13668_v39 }
 0x651   : > { %v6407_v17 = vpop.f32.mrb[0].mxu1  ;;  %9635 = vmatmul.mubr.msk.f32.gmra.mrb[130].mxu0 %vm6544_vm15, %v13556_v9 }
 0x652   : > { %v6409_v54 = vpop.f32.mrb[1].mxu1  ;;  %6977 = vmatprep.mubr.f32.mxu0 %v11161_v42  ;;  %v13685_v34 = vadd.f32 %v6407_v17, %v13501_v19 }
 0x653   : > { %v6411_v14 = vpop.f32.mrb[2].mxu1  ;;  %v13691_v6 = vadd.f32 %v6409_v54, %v13503_v35 }
 0x654   : > { %v13688_v13 = vadd.f32 %v6411_v14, %v13501_v19  ;;  %v6413_v18 = vpop.f32.mrb[3].mxu1 }
 0x655   : > { %v13694_v55 = vadd.f32 %v6413_v18, %v13503_v35  ;;  %9636 = vmatmul.mubr.msk.f32.vlgmr.msra.gmra.mrb[132].mxu0 %vm6544_vm15, %v13522_v62 }
 0x656   : > { %v10009_v23 = vpack.c.bf16 %v13688_v13, %v13685_v34  ;;  %9994 = vmatpush1.bf16.msra.mxu0 %v9993_v32  ;;  %6983 = vmatprep.mubr.f32.mxu0 %v11161_v42 }
 0x657   : > { %v10007_v31 = vpack.c.bf16 %v13694_v55, %v13691_v6  ;;  %9996 = vmatprep.subr.bf16.mxu0 %v9995_v16 }
 0x659   : > { %v6417_v15 = vpop.f32.mrb[4].mxu1  ;;  %9637 = vmatmul.mubr.msk.f32.gmra.mrb[134].mxu0 %vm6544_vm15, %v13532_v24 }
 0x65a   : > { %v6419_v2 = vpop.f32.mrb[5].mxu1  ;;  %6989 = vmatprep.mubr.f32.mxu0 %v11161_v42  ;;  %v13710_v20 = vadd.f32 %v6417_v15, %v13501_v19 }
 0x65b   : > { %v6421_v38 = vpop.f32.mrb[6].mxu1  ;;  %v13716_v32 = vadd.f32 %v6419_v2, %v13503_v35 }
 0x65c   : > { %v13713_v12 = vadd.f32 %v6421_v38, %v13501_v19  ;;  %v6423_v22 = vpop.f32.mrb[7].mxu1 }
 0x65d   : > { %v13719_v16 = vadd.f32 %v6423_v22, %v13503_v35  ;;  %9638 = vmatmul.mubr.msk.f32.gmra.mrb[136].mxu0 %vm6544_vm15, %v13546_v43 }
 0x65e   : > { %v10013_v57 = vpack.c.bf16 %v13713_v12, %v13710_v20  ;;  %6995 = vmatprep.mubr.f32.mxu0 %v11161_v42 }
 0x65f   : > { %v10011_v44 = vpack.c.bf16 %v13719_v16, %v13716_v32 }
 0x661   : > { %v6427_v46 = vpop.f32.mrb[8].mxu1  ;;  %9639 = vmatmul.mubr.msk.f32.gmra.mrb[138].mxu0 %vm6544_vm15, %v13556_v9 }
 0x662   : > { %v6429_v3 = vpop.f32.mrb[9].mxu1  ;;  %7066 = vmatprep.mubr.f32.mxu0 %v11161_v42  ;;  %v13732_v11 = vadd.f32 %v6427_v46, %v13501_v19 }
 0x663   : > { %v6431_v1 = vpop.f32.mrb[10].mxu1  ;;  %v13738_v10 = vadd.f32 %v6429_v3, %v13503_v35 }
 0x664   : > { %v13735_v58 = vadd.f32 %v6431_v1, %v13501_v19  ;;  %v6433_v30 = vpop.f32.mrb[11].mxu1 }
 0x665   : > { %v13741_v50 = vadd.f32 %v6433_v30, %v13503_v35  ;;  %9640 = vmatmul.mubr.msk.f32.vlgmr.msra.gmra.mrb[140].mxu0 %vm6544_vm15, %v13522_v62 }
 0x666   : > { %v10017_v45 = vpack.c.bf16 %v13735_v58, %v13732_v11  ;;  %9998 = vmatpush1.bf16.msra.mxu0 %v9997_v8  ;;  %7072 = vmatprep.mubr.f32.mxu0 %v11161_v42 }
 0x667   : > { %v10015_v37 = vpack.c.bf16 %v13741_v50, %v13738_v10  ;;  %10000 = vmatprep.subr.bf16.mxu0 %v9999_v7 }
 0x669   : > { %v6437_v49 = vpop.f32.mrb[12].mxu1  ;;  %9641 = vmatmul.mubr.msk.f32.gmra.mrb[142].mxu0 %vm6544_vm15, %v13532_v24 }
 0x66a   : > { %v6439_v51 = vpop.f32.mrb[13].mxu1  ;;  %7078 = vmatprep.mubr.f32.mxu0 %v11161_v42  ;;  %v13760_v26 = vadd.f32 %v6437_v49, %v13501_v19 }
 0x66b   : > { %v6441_v33 = vpop.f32.mrb[14].mxu1  ;;  %v13766_v56 = vadd.f32 %v6439_v51, %v13503_v35 }
 0x66c   : > { %v13763_v60 = vadd.f32 %v6441_v33, %v13501_v19  ;;  %v6443_v8 = vpop.f32.mrb[15].mxu1 }
 0x66d   : > { %v13769_v36 = vadd.f32 %v6443_v8, %v13503_v35  ;;  %9642 = vmatmul.mubr.msk.f32.gmra.mrb[144].mxu0 %vm6544_vm15, %v13546_v43 }
 0x66e   : > { %v10021_v29 = vpack.c.bf16 %v13763_v60, %v13760_v26  ;;  %7084 = vmatprep.mubr.f32.mxu0 %v11161_v42 }
 0x66f   : > { %v10019_v7 = vpack.c.bf16 %v13769_v36, %v13766_v56 }
 0x671   : > { %v6447_v28 = vpop.f32.mrb[16].mxu1  ;;  %9643 = vmatmul.mubr.msk.f32.gmra.mrb[146].mxu0 %vm6544_vm15, %v13556_v9 }
 0x672   : > { %v6449_v41 = vpop.f32.mrb[17].mxu1  ;;  %7155 = vmatprep.mubr.f32.mxu0 %v11161_v42  ;;  %v13782_v47 = vadd.f32 %v6447_v28, %v13501_v19 }
 0x673   : > { %v6451_v48 = vpop.f32.mrb[18].mxu1  ;;  %v13788_v40 = vadd.f32 %v6449_v41, %v13503_v35 }
 0x674   : > { %v13785_v63 = vadd.f32 %v6451_v48, %v13501_v19  ;;  %v6453_v25 = vpop.f32.mrb[19].mxu1 }
 0x675   : > { %v13791_v52 = vadd.f32 %v6453_v25, %v13503_v35  ;;  %9644 = vmatmul.mubr.msk.f32.vlgmr.msra.gmra.mrb[148].mxu0 %vm6544_vm15, %v13522_v62 }
 0x676   : > { %v10025_v17 = vpack.c.bf16 %v13785_v63, %v13782_v47  ;;  %10002 = vmatpush1.bf16.msra.mxu0 %v10001_v4  ;;  %7161 = vmatprep.mubr.f32.mxu0 %v11161_v42 }
 0x677   : > { %v10023_v54 = vpack.c.bf16 %v13791_v52, %v13788_v40  ;;  %10004 = vmatprep.subr.bf16.mxu0 %v10003_v21 }
 0x679   : > { %v6457_v14 = vpop.f32.mrb[20].mxu1  ;;  %9645 = vmatmul.mubr.msk.f32.gmra.mrb[150].mxu0 %vm6544_vm15, %v13532_v24 }
 0x67a   : > { %v6459_v18 = vpop.f32.mrb[21].mxu1  ;;  %7167 = vmatprep.mubr.f32.mxu0 %v11161_v42  ;;  %v13810_v53 = vadd.f32 %v6457_v14, %v13501_v19 }
 0x67b   : > { %v6461_v15 = vpop.f32.mrb[22].mxu1  ;;  %v13816_v2 = vadd.f32 %v6459_v18, %v13503_v35 }
 0x67c   : > { %v13813_v59 = vadd.f32 %v6461_v15, %v13501_v19  ;;  %v6463_v4 = vpop.f32.mrb[23].mxu1 }
 0x67d   : > { %v13819_v39 = vadd.f32 %v6463_v4, %v13503_v35  ;;  %9646 = vmatmul.mubr.msk.f32.gmra.mrb[152].mxu0 %vm6544_vm15, %v13546_v43 }
 0x67e   : > { %v10029_v61 = vpack.c.bf16 %v13813_v59, %v13810_v53  ;;  %7173 = vmatprep.mubr.f32.mxu0 %v11161_v42 }
 0x67f   : > { %v10027_v21 = vpack.c.bf16 %v13819_v39, %v13816_v2 }
 0x681   : > { %v6467_v38 = vpop.f32.mrb[24].mxu1  ;;  %9647 = vmatmul.mubr.msk.f32.gmra.mrb[154].mxu0 %vm6544_vm15, %v13556_v9 }
 0x682   : > { %v6469_v22 = vpop.f32.mrb[25].mxu1  ;;  %7244 = vmatprep.mubr.f32.mxu0 %v11161_v42  ;;  %v13832_v3 = vadd.f32 %v6467_v38, %v13501_v19 }
 0x683   : > { %v6471_v46 = vpop.f32.mrb[26].mxu1  ;;  %v13838_v49 = vadd.f32 %v6469_v22, %v13503_v35 }
 0x684   : > { %v13835_v1 = vadd.f32 %v6471_v46, %v13501_v19  ;;  %v6473_v30 = vpop.f32.mrb[27].mxu1 }
 0x685   : > { %v13841_v51 = vadd.f32 %v6473_v30, %v13503_v35  ;;  %9648 = vmatmul.mubr.msk.f32.vlgmr.msra.gmra.mrb[156].mxu0 %vm6544_vm15, %v13522_v62 }
 0x686   : > { %v10033_v33 = vpack.c.bf16 %v13835_v1, %v13832_v3  ;;  %10006 = vmatpush1.bf16.msra.mxu0 %v10005_v0  ;;  %7250 = vmatprep.mubr.f32.mxu0 %v11161_v42 }
 0x687   : > { %v10031_v19 = vpack.c.bf16 %v13841_v51, %v13838_v49  ;;  %10008 = vmatprep.subr.bf16.mxu0 %v10007_v31 }
 0x689   : > { %9649 = vmatmul.mubr.msk.f32.gmra.mrb[158].mxu0 %vm6544_vm15, %v13532_v24 }
 0x68a   : > { %7256 = vmatprep.mubr.f32.mxu0 %v11161_v42 }
 0x68d   : > { %9650 = vmatmul.mubr.msk.f32.gmra.mrb[160].mxu0 %vm6544_vm15, %v13546_v43 }
 0x68e   : > { %7262 = vmatprep.mubr.f32.mxu0 %v11161_v42 }
 0x691   : > { %9651 = vmatmul.mubr.msk.f32.gmra.mrb[162].mxu0 %vm6544_vm15, %v13556_v9 }
 0x692   : > { %7333 = vmatprep.mubr.f32.mxu0 %v11161_v42 }
 0x695   : > { %9652 = vmatmul.mubr.msk.f32.vlgmr.msra.gmra.mrb[164].mxu0 %vm6544_vm15, %v13522_v62 }
 0x696   : > { %10010 = vmatpush1.bf16.msra.mxu0 %v10009_v23  ;;  %7339 = vmatprep.mubr.f32.mxu0 %v11161_v42 }
 0x697   : > { %10012 = vmatprep.subr.bf16.mxu0 %v10011_v44 }
 0x699   : > { %9653 = vmatmul.mubr.msk.f32.gmra.mrb[166].mxu0 %vm6544_vm15, %v13532_v24 }
 0x69a   : > { %7345 = vmatprep.mubr.f32.mxu0 %v11161_v42 }
 0x69d   : > { %9654 = vmatmul.mubr.msk.f32.gmra.mrb[168].mxu0 %vm6544_vm15, %v13546_v43 }
 0x69e   : > { %7351 = vmatprep.mubr.f32.mxu0 %v11161_v42 }
 0x6a1   : > { %9655 = vmatmul.mubr.msk.f32.gmra.mrb[170].mxu0 %vm6544_vm15, %v13556_v9 }
 0x6a2   : > { %7422 = vmatprep.mubr.f32.mxu0 %v11161_v42 }
 0x6a5   : > { %9656 = vmatmul.mubr.msk.f32.vlgmr.msra.gmra.mrb[172].mxu0 %vm6544_vm15, %v13522_v62 }
 0x6a6   : > { %10014 = vmatpush1.bf16.msra.mxu0 %v10013_v57  ;;  %7428 = vmatprep.mubr.f32.mxu0 %v11161_v42 }
 0x6a7   : > { %10016 = vmatprep.subr.bf16.mxu0 %v10015_v37 }
 0x6a9   : > { %9657 = vmatmul.mubr.msk.f32.gmra.mrb[174].mxu0 %vm6544_vm15, %v13532_v24 }
 0x6aa   : > { %7434 = vmatprep.mubr.f32.mxu0 %v11161_v42 }
 0x6ad   : > { %9658 = vmatmul.mubr.msk.f32.gmra.mrb[176].mxu0 %vm6544_vm15, %v13546_v43 }
 0x6ae   : > { %7440 = vmatprep.mubr.f32.mxu0 %v11161_v42 }
 0x6b1   : > { %9659 = vmatmul.mubr.msk.f32.gmra.mrb[178].mxu0 %vm6544_vm15, %v13556_v9 }
 0x6b2   : > { %7511 = vmatprep.mubr.f32.mxu0 %v11161_v42 }
 0x6b5   : > { %9660 = vmatmul.mubr.msk.f32.vlgmr.msra.gmra.mrb[180].mxu0 %vm6544_vm15, %v13522_v62 }
 0x6b6   : > { %10018 = vmatpush1.bf16.msra.mxu0 %v10017_v45  ;;  %7517 = vmatprep.mubr.f32.mxu0 %v11161_v42 }
 0x6b7   : > { %10020 = vmatprep.subr.bf16.mxu0 %v10019_v7 }
 0x6b9   : > { %9661 = vmatmul.mubr.msk.f32.gmra.mrb[182].mxu0 %vm6544_vm15, %v13532_v24 }
 0x6ba   : > { %7523 = vmatprep.mubr.f32.mxu0 %v11161_v42 }
 0x6bd   : > { %9662 = vmatmul.mubr.msk.f32.gmra.mrb[184].mxu0 %vm6544_vm15, %v13546_v43 }
 0x6be   : > { %7529 = vmatprep.mubr.f32.mxu0 %v11161_v42 }
 0x6c1   : > { %9663 = vmatmul.mubr.msk.f32.gmra.mrb[186].mxu0 %vm6544_vm15, %v13556_v9 }
 0x6c2   : > { %7600 = vmatprep.mubr.f32.mxu0 %v11161_v42 }
 0x6c5   : > { %9664 = vmatmul.mubr.msk.f32.vlgmr.msra.gmra.mrb[188].mxu0 %vm6544_vm15, %v13522_v62 }
 0x6c6   : > { %10022 = vmatpush1.bf16.msra.mxu0 %v10021_v29  ;;  %7606 = vmatprep.mubr.f32.mxu0 %v11161_v42 }
 0x6c7   : > { %10024 = vmatprep.subr.bf16.mxu0 %v10023_v54 }
 0x6c9   : > { %9665 = vmatmul.mubr.msk.f32.gmra.mrb[190].mxu0 %vm6544_vm15, %v13532_v24 }
 0x6ca   : > { %7612 = vmatprep.mubr.f32.mxu0 %v11161_v42 }
 0x6cd   : > { %9666 = vmatmul.mubr.msk.f32.gmra.mrb[192].mxu0 %vm6544_vm15, %v13546_v43 }
 0x6ce   : > { %7618 = vmatprep.mubr.f32.mxu0 %v11161_v42 }
 0x6d1   : > { %9667 = vmatmul.mubr.msk.f32.gmra.mrb[194].mxu0 %vm6544_vm15, %v13556_v9 }
 0x6d2   : > { %7689 = vmatprep.mubr.f32.mxu0 %v11161_v42 }
 0x6d5   : > { %9668 = vmatmul.mubr.msk.f32.vlgmr.msra.gmra.mrb[196].mxu0 %vm6544_vm15, %v13522_v62 }
 0x6d6   : > { %10026 = vmatpush1.bf16.msra.mxu0 %v10025_v17  ;;  %7695 = vmatprep.mubr.f32.mxu0 %v11161_v42 }
 0x6d7   : > { %10028 = vmatprep.subr.bf16.mxu0 %v10027_v21 }
 0x6d9   : > { %9669 = vmatmul.mubr.msk.f32.gmra.mrb[198].mxu0 %vm6544_vm15, %v13532_v24 }
 0x6da   : > { %7701 = vmatprep.mubr.f32.mxu0 %v11161_v42 }
 0x6dd   : > { %9670 = vmatmul.mubr.msk.f32.gmra.mrb[200].mxu0 %vm6544_vm15, %v13546_v43 }
 0x6de   : > { %7707 = vmatprep.mubr.f32.mxu0 %v11161_v42 }
 0x6e1   : > { %9671 = vmatmul.mubr.msk.f32.gmra.mrb[202].mxu0 %vm6544_vm15, %v13556_v9 }
 0x6e2   : > { %7778 = vmatprep.mubr.f32.mxu0 %v11161_v42 }
 0x6e5   : > { %9672 = vmatmul.mubr.msk.f32.vlgmr.msra.gmra.mrb[204].mxu0 %vm6544_vm15, %v13522_v62 }
 0x6e6   : > { %10030 = vmatpush1.bf16.msra.mxu0 %v10029_v61  ;;  %7784 = vmatprep.mubr.f32.mxu0 %v11161_v42 }
 0x6e7   : > { %10032 = vmatprep.subr.bf16.mxu0 %v10031_v19 }
 0x6e8   : > { %v6623_v35 = vpop.f32.mrb[100].mxu0 }
 0x6e9   : > { %9673 = vmatmul.mubr.msk.f32.gmra.mrb[206].mxu0 %vm6544_vm15, %v13532_v24  ;;  %7981 = vst [vmem:[%s13966_s18] sm:$0xff] %v6623_v35  ;;  %v6625_v5 = vpop.f32.mrb[101].mxu0  ;;  %v7989_v23 = vmul.f32 0.516129, %v6623_v35  ;;  %v8022_v20 = vmul.f32 0.032258064, %v6623_v35 }
 0x6ea   : > { %7790 = vmatprep.mubr.f32.mxu0 %v11161_v42  ;;  %7982 = vst [vmem:[%s13966_s18 + $0x8] sm:$0xff] %v6625_v5  ;;  %v7990_v16 = vmul.f32 0.516129, %v6625_v5  ;;  %v8023_v57 = vmul.f32 0.032258064, %v6625_v5 }
 0x6ec   : > { %v6629_v27 = vpop.f32.mrb[102].mxu0 }
 0x6ed   : > { %9674 = vmatmul.mubr.msk.f32.gmra.mrb[208].mxu0 %vm6544_vm15, %v13546_v43  ;;  %7983 = vst [vmem:[%s13966_s18 + $0x10] sm:$0xff] %v6629_v27  ;;  %v6631_v0 = vpop.f32.mrb[103].mxu0  ;;  %v7991_v45 = vmul.f32 0.516129, %v6629_v27  ;;  %v8024_v37 = vmul.f32 0.032258064, %v6629_v27 }
 0x6ee   : > { %7796 = vmatprep.mubr.f32.mxu0 %v11161_v42  ;;  %7984 = vst [vmem:[%s13966_s18 + $0x18] sm:$0xff] %v6631_v0  ;;  %v7992_v7 = vmul.f32 0.516129, %v6631_v0  ;;  %v8025_v41 = vmul.f32 0.032258064, %v6631_v0 }
 0x6f0   : > { %v6635_v34 = vpop.f32.mrb[104].mxu0 }
 0x6f1   : > { %9675 = vmatmul.mubr.msk.f32.gmra.mrb[210].mxu0 %vm6544_vm15, %v13556_v9  ;;  %7985 = vst [vmem:[%s13966_s18 + $0x20] sm:$0xff] %v6635_v34  ;;  %v6637_v13 = vpop.f32.mrb[105].mxu0  ;;  %v7993_v25 = vmul.f32 0.516129, %v6635_v34  ;;  %v8026_v17 = vmul.f32 0.032258064, %v6635_v34 }
 0x6f2   : > { %7867 = vmatprep.mubr.f32.mxu0 %v11161_v42  ;;  %7986 = vst [vmem:[%s13966_s18 + $0x28] sm:$0xff] %v6637_v13  ;;  %v7994_v15 = vmul.f32 0.516129, %v6637_v13  ;;  %v8027_v53 = vmul.f32 0.032258064, %v6637_v13 }
 0x6f4   : > { %v6641_v6 = vpop.f32.mrb[106].mxu0 }
 0x6f5   : > { %9676 = vmatmul.mubr.msk.f32.vlgmr.msra.gmra.mrb[212].mxu0 %vm6544_vm15, %v13522_v62  ;;  %7987 = vst [vmem:[%s13966_s18 + $0x30] sm:$0xff] %v6641_v6  ;;  %v13984_v55 = vpop.f32.mrb[107].mxu0  ;;  %v7995_v21 = vmul.f32 0.516129, %v6641_v6  ;;  %v8028_v38 = vmul.f32 0.032258064, %v6641_v6 }
 0x6f6   : > { %10034 = vmatpush1.bf16.msra.mxu0 %v10033_v33  ;;  %7988 = vst [vmem:[%s13966_s18 + $0x38] sm:$0xff] %v13984_v55  ;;  %7873 = vmatprep.mubr.f32.mxu0 %v11161_v42  ;;  %v7996_v51 = vmul.f32 0.516129, %v13984_v55  ;;  %v8029_v19 = vmul.f32 0.032258064, %v13984_v55 }
 0x6f8   : > { %v13992_v31 = vpop.f32.mrb[108].mxu0 }
 0x6f9   : > { %v7997_v12 = vmul.f32 0.48387095, %v13992_v31  ;;  %v8030_v32 = vmul.f32 0.9677419, %v13992_v31  ;;  %9677 = vmatmul.mubr.msk.f32.gmra.mrb[214].mxu0 %vm6544_vm15, %v13532_v24  ;;  %v13998_v44 = vpop.f32.mrb[109].mxu0 }
 0x6fa   : > { %7879 = vmatprep.mubr.f32.mxu0 %v11161_v42  ;;  %v7998_v10 = vmul.f32 0.48387095, %v13998_v44  ;;  %v8031_v50 = vmul.f32 0.9677419, %v13998_v44  ;;  %v8055_v0 = vmul.f32 0.5483871, %v13992_v31 }
 0x6fb   : > { %v8005_v11 = vadd.f32 %v7997_v12, %v7989_v23  ;;  %v8038_v58 = vadd.f32 %v8030_v32, %v8022_v20  ;;  %v8088_v13 = vmul.f32 0.06451613, %v13992_v31  ;;  %v8056_v20 = vmul.f32 0.5483871, %v13998_v44 }
 0x6fc   : > { %v14003_v26 = vpop.f32.mrb[110].mxu0  ;;  %v8006_v60 = vadd.f32 %v7998_v10, %v7990_v16  ;;  %v8039_v8 = vadd.f32 %v8031_v50, %v8023_v57  ;;  %v8089_v12 = vmul.f32 0.06451613, %v13998_v44 }
 0x6fd   : > { %9684 = vst [vmem:[%s13966_s18 + $0x40] sm:$0xff] %v8005_v11  ;;  %9692 = vst [vmem:[%s13966_s18 + $0x80] sm:$0xff] %v8038_v58  ;;  %v7999_v56 = vmul.f32 0.48387095, %v14003_v26  ;;  %v8032_v36 = vmul.f32 0.9677419, %v14003_v26  ;;  %9678 = vmatmul.mubr.msk.f32.gmra.mrb[216].mxu0 %vm6544_vm15, %v13546_v43 }
 0x6fe   : > { %v14009_v29 = vpop.f32.mrb[111].mxu0  ;;  %7885 = vmatprep.mubr.f32.mxu0 %v11161_v42  ;;  %9685 = vst [vmem:[%s13966_s18 + $0x48] sm:$0xff] %v8006_v60  ;;  %9693 = vst [vmem:[%s13966_s18 + $0x88] sm:$0xff] %v8039_v8  ;;  %v8057_v58 = vmul.f32 0.5483871, %v14003_v26 }
 0x6ff   : > { %v8000_v28 = vmul.f32 0.48387095, %v14009_v29  ;;  %v8007_v48 = vadd.f32 %v7999_v56, %v7991_v45  ;;  %v8040_v47 = vadd.f32 %v8032_v36, %v8024_v37  ;;  %v8033_v63 = vmul.f32 0.9677419, %v14009_v29 }
 0x700   : > { %v14018_v52 = vpop.f32.mrb[112].mxu0  ;;  %v8058_v8 = vmul.f32 0.5483871, %v14009_v29  ;;  %v8091_v56 = vmul.f32 0.06451613, %v14009_v29 }
 0x701   : > { %v8008_v40 = vadd.f32 %v8000_v28, %v7992_v7  ;;  %9686 = vst [vmem:[%s13966_s18 + $0x50] sm:$0xff] %v8007_v48  ;;  %9694 = vst [vmem:[%s13966_s18 + $0x90] sm:$0xff] %v8040_v47  ;;  %v8041_v54 = vadd.f32 %v8033_v63, %v8025_v41  ;;  %v8001_v14 = vmul.f32 0.48387095, %v14018_v52  ;;  %v8034_v18 = vmul.f32 0.9677419, %v14018_v52  ;;  %9679 = vmatmul.mubr.msk.f32.gmra.mrb[218].mxu0 %vm6544_vm15, %v13556_v9 }
 0x702   : > { %v14027_v59 = vpop.f32.mrb[113].mxu0  ;;  %7956 = vmatprep.mubr.f32.mxu0 %v11161_v42  ;;  %v8059_v41 = vmul.f32 0.5483871, %v14018_v52  ;;  %v8092_v47 = vmul.f32 0.06451613, %v14018_v52 }
 0x703   : > { %9687 = vst [vmem:[%s13966_s18 + $0x58] sm:$0xff] %v8008_v40  ;;  %9695 = vst [vmem:[%s13966_s18 + $0x98] sm:$0xff] %v8041_v54  ;;  %v8009_v4 = vadd.f32 %v8001_v14, %v7993_v25  ;;  %v8042_v2 = vadd.f32 %v8034_v18, %v8026_v17  ;;  %v8002_v39 = vmul.f32 0.48387095, %v14027_v59  ;;  %v8035_v61 = vmul.f32 0.9677419, %v14027_v59 }
 0x704   : > { %v14033_v22 = vpop.f32.mrb[114].mxu0  ;;  %v8060_v25 = vmul.f32 0.5483871, %v14027_v59  ;;  %v8093_v40 = vmul.f32 0.06451613, %v14027_v59 }
 0x705   : > { %9688 = vst [vmem:[%s13966_s18 + $0x60] sm:$0xff] %v8009_v4  ;;  %9696 = vst [vmem:[%s13966_s18 + $0xa0] sm:$0xff] %v8042_v2  ;;  %v8010_v46 = vadd.f32 %v8002_v39, %v7994_v15  ;;  %v8043_v3 = vadd.f32 %v8035_v61, %v8027_v53  ;;  %v8003_v1 = vmul.f32 0.48387095, %v14033_v22  ;;  %v8036_v30 = vmul.f32 0.9677419, %v14033_v22  ;;  %9680 = vmatmul.mubr.msk.f32.vlgmr.msra.gmra.mrb[220].mxu0 %vm6544_vm15, %v13522_v62 }
 0x706   : > { %v14039_v49 = vpop.f32.mrb[115].mxu0  ;;  %7962 = vmatprep.mubr.f32.mxu0 %v11161_v42  ;;  %v8061_v15 = vmul.f32 0.5483871, %v14033_v22 }
 0x707   : > { %v8004_v33 = vmul.f32 0.48387095, %v14039_v49  ;;  %9689 = vst [vmem:[%s13966_s18 + $0x68] sm:$0xff] %v8010_v46  ;;  %9697 = vst [vmem:[%s13966_s18 + $0xa8] sm:$0xff] %v8043_v3  ;;  %v8011_v35 = vadd.f32 %v8003_v1, %v7995_v21  ;;  %v8044_v5 = vadd.f32 %v8036_v30, %v8028_v38  ;;  %v8037_v27 = vmul.f32 0.9677419, %v14039_v49 }
 0x708   : > { %v14051_v62 = vpop.f32.mrb[116].mxu0  ;;  %v8062_v21 = vmul.f32 0.5483871, %v14039_v49 }
 0x709   : > { %v8012_v34 = vadd.f32 %v8004_v33, %v7996_v51  ;;  %9690 = vst [vmem:[%s13966_s18 + $0x70] sm:$0xff] %v8011_v35  ;;  %9698 = vst [vmem:[%s13966_s18 + $0xb0] sm:$0xff] %v8044_v5  ;;  %v8045_v6 = vadd.f32 %v8037_v27, %v8029_v19  ;;  %v8063_v55 = vmul.f32 0.4516129, %v14051_v62  ;;  %v8096_v23 = vmul.f32 0.9354839, %v14051_v62  ;;  %9681 = vmatmul.mubr.msk.f32.gmra.mrb[222].mxu0 %vm6544_vm15, %v13532_v24 }
 0x70a   : > { %v14063_v32 = vpop.f32.mrb[117].mxu0  ;;  %7968 = vmatprep.mubr.f32.mxu0 %v11161_v42  ;;  %v8090_v24 = vmul.f32 0.06451613, %v14003_v26  ;;  %v8121_v30 = vmul.f32 0.58064514, %v14051_v62 }
 0x70b   : > { %9691 = vst [vmem:[%s13966_s18 + $0x78] sm:$0xff] %v8012_v34  ;;  %9699 = vst [vmem:[%s13966_s18 + $0xb8] sm:$0xff] %v8045_v6  ;;  %v8071_v31 = vadd.f32 %v8063_v55, %v8055_v0  ;;  %v8104_v16 = vadd.f32 %v8096_v23, %v8088_v13  ;;  %v8064_v57 = vmul.f32 0.4516129, %v14063_v32  ;;  %v8097_v11 = vmul.f32 0.9354839, %v14063_v32 }
 0x70c   : > { %v14071_v10 = vpop.f32.mrb[118].mxu0  ;;  %v8154_v19 = vmul.f32 0.09677419, %v14051_v62  ;;  %v8122_v27 = vmul.f32 0.58064514, %v14063_v32 }
 0x70d   : > { %9700 = vst [vmem:[%s13966_s18 + $0xc0] sm:$0xff] %v8071_v31  ;;  %9708 = vst [vmem:[%s13966_s18 + $0x100] sm:$0xff] %v8104_v16  ;;  %v8072_v44 = vadd.f32 %v8064_v57, %v8056_v20  ;;  %v8105_v50 = vadd.f32 %v8097_v11, %v8089_v12  ;;  %v8065_v45 = vmul.f32 0.4516129, %v14071_v10  ;;  %v8098_v37 = vmul.f32 0.9354839, %v14071_v10  ;;  %9682 = vmatmul.mubr.msk.f32.gmra.mrb[224].mxu0 %vm6544_vm15, %v13546_v43 }
 0x70e   : > { %v14077_v60 = vpop.f32.mrb[119].mxu0  ;;  %7974 = vmatprep.mubr.f32.mxu0 %v11161_v42  ;;  %v8155_v0 = vmul.f32 0.09677419, %v14063_v32  ;;  %v8123_v23 = vmul.f32 0.58064514, %v14071_v10 }
 0x70f   : > { %v8066_v26 = vmul.f32 0.4516129, %v14077_v60  ;;  %9701 = vst [vmem:[%s13966_s18 + $0xc8] sm:$0xff] %v8072_v44  ;;  %9709 = vst [vmem:[%s13966_s18 + $0x108] sm:$0xff] %v8105_v50  ;;  %v8073_v36 = vadd.f32 %v8065_v45, %v8057_v58  ;;  %v8106_v7 = vadd.f32 %v8098_v37, %v8090_v24  ;;  %v8099_v28 = vmul.f32 0.9354839, %v14077_v60 }
 0x710   : > { %v14089_v43 = vpop.f32.mrb[120].mxu0  ;;  %v8156_v20 = vmul.f32 0.09677419, %v14071_v10  ;;  %v8124_v58 = vmul.f32 0.58064514, %v14077_v60 }
 0x711   : > { %v8074_v48 = vadd.f32 %v8066_v26, %v8058_v8  ;;  %9702 = vst [vmem:[%s13966_s18 + $0xd0] sm:$0xff] %v8073_v36  ;;  %9710 = vst [vmem:[%s13966_s18 + $0x110] sm:$0xff] %v8106_v7  ;;  %v8107_v42 = vadd.f32 %v8099_v28, %v8091_v56  ;;  %v8067_v29 = vmul.f32 0.4516129, %v14089_v43  ;;  %v8100_v63 = vmul.f32 0.9354839, %v14089_v43  ;;  %9683 = vmatmul.mubr.msk.f32.gmra.mrb[226].mxu0 %vm6544_vm15, %v13556_v9 }
 0x712   : > { %v14101_v17 = vpop.f32.mrb[121].mxu0  ;;  %v8094_v9 = vmul.f32 0.06451613, %v14033_v22  ;;  %v8095_v22 = vmul.f32 0.06451613, %v14039_v49 }
 0x713   : > { %9703 = vst [vmem:[%s13966_s18 + $0xd8] sm:$0xff] %v8074_v48  ;;  %9711 = vst [vmem:[%s13966_s18 + $0x118] sm:$0xff] %v8107_v42  ;;  %v8075_v52 = vadd.f32 %v8067_v29, %v8059_v41  ;;  %v8108_v54 = vadd.f32 %v8100_v63, %v8092_v47  ;;  %v8068_v14 = vmul.f32 0.4516129, %v14101_v17  ;;  %v8101_v18 = vmul.f32 0.9354839, %v14101_v17 }
 0x714   : > { %v14108_v53 = vpop.f32.mrb[122].mxu0  ;;  %v8157_v10 = vmul.f32 0.09677419, %v14077_v60  ;;  %v8125_v37 = vmul.f32 0.58064514, %v14089_v43 }
 0x715   : > { %9704 = vst [vmem:[%s13966_s18 + $0xe0] sm:$0xff] %v8075_v52  ;;  %9712 = vst [vmem:[%s13966_s18 + $0x120] sm:$0xff] %v8108_v54  ;;  %v8076_v59 = vadd.f32 %v8068_v14, %v8060_v25  ;;  %v8109_v4 = vadd.f32 %v8101_v18, %v8093_v40  ;;  %v8069_v2 = vmul.f32 0.4516129, %v14108_v53  ;;  %v8102_v39 = vmul.f32 0.9354839, %v14108_v53 }
 0x716   : > { %v14114_v61 = vpop.f32.mrb[123].mxu0  ;;  %v8158_v56 = vmul.f32 0.09677419, %v14089_v43  ;;  %v8126_v28 = vmul.f32 0.58064514, %v14101_v17 }
 0x717   : > { %v8070_v38 = vmul.f32 0.4516129, %v14114_v61  ;;  %9705 = vst [vmem:[%s13966_s18 + $0xe8] sm:$0xff] %v8076_v59  ;;  %9713 = vst [vmem:[%s13966_s18 + $0x128] sm:$0xff] %v8109_v4  ;;  %v8077_v46 = vadd.f32 %v8069_v2, %v8061_v15  ;;  %v8110_v3 = vadd.f32 %v8102_v39, %v8094_v9  ;;  %v8103_v1 = vmul.f32 0.9354839, %v14114_v61 }
 0x718   : > { %v14123_v33 = vpop.f32.mrb[124].mxu0  ;;  %v8159_v41 = vmul.f32 0.09677419, %v14101_v17  ;;  %v8127_v63 = vmul.f32 0.58064514, %v14108_v53 }
 0x719   : > { %v8078_v51 = vadd.f32 %v8070_v38, %v8062_v21  ;;  %9706 = vst [vmem:[%s13966_s18 + $0xf0] sm:$0xff] %v8077_v46  ;;  %9714 = vst [vmem:[%s13966_s18 + $0x130] sm:$0xff] %v8110_v3  ;;  %v8111_v35 = vadd.f32 %v8103_v1, %v8095_v22  ;;  %v8129_v49 = vmul.f32 0.41935483, %v14123_v33  ;;  %v8162_v5 = vmul.f32 0.9032258, %v14123_v33 }
 0x71a   : > { %v14133_v34 = vpop.f32.mrb[125].mxu0  ;;  %v8160_v25 = vmul.f32 0.09677419, %v14108_v53  ;;  %v8128_v15 = vmul.f32 0.58064514, %v14114_v61 }
 0x71b   : > { %9707 = vst [vmem:[%s13966_s18 + $0xf8] sm:$0xff] %v8078_v51  ;;  %9715 = vst [vmem:[%s13966_s18 + $0x138] sm:$0xff] %v8111_v35  ;;  %v8137_v13 = vadd.f32 %v8129_v49, %v8121_v30  ;;  %v8170_v6 = vadd.f32 %v8162_v5, %v8154_v19  ;;  %v8130_v62 = vmul.f32 0.41935483, %v14133_v34  ;;  %v8163_v55 = vmul.f32 0.9032258, %v14133_v34 }
 0x71c   : > { %v14140_v12 = vpop.f32.mrb[126].mxu0  ;;  %v8161_v53 = vmul.f32 0.09677419, %v14114_v61  ;;  %v8187_v39 = vmul.f32 0.61290324, %v14123_v33 }
 0x71d   : > { %9716 = vst [vmem:[%s13966_s18 + $0x140] sm:$0xff] %v8137_v13  ;;  %9724 = vst [vmem:[%s13966_s18 + $0x180] sm:$0xff] %v8170_v6  ;;  %v8138_v32 = vadd.f32 %v8130_v62, %v8122_v27  ;;  %v8171_v31 = vadd.f32 %v8163_v55, %v8155_v0  ;;  %v8131_v16 = vmul.f32 0.41935483, %v14140_v12  ;;  %v8164_v57 = vmul.f32 0.9032258, %v14140_v12 }
 0x71e   : > { %v14146_v11 = vpop.f32.mrb[127].mxu0  ;;  %v8220_v22 = vmul.f32 0.12903225, %v14123_v33  ;;  %v8188_v1 = vmul.f32 0.61290324, %v14133_v34 }
 0x71f   : > { %v8132_v24 = vmul.f32 0.41935483, %v14146_v11  ;;  %9717 = vst [vmem:[%s13966_s18 + $0x148] sm:$0xff] %v8138_v32  ;;  %9725 = vst [vmem:[%s13966_s18 + $0x188] sm:$0xff] %v8171_v31  ;;  %v8139_v44 = vadd.f32 %v8131_v16, %v8123_v23  ;;  %v8172_v50 = vadd.f32 %v8164_v57, %v8156_v20  ;;  %v8165_v45 = vmul.f32 0.9032258, %v14146_v11 }
 0x720   : > { %v14155_v26 = vpop.f32.mrb[128].mxu0  ;;  %v8221_v30 = vmul.f32 0.12903225, %v14133_v34  ;;  %v8189_v5 = vmul.f32 0.61290324, %v14140_v12 }
 0x721   : > { %v8140_v8 = vadd.f32 %v8132_v24, %v8124_v58  ;;  %9718 = vst [vmem:[%s13966_s18 + $0x150] sm:$0xff] %v8139_v44  ;;  %9726 = vst [vmem:[%s13966_s18 + $0x190] sm:$0xff] %v8172_v50  ;;  %v8173_v36 = vadd.f32 %v8165_v45, %v8157_v10  ;;  %v8133_v60 = vmul.f32 0.41935483, %v14155_v26  ;;  %v8166_v7 = vmul.f32 0.9032258, %v14155_v26 }
 0x722   : > { %v14165_v48 = vpop.f32.mrb[129].mxu0  ;;  %v8222_v27 = vmul.f32 0.12903225, %v14140_v12  ;;  %v8190_v23 = vmul.f32 0.61290324, %v14146_v11 }
 0x723   : > { %9719 = vst [vmem:[%s13966_s18 + $0x158] sm:$0xff] %v8140_v8  ;;  %9727 = vst [vmem:[%s13966_s18 + $0x198] sm:$0xff] %v8173_v36  ;;  %v8141_v47 = vadd.f32 %v8133_v60, %v8125_v37  ;;  %v8174_v42 = vadd.f32 %v8166_v7, %v8158_v56  ;;  %v8134_v43 = vmul.f32 0.41935483, %v14165_v48  ;;  %v8167_v29 = vmul.f32 0.9032258, %v14165_v48 }
 0x724   : > { %v14172_v40 = vpop.f32.mrb[130].mxu0  ;;  %v8223_v12 = vmul.f32 0.12903225, %v14146_v11  ;;  %v8191_v57 = vmul.f32 0.61290324, %v14155_v26 }
 0x725   : > { %9720 = vst [vmem:[%s13966_s18 + $0x160] sm:$0xff] %v8141_v47  ;;  %9728 = vst [vmem:[%s13966_s18 + $0x1a0] sm:$0xff] %v8174_v42  ;;  %v8142_v17 = vadd.f32 %v8134_v43, %v8126_v28  ;;  %v8175_v52 = vadd.f32 %v8167_v29, %v8159_v41  ;;  %v8135_v54 = vmul.f32 0.41935483, %v14172_v40  ;;  %v8168_v14 = vmul.f32 0.9032258, %v14172_v40 }
 0x726   : > { %v14178_v18 = vpop.f32.mrb[131].mxu0  ;;  %v8224_v10 = vmul.f32 0.12903225, %v14155_v26  ;;  %v8192_v45 = vmul.f32 0.61290324, %v14165_v48 }
 0x727   : > { %v8136_v9 = vmul.f32 0.41935483, %v14178_v18  ;;  %9721 = vst [vmem:[%s13966_s18 + $0x168] sm:$0xff] %v8142_v17  ;;  %9729 = vst [vmem:[%s13966_s18 + $0x1a8] sm:$0xff] %v8175_v52  ;;  %v8143_v59 = vadd.f32 %v8135_v54, %v8127_v63  ;;  %v8176_v4 = vadd.f32 %v8168_v14, %v8160_v25  ;;  %v8169_v2 = vmul.f32 0.9032258, %v14178_v18 }
 0x728   : > { %v14187_v38 = vpop.f32.mrb[132].mxu0  ;;  %v8225_v37 = vmul.f32 0.12903225, %v14165_v48  ;;  %v8193_v7 = vmul.f32 0.61290324, %v14172_v40 }
 0x729   : > { %v8144_v21 = vadd.f32 %v8136_v9, %v8128_v15  ;;  %9722 = vst [vmem:[%s13966_s18 + $0x170] sm:$0xff] %v8143_v59  ;;  %9730 = vst [vmem:[%s13966_s18 + $0x1b0] sm:$0xff] %v8176_v4  ;;  %v8177_v46 = vadd.f32 %v8169_v2, %v8161_v53  ;;  %v8195_v61 = vmul.f32 0.38709676, %v14187_v38  ;;  %v8228_v3 = vmul.f32 0.87096775, %v14187_v38 }
 0x72a   : > { %v14197_v51 = vpop.f32.mrb[133].mxu0  ;;  %v8226_v28 = vmul.f32 0.12903225, %v14172_v40  ;;  %v8194_v63 = vmul.f32 0.61290324, %v14178_v18 }
 0x72b   : > { %9723 = vst [vmem:[%s13966_s18 + $0x178] sm:$0xff] %v8144_v21  ;;  %9731 = vst [vmem:[%s13966_s18 + $0x1b8] sm:$0xff] %v8177_v46  ;;  %v8203_v19 = vadd.f32 %v8195_v61, %v8187_v39  ;;  %v8236_v35 = vadd.f32 %v8228_v3, %v8220_v22  ;;  %v8196_v33 = vmul.f32 0.38709676, %v14197_v51  ;;  %v8229_v49 = vmul.f32 0.87096775, %v14197_v51 }
 0x72c   : > { %v14204_v0 = vpop.f32.mrb[134].mxu0  ;;  %v8227_v40 = vmul.f32 0.12903225, %v14178_v18  ;;  %v8253_v14 = vmul.f32 0.6451613, %v14187_v38 }
 0x72d   : > { %9732 = vst [vmem:[%s13966_s18 + $0x1c0] sm:$0xff] %v8203_v19  ;;  %9740 = vst [vmem:[%s13966_s18 + $0x200] sm:$0xff] %v8236_v35  ;;  %v8204_v34 = vadd.f32 %v8196_v33, %v8188_v1  ;;  %v8237_v13 = vadd.f32 %v8229_v49, %v8221_v30  ;;  %v8197_v6 = vmul.f32 0.38709676, %v14204_v0  ;;  %v8230_v62 = vmul.f32 0.87096775, %v14204_v0 }
 0x72e   : > { %v14210_v55 = vpop.f32.mrb[135].mxu0  ;;  %v8286_v53 = vmul.f32 0.16129032, %v14187_v38  ;;  %v8254_v2 = vmul.f32 0.6451613, %v14197_v51 }
 0x72f   : > { %v8198_v20 = vmul.f32 0.38709676, %v14210_v55  ;;  %9733 = vst [vmem:[%s13966_s18 + $0x1c8] sm:$0xff] %v8204_v34  ;;  %9741 = vst [vmem:[%s13966_s18 + $0x208] sm:$0xff] %v8237_v13  ;;  %v8205_v32 = vadd.f32 %v8197_v6, %v8189_v5  ;;  %v8238_v31 = vadd.f32 %v8230_v62, %v8222_v27  ;;  %v8231_v16 = vmul.f32 0.87096775, %v14210_v55 }
 0x730   : > { %v14219_v24 = vpop.f32.mrb[136].mxu0  ;;  %v8287_v39 = vmul.f32 0.16129032, %v14197_v51  ;;  %v8255_v3 = vmul.f32 0.6451613, %v14204_v0 }
 0x731   : > { %v8206_v58 = vadd.f32 %v8198_v20, %v8190_v23  ;;  %9734 = vst [vmem:[%s13966_s18 + $0x1d0] sm:$0xff] %v8205_v32  ;;  %9742 = vst [vmem:[%s13966_s18 + $0x210] sm:$0xff] %v8238_v31  ;;  %v8239_v44 = vadd.f32 %v8231_v16, %v8223_v12  ;;  %v8199_v11 = vmul.f32 0.38709676, %v14219_v24  ;;  %v8232_v50 = vmul.f32 0.87096775, %v14219_v24 }
 0x732   : > { %v14229_v8 = vpop.f32.mrb[137].mxu0  ;;  %v8288_v1 = vmul.f32 0.16129032, %v14204_v0  ;;  %v8256_v5 = vmul.f32 0.6451613, %v14210_v55 }
 0x733   : > { %9735 = vst [vmem:[%s13966_s18 + $0x1d8] sm:$0xff] %v8206_v58  ;;  %9743 = vst [vmem:[%s13966_s18 + $0x218] sm:$0xff] %v8239_v44  ;;  %v8207_v56 = vadd.f32 %v8199_v11, %v8191_v57  ;;  %v8240_v36 = vadd.f32 %v8232_v50, %v8224_v10  ;;  %v8200_v26 = vmul.f32 0.38709676, %v14229_v8  ;;  %v8233_v60 = vmul.f32 0.87096775, %v14229_v8 }
 0x734   : > { %v14236_v41 = vpop.f32.mrb[138].mxu0  ;;  %v8289_v0 = vmul.f32 0.16129032, %v14210_v55  ;;  %v8257_v62 = vmul.f32 0.6451613, %v14219_v24 }
 0x735   : > { %9736 = vst [vmem:[%s13966_s18 + $0x1e0] sm:$0xff] %v8207_v56  ;;  %9744 = vst [vmem:[%s13966_s18 + $0x220] sm:$0xff] %v8240_v36  ;;  %v8208_v48 = vadd.f32 %v8200_v26, %v8192_v45  ;;  %v8241_v47 = vadd.f32 %v8233_v60, %v8225_v37  ;;  %v8201_v42 = vmul.f32 0.38709676, %v14236_v41  ;;  %v8234_v43 = vmul.f32 0.87096775, %v14236_v41 }
 0x736   : > { %v14242_v29 = vpop.f32.mrb[139].mxu0  ;;  %v8290_v12 = vmul.f32 0.16129032, %v14219_v24  ;;  %v8258_v16 = vmul.f32 0.6451613, %v14229_v8 }
 0x737   : > { %v8202_v25 = vmul.f32 0.38709676, %v14242_v29  ;;  %9737 = vst [vmem:[%s13966_s18 + $0x1e8] sm:$0xff] %v8208_v48  ;;  %9745 = vst [vmem:[%s13966_s18 + $0x228] sm:$0xff] %v8241_v47  ;;  %v8209_v17 = vadd.f32 %v8201_v42, %v8193_v7  ;;  %v8242_v52 = vadd.f32 %v8234_v43, %v8226_v28  ;;  %v8235_v54 = vmul.f32 0.87096775, %v14242_v29 }
 0x738   : > { %v14251_v9 = vpop.f32.mrb[140].mxu0  ;;  %v8291_v57 = vmul.f32 0.16129032, %v14229_v8  ;;  %v8259_v50 = vmul.f32 0.6451613, %v14236_v41 }
 0x739   : > { %v8210_v15 = vadd.f32 %v8202_v25, %v8194_v63  ;;  %9738 = vst [vmem:[%s13966_s18 + $0x1f0] sm:$0xff] %v8209_v17  ;;  %9746 = vst [vmem:[%s13966_s18 + $0x230] sm:$0xff] %v8242_v52  ;;  %v8243_v59 = vadd.f32 %v8235_v54, %v8227_v40  ;;  %v8261_v18 = vmul.f32 0.3548387, %v14251_v9  ;;  %v8294_v4 = vmul.f32 0.83870965, %v14251_v9 }
 0x73a   : > { %v14261_v21 = vpop.f32.mrb[141].mxu0  ;;  %v8292_v45 = vmul.f32 0.16129032, %v14236_v41  ;;  %v8260_v7 = vmul.f32 0.6451613, %v14242_v29 }
 0x73b   : > { %9739 = vst [vmem:[%s13966_s18 + $0x1f8] sm:$0xff] %v8210_v15  ;;  %9747 = vst [vmem:[%s13966_s18 + $0x238] sm:$0xff] %v8243_v59  ;;  %v8269_v22 = vadd.f32 %v8261_v18, %v8253_v14  ;;  %v8302_v46 = vadd.f32 %v8294_v4, %v8286_v53  ;;  %v8262_v38 = vmul.f32 0.3548387, %v14261_v21  ;;  %v8295_v61 = vmul.f32 0.83870965, %v14261_v21 }
 0x73c   : > { %v14268_v30 = vpop.f32.mrb[142].mxu0  ;;  %v8293_v41 = vmul.f32 0.16129032, %v14242_v29  ;;  %v8319_v43 = vmul.f32 0.67741936, %v14251_v9 }
 0x73d   : > { %9748 = vst [vmem:[%s13966_s18 + $0x240] sm:$0xff] %v8269_v22  ;;  %9756 = vst [vmem:[%s13966_s18 + $0x280] sm:$0xff] %v8302_v46  ;;  %v8270_v51 = vadd.f32 %v8262_v38, %v8254_v2  ;;  %v8303_v19 = vadd.f32 %v8295_v61, %v8287_v39  ;;  %v8263_v35 = vmul.f32 0.3548387, %v14268_v30  ;;  %v8296_v33 = vmul.f32 0.83870965, %v14268_v30 }
 0x73e   : > { %v14274_v49 = vpop.f32.mrb[143].mxu0  ;;  %v8352_v40 = vmul.f32 0.19354838, %v14251_v9  ;;  %v8320_v54 = vmul.f32 0.67741936, %v14261_v21 }
 0x73f   : > { %v8264_v27 = vmul.f32 0.3548387, %v14274_v49  ;;  %9749 = vst [vmem:[%s13966_s18 + $0x248] sm:$0xff] %v8270_v51  ;;  %9757 = vst [vmem:[%s13966_s18 + $0x288] sm:$0xff] %v8303_v19  ;;  %v8271_v34 = vadd.f32 %v8263_v35, %v8255_v3  ;;  %v8304_v13 = vadd.f32 %v8296_v33, %v8288_v1  ;;  %v8297_v6 = vmul.f32 0.83870965, %v14274_v49 }
 0x740   : > { %v14283_v20 = vpop.f32.mrb[144].mxu0  ;;  %v8353_v14 = vmul.f32 0.19354838, %v14261_v21  ;;  %v8321_v4 = vmul.f32 0.67741936, %v14268_v30 }
 0x741   : > { %v8272_v23 = vadd.f32 %v8264_v27, %v8256_v5  ;;  %9750 = vst [vmem:[%s13966_s18 + $0x250] sm:$0xff] %v8271_v34  ;;  %9758 = vst [vmem:[%s13966_s18 + $0x290] sm:$0xff] %v8304_v13  ;;  %v8305_v32 = vadd.f32 %v8297_v6, %v8289_v0  ;;  %v8265_v55 = vmul.f32 0.3548387, %v14283_v20  ;;  %v8298_v31 = vmul.f32 0.83870965, %v14283_v20 }
 0x742   : > { %v14293_v58 = vpop.f32.mrb[145].mxu0  ;;  %v8354_v2 = vmul.f32 0.19354838, %v14268_v30  ;;  %v8322_v3 = vmul.f32 0.67741936, %v14274_v49 }
 0x743   : > { %9751 = vst [vmem:[%s13966_s18 + $0x258] sm:$0xff] %v8272_v23  ;;  %9759 = vst [vmem:[%s13966_s18 + $0x298] sm:$0xff] %v8305_v32  ;;  %v8273_v10 = vadd.f32 %v8265_v55, %v8257_v62  ;;  %v8306_v44 = vadd.f32 %v8298_v31, %v8290_v12  ;;  %v8266_v24 = vmul.f32 0.3548387, %v14293_v58  ;;  %v8299_v11 = vmul.f32 0.83870965, %v14293_v58 }
 0x744   : > { %v14300_v37 = vpop.f32.mrb[146].mxu0  ;;  %v8355_v30 = vmul.f32 0.19354838, %v14274_v49  ;;  %v8323_v33 = vmul.f32 0.67741936, %v14283_v20 }
 0x745   : > { %9752 = vst [vmem:[%s13966_s18 + $0x260] sm:$0xff] %v8273_v10  ;;  %9760 = vst [vmem:[%s13966_s18 + $0x2a0] sm:$0xff] %v8306_v44  ;;  %v8274_v8 = vadd.f32 %v8266_v24, %v8258_v16  ;;  %v8307_v56 = vadd.f32 %v8299_v11, %v8291_v57  ;;  %v8267_v36 = vmul.f32 0.3548387, %v14300_v37  ;;  %v8300_v26 = vmul.f32 0.83870965, %v14300_v37 }
 0x746   : > { %v14306_v60 = vpop.f32.mrb[147].mxu0  ;;  %v8356_v0 = vmul.f32 0.19354838, %v14283_v20  ;;  %v8324_v6 = vmul.f32 0.67741936, %v14293_v58 }
 0x747   : > { %v8268_v28 = vmul.f32 0.3548387, %v14306_v60  ;;  %9753 = vst [vmem:[%s13966_s18 + $0x268] sm:$0xff] %v8274_v8  ;;  %9761 = vst [vmem:[%s13966_s18 + $0x2a8] sm:$0xff] %v8307_v56  ;;  %v8275_v48 = vadd.f32 %v8267_v36, %v8259_v50  ;;  %v8308_v47 = vadd.f32 %v8300_v26, %v8292_v45  ;;  %v8301_v42 = vmul.f32 0.83870965, %v14306_v60 }
 0x748   : > { %v14315_v25 = vpop.f32.mrb[148].mxu0  ;;  %v8357_v62 = vmul.f32 0.19354838, %v14293_v58  ;;  %v8325_v31 = vmul.f32 0.67741936, %v14300_v37 }
 0x749   : > { %v8276_v63 = vadd.f32 %v8268_v28, %v8260_v7  ;;  %9754 = vst [vmem:[%s13966_s18 + $0x270] sm:$0xff] %v8275_v48  ;;  %9762 = vst [vmem:[%s13966_s18 + $0x2b0] sm:$0xff] %v8308_v47  ;;  %v8309_v17 = vadd.f32 %v8301_v42, %v8293_v41  ;;  %v8327_v29 = vmul.f32 0.32258064, %v14315_v25  ;;  %v8360_v52 = vmul.f32 0.8064516, %v14315_v25 }
 0x74a   : > { %v14325_v15 = vpop.f32.mrb[149].mxu0  ;;  %v8358_v16 = vmul.f32 0.19354838, %v14300_v37  ;;  %v8326_v50 = vmul.f32 0.67741936, %v14306_v60 }
 0x74b   : > { %9755 = vst [vmem:[%s13966_s18 + $0x278] sm:$0xff] %v8276_v63  ;;  %9763 = vst [vmem:[%s13966_s18 + $0x2b8] sm:$0xff] %v8309_v17  ;;  %v8335_v53 = vadd.f32 %v8327_v29, %v8319_v43  ;;  %v8368_v59 = vadd.f32 %v8360_v52, %v8352_v40  ;;  %v8328_v9 = vmul.f32 0.32258064, %v14325_v15  ;;  %v8361_v18 = vmul.f32 0.8064516, %v14325_v15 }
 0x74c   : > { %v14332_v39 = vpop.f32.mrb[150].mxu0  ;;  %v8359_v37 = vmul.f32 0.19354838, %v14306_v60  ;;  %v8385_v26 = vmul.f32 0.7096774, %v14315_v25 }
 0x74d   : > { %9764 = vst [vmem:[%s13966_s18 + $0x2c0] sm:$0xff] %v8335_v53  ;;  %9772 = vst [vmem:[%s13966_s18 + $0x300] sm:$0xff] %v8368_v59  ;;  %v8336_v21 = vadd.f32 %v8328_v9, %v8320_v54  ;;  %v8369_v22 = vadd.f32 %v8361_v18, %v8353_v14  ;;  %v8329_v46 = vmul.f32 0.32258064, %v14332_v39  ;;  %v8362_v38 = vmul.f32 0.8064516, %v14332_v39 }
 0x74e   : > { %v14338_v61 = vpop.f32.mrb[151].mxu0  ;;  %v8418_v41 = vmul.f32 0.22580644, %v14315_v25  ;;  %v8386_v42 = vmul.f32 0.7096774, %v14325_v15 }
 0x74f   : > { %v8330_v1 = vmul.f32 0.32258064, %v14338_v61  ;;  %9765 = vst [vmem:[%s13966_s18 + $0x2c8] sm:$0xff] %v8336_v21  ;;  %9773 = vst [vmem:[%s13966_s18 + $0x308] sm:$0xff] %v8369_v22  ;;  %v8337_v51 = vadd.f32 %v8329_v46, %v8321_v4  ;;  %v8370_v19 = vadd.f32 %v8362_v38, %v8354_v2  ;;  %v8363_v35 = vmul.f32 0.8064516, %v14338_v61 }
 0x750   : > { %v14347_v27 = vpop.f32.mrb[152].mxu0  ;;  %v8419_v43 = vmul.f32 0.22580644, %v14325_v15  ;;  %v8387_v52 = vmul.f32 0.7096774, %v14332_v39 }
 0x751   : > { %v8338_v5 = vadd.f32 %v8330_v1, %v8322_v3  ;;  %9766 = vst [vmem:[%s13966_s18 + $0x2d0] sm:$0xff] %v8337_v51  ;;  %9774 = vst [vmem:[%s13966_s18 + $0x310] sm:$0xff] %v8370_v19  ;;  %v8371_v34 = vadd.f32 %v8363_v35, %v8355_v30  ;;  %v8331_v49 = vmul.f32 0.32258064, %v14347_v27  ;;  %v8364_v13 = vmul.f32 0.8064516, %v14347_v27 }
 0x752   : > { %v14357_v23 = vpop.f32.mrb[153].mxu0  ;;  %v8420_v54 = vmul.f32 0.22580644, %v14332_v39  ;;  %v8388_v4 = vmul.f32 0.7096774, %v14338_v61 }
 0x753   : > { %9767 = vst [vmem:[%s13966_s18 + $0x2d8] sm:$0xff] %v8338_v5  ;;  %9775 = vst [vmem:[%s13966_s18 + $0x318] sm:$0xff] %v8371_v34  ;;  %v8339_v12 = vadd.f32 %v8331_v49, %v8323_v33  ;;  %v8372_v32 = vadd.f32 %v8364_v13, %v8356_v0  ;;  %v8332_v20 = vmul.f32 0.32258064, %v14357_v23  ;;  %v8365_v55 = vmul.f32 0.8064516, %v14357_v23 }
 0x754   : > { %v14364_v57 = vpop.f32.mrb[154].mxu0  ;;  %v8421_v39 = vmul.f32 0.22580644, %v14338_v61  ;;  %v8389_v38 = vmul.f32 0.7096774, %v14347_v27 }
 0x755   : > { %9768 = vst [vmem:[%s13966_s18 + $0x2e0] sm:$0xff] %v8339_v12  ;;  %9776 = vst [vmem:[%s13966_s18 + $0x320] sm:$0xff] %v8372_v32  ;;  %v8340_v58 = vadd.f32 %v8332_v20, %v8324_v6  ;;  %v8373_v10 = vadd.f32 %v8365_v55, %v8357_v62  ;;  %v8333_v44 = vmul.f32 0.32258064, %v14364_v57  ;;  %v8366_v24 = vmul.f32 0.8064516, %v14364_v57 }
 0x756   : > { %v14370_v11 = vpop.f32.mrb[155].mxu0  ;;  %v8422_v30 = vmul.f32 0.22580644, %v14347_v27  ;;  %v8390_v35 = vmul.f32 0.7096774, %v14357_v23 }
 0x757   : > { %v8334_v45 = vmul.f32 0.32258064, %v14370_v11  ;;  %9769 = vst [vmem:[%s13966_s18 + $0x2e8] sm:$0xff] %v8340_v58  ;;  %9777 = vst [vmem:[%s13966_s18 + $0x328] sm:$0xff] %v8373_v10  ;;  %v8341_v8 = vadd.f32 %v8333_v44, %v8325_v31  ;;  %v8374_v56 = vadd.f32 %v8366_v24, %v8358_v16  ;;  %v8367_v36 = vmul.f32 0.8064516, %v14370_v11 }
 0x758   : > { %v14379_v28 = vpop.f32.mrb[156].mxu0  ;;  %v8423_v33 = vmul.f32 0.22580644, %v14357_v23  ;;  %v8391_v13 = vmul.f32 0.7096774, %v14364_v57 }
 0x759   : > { %v8342_v7 = vadd.f32 %v8334_v45, %v8326_v50  ;;  %9770 = vst [vmem:[%s13966_s18 + $0x2f0] sm:$0xff] %v8341_v8  ;;  %9778 = vst [vmem:[%s13966_s18 + $0x330] sm:$0xff] %v8374_v56  ;;  %v8375_v48 = vadd.f32 %v8367_v36, %v8359_v37  ;;  %v8393_v60 = vmul.f32 0.29032257, %v14379_v28  ;;  %v8426_v47 = vmul.f32 0.7741935, %v14379_v28 }
 0x75a   : > { %v14389_v63 = vpop.f32.mrb[157].mxu0  ;;  %v8424_v6 = vmul.f32 0.22580644, %v14364_v57  ;;  %v8392_v31 = vmul.f32 0.7096774, %v14370_v11 }
 0x75b   : > { %9771 = vst [vmem:[%s13966_s18 + $0x2f8] sm:$0xff] %v8342_v7  ;;  %9779 = vst [vmem:[%s13966_s18 + $0x338] sm:$0xff] %v8375_v48  ;;  %v8401_v40 = vadd.f32 %v8393_v60, %v8385_v26  ;;  %v8434_v17 = vadd.f32 %v8426_v47, %v8418_v41  ;;  %v8394_v25 = vmul.f32 0.29032257, %v14389_v63  ;;  %v8427_v29 = vmul.f32 0.7741935, %v14389_v63 }
 0x75c   : > { %v14396_v14 = vpop.f32.mrb[158].mxu0  ;;  %v8425_v57 = vmul.f32 0.22580644, %v14370_v11  ;;  %v8451_v24 = vmul.f32 0.7419355, %v14379_v28 }
 0x75d   : > { %9780 = vst [vmem:[%s13966_s18 + $0x340] sm:$0xff] %v8401_v40  ;;  %9788 = vst [vmem:[%s13966_s18 + $0x380] sm:$0xff] %v8434_v17  ;;  %v8402_v15 = vadd.f32 %v8394_v25, %v8386_v42  ;;  %v8435_v53 = vadd.f32 %v8427_v29, %v8419_v43  ;;  %v8395_v59 = vmul.f32 0.29032257, %v14396_v14  ;;  %v8428_v9 = vmul.f32 0.7741935, %v14396_v14 }
 0x75e   : > { %v14402_v18 = vpop.f32.mrb[159].mxu0  ;;  %v8484_v37 = vmul.f32 0.2580645, %v14379_v28  ;;  %v8452_v36 = vmul.f32 0.7419355, %v14389_v63 }
 0x75f   : > { %v8396_v2 = vmul.f32 0.29032257, %v14402_v18  ;;  %9781 = vst [vmem:[%s13966_s18 + $0x348] sm:$0xff] %v8402_v15  ;;  %9789 = vst [vmem:[%s13966_s18 + $0x388] sm:$0xff] %v8435_v53  ;;  %v8403_v21 = vadd.f32 %v8395_v59, %v8387_v52  ;;  %v8436_v22 = vadd.f32 %v8428_v9, %v8420_v54  ;;  %v8429_v46 = vmul.f32 0.7741935, %v14402_v18 }
 0x760   : > { %v14411_v1 = vpop.f32.mrb[160].mxu0  ;;  %v8485_v26 = vmul.f32 0.2580645, %v14389_v63  ;;  %v8453_v47 = vmul.f32 0.7419355, %v14396_v14 }
 0x761   : > { %v8404_v3 = vadd.f32 %v8396_v2, %v8388_v4  ;;  %9782 = vst [vmem:[%s13966_s18 + $0x350] sm:$0xff] %v8403_v21  ;;  %9790 = vst [vmem:[%s13966_s18 + $0x390] sm:$0xff] %v8436_v22  ;;  %v8437_v51 = vadd.f32 %v8429_v46, %v8421_v39  ;;  %v8397_v61 = vmul.f32 0.29032257, %v14411_v1  ;;  %v8430_v19 = vmul.f32 0.7741935, %v14411_v1 }
 0x762   : > { %v14421_v5 = vpop.f32.mrb[161].mxu0  ;;  %v8486_v42 = vmul.f32 0.2580645, %v14396_v14  ;;  %v8454_v52 = vmul.f32 0.7419355, %v14402_v18 }
 0x763   : > { %9783 = vst [vmem:[%s13966_s18 + $0x358] sm:$0xff] %v8404_v3  ;;  %9791 = vst [vmem:[%s13966_s18 + $0x398] sm:$0xff] %v8437_v51  ;;  %v8405_v0 = vadd.f32 %v8397_v61, %v8389_v38  ;;  %v8438_v34 = vadd.f32 %v8430_v19, %v8422_v30  ;;  %v8398_v27 = vmul.f32 0.29032257, %v14421_v5  ;;  %v8431_v49 = vmul.f32 0.7741935, %v14421_v5 }
 0x764   : > { %v14428_v62 = vpop.f32.mrb[162].mxu0  ;;  %v8487_v14 = vmul.f32 0.2580645, %v14402_v18  ;;  %v8455_v9 = vmul.f32 0.7419355, %v14411_v1 }
 0x765   : > { %9784 = vst [vmem:[%s13966_s18 + $0x360] sm:$0xff] %v8405_v0  ;;  %9792 = vst [vmem:[%s13966_s18 + $0x3a0] sm:$0xff] %v8438_v34  ;;  %v8406_v23 = vadd.f32 %v8398_v27, %v8390_v35  ;;  %v8439_v12 = vadd.f32 %v8431_v49, %v8423_v33  ;;  %v8399_v32 = vmul.f32 0.29032257, %v14428_v62  ;;  %v8432_v20 = vmul.f32 0.7741935, %v14428_v62 }
 0x766   : > { %v14434_v55 = vpop.f32.mrb[163].mxu0  ;;  %v8488_v39 = vmul.f32 0.2580645, %v14411_v1  ;;  %v8456_v46 = vmul.f32 0.7419355, %v14421_v5 }
 0x767   : > { %v8400_v16 = vmul.f32 0.29032257, %v14434_v55  ;;  %9785 = vst [vmem:[%s13966_s18 + $0x368] sm:$0xff] %v8406_v23  ;;  %9793 = vst [vmem:[%s13966_s18 + $0x3a8] sm:$0xff] %v8439_v12  ;;  %v8407_v58 = vadd.f32 %v8399_v32, %v8391_v13  ;;  %v8440_v10 = vadd.f32 %v8432_v20, %v8424_v6  ;;  %v8433_v44 = vmul.f32 0.7741935, %v14434_v55 }
 0x768   : > { %v14443_v45 = vpop.f32.mrb[164].mxu0  ;;  %v8489_v38 = vmul.f32 0.2580645, %v14421_v5  ;;  %v8457_v19 = vmul.f32 0.7419355, %v14428_v62 }
 0x769   : > { %v8408_v50 = vadd.f32 %v8400_v16, %v8392_v31  ;;  %9786 = vst [vmem:[%s13966_s18 + $0x370] sm:$0xff] %v8407_v58  ;;  %9794 = vst [vmem:[%s13966_s18 + $0x3b0] sm:$0xff] %v8440_v10  ;;  %v8441_v8 = vadd.f32 %v8433_v44, %v8425_v57  ;;  %v8459_v11 = vmul.f32 0.2580645, %v14443_v45  ;;  %v8492_v56 = vmul.f32 0.7419355, %v14443_v45 }
 0x76a   : > { %v14453_v7 = vpop.f32.mrb[165].mxu0  ;;  %v8490_v35 = vmul.f32 0.2580645, %v14428_v62  ;;  %v8458_v13 = vmul.f32 0.7419355, %v14434_v55 }
 0x76b   : > { %9787 = vst [vmem:[%s13966_s18 + $0x378] sm:$0xff] %v8408_v50  ;;  %9795 = vst [vmem:[%s13966_s18 + $0x3b8] sm:$0xff] %v8441_v8  ;;  %v8467_v41 = vadd.f32 %v8459_v11, %v8451_v24  ;;  %v8500_v48 = vadd.f32 %v8492_v56, %v8484_v37  ;;  %v8460_v28 = vmul.f32 0.2580645, %v14453_v7  ;;  %v8493_v60 = vmul.f32 0.7419355, %v14453_v7 }
 0x76c   : > { %v14460_v43 = vpop.f32.mrb[166].mxu0  ;;  %v8491_v62 = vmul.f32 0.2580645, %v14434_v55  ;;  %v8517_v20 = vmul.f32 0.7741935, %v14443_v45 }
 0x76d   : > { %9796 = vst [vmem:[%s13966_s18 + $0x3c0] sm:$0xff] %v8467_v41  ;;  %9804 = vst [vmem:[%s13966_s18 + $0x400] sm:$0xff] %v8500_v48  ;;  %v8468_v63 = vadd.f32 %v8460_v28, %v8452_v36  ;;  %v8501_v40 = vadd.f32 %v8493_v60, %v8485_v26  ;;  %v8461_v17 = vmul.f32 0.2580645, %v14460_v43  ;;  %v8494_v25 = vmul.f32 0.7419355, %v14460_v43 }
 0x76e   : > { %v14466_v29 = vpop.f32.mrb[167].mxu0  ;;  %v8550_v57 = vmul.f32 0.29032257, %v14443_v45  ;;  %v8518_v44 = vmul.f32 0.7741935, %v14453_v7 }
 0x76f   : > { %v8462_v54 = vmul.f32 0.2580645, %v14466_v29  ;;  %9797 = vst [vmem:[%s13966_s18 + $0x3c8] sm:$0xff] %v8468_v63  ;;  %9805 = vst [vmem:[%s13966_s18 + $0x408] sm:$0xff] %v8501_v40  ;;  %v8469_v15 = vadd.f32 %v8461_v17, %v8453_v47  ;;  %v8502_v53 = vadd.f32 %v8494_v25, %v8486_v42  ;;  %v8495_v59 = vmul.f32 0.7419355, %v14466_v29 }
 0x770   : > { %v14475_v2 = vpop.f32.mrb[168].mxu0  ;;  %v8551_v24 = vmul.f32 0.29032257, %v14453_v7  ;;  %v8519_v56 = vmul.f32 0.7741935, %v14460_v43 }
 0x771   : > { %v8470_v4 = vadd.f32 %v8462_v54, %v8454_v52  ;;  %9798 = vst [vmem:[%s13966_s18 + $0x3d0] sm:$0xff] %v8469_v15  ;;  %9806 = vst [vmem:[%s13966_s18 + $0x410] sm:$0xff] %v8502_v53  ;;  %v8503_v21 = vadd.f32 %v8495_v59, %v8487_v14  ;;  %v8463_v18 = vmul.f32 0.2580645, %v14475_v2  ;;  %v8496_v22 = vmul.f32 0.7419355, %v14475_v2 }
 0x772   : > { %v14485_v3 = vpop.f32.mrb[169].mxu0  ;;  %v8552_v36 = vmul.f32 0.29032257, %v14460_v43  ;;  %v8520_v47 = vmul.f32 0.7741935, %v14466_v29 }
 0x773   : > { %9799 = vst [vmem:[%s13966_s18 + $0x3d8] sm:$0xff] %v8470_v4  ;;  %9807 = vst [vmem:[%s13966_s18 + $0x418] sm:$0xff] %v8503_v21  ;;  %v8471_v30 = vadd.f32 %v8463_v18, %v8455_v9  ;;  %v8504_v51 = vadd.f32 %v8496_v22, %v8488_v39  ;;  %v8464_v1 = vmul.f32 0.2580645, %v14485_v3  ;;  %v8497_v61 = vmul.f32 0.7419355, %v14485_v3 }
 0x774   : > { %v14492_v33 = vpop.f32.mrb[170].mxu0  ;;  %v8553_v43 = vmul.f32 0.29032257, %v14466_v29  ;;  %v8521_v25 = vmul.f32 0.7741935, %v14475_v2 }
 0x775   : > { %9800 = vst [vmem:[%s13966_s18 + $0x3e0] sm:$0xff] %v8471_v30  ;;  %9808 = vst [vmem:[%s13966_s18 + $0x420] sm:$0xff] %v8504_v51  ;;  %v8472_v5 = vadd.f32 %v8464_v1, %v8456_v46  ;;  %v8505_v0 = vadd.f32 %v8497_v61, %v8489_v38  ;;  %v8465_v34 = vmul.f32 0.2580645, %v14492_v33  ;;  %v8498_v27 = vmul.f32 0.7419355, %v14492_v33 }
 0x776   : > { %v14498_v49 = vpop.f32.mrb[171].mxu0  ;;  %v8554_v14 = vmul.f32 0.29032257, %v14475_v2  ;;  %v8522_v59 = vmul.f32 0.7741935, %v14485_v3 }
 0x777   : > { %v8466_v6 = vmul.f32 0.2580645, %v14498_v49  ;;  %9801 = vst [vmem:[%s13966_s18 + $0x3e8] sm:$0xff] %v8472_v5  ;;  %9809 = vst [vmem:[%s13966_s18 + $0x428] sm:$0xff] %v8505_v0  ;;  %v8473_v23 = vadd.f32 %v8465_v34, %v8457_v19  ;;  %v8506_v12 = vadd.f32 %v8498_v27, %v8490_v35  ;;  %v8499_v32 = vmul.f32 0.7419355, %v14498_v49 }
 0x778   : > { %v14507_v16 = vpop.f32.mrb[172].mxu0  ;;  %v8555_v9 = vmul.f32 0.29032257, %v14485_v3  ;;  %v8523_v22 = vmul.f32 0.7741935, %v14492_v33 }
 0x779   : > { %v8474_v31 = vadd.f32 %v8466_v6, %v8458_v13  ;;  %9802 = vst [vmem:[%s13966_s18 + $0x3f0] sm:$0xff] %v8473_v23  ;;  %9810 = vst [vmem:[%s13966_s18 + $0x430] sm:$0xff] %v8506_v12  ;;  %v8507_v58 = vadd.f32 %v8499_v32, %v8491_v62  ;;  %v8525_v55 = vmul.f32 0.22580644, %v14507_v16  ;;  %v8558_v10 = vmul.f32 0.7096774, %v14507_v16 }
 0x77a   : > { %v14517_v50 = vpop.f32.mrb[173].mxu0  ;;  %v8556_v46 = vmul.f32 0.29032257, %v14492_v33  ;;  %v8524_v19 = vmul.f32 0.7741935, %v14498_v49 }
 0x77b   : > { %9803 = vst [vmem:[%s13966_s18 + $0x3f8] sm:$0xff] %v8474_v31  ;;  %9811 = vst [vmem:[%s13966_s18 + $0x438] sm:$0xff] %v8507_v58  ;;  %v8533_v37 = vadd.f32 %v8525_v55, %v8517_v20  ;;  %v8566_v8 = vadd.f32 %v8558_v10, %v8550_v57  ;;  %v8526_v45 = vmul.f32 0.22580644, %v14517_v50  ;;  %v8559_v11 = vmul.f32 0.7096774, %v14517_v50 }
 0x77c   : > { %v14524_v26 = vpop.f32.mrb[174].mxu0  ;;  %v8557_v33 = vmul.f32 0.29032257, %v14498_v49  ;;  %v8583_v27 = vmul.f32 0.8064516, %v14507_v16 }
 0x77d   : > { %9812 = vst [vmem:[%s13966_s18 + $0x440] sm:$0xff] %v8533_v37  ;;  %9820 = vst [vmem:[%s13966_s18 + $0x480] sm:$0xff] %v8566_v8  ;;  %v8534_v7 = vadd.f32 %v8526_v45, %v8518_v44  ;;  %v8567_v41 = vadd.f32 %v8559_v11, %v8551_v24  ;;  %v8527_v48 = vmul.f32 0.22580644, %v14524_v26  ;;  %v8560_v28 = vmul.f32 0.7096774, %v14524_v26 }
 0x77e   : > { %v14530_v60 = vpop.f32.mrb[175].mxu0  ;;  %v8616_v62 = vmul.f32 0.32258064, %v14507_v16  ;;  %v8584_v32 = vmul.f32 0.8064516, %v14517_v50 }
 0x77f   : > { %v8528_v42 = vmul.f32 0.22580644, %v14530_v60  ;;  %9813 = vst [vmem:[%s13966_s18 + $0x448] sm:$0xff] %v8534_v7  ;;  %9821 = vst [vmem:[%s13966_s18 + $0x488] sm:$0xff] %v8567_v41  ;;  %v8535_v63 = vadd.f32 %v8527_v48, %v8519_v56  ;;  %v8568_v40 = vadd.f32 %v8560_v28, %v8552_v36  ;;  %v8561_v17 = vmul.f32 0.7096774, %v14530_v60 }
 0x780   : > { %v14539_v54 = vpop.f32.mrb[176].mxu0  ;;  %v8617_v20 = vmul.f32 0.32258064, %v14517_v50  ;;  %v8585_v10 = vmul.f32 0.8064516, %v14524_v26 }
 0x781   : > { %v8536_v52 = vadd.f32 %v8528_v42, %v8520_v47  ;;  %9814 = vst [vmem:[%s13966_s18 + $0x450] sm:$0xff] %v8535_v63  ;;  %9822 = vst [vmem:[%s13966_s18 + $0x490] sm:$0xff] %v8568_v40  ;;  %v8569_v15 = vadd.f32 %v8561_v17, %v8553_v43  ;;  %v8529_v29 = vmul.f32 0.22580644, %v14539_v54  ;;  %v8562_v53 = vmul.f32 0.7096774, %v14539_v54 }
 0x782   : > { %v14549_v4 = vpop.f32.mrb[177].mxu0  ;;  %v8618_v44 = vmul.f32 0.32258064, %v14524_v26  ;;  %v8586_v56 = vmul.f32 0.8064516, %v14530_v60 }
 0x783   : > { %9815 = vst [vmem:[%s13966_s18 + $0x458] sm:$0xff] %v8536_v52  ;;  %9823 = vst [vmem:[%s13966_s18 + $0x498] sm:$0xff] %v8569_v15  ;;  %v8537_v39 = vadd.f32 %v8529_v29, %v8521_v25  ;;  %v8570_v21 = vadd.f32 %v8562_v53, %v8554_v14  ;;  %v8530_v2 = vmul.f32 0.22580644, %v14549_v4  ;;  %v8563_v18 = vmul.f32 0.7096774, %v14549_v4 }
 0x784   : > { %v14556_v38 = vpop.f32.mrb[178].mxu0  ;;  %v8619_v26 = vmul.f32 0.32258064, %v14530_v60  ;;  %v8587_v28 = vmul.f32 0.8064516, %v14539_v54 }
 0x785   : > { %9816 = vst [vmem:[%s13966_s18 + $0x460] sm:$0xff] %v8537_v39  ;;  %9824 = vst [vmem:[%s13966_s18 + $0x4a0] sm:$0xff] %v8570_v21  ;;  %v8538_v3 = vadd.f32 %v8530_v2, %v8522_v59  ;;  %v8571_v30 = vadd.f32 %v8563_v18, %v8555_v9  ;;  %v8531_v51 = vmul.f32 0.22580644, %v14556_v38  ;;  %v8564_v1 = vmul.f32 0.7096774, %v14556_v38 }
 0x786   : > { %v14562_v61 = vpop.f32.mrb[179].mxu0  ;;  %v8620_v43 = vmul.f32 0.32258064, %v14539_v54  ;;  %v8588_v17 = vmul.f32 0.8064516, %v14549_v4 }
 0x787   : > { %v8532_v35 = vmul.f32 0.22580644, %v14562_v61  ;;  %9817 = vst [vmem:[%s13966_s18 + $0x468] sm:$0xff] %v8538_v3  ;;  %9825 = vst [vmem:[%s13966_s18 + $0x4a8] sm:$0xff] %v8571_v30  ;;  %v8539_v5 = vadd.f32 %v8531_v51, %v8523_v22  ;;  %v8572_v0 = vadd.f32 %v8564_v1, %v8556_v46  ;;  %v8565_v34 = vmul.f32 0.7096774, %v14562_v61 }
 0x788   : > { %v14571_v6 = vpop.f32.mrb[180].mxu0  ;;  %v8621_v25 = vmul.f32 0.32258064, %v14549_v4  ;;  %v8589_v53 = vmul.f32 0.8064516, %v14556_v38 }
 0x789   : > { %v8540_v13 = vadd.f32 %v8532_v35, %v8524_v19  ;;  %9818 = vst [vmem:[%s13966_s18 + $0x470] sm:$0xff] %v8539_v5  ;;  %9826 = vst [vmem:[%s13966_s18 + $0x4b0] sm:$0xff] %v8572_v0  ;;  %v8573_v23 = vadd.f32 %v8565_v34, %v8557_v33  ;;  %v8591_v49 = vmul.f32 0.19354838, %v14571_v6  ;;  %v8624_v12 = vmul.f32 0.67741936, %v14571_v6 }
 0x78a   : > { %v14581_v31 = vpop.f32.mrb[181].mxu0  ;;  %v8622_v59 = vmul.f32 0.32258064, %v14556_v38  ;;  %v8590_v22 = vmul.f32 0.8064516, %v14562_v61 }
 0x78b   : > { %9819 = vst [vmem:[%s13966_s18 + $0x478] sm:$0xff] %v8540_v13  ;;  %9827 = vst [vmem:[%s13966_s18 + $0x4b8] sm:$0xff] %v8573_v23  ;;  %v8599_v57 = vadd.f32 %v8591_v49, %v8583_v27  ;;  %v8632_v58 = vadd.f32 %v8624_v12, %v8616_v62  ;;  %v8592_v16 = vmul.f32 0.19354838, %v14581_v31  ;;  %v8625_v55 = vmul.f32 0.67741936, %v14581_v31 }
 0x78c   : > { %v14588_v24 = vpop.f32.mrb[182].mxu0  ;;  %v8623_v38 = vmul.f32 0.32258064, %v14562_v61  ;;  %v8649_v1 = vmul.f32 0.83870965, %v14571_v6 }
 0x78d   : > { %9828 = vst [vmem:[%s13966_s18 + $0x4c0] sm:$0xff] %v8599_v57  ;;  %9836 = vst [vmem:[%s13966_s18 + $0x500] sm:$0xff] %v8632_v58  ;;  %v8600_v50 = vadd.f32 %v8592_v16, %v8584_v32  ;;  %v8633_v37 = vadd.f32 %v8625_v55, %v8617_v20  ;;  %v8593_v8 = vmul.f32 0.19354838, %v14588_v24  ;;  %v8626_v45 = vmul.f32 0.67741936, %v14588_v24 }
 0x78e   : > { %v14594_v11 = vpop.f32.mrb[183].mxu0  ;;  %v8682_v33 = vmul.f32 0.3548387, %v14571_v6  ;;  %v8650_v34 = vmul.f32 0.83870965, %v14581_v31 }
 0x78f   : > { %v8594_v36 = vmul.f32 0.19354838, %v14594_v11  ;;  %9829 = vst [vmem:[%s13966_s18 + $0x4c8] sm:$0xff] %v8600_v50  ;;  %9837 = vst [vmem:[%s13966_s18 + $0x508] sm:$0xff] %v8633_v37  ;;  %v8601_v7 = vadd.f32 %v8593_v8, %v8585_v10  ;;  %v8634_v41 = vadd.f32 %v8626_v45, %v8618_v44  ;;  %v8627_v48 = vmul.f32 0.67741936, %v14594_v11 }
 0x790   : > { %v14603_v42 = vpop.f32.mrb[184].mxu0  ;;  %v8683_v27 = vmul.f32 0.3548387, %v14581_v31  ;;  %v8651_v12 = vmul.f32 0.83870965, %v14588_v24 }
 0x791   : > { %v8602_v47 = vadd.f32 %v8594_v36, %v8586_v56  ;;  %9830 = vst [vmem:[%s13966_s18 + $0x4d0] sm:$0xff] %v8601_v7  ;;  %9838 = vst [vmem:[%s13966_s18 + $0x510] sm:$0xff] %v8634_v41  ;;  %v8635_v63 = vadd.f32 %v8627_v48, %v8619_v26  ;;  %v8595_v60 = vmul.f32 0.19354838, %v14603_v42  ;;  %v8628_v40 = vmul.f32 0.67741936, %v14603_v42 }
 0x792   : > { %v14613_v52 = vpop.f32.mrb[185].mxu0  ;;  %v8684_v32 = vmul.f32 0.3548387, %v14588_v24  ;;  %v8652_v10 = vmul.f32 0.83870965, %v14594_v11 }
 0x793   : > { %9831 = vst [vmem:[%s13966_s18 + $0x4d8] sm:$0xff] %v8602_v47  ;;  %9839 = vst [vmem:[%s13966_s18 + $0x518] sm:$0xff] %v8635_v63  ;;  %v8603_v14 = vadd.f32 %v8595_v60, %v8587_v28  ;;  %v8636_v15 = vadd.f32 %v8628_v40, %v8620_v43  ;;  %v8596_v54 = vmul.f32 0.19354838, %v14613_v52  ;;  %v8629_v29 = vmul.f32 0.67741936, %v14613_v52 }
 0x794   : > { %v14620_v9 = vpop.f32.mrb[186].mxu0  ;;  %v8685_v24 = vmul.f32 0.3548387, %v14594_v11  ;;  %v8653_v45 = vmul.f32 0.83870965, %v14603_v42 }
 0x795   : > { %9832 = vst [vmem:[%s13966_s18 + $0x4e0] sm:$0xff] %v8603_v14  ;;  %9840 = vst [vmem:[%s13966_s18 + $0x520] sm:$0xff] %v8636_v15  ;;  %v8604_v4 = vadd.f32 %v8596_v54, %v8588_v17  ;;  %v8637_v39 = vadd.f32 %v8629_v29, %v8621_v25  ;;  %v8597_v21 = vmul.f32 0.19354838, %v14620_v9  ;;  %v8630_v2 = vmul.f32 0.67741936, %v14620_v9 }
 0x796   : > { %v14626_v18 = vpop.f32.mrb[187].mxu0  ;;  %v8686_v26 = vmul.f32 0.3548387, %v14603_v42  ;;  %v8654_v48 = vmul.f32 0.83870965, %v14613_v52 }
 0x797   : > { %v8598_v46 = vmul.f32 0.19354838, %v14626_v18  ;;  %9833 = vst [vmem:[%s13966_s18 + $0x4e8] sm:$0xff] %v8604_v4  ;;  %9841 = vst [vmem:[%s13966_s18 + $0x528] sm:$0xff] %v8637_v39  ;;  %v8605_v3 = vadd.f32 %v8597_v21, %v8589_v53  ;;  %v8638_v30 = vadd.f32 %v8630_v2, %v8622_v59  ;;  %v8631_v51 = vmul.f32 0.67741936, %v14626_v18 }
 0x798   : > { %v14635_v35 = vpop.f32.mrb[188].mxu0  ;;  %v8687_v28 = vmul.f32 0.3548387, %v14613_v52  ;;  %v8655_v40 = vmul.f32 0.83870965, %v14620_v9 }
 0x799   : > { %v8606_v19 = vadd.f32 %v8598_v46, %v8590_v22  ;;  %9834 = vst [vmem:[%s13966_s18 + $0x4f0] sm:$0xff] %v8605_v3  ;;  %9842 = vst [vmem:[%s13966_s18 + $0x530] sm:$0xff] %v8638_v30  ;;  %v8639_v5 = vadd.f32 %v8631_v51, %v8623_v38  ;;  %v8657_v61 = vmul.f32 0.16129032, %v14635_v35  ;;  %v8690_v0 = vmul.f32 0.6451613, %v14635_v35 }
 0x79a   : > { %v14645_v13 = vpop.f32.mrb[189].mxu0  ;;  %v8688_v17 = vmul.f32 0.3548387, %v14620_v9  ;;  %v8656_v53 = vmul.f32 0.83870965, %v14626_v18 }
 0x79b   : > { %9835 = vst [vmem:[%s13966_s18 + $0x4f8] sm:$0xff] %v8606_v19  ;;  %9843 = vst [vmem:[%s13966_s18 + $0x538] sm:$0xff] %v8639_v5  ;;  %v8665_v62 = vadd.f32 %v8657_v61, %v8649_v1  ;;  %v8698_v23 = vadd.f32 %v8690_v0, %v8682_v33  ;;  %v8658_v6 = vmul.f32 0.16129032, %v14645_v13  ;;  %v8691_v49 = vmul.f32 0.6451613, %v14645_v13 }
 0x79c   : > { %v14652_v20 = vpop.f32.mrb[190].mxu0  ;;  %v8689_v9 = vmul.f32 0.3548387, %v14626_v18  ;;  %v8715_v2 = vmul.f32 0.87096775, %v14635_v35 }
 0x79d   : > { %9844 = vst [vmem:[%s13966_s18 + $0x540] sm:$0xff] %v8665_v62  ;;  %9852 = vst [vmem:[%s13966_s18 + $0x580] sm:$0xff] %v8698_v23  ;;  %v8666_v31 = vadd.f32 %v8658_v6, %v8650_v34  ;;  %v8699_v57 = vadd.f32 %v8691_v49, %v8683_v27  ;;  %v8659_v58 = vmul.f32 0.16129032, %v14652_v20  ;;  %v8692_v16 = vmul.f32 0.6451613, %v14652_v20 }
 0x79e   : > { %v14658_v55 = vpop.f32.mrb[191].mxu0  ;;  %v8748_v38 = vmul.f32 0.38709676, %v14635_v35  ;;  %v8716_v51 = vmul.f32 0.87096775, %v14645_v13 }
 0x79f   : > { %v8660_v44 = vmul.f32 0.16129032, %v14658_v55  ;;  %9845 = vst [vmem:[%s13966_s18 + $0x548] sm:$0xff] %v8666_v31  ;;  %9853 = vst [vmem:[%s13966_s18 + $0x588] sm:$0xff] %v8699_v57  ;;  %v8667_v50 = vadd.f32 %v8659_v58, %v8651_v12  ;;  %v8700_v37 = vadd.f32 %v8692_v16, %v8684_v32  ;;  %v8693_v8 = vmul.f32 0.6451613, %v14658_v55 }
 0x7a0   : > { %v14667_v36 = vpop.f32.mrb[192].mxu0  ;;  %v8749_v1 = vmul.f32 0.38709676, %v14645_v13  ;;  %v8717_v0 = vmul.f32 0.87096775, %v14652_v20 }
 0x7a1   : > { %v8668_v56 = vadd.f32 %v8660_v44, %v8652_v10  ;;  %9846 = vst [vmem:[%s13966_s18 + $0x550] sm:$0xff] %v8667_v50  ;;  %9854 = vst [vmem:[%s13966_s18 + $0x590] sm:$0xff] %v8700_v37  ;;  %v8701_v7 = vadd.f32 %v8693_v8, %v8685_v24  ;;  %v8661_v11 = vmul.f32 0.16129032, %v14667_v36  ;;  %v8694_v41 = vmul.f32 0.6451613, %v14667_v36 }
 0x7a2   : > { %v14677_v47 = vpop.f32.mrb[193].mxu0  ;;  %v8750_v34 = vmul.f32 0.38709676, %v14652_v20  ;;  %v8718_v12 = vmul.f32 0.87096775, %v14658_v55 }
 0x7a3   : > { %9847 = vst [vmem:[%s13966_s18 + $0x558] sm:$0xff] %v8668_v56  ;;  %9855 = vst [vmem:[%s13966_s18 + $0x598] sm:$0xff] %v8701_v7  ;;  %v8669_v43 = vadd.f32 %v8661_v11, %v8653_v45  ;;  %v8702_v63 = vadd.f32 %v8694_v41, %v8686_v26  ;;  %v8662_v42 = vmul.f32 0.16129032, %v14677_v47  ;;  %v8695_v60 = vmul.f32 0.6451613, %v14677_v47 }
 0x7a4   : > { %v14684_v25 = vpop.f32.mrb[194].mxu0  ;;  %v8751_v20 = vmul.f32 0.38709676, %v14658_v55  ;;  %v8719_v16 = vmul.f32 0.87096775, %v14667_v36 }
 0x7a5   : > { %9848 = vst [vmem:[%s13966_s18 + $0x560] sm:$0xff] %v8669_v43  ;;  %9856 = vst [vmem:[%s13966_s18 + $0x5a0] sm:$0xff] %v8702_v63  ;;  %v8670_v52 = vadd.f32 %v8662_v42, %v8654_v48  ;;  %v8703_v14 = vadd.f32 %v8695_v60, %v8687_v28  ;;  %v8663_v15 = vmul.f32 0.16129032, %v14684_v25  ;;  %v8696_v54 = vmul.f32 0.6451613, %v14684_v25 }
 0x7a6   : > { %v14690_v29 = vpop.f32.mrb[195].mxu0  ;;  %v8752_v24 = vmul.f32 0.38709676, %v14667_v36  ;;  %v8720_v8 = vmul.f32 0.87096775, %v14677_v47 }
 0x7a7   : > { %v8664_v59 = vmul.f32 0.16129032, %v14690_v29  ;;  %9849 = vst [vmem:[%s13966_s18 + $0x568] sm:$0xff] %v8670_v52  ;;  %9857 = vst [vmem:[%s13966_s18 + $0x5a8] sm:$0xff] %v8703_v14  ;;  %v8671_v4 = vadd.f32 %v8663_v15, %v8655_v40  ;;  %v8704_v39 = vadd.f32 %v8696_v54, %v8688_v17  ;;  %v8697_v21 = vmul.f32 0.6451613, %v14690_v29 }
 0x7a8   : > { %v14699_v46 = vpop.f32.mrb[196].mxu0  ;;  %v8753_v45 = vmul.f32 0.38709676, %v14677_v47  ;;  %v8721_v41 = vmul.f32 0.87096775, %v14684_v25 }
 0x7a9   : > { %v8672_v22 = vadd.f32 %v8664_v59, %v8656_v53  ;;  %9850 = vst [vmem:[%s13966_s18 + $0x570] sm:$0xff] %v8671_v4  ;;  %9858 = vst [vmem:[%s13966_s18 + $0x5b0] sm:$0xff] %v8704_v39  ;;  %v8705_v3 = vadd.f32 %v8697_v21, %v8689_v9  ;;  %v8723_v18 = vmul.f32 0.12903225, %v14699_v46  ;;  %v8756_v30 = vmul.f32 0.61290324, %v14699_v46 }
 0x7aa   : > { %v14709_v19 = vpop.f32.mrb[197].mxu0  ;;  %v8754_v48 = vmul.f32 0.38709676, %v14684_v25  ;;  %v8722_v40 = vmul.f32 0.87096775, %v14690_v29 }
 0x7ab   : > { %9851 = vst [vmem:[%s13966_s18 + $0x578] sm:$0xff] %v8672_v22  ;;  %9859 = vst [vmem:[%s13966_s18 + $0x5b8] sm:$0xff] %v8705_v3  ;;  %v8731_v33 = vadd.f32 %v8723_v18, %v8715_v2  ;;  %v8764_v5 = vadd.f32 %v8756_v30, %v8748_v38  ;;  %v8724_v35 = vmul.f32 0.12903225, %v14709_v19  ;;  %v8757_v61 = vmul.f32 0.61290324, %v14709_v19 }
 0x7ac   : > { %v14716_v27 = vpop.f32.mrb[198].mxu0  ;;  %v8755_v25 = vmul.f32 0.38709676, %v14690_v29  ;;  %v8781_v54 = vmul.f32 0.9032258, %v14699_v46 }
 0x7ad   : > { %9860 = vst [vmem:[%s13966_s18 + $0x5c0] sm:$0xff] %v8731_v33  ;;  %9868 = vst [vmem:[%s13966_s18 + $0x600] sm:$0xff] %v8764_v5  ;;  %v8732_v13 = vadd.f32 %v8724_v35, %v8716_v51  ;;  %v8765_v62 = vadd.f32 %v8757_v61, %v8749_v1  ;;  %v8725_v23 = vmul.f32 0.12903225, %v14716_v27  ;;  %v8758_v6 = vmul.f32 0.61290324, %v14716_v27 }
 0x7ae   : > { %v14722_v49 = vpop.f32.mrb[199].mxu0  ;;  %v8814_v9 = vmul.f32 0.41935483, %v14699_v46  ;;  %v8782_v21 = vmul.f32 0.9032258, %v14709_v19 }
 0x7af   : > { %v8726_v32 = vmul.f32 0.12903225, %v14722_v49  ;;  %9861 = vst [vmem:[%s13966_s18 + $0x5c8] sm:$0xff] %v8732_v13  ;;  %9869 = vst [vmem:[%s13966_s18 + $0x608] sm:$0xff] %v8765_v62  ;;  %v8733_v31 = vadd.f32 %v8725_v23, %v8717_v0  ;;  %v8766_v57 = vadd.f32 %v8758_v6, %v8750_v34  ;;  %v8759_v58 = vmul.f32 0.61290324, %v14722_v49 }
 0x7b0   : > { %v14731_v44 = vpop.f32.mrb[200].mxu0  ;;  %v8815_v2 = vmul.f32 0.41935483, %v14709_v19  ;;  %v8783_v30 = vmul.f32 0.9032258, %v14716_v27 }
 0x7b1   : > { %v8734_v10 = vadd.f32 %v8726_v32, %v8718_v12  ;;  %9862 = vst [vmem:[%s13966_s18 + $0x5d0] sm:$0xff] %v8733_v31  ;;  %9870 = vst [vmem:[%s13966_s18 + $0x610] sm:$0xff] %v8766_v57  ;;  %v8767_v50 = vadd.f32 %v8759_v58, %v8751_v20  ;;  %v8727_v55 = vmul.f32 0.12903225, %v14731_v44  ;;  %v8760_v37 = vmul.f32 0.61290324, %v14731_v44 }
 0x7b2   : > { %v14741_v56 = vpop.f32.mrb[201].mxu0  ;;  %v8816_v51 = vmul.f32 0.41935483, %v14716_v27  ;;  %v8784_v0 = vmul.f32 0.9032258, %v14722_v49 }
 0x7b3   : > { %9863 = vst [vmem:[%s13966_s18 + $0x5d8] sm:$0xff] %v8734_v10  ;;  %9871 = vst [vmem:[%s13966_s18 + $0x618] sm:$0xff] %v8767_v50  ;;  %v8735_v26 = vadd.f32 %v8727_v55, %v8719_v16  ;;  %v8768_v7 = vadd.f32 %v8760_v37, %v8752_v24  ;;  %v8728_v36 = vmul.f32 0.12903225, %v14741_v56  ;;  %v8761_v11 = vmul.f32 0.61290324, %v14741_v56 }
 0x7b4   : > { %v14748_v28 = vpop.f32.mrb[202].mxu0  ;;  %v8817_v27 = vmul.f32 0.41935483, %v14722_v49  ;;  %v8785_v6 = vmul.f32 0.9032258, %v14731_v44 }
 0x7b5   : > { %9864 = vst [vmem:[%s13966_s18 + $0x5e0] sm:$0xff] %v8735_v26  ;;  %9872 = vst [vmem:[%s13966_s18 + $0x620] sm:$0xff] %v8768_v7  ;;  %v8736_v47 = vadd.f32 %v8728_v36, %v8720_v8  ;;  %v8769_v43 = vadd.f32 %v8761_v11, %v8753_v45  ;;  %v8729_v63 = vmul.f32 0.12903225, %v14748_v28  ;;  %v8762_v42 = vmul.f32 0.61290324, %v14748_v28 }
 0x7b6   : > { %v14754_v60 = vpop.f32.mrb[203].mxu0  ;;  %v8818_v20 = vmul.f32 0.41935483, %v14731_v44  ;;  %v8786_v58 = vmul.f32 0.9032258, %v14741_v56 }
 0x7b7   : > { %v8730_v17 = vmul.f32 0.12903225, %v14754_v60  ;;  %9865 = vst [vmem:[%s13966_s18 + $0x5e8] sm:$0xff] %v8736_v47  ;;  %9873 = vst [vmem:[%s13966_s18 + $0x628] sm:$0xff] %v8769_v43  ;;  %v8737_v52 = vadd.f32 %v8729_v63, %v8721_v41  ;;  %v8770_v14 = vadd.f32 %v8762_v42, %v8754_v48  ;;  %v8763_v15 = vmul.f32 0.61290324, %v14754_v60 }
 0x7b8   : > { %v14763_v59 = vpop.f32.mrb[204].mxu0  ;;  %v8819_v16 = vmul.f32 0.41935483, %v14741_v56  ;;  %v8787_v37 = vmul.f32 0.9032258, %v14748_v28 }
 0x7b9   : > { %v8738_v53 = vadd.f32 %v8730_v17, %v8722_v40  ;;  %9866 = vst [vmem:[%s13966_s18 + $0x5f0] sm:$0xff] %v8737_v52  ;;  %9874 = vst [vmem:[%s13966_s18 + $0x630] sm:$0xff] %v8770_v14  ;;  %v8771_v4 = vadd.f32 %v8763_v15, %v8755_v25  ;;  %v8789_v29 = vmul.f32 0.09677419, %v14763_v59  ;;  %v8822_v39 = vmul.f32 0.58064514, %v14763_v59 }
 0x7ba   : > { %v14773_v22 = vpop.f32.mrb[205].mxu0  ;;  %v8820_v8 = vmul.f32 0.41935483, %v14748_v28  ;;  %v8788_v41 = vmul.f32 0.9032258, %v14754_v60 }
 0x7bb   : > { %9867 = vst [vmem:[%s13966_s18 + $0x5f8] sm:$0xff] %v8738_v53  ;;  %9875 = vst [vmem:[%s13966_s18 + $0x638] sm:$0xff] %v8771_v4  ;;  %v8797_v38 = vadd.f32 %v8789_v29, %v8781_v54  ;;  %v8830_v3 = vadd.f32 %v8822_v39, %v8814_v9  ;;  %v8790_v46 = vmul.f32 0.09677419, %v14773_v22  ;;  %v8823_v18 = vmul.f32 0.58064514, %v14773_v22 }
 0x7bc   : > { %v14780_v1 = vpop.f32.mrb[206].mxu0  ;;  %v8821_v28 = vmul.f32 0.41935483, %v14754_v60  ;;  %v8847_v42 = vmul.f32 0.9354839, %v14763_v59 }
 0x7bd   : > { %9876 = vst [vmem:[%s13966_s18 + $0x640] sm:$0xff] %v8797_v38  ;;  %9884 = vst [vmem:[%s13966_s18 + $0x680] sm:$0xff] %v8830_v3  ;;  %v8798_v19 = vadd.f32 %v8790_v46, %v8782_v21  ;;  %v8831_v33 = vadd.f32 %v8823_v18, %v8815_v2  ;;  %v8791_v5 = vmul.f32 0.09677419, %v14780_v1  ;;  %v8824_v35 = vmul.f32 0.58064514, %v14780_v1 }
 0x7be   : > { %v14786_v61 = vpop.f32.mrb[207].mxu0  ;;  %v8880_v25 = vmul.f32 0.4516129, %v14763_v59  ;;  %v8848_v15 = vmul.f32 0.9354839, %v14773_v22 }
 0x7bf   : > { %v8792_v34 = vmul.f32 0.09677419, %v14786_v61  ;;  %9877 = vst [vmem:[%s13966_s18 + $0x648] sm:$0xff] %v8798_v19  ;;  %9885 = vst [vmem:[%s13966_s18 + $0x688] sm:$0xff] %v8831_v33  ;;  %v8799_v13 = vadd.f32 %v8791_v5, %v8783_v30  ;;  %v8832_v62 = vadd.f32 %v8824_v35, %v8816_v51  ;;  %v8825_v23 = vmul.f32 0.58064514, %v14786_v61 }
 0x7c0   : > { %v14795_v32 = vpop.f32.mrb[208].mxu0  ;;  %v8881_v54 = vmul.f32 0.4516129, %v14773_v22  ;;  %v8849_v39 = vmul.f32 0.9354839, %v14780_v1 }
 0x7c1   : > { %v8800_v12 = vadd.f32 %v8792_v34, %v8784_v0  ;;  %9878 = vst [vmem:[%s13966_s18 + $0x650] sm:$0xff] %v8799_v13  ;;  %9886 = vst [vmem:[%s13966_s18 + $0x690] sm:$0xff] %v8832_v62  ;;  %v8833_v31 = vadd.f32 %v8825_v23, %v8817_v27  ;;  %v8793_v49 = vmul.f32 0.09677419, %v14795_v32  ;;  %v8826_v57 = vmul.f32 0.58064514, %v14795_v32 }
 0x7c2   : > { %v14805_v10 = vpop.f32.mrb[209].mxu0  ;;  %v8882_v21 = vmul.f32 0.4516129, %v14780_v1  ;;  %v8850_v30 = vmul.f32 0.9354839, %v14786_v61 }
 0x7c3   : > { %9879 = vst [vmem:[%s13966_s18 + $0x658] sm:$0xff] %v8800_v12  ;;  %9887 = vst [vmem:[%s13966_s18 + $0x698] sm:$0xff] %v8833_v31  ;;  %v8801_v24 = vadd.f32 %v8793_v49, %v8785_v6  ;;  %v8834_v50 = vadd.f32 %v8826_v57, %v8818_v20  ;;  %v8794_v44 = vmul.f32 0.09677419, %v14805_v10  ;;  %v8827_v55 = vmul.f32 0.58064514, %v14805_v10 }
 0x7c4   : > { %v14812_v45 = vpop.f32.mrb[210].mxu0  ;;  %v8883_v1 = vmul.f32 0.4516129, %v14786_v61  ;;  %v8851_v35 = vmul.f32 0.9354839, %v14795_v32 }
 0x7c5   : > { %9880 = vst [vmem:[%s13966_s18 + $0x660] sm:$0xff] %v8801_v24  ;;  %9888 = vst [vmem:[%s13966_s18 + $0x6a0] sm:$0xff] %v8834_v50  ;;  %v8802_v56 = vadd.f32 %v8794_v44, %v8786_v58  ;;  %v8835_v26 = vadd.f32 %v8827_v55, %v8819_v16  ;;  %v8795_v7 = vmul.f32 0.09677419, %v14812_v45  ;;  %v8828_v36 = vmul.f32 0.58064514, %v14812_v45 }
 0x7c6   : > { %v14818_v11 = vpop.f32.mrb[211].mxu0  ;;  %v8884_v27 = vmul.f32 0.4516129, %v14795_v32  ;;  %v8852_v23 = vmul.f32 0.9354839, %v14805_v10 }
 0x7c7   : > { %v8796_v48 = vmul.f32 0.09677419, %v14818_v11  ;;  %9881 = vst [vmem:[%s13966_s18 + $0x668] sm:$0xff] %v8802_v56  ;;  %9889 = vst [vmem:[%s13966_s18 + $0x6a8] sm:$0xff] %v8835_v26  ;;  %v8803_v47 = vadd.f32 %v8795_v7, %v8787_v37  ;;  %v8836_v43 = vadd.f32 %v8828_v36, %v8820_v8  ;;  %v8829_v63 = vmul.f32 0.58064514, %v14818_v11 }
 0x7c8   : > { %v14827_v17 = vpop.f32.mrb[212].mxu0  ;;  %v8885_v6 = vmul.f32 0.4516129, %v14805_v10  ;;  %v8853_v57 = vmul.f32 0.9354839, %v14812_v45 }
 0x7c9   : > { %v8804_v40 = vadd.f32 %v8796_v48, %v8788_v41  ;;  %9882 = vst [vmem:[%s13966_s18 + $0x670] sm:$0xff] %v8803_v47  ;;  %9890 = vst [vmem:[%s13966_s18 + $0x6b0] sm:$0xff] %v8836_v43  ;;  %v8837_v52 = vadd.f32 %v8829_v63, %v8821_v28  ;;  %v8855_v60 = vmul.f32 0.06451613, %v14827_v17  ;;  %v8888_v14 = vmul.f32 0.5483871, %v14827_v17 }
 0x7ca   : > { %v14837_v53 = vpop.f32.mrb[213].mxu0  ;;  %v8886_v58 = vmul.f32 0.4516129, %v14812_v45  ;;  %v8854_v37 = vmul.f32 0.9354839, %v14818_v11 }
 0x7cb   : > { %9883 = vst [vmem:[%s13966_s18 + $0x678] sm:$0xff] %v8804_v40  ;;  %9891 = vst [vmem:[%s13966_s18 + $0x6b8] sm:$0xff] %v8837_v52  ;;  %v8863_v9 = vadd.f32 %v8855_v60, %v8847_v42  ;;  %v8896_v4 = vadd.f32 %v8888_v14, %v8880_v25  ;;  %v8856_v59 = vmul.f32 0.06451613, %v14837_v53  ;;  %v8889_v29 = vmul.f32 0.5483871, %v14837_v53 }
 0x7cc   : > { %v14844_v2 = vpop.f32.mrb[214].mxu0  ;;  %v8887_v8 = vmul.f32 0.4516129, %v14818_v11  ;;  %v8913_v56 = vmul.f32 0.9677419, %v14827_v17 }
 0x7cd   : > { %9892 = vst [vmem:[%s13966_s18 + $0x6c0] sm:$0xff] %v8863_v9  ;;  %9900 = vst [vmem:[%s13966_s18 + $0x700] sm:$0xff] %v8896_v4  ;;  %v8864_v22 = vadd.f32 %v8856_v59, %v8848_v15  ;;  %v8897_v38 = vadd.f32 %v8889_v29, %v8881_v54  ;;  %v8857_v3 = vmul.f32 0.06451613, %v14844_v2  ;;  %v8890_v46 = vmul.f32 0.5483871, %v14844_v2 }
 0x7ce   : > { %v14850_v18 = vpop.f32.mrb[215].mxu0  ;;  %v8946_v41 = vmul.f32 0.48387095, %v14827_v17  ;;  %v8914_v48 = vmul.f32 0.9677419, %v14837_v53 }
 0x7cf   : > { %v8858_v51 = vmul.f32 0.06451613, %v14850_v18  ;;  %9893 = vst [vmem:[%s13966_s18 + $0x6c8] sm:$0xff] %v8864_v22  ;;  %9901 = vst [vmem:[%s13966_s18 + $0x708] sm:$0xff] %v8897_v38  ;;  %v8865_v19 = vadd.f32 %v8857_v3, %v8849_v39  ;;  %v8898_v33 = vadd.f32 %v8890_v46, %v8882_v21  ;;  %v8891_v5 = vmul.f32 0.5483871, %v14850_v18 }
 0x7d0   : > { %v14859_v34 = vpop.f32.mrb[216].mxu0  ;;  %v8947_v40 = vmul.f32 0.48387095, %v14837_v53  ;;  %v8915_v52 = vmul.f32 0.9677419, %v14844_v2 }
 0x7d1   : > { %v8866_v0 = vadd.f32 %v8858_v51, %v8850_v30  ;;  %9894 = vst [vmem:[%s13966_s18 + $0x6d0] sm:$0xff] %v8865_v19  ;;  %9902 = vst [vmem:[%s13966_s18 + $0x710] sm:$0xff] %v8898_v33  ;;  %v8899_v13 = vadd.f32 %v8891_v5, %v8883_v1  ;;  %v8859_v61 = vmul.f32 0.06451613, %v14859_v34  ;;  %v8892_v62 = vmul.f32 0.5483871, %v14859_v34 }
 0x7d2   : > { %v14869_v12 = vpop.f32.mrb[217].mxu0  ;;  %v8948_v15 = vmul.f32 0.48387095, %v14844_v2  ;;  %v8916_v54 = vmul.f32 0.9677419, %v14850_v18 }
 0x7d3   : > { %9895 = vst [vmem:[%s13966_s18 + $0x6d8] sm:$0xff] %v8866_v0  ;;  %9903 = vst [vmem:[%s13966_s18 + $0x718] sm:$0xff] %v8899_v13  ;;  %v8867_v20 = vadd.f32 %v8859_v61, %v8851_v35  ;;  %v8900_v31 = vadd.f32 %v8892_v62, %v8884_v27  ;;  %v8860_v32 = vmul.f32 0.06451613, %v14869_v12  ;;  %v8893_v49 = vmul.f32 0.5483871, %v14869_v12 }
 0x7d4   : > { %v14876_v16 = vpop.f32.mrb[218].mxu0  ;;  %v8949_v21 = vmul.f32 0.48387095, %v14850_v18  ;;  %v8917_v38 = vmul.f32 0.9677419, %v14859_v34 }
 0x7d5   : > { %9896 = vst [vmem:[%s13966_s18 + $0x6e0] sm:$0xff] %v8867_v20  ;;  %9904 = vst [vmem:[%s13966_s18 + $0x720] sm:$0xff] %v8900_v31  ;;  %v8868_v10 = vadd.f32 %v8860_v32, %v8852_v23  ;;  %v8901_v24 = vadd.f32 %v8893_v49, %v8885_v6  ;;  %v8861_v50 = vmul.f32 0.06451613, %v14876_v16  ;;  %v8894_v44 = vmul.f32 0.5483871, %v14876_v16 }
 0x7d6   : > { %v14882_v55 = vpop.f32.mrb[219].mxu0  ;;  %v8950_v30 = vmul.f32 0.48387095, %v14859_v34  ;;  %v8918_v51 = vmul.f32 0.9677419, %v14869_v12 }
 0x7d7   : > { %v8862_v45 = vmul.f32 0.06451613, %v14882_v55  ;;  %9897 = vst [vmem:[%s13966_s18 + $0x6e8] sm:$0xff] %v8868_v10  ;;  %9905 = vst [vmem:[%s13966_s18 + $0x728] sm:$0xff] %v8901_v24  ;;  %v8869_v26 = vadd.f32 %v8861_v50, %v8853_v57  ;;  %v8902_v7 = vadd.f32 %v8894_v44, %v8886_v58  ;;  %v8895_v36 = vmul.f32 0.5483871, %v14882_v55 }
 0x7d8   : > { %v7958_v11 = vpop.f32.mrb[220].mxu0  ;;  %v8951_v0 = vmul.f32 0.48387095, %v14869_v12  ;;  %v8919_v13 = vmul.f32 0.9677419, %v14876_v16 }
 0x7d9   : > { %v8870_v28 = vadd.f32 %v8862_v45, %v8854_v37  ;;  %9898 = vst [vmem:[%s13966_s18 + $0x6f0] sm:$0xff] %v8869_v26  ;;  %9906 = vst [vmem:[%s13966_s18 + $0x730] sm:$0xff] %v8902_v7  ;;  %v8903_v47 = vadd.f32 %v8895_v36, %v8887_v8  ;;  %v8921_v43 = vmul.f32 0.032258064, %v7958_v11  ;;  %v8954_v63 = vmul.f32 0.516129, %v7958_v11 }
 0x7da   : > { %9924 = vst [vmem:[%s13966_s18 + $0x7c0] sm:$0xff] %v7958_v11  ;;  %v7960_v42 = vpop.f32.mrb[221].mxu0  ;;  %v8952_v23 = vmul.f32 0.48387095, %v14876_v16  ;;  %v8920_v31 = vmul.f32 0.9677419, %v14882_v55 }
 0x7db   : > { %9899 = vst [vmem:[%s13966_s18 + $0x6f8] sm:$0xff] %v8870_v28  ;;  %v8922_v25 = vmul.f32 0.032258064, %v7960_v42  ;;  %v8955_v17 = vmul.f32 0.516129, %v7960_v42  ;;  %9925 = vst [vmem:[%s13966_s18 + $0x7c8] sm:$0xff] %v7960_v42  ;;  %v8929_v60 = vadd.f32 %v8921_v43, %v8913_v56  ;;  %v8962_v14 = vadd.f32 %v8954_v63, %v8946_v41 }
 0x7dc   : > { %9907 = vst [vmem:[%s13966_s18 + $0x738] sm:$0xff] %v8903_v47  ;;  %v7964_v53 = vpop.f32.mrb[222].mxu0  ;;  %v8953_v16 = vmul.f32 0.48387095, %v14882_v55 }
 0x7dd   : > { %v8930_v9 = vadd.f32 %v8922_v25, %v8914_v48  ;;  %v8963_v4 = vadd.f32 %v8955_v17, %v8947_v40  ;;  %9908 = vst [vmem:[%s13966_s18 + $0x740] sm:$0xff] %v8929_v60  ;;  %9916 = vst [vmem:[%s13966_s18 + $0x780] sm:$0xff] %v8962_v14  ;;  %v8923_v59 = vmul.f32 0.032258064, %v7964_v53  ;;  %v8956_v29 = vmul.f32 0.516129, %v7964_v53 }
 0x7de   : > { %9926 = vst [vmem:[%s13966_s18 + $0x7d0] sm:$0xff] %v7964_v53  ;;  %v7966_v39 = vpop.f32.mrb[223].mxu0 }
 0x7df   : > { %9909 = vst [vmem:[%s13966_s18 + $0x748] sm:$0xff] %v8930_v9  ;;  %9917 = vst [vmem:[%s13966_s18 + $0x788] sm:$0xff] %v8963_v4  ;;  %v8924_v2 = vmul.f32 0.032258064, %v7966_v39  ;;  %v8957_v22 = vmul.f32 0.516129, %v7966_v39  ;;  %v8931_v3 = vadd.f32 %v8923_v59, %v8915_v52  ;;  %v8964_v46 = vadd.f32 %v8956_v29, %v8948_v15 }
 0x7e0   : > { %9927 = vst [vmem:[%s13966_s18 + $0x7d8] sm:$0xff] %v7966_v39  ;;  %v7970_v18 = vpop.f32.mrb[224].mxu0 }
 0x7e1   : > { %v8932_v1 = vadd.f32 %v8924_v2, %v8916_v54  ;;  %v8965_v19 = vadd.f32 %v8957_v22, %v8949_v21  ;;  %9910 = vst [vmem:[%s13966_s18 + $0x750] sm:$0xff] %v8931_v3  ;;  %9918 = vst [vmem:[%s13966_s18 + $0x790] sm:$0xff] %v8964_v46  ;;  %v8925_v33 = vmul.f32 0.032258064, %v7970_v18  ;;  %v8958_v5 = vmul.f32 0.516129, %v7970_v18 }
 0x7e2   : > { %9928 = vst [vmem:[%s13966_s18 + $0x7e0] sm:$0xff] %v7970_v18  ;;  %v7972_v35 = vpop.f32.mrb[225].mxu0 }
 0x7e3   : > { %9911 = vst [vmem:[%s13966_s18 + $0x758] sm:$0xff] %v8932_v1  ;;  %9919 = vst [vmem:[%s13966_s18 + $0x798] sm:$0xff] %v8965_v19  ;;  %v8926_v34 = vmul.f32 0.032258064, %v7972_v35  ;;  %v8959_v27 = vmul.f32 0.516129, %v7972_v35  ;;  %v8933_v61 = vadd.f32 %v8925_v33, %v8917_v38  ;;  %v8966_v62 = vadd.f32 %v8958_v5, %v8950_v30 }
 0x7e4   : > { %9929 = vst [vmem:[%s13966_s18 + $0x7e8] sm:$0xff] %v7972_v35  ;;  %v7976_v20 = vpop.f32.mrb[226].mxu0 }
 0x7e5   : > { %v8934_v6 = vadd.f32 %v8926_v34, %v8918_v51  ;;  %v8967_v12 = vadd.f32 %v8959_v27, %v8951_v0  ;;  %9912 = vst [vmem:[%s13966_s18 + $0x760] sm:$0xff] %v8933_v61  ;;  %9920 = vst [vmem:[%s13966_s18 + $0x7a0] sm:$0xff] %v8966_v62  ;;  %v8927_v32 = vmul.f32 0.032258064, %v7976_v20  ;;  %v8960_v49 = vmul.f32 0.516129, %v7976_v20 }
 0x7e6   : > { %9930 = vst [vmem:[%s13966_s18 + $0x7f0] sm:$0xff] %v7976_v20  ;;  %v7978_v57 = vpop.f32.mrb[227].mxu0 }
 0x7e7   : > { %9913 = vst [vmem:[%s13966_s18 + $0x768] sm:$0xff] %v8934_v6  ;;  %9921 = vst [vmem:[%s13966_s18 + $0x7a8] sm:$0xff] %v8967_v12  ;;  %v8928_v58 = vmul.f32 0.032258064, %v7978_v57  ;;  %v8961_v10 = vmul.f32 0.516129, %v7978_v57  ;;  %v8935_v24 = vadd.f32 %v8927_v32, %v8919_v13  ;;  %v8968_v50 = vadd.f32 %v8960_v49, %v8952_v23 }
 0x7e8   : > { %9931 = vst [vmem:[%s13966_s18 + $0x7f8] sm:$0xff] %v7978_v57 }
 0x7e9   : > { %v8936_v44 = vadd.f32 %v8928_v58, %v8920_v31  ;;  %v8969_v37 = vadd.f32 %v8961_v10, %v8953_v16  ;;  %9914 = vst [vmem:[%s13966_s18 + $0x770] sm:$0xff] %v8935_v24  ;;  %9922 = vst [vmem:[%s13966_s18 + $0x7b0] sm:$0xff] %v8968_v50 }
 0x7eb   : > { %9915 = vst [vmem:[%s13966_s18 + $0x778] sm:$0xff] %v8936_v44  ;;  %9923 = vst [vmem:[%s13966_s18 + $0x7b8] sm:$0xff] %v8969_v37 }
 0x7ec   : > { %11108 = shalt.err (!%p11105_p3)
}
 0x7ed   : > { %s11109_s13 = scalar_lea.hbm %s14935_s28, 32768  ;;  %s11113_s15 = scalar_lea.hbm %s14992_s6, 65536 }
 0x7ee   : > { %p11110_p4 = scmp.ne.s32.totalorder %s14935_s28, %s11109_s13  ;;  %p11114_p9 = scmp.lt.u32.totalorder %s14935_s28, %s14992_s6 }
 0x7ef   : > { %p11115_p10 = scmp.lt.u32.totalorder %s11113_s15, %s11109_s13  ;;  %p11117_p12 = scmp.lt.u32.totalorder %s11109_s13, %s14935_s28 }
 0x7f0   : > { %p11111_p7 = pnand %p11110_p4, %p11238_p5 }
 0x7f1   : > { %p11116_p11 = por %p11115_p10, %p11114_p9 }
 0x7f2   : > { %p11112_p8 = pneg %p11111_p7 }
 0x7f3   : > { %p11118_p13 = por %p11117_p12, %p11116_p11 }
 0x7f5   : > { %p11119_p0 = pnand %p11118_p13, %p11112_p8 }
 0x7f7   : > { %11122 = shalt.err (!%p11119_p0)
}
 0x7f8   : > { %s11163_s19 = smov 256   ;;  %s11164_s25 = smov 16  }
 0x7f9   : > { %10611 = dma.vmem_to_hbm [thread:$0]  (%p11238_p5), %s14937_s20, 32768, %s14935_s28, %s14945_s29, %s11163_s19, %s11163_s19, %s11164_s25  }
 0x7fa PF: > { %p10617_p1 = scmp.ge.s32.totalorder %s11157_s24, 2  ;;  %s9017_s26 = sand.u32 1, %s11145_s21  }
 0x7fb   : > { %s9018_s9 = scalar_lea.sflag [#allocation5], %s9017_s26 }
 0x7fc   : > { %p10614_p2 = pnand %p10617_p1, %p11242_p6 }
 0x7fe   : > { %11140 = dma.done.wait (!%p10614_p2), %s9018_s9, 32768  }
 0x7ff   : > { %11142 = vsyncadd (!%p10614_p2), %s9018_s9, 4294934528  ;;  %p16_p3 = scmp.ge.s32.totalorder %s11225_s27, 4   ;;  %s15097_s21 = smov %s11149_s22 }
 0x800   : > { %s15098_s22 = smov %s11153_s23  ;;  %s15099_s23 = smov %s11236_s30 }
 0x801   : > { %s15100_s24 = smov %s11225_s27  ;;  %18 = sbr.rel (!%p16_p3) target bundleno = 3 (0x3), region = 116 }
 0x808   :  { %9023 = vsyncpa [#allocation5], 1 }
 0x809   :  { %9025 = vsyncpa [#allocation5 + $0x1], 1 }

</bundles_post_ra>
